<compile_context>
chip_gen: v7x
topology: tpu7x:2x2x1
jax: 0.10.0
libtpu: 0.0.40
codegen_flags: <defaults>
</compile_context>

<pallas_src>
import jax
import jax.numpy as jnp
from jax import lax
from jax.experimental import pallas as pl
from jax.experimental.pallas import tpu as pltpu

# ----------------------------- configuration --------------------------------
D_MODEL = 4          # d_model
NHEAD = 2            # nhead
NUM_LAYER = 1        # transformer encoder layers
BATCH = 2            # batch_size
LENGTH = 8           # sequence length ("length")
FF_DIM = 2048        # nn.TransformerEncoderLayer default dim_feedforward
LN_EPS = 1e-5
BN_EPS = 1e-5

H1 = 2 * D_MODEL               # BiLSTM1 hidden  -> output 4*d_model
H2 = 6 * D_MODEL               # BiLSTM2 hidden  -> output 12*d_model
GNN_HID = 32
GNN_OUT = 16
C_MID = 12 * D_MODEL           # 48  (conv1 out channels)
C_IN = C_MID + GNN_OUT         # 64  (conv1 in channels)
CONV_OUT = 48                  # conv2 out channels
PRED_DIMS = [LENGTH * 48, LENGTH * 32, LENGTH * 32, LENGTH * 64, LENGTH * 64,
             LENGTH * 32, LENGTH * 16, LENGTH * 8, LENGTH * 2]
N_ROWS = LENGTH * BATCH        # 16: persistent time-major slab height (row = t*B + b)


def _vmem():
    return pl.BlockSpec(memory_space=pltpu.MemorySpace.VMEM)


# --------------------------- weight packing layout ---------------------------
def _round8(n):
    return ((n + 7) // 8) * 8


def _pack_layout(specs):
    """specs: [(name, (rows, cols))]. 8-aligned row offsets inside one blob."""
    layout, off = {}, 0
    for name, (r, _c) in specs:
        layout[name] = (off, r, _c)
        off += _round8(r)
    return layout, max(off, 8)


def _f32_specs():
    s = []
    for li in range(NUM_LAYER):
        p = f"t{li}_"
        s += [(p + "w_qkv", (D_MODEL, 3 * D_MODEL)), (p + "b_qkv", (1, 3 * D_MODEL)),
              (p + "w_o", (D_MODEL, D_MODEL)), (p + "b_o", (1, D_MODEL)),
              (p + "ln1_g", (1, D_MODEL)), (p + "ln1_b", (1, D_MODEL)),
              (p + "b_ff2", (1, D_MODEL)),
              (p + "ln2_g", (1, D_MODEL)), (p + "ln2_b", (1, D_MODEL))]
    s += [("l1_wih", (D_MODEL, 8 * H1)), ("l1_whh", (2 * H1, 8 * H1)), ("l1_b", (1, 8 * H1)),
          ("l2_wih", (2 * H1, 8 * H2)), ("l2_whh", (2 * H2, 8 * H2)), ("l2_b", (1, 8 * H2)),
          ("g_w1", (C_MID, GNN_HID)), ("g_b1", (1, GNN_HID)),
          ("g_w2", (GNN_HID, GNN_OUT)), ("g_b2", (1, GNN_OUT)),
          ("c_b1", (1, C_MID)), ("c_b2", (1, CONV_OUT))]
    for i in range(1, len(PRED_DIMS)):
        s += [(f"p_b{i}", (1, PRED_DIMS[i]))]
    return s


def _ffw_specs():
    s = []
    for li in range(NUM_LAYER):
        s += [(f"t{li}_w_ff1", (D_MODEL, FF_DIM)), (f"t{li}_b_ff1", (1, FF_DIM))]
    return s


def _tall_specs():
    s = []
    for li in range(NUM_LAYER):
        s += [(f"t{li}_w_ff2", (FF_DIM, D_MODEL))]
    s += [("c_w1", (9 * C_IN, C_MID)), ("c_w2", (3 * C_MID, CONV_OUT))]
    return s


def _pred_specs():
    return [(f"p_w{i}", (PRED_DIMS[i - 1], PRED_DIMS[i])) for i in range(1, len(PRED_DIMS))]


F32_SPECS = _f32_specs()
F32_LAYOUT, F32_ROWS = _pack_layout(F32_SPECS)
F32_WIDTH = max(c for _, (_, c) in F32_SPECS)          # 512

FFW_SPECS = _ffw_specs()
FFW_LAYOUT, FFW_ROWS = _pack_layout(FFW_SPECS)
FFW_WIDTH = FF_DIM                                      # 2048

TALL_SPECS = _tall_specs()
TALL_LAYOUT, TALL_ROWS = _pack_layout(TALL_SPECS)
TALL_WIDTH = max(c for _, (_, c) in TALL_SPECS)         # 48

PRED_SPECS = _pred_specs()
PRED_LAYOUT, PRED_ROWS = _pack_layout(PRED_SPECS)
PRED_WIDTH = max(c for _, (_, c) in PRED_SPECS)         # 512


def _slab(ref, layout, name):
    off, r, c = layout[name]
    return ref[off:off + r, 0:c]


# --------------------------- in-kernel helpers -------------------------------
def _layernorm(x, g, b):
    mu = jnp.mean(x, axis=-1, keepdims=True)
    var = jnp.mean((x - mu) * (x - mu), axis=-1, keepdims=True)
    return (x - mu) * lax.rsqrt(var + LN_EPS) * g + b


def _elu(y):
    return jnp.where(y > 0, y, jnp.exp(jnp.minimum(y, 0.0)) - 1.0)


def _relu(y):
    return jnp.maximum(y, 0.0)


def _dot(a, b):
    return jnp.dot(a, b, preferred_element_type=jnp.float32)


def _dot_bf16(a, w_bf16):
    return jnp.dot(a.astype(jnp.bfloat16), w_bf16, preferred_element_type=jnp.float32)


def _bilstm(x_tm, w_ih, w_hh, bias, hd):
    """Fused bidirectional LSTM over a time-major (L*B, Din) slab.

    Gate column layout (host packed): [i | f | o | g], each block 2*hd wide
    laid out as [fwd hd | bwd hd].  W_hh is block-diagonal over [h_fwd | h_bwd].
    Input projections for all timesteps & both directions are hoisted into one
    matmul; the unrolled recurrence does 1 matmul + 1 sigmoid + 2 tanh per step.
    Returns the time-major (L*B, 2*hd) output ([fwd | bwd] per timestep)."""
    L, B = LENGTH, BATCH
    gx = _dot(x_tm, w_ih) + bias                                    # (L*B, 8*hd)
    col = lax.broadcasted_iota(jnp.int32, (B, 8 * hd), 1)
    is_fwd = (col % (2 * hd)) < hd                                  # fwd-column mask
    h = jnp.zeros((B, 2 * hd), jnp.float32)                         # [h_fwd | h_bwd]
    c = jnp.zeros((B, 2 * hd), jnp.float32)
    outs_f = [None] * L
    outs_b = [None] * L
    for t in range(L):
        tb = L - 1 - t
        gin = jnp.where(is_fwd, gx[t * B:(t + 1) * B, :], gx[tb * B:(tb + 1) * B, :])
        gates = gin + _dot(h, w_hh)                                 # (B, 8*hd)
        ifo = jax.nn.sigmoid(gates[:, 0:6 * hd])
        g = jnp.tanh(gates[:, 6 * hd:8 * hd])
        c = ifo[:, 2 * hd:4 * hd] * c + ifo[:, 0:2 * hd] * g
        h = ifo[:, 4 * hd:6 * hd] * jnp.tanh(c)
        outs_f[t] = h[:, 0:hd]
        outs_b[tb] = h[:, hd:2 * hd]
    rows = [jnp.concatenate([outs_f[t], outs_b[t]], axis=1) for t in range(L)]
    return jnp.concatenate(rows, axis=0)                            # (L*B, 2*hd)


# ------------------------------ the fused kernel ------------------------------
def _modelf_kernel(x_ref, amask_ref, abig_ref, wf_ref, wffw_ref, wtall_ref,
                   wpred_ref, out_ref):
    E, Hh, L, B, N = D_MODEL, NHEAD, LENGTH, BATCH, N_ROWS
    Dh = E // Hh
    scale = 1.0 / (Dh ** 0.5)

    def f32(name):
        return _slab(wf_ref, F32_LAYOUT, name)

    def ffw(name):
        return _slab(wffw_ref, FFW_LAYOUT, name)

    def tall(name):
        return _slab(wtall_ref, TALL_LAYOUT, name)

    def pred(name):
        return _slab(wpred_ref, PRED_LAYOUT, name)

    x = x_ref[...]                       # (N, E)  time-major: row = t*B + b
    amask = amask_ref[...]               # (N, N)  additive batch/padding mask
    a_big = abig_ref[...]                # (N, N)  block-diagonal adjacency

    # --------------- transformer encoder (post-norm, ReLU FF) ----------------
    for li in range(NUM_LAYER):
        p = f"t{li}_"
        qkv = _dot(x, f32(p + "w_qkv")) + f32(p + "b_qkv")          # (N, 3E)
        heads = []
        for hi in range(Hh):
            qh = qkv[:, hi * Dh:(hi + 1) * Dh]
            kh = qkv[:, E + hi * Dh:E + (hi + 1) * Dh]
            vh = qkv[:, 2 * E + hi * Dh:2 * E + (hi + 1) * Dh]
            s = lax.dot_general(qh, kh, (((1,), (1,)), ((), ())),
                                preferred_element_type=jnp.float32)  # (N, N)
            s = s * scale + amask
            s = s - jnp.max(s, axis=-1, keepdims=True)
            e = jnp.exp(s)
            pattn = e / jnp.sum(e, axis=-1, keepdims=True)
            heads.append(_dot(pattn, vh))                            # (N, Dh)
        ctx = jnp.concatenate(heads, axis=1)                         # (N, E)
        attn = _dot(ctx, f32(p + "w_o")) + f32(p + "b_o")
        y = _layernorm(x + attn, f32(p + "ln1_g"), f32(p + "ln1_b"))
        ff = _relu(_dot_bf16(y, ffw(p + "w_ff1")) + ffw(p + "b_ff1"))  # (N, FF)
        ff = _dot_bf16(ff, tall(p + "w_ff2")) + f32(p + "b_ff2")       # (N, E)
        x = _layernorm(y + ff, f32(p + "ln2_g"), f32(p + "ln2_b"))

    # ---------------- BiLSTM1 / BiLSTM2 (fused fwd+bwd, unrolled) -------------
    h1 = _bilstm(x, f32("l1_wih"), f32("l1_whh"), f32("l1_b"), H1)   # (N, 16)
    h2 = _bilstm(h1, f32("l2_wih"), f32("l2_whh"), f32("l2_b"), H2)  # (N, 48)

    # ---------------- GNN (batched via block-diagonal adjacency) --------------
    g1 = _elu(_dot(_dot(a_big, h2), f32("g_w1")) + f32("g_b1"))      # (N, 32)
    g2 = _dot(_dot(a_big, g1), f32("g_w2")) + f32("g_b2")            # (N, 16)
    cb = jnp.concatenate([h2, g2], axis=1)                           # (N, 64)

    # ---------------- Conv1d stack (batched im2col matmuls) -------------------
    zp1 = jnp.zeros((4 * B, C_IN), jnp.float32)
    pad1 = jnp.concatenate([zp1, cb, zp1], axis=0)                   # (N+8B, 64)
    cols1 = jnp.concatenate([pad1[k * B:k * B + N, :] for k in range(9)], axis=1)
    c1 = _elu(_dot_bf16(cols1, tall("c_w1")) + f32("c_b1"))          # (N, 48)

    zp2 = jnp.zeros((B, C_MID), jnp.float32)
    pad2 = jnp.concatenate([zp2, c1, zp2], axis=0)                   # (N+2B, 48)
    cols2 = jnp.concatenate([pad2[k * B:k * B + N, :] for k in range(3)], axis=1)
    c2 = _elu(_dot_bf16(cols2, tall("c_w2")) + f32("c_b2"))          # (N, 48)

    # ---------------- Predit_layer (single matmul per Linear) -----------------
    # (B, L*48) assembled lane-contiguously; PyTorch permute+flatten absorbed
    # into the host-side re-layout of p_w1.
    hp = jnp.concatenate([c2[l * B:(l + 1) * B, :] for l in range(L)], axis=1)
    for i in range(1, len(PRED_DIMS)):
        hp = _relu(_dot_bf16(hp, pred(f"p_w{i}")) + f32(f"p_b{i}"))

    # ---- final softmax over 2 classes (class-major columns, host permuted) ---
    z0 = hp[:, 0:L]
    z1 = hp[:, L:2 * L]
    m = jnp.maximum(z0, z1)
    e0 = jnp.exp(z0 - m)
    e1 = jnp.exp(z1 - m)
    inv = 1.0 / (e0 + e1)
    out_ref[...] = jnp.concatenate([e0 * inv, e1 * inv], axis=1)     # (B, 2L)


# ------------------------------ python wrapper --------------------------------
def modelf_forward(packed, x, adj, src_padding_mask):
    """packed: (wf32, wffw_bf16, wtall_bf16, wpred_bf16) weight blobs.
    x: (L, B, d_model) seq-first (PyTorch nn.Transformer layout),
    adj: (B, L, L), src_padding_mask: (B, L) bool (True = padded)."""
    wf, wffw, wtall, wpred = packed
    L, B, E, N = LENGTH, BATCH, D_MODEL, N_ROWS

    x_tm = x.reshape(N, E).astype(jnp.float32)            # time-major: row = t*B + b

    rows = jnp.arange(N)
    bi = rows % B
    key_pad = src_padding_mask[bi, rows // B]              # padded flag per key row
    allowed = (bi[:, None] == bi[None, :]) & (~key_pad)[None, :]
    amask = jnp.where(allowed, 0.0, -1e9).astype(jnp.float32)

    # block-diagonal adjacency in the interleaved time-major layout
    a_big = (jnp.transpose(adj.astype(jnp.float32), (1, 0, 2))[:, :, :, None]
             * jnp.eye(B, dtype=jnp.float32)[None, :, None, :]).reshape(N, N)

    inputs = (x_tm, amask, a_big, wf, wffw, wtall, wpred)
    out = pl.pallas_call(
        _modelf_kernel,
        out_shape=jax.ShapeDtypeStruct((B, 2 * L), jnp.float32),
        in_specs=[_vmem() for _ in inputs],
        out_specs=_vmem(),
        cost_estimate=pl.CostEstimate(flops=5_200_000, transcendentals=30_000,
                                      bytes_accessed=4_500_000),
    )(*inputs)
    # class-major (B, 2L) -> (B, L, 2)
    return jnp.transpose(out.reshape(B, 2, L), (0, 2, 1))


# ------------------------------ parameter init --------------------------------
class KeyGen:
    def __init__(self, key):
        self.key = key

    def __call__(self):
        self.key, sub = jax.random.split(self.key)
        return sub


def _winit(kg, shape):
    fan_in = 1
    for s in shape[:-1]:
        fan_in *= s
    return jax.random.normal(kg(), shape, jnp.float32) * (1.0 / (fan_in ** 0.5))


def _bn(n):
    return dict(gamma=jnp.ones((1, n), jnp.float32), beta=jnp.zeros((1, n), jnp.float32),
                mean=jnp.zeros((1, n), jnp.float32), var=jnp.ones((1, n), jnp.float32))


def fold_bn(w, b, bn, eps=BN_EPS):
    """Fold an eval-mode BatchNorm into the preceding linear/conv weights (host-side)."""
    scale = bn["gamma"] / jnp.sqrt(bn["var"] + eps)
    return w * scale, (b - bn["mean"]) * scale + bn["beta"]


def _blob(layout, rows, width, dtype, pieces):
    blob = jnp.zeros((rows, width), dtype)
    for name, arr in pieces.items():
        off, r, c = layout[name]
        blob = blob.at[off:off + r, 0:c].set(jnp.asarray(arr, dtype))
    return blob


def init_weights(key):
    # TODO(synk): init does not replicate PyTorch's per-module default initializers;
    #             it only provides deterministic values for kernel benchmarking.
    kg = KeyGen(key)
    E, L = D_MODEL, LENGTH
    f32p, ffwp, tallp, predp = {}, {}, {}, {}

    # transformer layers
    for li in range(NUM_LAYER):
        p = f"t{li}_"
        wq = _winit(kg, (E, E)); wk = _winit(kg, (E, E)); wv = _winit(kg, (E, E))
        f32p[p + "w_qkv"] = jnp.concatenate([wq, wk, wv], axis=1)
        f32p[p + "b_qkv"] = jnp.zeros((1, 3 * E), jnp.float32)
        f32p[p + "w_o"] = _winit(kg, (E, E))
        f32p[p + "b_o"] = jnp.zeros((1, E), jnp.float32)
        f32p[p + "ln1_g"] = jnp.ones((1, E), jnp.float32)
        f32p[p + "ln1_b"] = jnp.zeros((1, E), jnp.float32)
        ffwp[p + "w_ff1"] = _winit(kg, (E, FF_DIM))
        ffwp[p + "b_ff1"] = jnp.zeros((1, FF_DIM), jnp.float32)
        tallp[p + "w_ff2"] = _winit(kg, (FF_DIM, E))
        f32p[p + "b_ff2"] = jnp.zeros((1, E), jnp.float32)
        f32p[p + "ln2_g"] = jnp.ones((1, E), jnp.float32)
        f32p[p + "ln2_b"] = jnp.zeros((1, E), jnp.float32)

    # BiLSTMs: fused layout.  Gate order repacked from torch (i,f,g,o) to (i,f,o,g);
    # per gate the columns are [fwd | bwd]; W_hh block-diagonal over [h_fwd | h_bwd].
    def bilstm_params(din, hd):
        wih_f = _winit(kg, (din, 4 * hd)); whh_f = _winit(kg, (hd, 4 * hd))
        wih_b = _winit(kg, (din, 4 * hd)); whh_b = _winit(kg, (hd, 4 * hd))
        b_f = jnp.zeros((1, 4 * hd), jnp.float32)        # torch b_ih + b_hh folded
        b_b = jnp.zeros((1, 4 * hd), jnp.float32)
        order = (0, 1, 3, 2)                             # (i, f, o, g) from (i, f, g, o)

        def gate(w, gi):
            return w[:, gi * hd:(gi + 1) * hd]

        wih = jnp.concatenate(
            [jnp.concatenate([gate(wih_f, gi), gate(wih_b, gi)], axis=1) for gi in order], axis=1)
        bias = jnp.concatenate(
            [jnp.concatenate([gate(b_f, gi), gate(b_b, gi)], axis=1) for gi in order], axis=1)
        whh = jnp.zeros((2 * hd, 8 * hd), jnp.float32)
        for slot, gi in enumerate(order):
            whh = whh.at[0:hd, slot * 2 * hd:slot * 2 * hd + hd].set(gate(whh_f, gi))
            whh = whh.at[hd:2 * hd, slot * 2 * hd + hd:(slot + 1) * 2 * hd].set(gate(whh_b, gi))
        return wih, whh, bias

    f32p["l1_wih"], f32p["l1_whh"], f32p["l1_b"] = bilstm_params(E, H1)
    f32p["l2_wih"], f32p["l2_whh"], f32p["l2_b"] = bilstm_params(2 * H1, H2)

    # GNN (2-layer GCN 48 -> 32 -> 16)
    f32p["g_w1"] = _winit(kg, (C_MID, GNN_HID)); f32p["g_b1"] = jnp.zeros((1, GNN_HID), jnp.float32)
    f32p["g_w2"] = _winit(kg, (GNN_HID, GNN_OUT)); f32p["g_b2"] = jnp.zeros((1, GNN_OUT), jnp.float32)

    # Conv1d stack: im2col layout (K*Cin, Cout) = torch weight.transpose(2,1,0).reshape;
    # BatchNorms folded host-side.
    w1 = _winit(kg, (9, C_IN, C_MID)).reshape(9 * C_IN, C_MID)
    w1, b1 = fold_bn(w1, jnp.zeros((1, C_MID), jnp.float32), _bn(C_MID))
    w2 = _winit(kg, (3, C_MID, CONV_OUT)).reshape(3 * C_MID, CONV_OUT)
    w2, b2 = fold_bn(w2, jnp.zeros((1, CONV_OUT), jnp.float32), _bn(CONV_OUT))
    tallp["c_w1"] = w1; f32p["c_b1"] = b1
    tallp["c_w2"] = w2; f32p["c_b2"] = b2

    # Predit_layer: BN folded; layer-1 rows re-ordered from torch (channel, pos)
    # flat order to the kernel's (pos, channel) order; last-layer columns permuted
    # to class-major so the final softmax uses contiguous lane slices.
    for i in range(1, len(PRED_DIMS)):
        w = _winit(kg, (PRED_DIMS[i - 1], PRED_DIMS[i]))
        b = jnp.zeros((1, PRED_DIMS[i]), jnp.float32)
        w, b = fold_bn(w, b, _bn(PRED_DIMS[i]))
        if i == 1:
            w = w.reshape(CONV_OUT, L, PRED_DIMS[1]).transpose(1, 0, 2).reshape(
                L * CONV_OUT, PRED_DIMS[1])
        if i == len(PRED_DIMS) - 1:
            perm = jnp.array([(j % L) * 2 + j // L for j in range(2 * L)], jnp.int32)
            w = w[:, perm]
            b = b[:, perm]
        predp[f"p_w{i}"] = w
        f32p[f"p_b{i}"] = b

    wf = _blob(F32_LAYOUT, F32_ROWS, F32_WIDTH, jnp.float32, f32p)
    wffw = _blob(FFW_LAYOUT, FFW_ROWS, FFW_WIDTH, jnp.bfloat16, ffwp)
    wtall = _blob(TALL_LAYOUT, TALL_ROWS, TALL_WIDTH, jnp.bfloat16, tallp)
    wpred = _blob(PRED_LAYOUT, PRED_ROWS, PRED_WIDTH, jnp.bfloat16, predp)
    return wf, wffw, wtall, wpred


# ----------------------------------- main -------------------------------------
if __name__ == "__main__":
    root = jax.random.PRNGKey(0)
    wkey, xkey, akey = jax.random.split(root, 3)

    packed = init_weights(wkey)
    x = jax.random.normal(xkey, (LENGTH, BATCH, D_MODEL), jnp.float32)   # (L, B, d_model)
    adj_raw = jax.random.uniform(akey, (BATCH, LENGTH, LENGTH), jnp.float32)
    adj = adj_raw / jnp.sum(adj_raw, axis=-1, keepdims=True)             # row-normalized
    src_padding_mask = jnp.zeros((BATCH, LENGTH), dtype=bool)            # no padding

    fwd = jax.jit(modelf_forward)
    out = jax.block_until_ready(fwd(packed, x, adj, src_padding_mask))

    assert out.shape == (BATCH, LENGTH, 2), out.shape
    assert bool(jnp.all(jnp.isfinite(out)))
    assert bool(jnp.all(jnp.abs(jnp.sum(out, axis=-1) - 1.0) < 1e-5))
    print("KERNEL_OK")
</pallas_src>

<mosaic_0001>
module attributes {stable_mosaic.version = 11 : i64} {
  func.func @_modelf_kernel(%arg0: memref<16x4xf32, #tpu.memory_space<vmem>>, %arg1: memref<16x16xf32, #tpu.memory_space<vmem>>, %arg2: memref<16x16xf32, #tpu.memory_space<vmem>>, %arg3: memref<352x512xf32, #tpu.memory_space<vmem>>, %arg4: memref<16x2048xbf16, #tpu.memory_space<vmem>>, %arg5: memref<2768x48xbf16, #tpu.memory_space<vmem>>, %arg6: memref<2368x512xbf16, #tpu.memory_space<vmem>>, %arg7: memref<2x16xf32, #tpu.memory_space<vmem>>) attributes {dimension_semantics = [], scalar_prefetch = 0 : i64, scratch_operands = 0 : i64, tpu.core_type = #tpu.core_type<tc>} {
    %c0 = arith.constant 0 : index
    %c0_0 = arith.constant 0 : index
    %0 = vector.load %arg0[%c0, %c0_0] : memref<16x4xf32, #tpu.memory_space<vmem>>, vector<16x4xf32>
    %c0_1 = arith.constant 0 : index
    %c0_2 = arith.constant 0 : index
    %1 = vector.load %arg1[%c0_1, %c0_2] : memref<16x16xf32, #tpu.memory_space<vmem>>, vector<16x16xf32>
    %c0_3 = arith.constant 0 : index
    %c0_4 = arith.constant 0 : index
    %2 = vector.load %arg2[%c0_3, %c0_4] : memref<16x16xf32, #tpu.memory_space<vmem>>, vector<16x16xf32>
    %c0_5 = arith.constant 0 : index
    %c0_6 = arith.constant 0 : index
    %3 = vector.load %arg3[%c0_5, %c0_6] : memref<352x512xf32, #tpu.memory_space<vmem>>, vector<4x12xf32>
    %cst = arith.constant dense<0.000000e+00> : vector<16x12xf32>
    %4 = tpu.matmul %0, %3, %cst {dimension_numbers = #tpu.dot_dimension_numbers<[1], [0], [0], [1], [0, 0, 1, 1], [], []>} : vector<16x4xf32>, vector<4x12xf32>, vector<16x12xf32> -> vector<16x12xf32>
    %c8 = arith.constant 8 : index
    %c0_7 = arith.constant 0 : index
    %5 = vector.load %arg3[%c8, %c0_7] : memref<352x512xf32, #tpu.memory_space<vmem>>, vector<1x12xf32>
    %6 = vector.broadcast %5 : vector<1x12xf32> to vector<16x12xf32>
    %7 = arith.addf %4, %6 : vector<16x12xf32>
    %8 = vector.extract_strided_slice %7 {offsets = [0, 0], sizes = [16, 2], strides = [1, 1]} : vector<16x12xf32> to vector<16x2xf32>
    %9 = vector.extract_strided_slice %7 {offsets = [0, 4], sizes = [16, 2], strides = [1, 1]} : vector<16x12xf32> to vector<16x2xf32>
    %10 = vector.extract_strided_slice %7 {offsets = [0, 8], sizes = [16, 2], strides = [1, 1]} : vector<16x12xf32> to vector<16x2xf32>
    %cst_8 = arith.constant dense<0.000000e+00> : vector<16x16xf32>
    %11 = tpu.matmul %8, %9, %cst_8 {dimension_numbers = #tpu.dot_dimension_numbers<[1], [1], [0], [0], [0, 0, 1, 0], [], []>} : vector<16x2xf32>, vector<16x2xf32>, vector<16x16xf32> -> vector<16x16xf32>
    %cst_9 = arith.constant 0.707106769 : f32
    %12 = vector.broadcast %cst_9 : f32 to vector<16x16xf32>
    %13 = arith.mulf %11, %12 : vector<16x16xf32>
    %14 = arith.addf %13, %1 : vector<16x16xf32>
    %cst_10 = arith.constant dense<0xFF800000> : vector<16xf32>
    %15 = vector.multi_reduction <maximumf>, %14, %cst_10 [1] : vector<16x16xf32> to vector<16xf32>
    %16 = vector.shape_cast %15 : vector<16xf32> to vector<16x1xf32>
    %17 = vector.broadcast %16 : vector<16x1xf32> to vector<16x16xf32>
    %18 = arith.subf %14, %17 : vector<16x16xf32>
    %19 = math.exp %18 : vector<16x16xf32>
    %cst_11 = arith.constant dense<0.000000e+00> : vector<16xf32>
    %20 = vector.multi_reduction <add>, %19, %cst_11 [1] : vector<16x16xf32> to vector<16xf32>
    %21 = vector.shape_cast %20 : vector<16xf32> to vector<16x1xf32>
    %22 = vector.broadcast %21 : vector<16x1xf32> to vector<16x16xf32>
    %23 = arith.divf %19, %22 : vector<16x16xf32>
    %cst_12 = arith.constant dense<0.000000e+00> : vector<16x2xf32>
    %24 = tpu.matmul %23, %10, %cst_12 {dimension_numbers = #tpu.dot_dimension_numbers<[1], [0], [0], [1], [0, 0, 1, 1], [], []>} : vector<16x16xf32>, vector<16x2xf32>, vector<16x2xf32> -> vector<16x2xf32>
    %25 = vector.extract_strided_slice %7 {offsets = [0, 2], sizes = [16, 2], strides = [1, 1]} : vector<16x12xf32> to vector<16x2xf32>
    %26 = vector.extract_strided_slice %7 {offsets = [0, 6], sizes = [16, 2], strides = [1, 1]} : vector<16x12xf32> to vector<16x2xf32>
    %27 = vector.extract_strided_slice %7 {offsets = [0, 10], sizes = [16, 2], strides = [1, 1]} : vector<16x12xf32> to vector<16x2xf32>
    %cst_13 = arith.constant dense<0.000000e+00> : vector<16x16xf32>
    %28 = tpu.matmul %25, %26, %cst_13 {dimension_numbers = #tpu.dot_dimension_numbers<[1], [1], [0], [0], [0, 0, 1, 0], [], []>} : vector<16x2xf32>, vector<16x2xf32>, vector<16x16xf32> -> vector<16x16xf32>
    %cst_14 = arith.constant 0.707106769 : f32
    %29 = vector.broadcast %cst_14 : f32 to vector<16x16xf32>
    %30 = arith.mulf %28, %29 : vector<16x16xf32>
    %31 = arith.addf %30, %1 : vector<16x16xf32>
    %cst_15 = arith.constant dense<0xFF800000> : vector<16xf32>
    %32 = vector.multi_reduction <maximumf>, %31, %cst_15 [1] : vector<16x16xf32> to vector<16xf32>
    %33 = vector.shape_cast %32 : vector<16xf32> to vector<16x1xf32>
    %34 = vector.broadcast %33 : vector<16x1xf32> to vector<16x16xf32>
    %35 = arith.subf %31, %34 : vector<16x16xf32>
    %36 = math.exp %35 : vector<16x16xf32>
    %cst_16 = arith.constant dense<0.000000e+00> : vector<16xf32>
    %37 = vector.multi_reduction <add>, %36, %cst_16 [1] : vector<16x16xf32> to vector<16xf32>
    %38 = vector.shape_cast %37 : vector<16xf32> to vector<16x1xf32>
    %39 = vector.broadcast %38 : vector<16x1xf32> to vector<16x16xf32>
    %40 = arith.divf %36, %39 : vector<16x16xf32>
    %cst_17 = arith.constant dense<0.000000e+00> : vector<16x2xf32>
    %41 = tpu.matmul %40, %27, %cst_17 {dimension_numbers = #tpu.dot_dimension_numbers<[1], [0], [0], [1], [0, 0, 1, 1], [], []>} : vector<16x16xf32>, vector<16x2xf32>, vector<16x2xf32> -> vector<16x2xf32>
    %42 = tpu.concatenate %24, %41 in 1 : vector<16x2xf32>, vector<16x2xf32> -> vector<16x4xf32>
    %c16 = arith.constant 16 : index
    %c0_18 = arith.constant 0 : index
    %43 = vector.load %arg3[%c16, %c0_18] : memref<352x512xf32, #tpu.memory_space<vmem>>, vector<4x4xf32>
    %cst_19 = arith.constant dense<0.000000e+00> : vector<16x4xf32>
    %44 = tpu.matmul %42, %43, %cst_19 {dimension_numbers = #tpu.dot_dimension_numbers<[1], [0], [0], [1], [0, 0, 1, 1], [], []>} : vector<16x4xf32>, vector<4x4xf32>, vector<16x4xf32> -> vector<16x4xf32>
    %c24 = arith.constant 24 : index
    %c0_20 = arith.constant 0 : index
    %45 = vector.load %arg3[%c24, %c0_20] : memref<352x512xf32, #tpu.memory_space<vmem>>, vector<1x4xf32>
    %46 = vector.broadcast %45 : vector<1x4xf32> to vector<16x4xf32>
    %47 = arith.addf %44, %46 : vector<16x4xf32>
    %48 = arith.addf %0, %47 : vector<16x4xf32>
    %c32 = arith.constant 32 : index
    %c0_21 = arith.constant 0 : index
    %49 = vector.load %arg3[%c32, %c0_21] : memref<352x512xf32, #tpu.memory_space<vmem>>, vector<1x4xf32>
    %c40 = arith.constant 40 : index
    %c0_22 = arith.constant 0 : index
    %50 = vector.load %arg3[%c40, %c0_22] : memref<352x512xf32, #tpu.memory_space<vmem>>, vector<1x4xf32>
    %cst_23 = arith.constant dense<0.000000e+00> : vector<16xf32>
    %51 = vector.multi_reduction <add>, %48, %cst_23 [1] : vector<16x4xf32> to vector<16xf32>
    %52 = vector.shape_cast %51 : vector<16xf32> to vector<16x1xf32>
    %cst_24 = arith.constant 4.000000e+00 : f32
    %53 = vector.broadcast %cst_24 : f32 to vector<16x1xf32>
    %54 = arith.divf %52, %53 : vector<16x1xf32>
    %55 = vector.broadcast %54 : vector<16x1xf32> to vector<16x4xf32>
    %56 = arith.subf %48, %55 : vector<16x4xf32>
    %57 = vector.broadcast %54 : vector<16x1xf32> to vector<16x4xf32>
    %58 = arith.subf %48, %57 : vector<16x4xf32>
    %59 = arith.mulf %56, %58 : vector<16x4xf32>
    %cst_25 = arith.constant dense<0.000000e+00> : vector<16xf32>
    %60 = vector.multi_reduction <add>, %59, %cst_25 [1] : vector<16x4xf32> to vector<16xf32>
    %61 = vector.shape_cast %60 : vector<16xf32> to vector<16x1xf32>
    %cst_26 = arith.constant 4.000000e+00 : f32
    %62 = vector.broadcast %cst_26 : f32 to vector<16x1xf32>
    %63 = arith.divf %61, %62 : vector<16x1xf32>
    %64 = vector.broadcast %54 : vector<16x1xf32> to vector<16x4xf32>
    %65 = arith.subf %48, %64 : vector<16x4xf32>
    %cst_27 = arith.constant 9.99999974E-6 : f32
    %66 = vector.broadcast %cst_27 : f32 to vector<16x1xf32>
    %67 = arith.addf %63, %66 : vector<16x1xf32>
    %68 = math.rsqrt %67 : vector<16x1xf32>
    %69 = vector.broadcast %68 : vector<16x1xf32> to vector<16x4xf32>
    %70 = arith.mulf %65, %69 : vector<16x4xf32>
    %71 = vector.broadcast %49 : vector<1x4xf32> to vector<16x4xf32>
    %72 = arith.mulf %70, %71 : vector<16x4xf32>
    %73 = vector.broadcast %50 : vector<1x4xf32> to vector<16x4xf32>
    %74 = arith.addf %72, %73 : vector<16x4xf32>
    %c0_28 = arith.constant 0 : index
    %c0_29 = arith.constant 0 : index
    %75 = vector.load %arg4[%c0_28, %c0_29] : memref<16x2048xbf16, #tpu.memory_space<vmem>>, vector<4x2048xbf16>
    %76 = arith.truncf %74 : vector<16x4xf32> to vector<16x4xbf16>
    %cst_30 = arith.constant dense<0.000000e+00> : vector<16x2048xf32>
    %77 = tpu.matmul %76, %75, %cst_30 {dimension_numbers = #tpu.dot_dimension_numbers<[1], [0], [0], [1], [0, 0, 1, 1], [], []>} : vector<16x4xbf16>, vector<4x2048xbf16>, vector<16x2048xf32> -> vector<16x2048xf32>
    %c8_31 = arith.constant 8 : index
    %c0_32 = arith.constant 0 : index
    %78 = vector.load %arg4[%c8_31, %c0_32] : memref<16x2048xbf16, #tpu.memory_space<vmem>>, vector<1x2048xbf16>
    %79 = arith.extf %78 : vector<1x2048xbf16> to vector<1x2048xf32>
    %80 = vector.broadcast %79 : vector<1x2048xf32> to vector<16x2048xf32>
    %81 = arith.addf %77, %80 : vector<16x2048xf32>
    %cst_33 = arith.constant 0.000000e+00 : f32
    %82 = vector.broadcast %cst_33 : f32 to vector<16x2048xf32>
    %83 = arith.maximumf %81, %82 : vector<16x2048xf32>
    %c0_34 = arith.constant 0 : index
    %c0_35 = arith.constant 0 : index
    %84 = vector.load %arg5[%c0_34, %c0_35] : memref<2768x48xbf16, #tpu.memory_space<vmem>>, vector<2048x4xbf16>
    %85 = arith.truncf %83 : vector<16x2048xf32> to vector<16x2048xbf16>
    %cst_36 = arith.constant dense<0.000000e+00> : vector<16x4xf32>
    %86 = tpu.matmul %85, %84, %cst_36 {dimension_numbers = #tpu.dot_dimension_numbers<[1], [0], [0], [1], [0, 0, 1, 1], [], []>} : vector<16x2048xbf16>, vector<2048x4xbf16>, vector<16x4xf32> -> vector<16x4xf32>
    %c48 = arith.constant 48 : index
    %c0_37 = arith.constant 0 : index
    %87 = vector.load %arg3[%c48, %c0_37] : memref<352x512xf32, #tpu.memory_space<vmem>>, vector<1x4xf32>
    %88 = vector.broadcast %87 : vector<1x4xf32> to vector<16x4xf32>
    %89 = arith.addf %86, %88 : vector<16x4xf32>
    %90 = arith.addf %74, %89 : vector<16x4xf32>
    %c56 = arith.constant 56 : index
    %c0_38 = arith.constant 0 : index
    %91 = vector.load %arg3[%c56, %c0_38] : memref<352x512xf32, #tpu.memory_space<vmem>>, vector<1x4xf32>
    %c64 = arith.constant 64 : index
    %c0_39 = arith.constant 0 : index
    %92 = vector.load %arg3[%c64, %c0_39] : memref<352x512xf32, #tpu.memory_space<vmem>>, vector<1x4xf32>
    %cst_40 = arith.constant dense<0.000000e+00> : vector<16xf32>
    %93 = vector.multi_reduction <add>, %90, %cst_40 [1] : vector<16x4xf32> to vector<16xf32>
    %94 = vector.shape_cast %93 : vector<16xf32> to vector<16x1xf32>
    %cst_41 = arith.constant 4.000000e+00 : f32
    %95 = vector.broadcast %cst_41 : f32 to vector<16x1xf32>
    %96 = arith.divf %94, %95 : vector<16x1xf32>
    %97 = vector.broadcast %96 : vector<16x1xf32> to vector<16x4xf32>
    %98 = arith.subf %90, %97 : vector<16x4xf32>
    %99 = vector.broadcast %96 : vector<16x1xf32> to vector<16x4xf32>
    %100 = arith.subf %90, %99 : vector<16x4xf32>
    %101 = arith.mulf %98, %100 : vector<16x4xf32>
    %cst_42 = arith.constant dense<0.000000e+00> : vector<16xf32>
    %102 = vector.multi_reduction <add>, %101, %cst_42 [1] : vector<16x4xf32> to vector<16xf32>
    %103 = vector.shape_cast %102 : vector<16xf32> to vector<16x1xf32>
    %cst_43 = arith.constant 4.000000e+00 : f32
    %104 = vector.broadcast %cst_43 : f32 to vector<16x1xf32>
    %105 = arith.divf %103, %104 : vector<16x1xf32>
    %106 = vector.broadcast %96 : vector<16x1xf32> to vector<16x4xf32>
    %107 = arith.subf %90, %106 : vector<16x4xf32>
    %cst_44 = arith.constant 9.99999974E-6 : f32
    %108 = vector.broadcast %cst_44 : f32 to vector<16x1xf32>
    %109 = arith.addf %105, %108 : vector<16x1xf32>
    %110 = math.rsqrt %109 : vector<16x1xf32>
    %111 = vector.broadcast %110 : vector<16x1xf32> to vector<16x4xf32>
    %112 = arith.mulf %107, %111 : vector<16x4xf32>
    %113 = vector.broadcast %91 : vector<1x4xf32> to vector<16x4xf32>
    %114 = arith.mulf %112, %113 : vector<16x4xf32>
    %115 = vector.broadcast %92 : vector<1x4xf32> to vector<16x4xf32>
    %116 = arith.addf %114, %115 : vector<16x4xf32>
    %c72 = arith.constant 72 : index
    %c0_45 = arith.constant 0 : index
    %117 = vector.load %arg3[%c72, %c0_45] : memref<352x512xf32, #tpu.memory_space<vmem>>, vector<4x64xf32>
    %c80 = arith.constant 80 : index
    %c0_46 = arith.constant 0 : index
    %118 = vector.load %arg3[%c80, %c0_46] : memref<352x512xf32, #tpu.memory_space<vmem>>, vector<16x64xf32>
    %c96 = arith.constant 96 : index
    %c0_47 = arith.constant 0 : index
    %119 = vector.load %arg3[%c96, %c0_47] : memref<352x512xf32, #tpu.memory_space<vmem>>, vector<1x64xf32>
    %cst_48 = arith.constant dense<0.000000e+00> : vector<16x64xf32>
    %120 = tpu.matmul %116, %117, %cst_48 {dimension_numbers = #tpu.dot_dimension_numbers<[1], [0], [0], [1], [0, 0, 1, 1], [], []>} : vector<16x4xf32>, vector<4x64xf32>, vector<16x64xf32> -> vector<16x64xf32>
    %121 = vector.broadcast %119 : vector<1x64xf32> to vector<16x64xf32>
    %122 = arith.addf %120, %121 : vector<16x64xf32>
    %123 = tpu.iota {dimensions = array<i32: 1>} : vector<2x64xi32>
    %c16_i32 = arith.constant 16 : i32
    %c0_i32 = arith.constant 0 : i32
    %124 = arith.cmpi eq, %c16_i32, %c0_i32 : i32
    %c1_i32 = arith.constant 1 : i32
    %125 = arith.select %124, %c1_i32, %c16_i32 : i32
    %126 = vector.broadcast %125 : i32 to vector<2x64xi32>
    %127 = arith.remsi %123, %126 : vector<2x64xi32>
    %c0_i32_49 = arith.constant 0 : i32
    %128 = vector.broadcast %c0_i32_49 : i32 to vector<2x64xi32>
    %129 = arith.cmpi ne, %127, %128 : vector<2x64xi32>
    %c0_i32_50 = arith.constant 0 : i32
    %130 = vector.broadcast %c0_i32_50 : i32 to vector<2x64xi32>
    %131 = arith.cmpi slt, %127, %130 : vector<2x64xi32>
    %c0_i32_51 = arith.constant 0 : i32
    %132 = arith.cmpi slt, %125, %c0_i32_51 : i32
    %133 = vector.broadcast %132 : i1 to vector<2x64xi1>
    %134 = vector.broadcast %133 : vector<2x64xi1> to vector<2x64xi1>
    %135 = arith.xori %131, %134 : vector<2x64xi1>
    %136 = arith.andi %135, %129 : vector<2x64xi1>
    %137 = vector.broadcast %125 : i32 to vector<2x64xi32>
    %138 = arith.addi %127, %137 : vector<2x64xi32>
    %139 = arith.select %136, %138, %127 : vector<2x64xi1>, vector<2x64xi32>
    %c8_i32 = arith.constant 8 : i32
    %140 = vector.broadcast %c8_i32 : i32 to vector<2x64xi32>
    %141 = arith.cmpi slt, %139, %140 : vector<2x64xi32>
    %cst_52 = arith.constant 0.000000e+00 : f32
    %142 = vector.broadcast %cst_52 : f32 to vector<2x16xf32>
    %cst_53 = arith.constant 0.000000e+00 : f32
    %143 = vector.broadcast %cst_53 : f32 to vector<2x16xf32>
    %144 = vector.extract_strided_slice %122 {offsets = [0, 0], sizes = [2, 64], strides = [1, 1]} : vector<16x64xf32> to vector<2x64xf32>
    %145 = vector.extract_strided_slice %122 {offsets = [14, 0], sizes = [2, 64], strides = [1, 1]} : vector<16x64xf32> to vector<2x64xf32>
    %146 = arith.select %141, %144, %145 : vector<2x64xi1>, vector<2x64xf32>
    %cst_54 = arith.constant dense<0.000000e+00> : vector<2x64xf32>
    %147 = tpu.matmul %142, %118, %cst_54 {dimension_numbers = #tpu.dot_dimension_numbers<[1], [0], [0], [1], [0, 0, 1, 1], [], []>} : vector<2x16xf32>, vector<16x64xf32>, vector<2x64xf32> -> vector<2x64xf32>
    %148 = arith.addf %146, %147 : vector<2x64xf32>
    %149 = vector.extract_strided_slice %148 {offsets = [0, 0], sizes = [2, 48], strides = [1, 1]} : vector<2x64xf32> to vector<2x48xf32>
    %150 = arith.negf %149 : vector<2x48xf32>
    %151 = math.exp %150 : vector<2x48xf32>
    %cst_55 = arith.constant 1.000000e+00 : f32
    %152 = vector.broadcast %cst_55 : f32 to vector<2x48xf32>
    %153 = arith.addf %152, %151 : vector<2x48xf32>
    %154 = arith.divf %152, %153 : vector<2x48xf32>
    %155 = vector.extract_strided_slice %148 {offsets = [0, 48], sizes = [2, 16], strides = [1, 1]} : vector<2x64xf32> to vector<2x16xf32>
    %156 = math.tanh %155 : vector<2x16xf32>
    %157 = vector.extract_strided_slice %154 {offsets = [0, 16], sizes = [2, 16], strides = [1, 1]} : vector<2x48xf32> to vector<2x16xf32>
    %158 = arith.mulf %157, %143 : vector<2x16xf32>
    %159 = vector.extract_strided_slice %154 {offsets = [0, 0], sizes = [2, 16], strides = [1, 1]} : vector<2x48xf32> to vector<2x16xf32>
    %160 = arith.mulf %159, %156 : vector<2x16xf32>
    %161 = arith.addf %158, %160 : vector<2x16xf32>
    %162 = vector.extract_strided_slice %154 {offsets = [0, 32], sizes = [2, 16], strides = [1, 1]} : vector<2x48xf32> to vector<2x16xf32>
    %163 = math.tanh %161 : vector<2x16xf32>
    %164 = arith.mulf %162, %163 : vector<2x16xf32>
    %165 = vector.extract_strided_slice %164 {offsets = [0, 0], sizes = [2, 8], strides = [1, 1]} : vector<2x16xf32> to vector<2x8xf32>
    %166 = vector.extract_strided_slice %164 {offsets = [0, 8], sizes = [2, 8], strides = [1, 1]} : vector<2x16xf32> to vector<2x8xf32>
    %167 = vector.extract_strided_slice %122 {offsets = [2, 0], sizes = [2, 64], strides = [1, 1]} : vector<16x64xf32> to vector<2x64xf32>
    %168 = vector.extract_strided_slice %122 {offsets = [12, 0], sizes = [2, 64], strides = [1, 1]} : vector<16x64xf32> to vector<2x64xf32>
    %169 = arith.select %141, %167, %168 : vector<2x64xi1>, vector<2x64xf32>
    %cst_56 = arith.constant dense<0.000000e+00> : vector<2x64xf32>
    %170 = tpu.matmul %164, %118, %cst_56 {dimension_numbers = #tpu.dot_dimension_numbers<[1], [0], [0], [1], [0, 0, 1, 1], [], []>} : vector<2x16xf32>, vector<16x64xf32>, vector<2x64xf32> -> vector<2x64xf32>
    %171 = arith.addf %169, %170 : vector<2x64xf32>
    %172 = vector.extract_strided_slice %171 {offsets = [0, 0], sizes = [2, 48], strides = [1, 1]} : vector<2x64xf32> to vector<2x48xf32>
    %173 = arith.negf %172 : vector<2x48xf32>
    %174 = math.exp %173 : vector<2x48xf32>
    %cst_57 = arith.constant 1.000000e+00 : f32
    %175 = vector.broadcast %cst_57 : f32 to vector<2x48xf32>
    %176 = arith.addf %175, %174 : vector<2x48xf32>
    %177 = arith.divf %175, %176 : vector<2x48xf32>
    %178 = vector.extract_strided_slice %171 {offsets = [0, 48], sizes = [2, 16], strides = [1, 1]} : vector<2x64xf32> to vector<2x16xf32>
    %179 = math.tanh %178 : vector<2x16xf32>
    %180 = vector.extract_strided_slice %177 {offsets = [0, 16], sizes = [2, 16], strides = [1, 1]} : vector<2x48xf32> to vector<2x16xf32>
    %181 = arith.mulf %180, %161 : vector<2x16xf32>
    %182 = vector.extract_strided_slice %177 {offsets = [0, 0], sizes = [2, 16], strides = [1, 1]} : vector<2x48xf32> to vector<2x16xf32>
    %183 = arith.mulf %182, %179 : vector<2x16xf32>
    %184 = arith.addf %181, %183 : vector<2x16xf32>
    %185 = vector.extract_strided_slice %177 {offsets = [0, 32], sizes = [2, 16], strides = [1, 1]} : vector<2x48xf32> to vector<2x16xf32>
    %186 = math.tanh %184 : vector<2x16xf32>
    %187 = arith.mulf %185, %186 : vector<2x16xf32>
    %188 = vector.extract_strided_slice %187 {offsets = [0, 0], sizes = [2, 8], strides = [1, 1]} : vector<2x16xf32> to vector<2x8xf32>
    %189 = vector.extract_strided_slice %187 {offsets = [0, 8], sizes = [2, 8], strides = [1, 1]} : vector<2x16xf32> to vector<2x8xf32>
    %190 = vector.extract_strided_slice %122 {offsets = [4, 0], sizes = [2, 64], strides = [1, 1]} : vector<16x64xf32> to vector<2x64xf32>
    %191 = vector.extract_strided_slice %122 {offsets = [10, 0], sizes = [2, 64], strides = [1, 1]} : vector<16x64xf32> to vector<2x64xf32>
    %192 = arith.select %141, %190, %191 : vector<2x64xi1>, vector<2x64xf32>
    %cst_58 = arith.constant dense<0.000000e+00> : vector<2x64xf32>
    %193 = tpu.matmul %187, %118, %cst_58 {dimension_numbers = #tpu.dot_dimension_numbers<[1], [0], [0], [1], [0, 0, 1, 1], [], []>} : vector<2x16xf32>, vector<16x64xf32>, vector<2x64xf32> -> vector<2x64xf32>
    %194 = arith.addf %192, %193 : vector<2x64xf32>
    %195 = vector.extract_strided_slice %194 {offsets = [0, 0], sizes = [2, 48], strides = [1, 1]} : vector<2x64xf32> to vector<2x48xf32>
    %196 = arith.negf %195 : vector<2x48xf32>
    %197 = math.exp %196 : vector<2x48xf32>
    %cst_59 = arith.constant 1.000000e+00 : f32
    %198 = vector.broadcast %cst_59 : f32 to vector<2x48xf32>
    %199 = arith.addf %198, %197 : vector<2x48xf32>
    %200 = arith.divf %198, %199 : vector<2x48xf32>
    %201 = vector.extract_strided_slice %194 {offsets = [0, 48], sizes = [2, 16], strides = [1, 1]} : vector<2x64xf32> to vector<2x16xf32>
    %202 = math.tanh %201 : vector<2x16xf32>
    %203 = vector.extract_strided_slice %200 {offsets = [0, 16], sizes = [2, 16], strides = [1, 1]} : vector<2x48xf32> to vector<2x16xf32>
    %204 = arith.mulf %203, %184 : vector<2x16xf32>
    %205 = vector.extract_strided_slice %200 {offsets = [0, 0], sizes = [2, 16], strides = [1, 1]} : vector<2x48xf32> to vector<2x16xf32>
    %206 = arith.mulf %205, %202 : vector<2x16xf32>
    %207 = arith.addf %204, %206 : vector<2x16xf32>
    %208 = vector.extract_strided_slice %200 {offsets = [0, 32], sizes = [2, 16], strides = [1, 1]} : vector<2x48xf32> to vector<2x16xf32>
    %209 = math.tanh %207 : vector<2x16xf32>
    %210 = arith.mulf %208, %209 : vector<2x16xf32>
    %211 = vector.extract_strided_slice %210 {offsets = [0, 0], sizes = [2, 8], strides = [1, 1]} : vector<2x16xf32> to vector<2x8xf32>
    %212 = vector.extract_strided_slice %210 {offsets = [0, 8], sizes = [2, 8], strides = [1, 1]} : vector<2x16xf32> to vector<2x8xf32>
    %213 = vector.extract_strided_slice %122 {offsets = [6, 0], sizes = [2, 64], strides = [1, 1]} : vector<16x64xf32> to vector<2x64xf32>
    %214 = vector.extract_strided_slice %122 {offsets = [8, 0], sizes = [2, 64], strides = [1, 1]} : vector<16x64xf32> to vector<2x64xf32>
    %215 = arith.select %141, %213, %214 : vector<2x64xi1>, vector<2x64xf32>
    %cst_60 = arith.constant dense<0.000000e+00> : vector<2x64xf32>
    %216 = tpu.matmul %210, %118, %cst_60 {dimension_numbers = #tpu.dot_dimension_numbers<[1], [0], [0], [1], [0, 0, 1, 1], [], []>} : vector<2x16xf32>, vector<16x64xf32>, vector<2x64xf32> -> vector<2x64xf32>
    %217 = arith.addf %215, %216 : vector<2x64xf32>
    %218 = vector.extract_strided_slice %217 {offsets = [0, 0], sizes = [2, 48], strides = [1, 1]} : vector<2x64xf32> to vector<2x48xf32>
    %219 = arith.negf %218 : vector<2x48xf32>
    %220 = math.exp %219 : vector<2x48xf32>
    %cst_61 = arith.constant 1.000000e+00 : f32
    %221 = vector.broadcast %cst_61 : f32 to vector<2x48xf32>
    %222 = arith.addf %221, %220 : vector<2x48xf32>
    %223 = arith.divf %221, %222 : vector<2x48xf32>
    %224 = vector.extract_strided_slice %217 {offsets = [0, 48], sizes = [2, 16], strides = [1, 1]} : vector<2x64xf32> to vector<2x16xf32>
    %225 = math.tanh %224 : vector<2x16xf32>
    %226 = vector.extract_strided_slice %223 {offsets = [0, 16], sizes = [2, 16], strides = [1, 1]} : vector<2x48xf32> to vector<2x16xf32>
    %227 = arith.mulf %226, %207 : vector<2x16xf32>
    %228 = vector.extract_strided_slice %223 {offsets = [0, 0], sizes = [2, 16], strides = [1, 1]} : vector<2x48xf32> to vector<2x16xf32>
    %229 = arith.mulf %228, %225 : vector<2x16xf32>
    %230 = arith.addf %227, %229 : vector<2x16xf32>
    %231 = vector.extract_strided_slice %223 {offsets = [0, 32], sizes = [2, 16], strides = [1, 1]} : vector<2x48xf32> to vector<2x16xf32>
    %232 = math.tanh %230 : vector<2x16xf32>
    %233 = arith.mulf %231, %232 : vector<2x16xf32>
    %234 = vector.extract_strided_slice %233 {offsets = [0, 0], sizes = [2, 8], strides = [1, 1]} : vector<2x16xf32> to vector<2x8xf32>
    %235 = vector.extract_strided_slice %233 {offsets = [0, 8], sizes = [2, 8], strides = [1, 1]} : vector<2x16xf32> to vector<2x8xf32>
    %236 = vector.extract_strided_slice %122 {offsets = [8, 0], sizes = [2, 64], strides = [1, 1]} : vector<16x64xf32> to vector<2x64xf32>
    %237 = vector.extract_strided_slice %122 {offsets = [6, 0], sizes = [2, 64], strides = [1, 1]} : vector<16x64xf32> to vector<2x64xf32>
    %238 = arith.select %141, %236, %237 : vector<2x64xi1>, vector<2x64xf32>
    %cst_62 = arith.constant dense<0.000000e+00> : vector<2x64xf32>
    %239 = tpu.matmul %233, %118, %cst_62 {dimension_numbers = #tpu.dot_dimension_numbers<[1], [0], [0], [1], [0, 0, 1, 1], [], []>} : vector<2x16xf32>, vector<16x64xf32>, vector<2x64xf32> -> vector<2x64xf32>
    %240 = arith.addf %238, %239 : vector<2x64xf32>
    %241 = vector.extract_strided_slice %240 {offsets = [0, 0], sizes = [2, 48], strides = [1, 1]} : vector<2x64xf32> to vector<2x48xf32>
    %242 = arith.negf %241 : vector<2x48xf32>
    %243 = math.exp %242 : vector<2x48xf32>
    %cst_63 = arith.constant 1.000000e+00 : f32
    %244 = vector.broadcast %cst_63 : f32 to vector<2x48xf32>
    %245 = arith.addf %244, %243 : vector<2x48xf32>
    %246 = arith.divf %244, %245 : vector<2x48xf32>
    %247 = vector.extract_strided_slice %240 {offsets = [0, 48], sizes = [2, 16], strides = [1, 1]} : vector<2x64xf32> to vector<2x16xf32>
    %248 = math.tanh %247 : vector<2x16xf32>
    %249 = vector.extract_strided_slice %246 {offsets = [0, 16], sizes = [2, 16], strides = [1, 1]} : vector<2x48xf32> to vector<2x16xf32>
    %250 = arith.mulf %249, %230 : vector<2x16xf32>
    %251 = vector.extract_strided_slice %246 {offsets = [0, 0], sizes = [2, 16], strides = [1, 1]} : vector<2x48xf32> to vector<2x16xf32>
    %252 = arith.mulf %251, %248 : vector<2x16xf32>
    %253 = arith.addf %250, %252 : vector<2x16xf32>
    %254 = vector.extract_strided_slice %246 {offsets = [0, 32], sizes = [2, 16], strides = [1, 1]} : vector<2x48xf32> to vector<2x16xf32>
    %255 = math.tanh %253 : vector<2x16xf32>
    %256 = arith.mulf %254, %255 : vector<2x16xf32>
    %257 = vector.extract_strided_slice %256 {offsets = [0, 0], sizes = [2, 8], strides = [1, 1]} : vector<2x16xf32> to vector<2x8xf32>
    %258 = vector.extract_strided_slice %256 {offsets = [0, 8], sizes = [2, 8], strides = [1, 1]} : vector<2x16xf32> to vector<2x8xf32>
    %259 = vector.extract_strided_slice %122 {offsets = [10, 0], sizes = [2, 64], strides = [1, 1]} : vector<16x64xf32> to vector<2x64xf32>
    %260 = vector.extract_strided_slice %122 {offsets = [4, 0], sizes = [2, 64], strides = [1, 1]} : vector<16x64xf32> to vector<2x64xf32>
    %261 = arith.select %141, %259, %260 : vector<2x64xi1>, vector<2x64xf32>
    %cst_64 = arith.constant dense<0.000000e+00> : vector<2x64xf32>
    %262 = tpu.matmul %256, %118, %cst_64 {dimension_numbers = #tpu.dot_dimension_numbers<[1], [0], [0], [1], [0, 0, 1, 1], [], []>} : vector<2x16xf32>, vector<16x64xf32>, vector<2x64xf32> -> vector<2x64xf32>
    %263 = arith.addf %261, %262 : vector<2x64xf32>
    %264 = vector.extract_strided_slice %263 {offsets = [0, 0], sizes = [2, 48], strides = [1, 1]} : vector<2x64xf32> to vector<2x48xf32>
    %265 = arith.negf %264 : vector<2x48xf32>
    %266 = math.exp %265 : vector<2x48xf32>
    %cst_65 = arith.constant 1.000000e+00 : f32
    %267 = vector.broadcast %cst_65 : f32 to vector<2x48xf32>
    %268 = arith.addf %267, %266 : vector<2x48xf32>
    %269 = arith.divf %267, %268 : vector<2x48xf32>
    %270 = vector.extract_strided_slice %263 {offsets = [0, 48], sizes = [2, 16], strides = [1, 1]} : vector<2x64xf32> to vector<2x16xf32>
    %271 = math.tanh %270 : vector<2x16xf32>
    %272 = vector.extract_strided_slice %269 {offsets = [0, 16], sizes = [2, 16], strides = [1, 1]} : vector<2x48xf32> to vector<2x16xf32>
    %273 = arith.mulf %272, %253 : vector<2x16xf32>
    %274 = vector.extract_strided_slice %269 {offsets = [0, 0], sizes = [2, 16], strides = [1, 1]} : vector<2x48xf32> to vector<2x16xf32>
    %275 = arith.mulf %274, %271 : vector<2x16xf32>
    %276 = arith.addf %273, %275 : vector<2x16xf32>
    %277 = vector.extract_strided_slice %269 {offsets = [0, 32], sizes = [2, 16], strides = [1, 1]} : vector<2x48xf32> to vector<2x16xf32>
    %278 = math.tanh %276 : vector<2x16xf32>
    %279 = arith.mulf %277, %278 : vector<2x16xf32>
    %280 = vector.extract_strided_slice %279 {offsets = [0, 0], sizes = [2, 8], strides = [1, 1]} : vector<2x16xf32> to vector<2x8xf32>
    %281 = vector.extract_strided_slice %279 {offsets = [0, 8], sizes = [2, 8], strides = [1, 1]} : vector<2x16xf32> to vector<2x8xf32>
    %282 = vector.extract_strided_slice %122 {offsets = [12, 0], sizes = [2, 64], strides = [1, 1]} : vector<16x64xf32> to vector<2x64xf32>
    %283 = vector.extract_strided_slice %122 {offsets = [2, 0], sizes = [2, 64], strides = [1, 1]} : vector<16x64xf32> to vector<2x64xf32>
    %284 = arith.select %141, %282, %283 : vector<2x64xi1>, vector<2x64xf32>
    %cst_66 = arith.constant dense<0.000000e+00> : vector<2x64xf32>
    %285 = tpu.matmul %279, %118, %cst_66 {dimension_numbers = #tpu.dot_dimension_numbers<[1], [0], [0], [1], [0, 0, 1, 1], [], []>} : vector<2x16xf32>, vector<16x64xf32>, vector<2x64xf32> -> vector<2x64xf32>
    %286 = arith.addf %284, %285 : vector<2x64xf32>
    %287 = vector.extract_strided_slice %286 {offsets = [0, 0], sizes = [2, 48], strides = [1, 1]} : vector<2x64xf32> to vector<2x48xf32>
    %288 = arith.negf %287 : vector<2x48xf32>
    %289 = math.exp %288 : vector<2x48xf32>
    %cst_67 = arith.constant 1.000000e+00 : f32
    %290 = vector.broadcast %cst_67 : f32 to vector<2x48xf32>
    %291 = arith.addf %290, %289 : vector<2x48xf32>
    %292 = arith.divf %290, %291 : vector<2x48xf32>
    %293 = vector.extract_strided_slice %286 {offsets = [0, 48], sizes = [2, 16], strides = [1, 1]} : vector<2x64xf32> to vector<2x16xf32>
    %294 = math.tanh %293 : vector<2x16xf32>
    %295 = vector.extract_strided_slice %292 {offsets = [0, 16], sizes = [2, 16], strides = [1, 1]} : vector<2x48xf32> to vector<2x16xf32>
    %296 = arith.mulf %295, %276 : vector<2x16xf32>
    %297 = vector.extract_strided_slice %292 {offsets = [0, 0], sizes = [2, 16], strides = [1, 1]} : vector<2x48xf32> to vector<2x16xf32>
    %298 = arith.mulf %297, %294 : vector<2x16xf32>
    %299 = arith.addf %296, %298 : vector<2x16xf32>
    %300 = vector.extract_strided_slice %292 {offsets = [0, 32], sizes = [2, 16], strides = [1, 1]} : vector<2x48xf32> to vector<2x16xf32>
    %301 = math.tanh %299 : vector<2x16xf32>
    %302 = arith.mulf %300, %301 : vector<2x16xf32>
    %303 = vector.extract_strided_slice %302 {offsets = [0, 0], sizes = [2, 8], strides = [1, 1]} : vector<2x16xf32> to vector<2x8xf32>
    %304 = vector.extract_strided_slice %302 {offsets = [0, 8], sizes = [2, 8], strides = [1, 1]} : vector<2x16xf32> to vector<2x8xf32>
    %305 = vector.extract_strided_slice %122 {offsets = [14, 0], sizes = [2, 64], strides = [1, 1]} : vector<16x64xf32> to vector<2x64xf32>
    %306 = vector.extract_strided_slice %122 {offsets = [0, 0], sizes = [2, 64], strides = [1, 1]} : vector<16x64xf32> to vector<2x64xf32>
    %307 = arith.select %141, %305, %306 : vector<2x64xi1>, vector<2x64xf32>
    %cst_68 = arith.constant dense<0.000000e+00> : vector<2x64xf32>
    %308 = tpu.matmul %302, %118, %cst_68 {dimension_numbers = #tpu.dot_dimension_numbers<[1], [0], [0], [1], [0, 0, 1, 1], [], []>} : vector<2x16xf32>, vector<16x64xf32>, vector<2x64xf32> -> vector<2x64xf32>
    %309 = arith.addf %307, %308 : vector<2x64xf32>
    %310 = vector.extract_strided_slice %309 {offsets = [0, 0], sizes = [2, 48], strides = [1, 1]} : vector<2x64xf32> to vector<2x48xf32>
    %311 = arith.negf %310 : vector<2x48xf32>
    %312 = math.exp %311 : vector<2x48xf32>
    %cst_69 = arith.constant 1.000000e+00 : f32
    %313 = vector.broadcast %cst_69 : f32 to vector<2x48xf32>
    %314 = arith.addf %313, %312 : vector<2x48xf32>
    %315 = arith.divf %313, %314 : vector<2x48xf32>
    %316 = vector.extract_strided_slice %309 {offsets = [0, 48], sizes = [2, 16], strides = [1, 1]} : vector<2x64xf32> to vector<2x16xf32>
    %317 = math.tanh %316 : vector<2x16xf32>
    %318 = vector.extract_strided_slice %315 {offsets = [0, 16], sizes = [2, 16], strides = [1, 1]} : vector<2x48xf32> to vector<2x16xf32>
    %319 = arith.mulf %318, %299 : vector<2x16xf32>
    %320 = vector.extract_strided_slice %315 {offsets = [0, 0], sizes = [2, 16], strides = [1, 1]} : vector<2x48xf32> to vector<2x16xf32>
    %321 = arith.mulf %320, %317 : vector<2x16xf32>
    %322 = arith.addf %319, %321 : vector<2x16xf32>
    %323 = vector.extract_strided_slice %315 {offsets = [0, 32], sizes = [2, 16], strides = [1, 1]} : vector<2x48xf32> to vector<2x16xf32>
    %324 = math.tanh %322 : vector<2x16xf32>
    %325 = arith.mulf %323, %324 : vector<2x16xf32>
    %326 = vector.extract_strided_slice %325 {offsets = [0, 0], sizes = [2, 8], strides = [1, 1]} : vector<2x16xf32> to vector<2x8xf32>
    %327 = vector.extract_strided_slice %325 {offsets = [0, 8], sizes = [2, 8], strides = [1, 1]} : vector<2x16xf32> to vector<2x8xf32>
    %328 = tpu.concatenate %165, %327 in 1 : vector<2x8xf32>, vector<2x8xf32> -> vector<2x16xf32>
    %329 = tpu.concatenate %188, %304 in 1 : vector<2x8xf32>, vector<2x8xf32> -> vector<2x16xf32>
    %330 = tpu.concatenate %211, %281 in 1 : vector<2x8xf32>, vector<2x8xf32> -> vector<2x16xf32>
    %331 = tpu.concatenate %234, %258 in 1 : vector<2x8xf32>, vector<2x8xf32> -> vector<2x16xf32>
    %332 = tpu.concatenate %257, %235 in 1 : vector<2x8xf32>, vector<2x8xf32> -> vector<2x16xf32>
    %333 = tpu.concatenate %280, %212 in 1 : vector<2x8xf32>, vector<2x8xf32> -> vector<2x16xf32>
    %334 = tpu.concatenate %303, %189 in 1 : vector<2x8xf32>, vector<2x8xf32> -> vector<2x16xf32>
    %335 = tpu.concatenate %326, %166 in 1 : vector<2x8xf32>, vector<2x8xf32> -> vector<2x16xf32>
    %336 = tpu.concatenate %328, %329, %330, %331, %332, %333, %334, %335 in 0 : vector<2x16xf32>, vector<2x16xf32>, vector<2x16xf32>, vector<2x16xf32>, vector<2x16xf32>, vector<2x16xf32>, vector<2x16xf32>, vector<2x16xf32> -> vector<16x16xf32>
    %c104 = arith.constant 104 : index
    %c0_70 = arith.constant 0 : index
    %337 = vector.load %arg3[%c104, %c0_70] : memref<352x512xf32, #tpu.memory_space<vmem>>, vector<16x192xf32>
    %c120 = arith.constant 120 : index
    %c0_71 = arith.constant 0 : index
    %338 = vector.load %arg3[%c120, %c0_71] : memref<352x512xf32, #tpu.memory_space<vmem>>, vector<48x192xf32>
    %c168 = arith.constant 168 : index
    %c0_72 = arith.constant 0 : index
    %339 = vector.load %arg3[%c168, %c0_72] : memref<352x512xf32, #tpu.memory_space<vmem>>, vector<1x192xf32>
    %cst_73 = arith.constant dense<0.000000e+00> : vector<16x192xf32>
    %340 = tpu.matmul %336, %337, %cst_73 {dimension_numbers = #tpu.dot_dimension_numbers<[1], [0], [0], [1], [0, 0, 1, 1], [], []>} : vector<16x16xf32>, vector<16x192xf32>, vector<16x192xf32> -> vector<16x192xf32>
    %341 = vector.broadcast %339 : vector<1x192xf32> to vector<16x192xf32>
    %342 = arith.addf %340, %341 : vector<16x192xf32>
    %343 = tpu.iota {dimensions = array<i32: 1>} : vector<2x192xi32>
    %c48_i32 = arith.constant 48 : i32
    %c0_i32_74 = arith.constant 0 : i32
    %344 = arith.cmpi eq, %c48_i32, %c0_i32_74 : i32
    %c1_i32_75 = arith.constant 1 : i32
    %345 = arith.select %344, %c1_i32_75, %c48_i32 : i32
    %346 = vector.broadcast %345 : i32 to vector<2x192xi32>
    %347 = arith.remsi %343, %346 : vector<2x192xi32>
    %c0_i32_76 = arith.constant 0 : i32
    %348 = vector.broadcast %c0_i32_76 : i32 to vector<2x192xi32>
    %349 = arith.cmpi ne, %347, %348 : vector<2x192xi32>
    %c0_i32_77 = arith.constant 0 : i32
    %350 = vector.broadcast %c0_i32_77 : i32 to vector<2x192xi32>
    %351 = arith.cmpi slt, %347, %350 : vector<2x192xi32>
    %c0_i32_78 = arith.constant 0 : i32
    %352 = arith.cmpi slt, %345, %c0_i32_78 : i32
    %353 = vector.broadcast %352 : i1 to vector<2x192xi1>
    %354 = vector.broadcast %353 : vector<2x192xi1> to vector<2x192xi1>
    %355 = arith.xori %351, %354 : vector<2x192xi1>
    %356 = arith.andi %355, %349 : vector<2x192xi1>
    %357 = vector.broadcast %345 : i32 to vector<2x192xi32>
    %358 = arith.addi %347, %357 : vector<2x192xi32>
    %359 = arith.select %356, %358, %347 : vector<2x192xi1>, vector<2x192xi32>
    %c24_i32 = arith.constant 24 : i32
    %360 = vector.broadcast %c24_i32 : i32 to vector<2x192xi32>
    %361 = arith.cmpi slt, %359, %360 : vector<2x192xi32>
    %cst_79 = arith.constant 0.000000e+00 : f32
    %362 = vector.broadcast %cst_79 : f32 to vector<2x48xf32>
    %cst_80 = arith.constant 0.000000e+00 : f32
    %363 = vector.broadcast %cst_80 : f32 to vector<2x48xf32>
    %364 = vector.extract_strided_slice %342 {offsets = [0, 0], sizes = [2, 192], strides = [1, 1]} : vector<16x192xf32> to vector<2x192xf32>
    %365 = vector.extract_strided_slice %342 {offsets = [14, 0], sizes = [2, 192], strides = [1, 1]} : vector<16x192xf32> to vector<2x192xf32>
    %366 = arith.select %361, %364, %365 : vector<2x192xi1>, vector<2x192xf32>
    %cst_81 = arith.constant dense<0.000000e+00> : vector<2x192xf32>
    %367 = tpu.matmul %362, %338, %cst_81 {dimension_numbers = #tpu.dot_dimension_numbers<[1], [0], [0], [1], [0, 0, 1, 1], [], []>} : vector<2x48xf32>, vector<48x192xf32>, vector<2x192xf32> -> vector<2x192xf32>
    %368 = arith.addf %366, %367 : vector<2x192xf32>
    %369 = vector.extract_strided_slice %368 {offsets = [0, 0], sizes = [2, 144], strides = [1, 1]} : vector<2x192xf32> to vector<2x144xf32>
    %370 = arith.negf %369 : vector<2x144xf32>
    %371 = math.exp %370 : vector<2x144xf32>
    %cst_82 = arith.constant 1.000000e+00 : f32
    %372 = vector.broadcast %cst_82 : f32 to vector<2x144xf32>
    %373 = arith.addf %372, %371 : vector<2x144xf32>
    %374 = arith.divf %372, %373 : vector<2x144xf32>
    %375 = vector.extract_strided_slice %368 {offsets = [0, 144], sizes = [2, 48], strides = [1, 1]} : vector<2x192xf32> to vector<2x48xf32>
    %376 = math.tanh %375 : vector<2x48xf32>
    %377 = vector.extract_strided_slice %374 {offsets = [0, 48], sizes = [2, 48], strides = [1, 1]} : vector<2x144xf32> to vector<2x48xf32>
    %378 = arith.mulf %377, %363 : vector<2x48xf32>
    %379 = vector.extract_strided_slice %374 {offsets = [0, 0], sizes = [2, 48], strides = [1, 1]} : vector<2x144xf32> to vector<2x48xf32>
    %380 = arith.mulf %379, %376 : vector<2x48xf32>
    %381 = arith.addf %378, %380 : vector<2x48xf32>
    %382 = vector.extract_strided_slice %374 {offsets = [0, 96], sizes = [2, 48], strides = [1, 1]} : vector<2x144xf32> to vector<2x48xf32>
    %383 = math.tanh %381 : vector<2x48xf32>
    %384 = arith.mulf %382, %383 : vector<2x48xf32>
    %385 = vector.extract_strided_slice %384 {offsets = [0, 0], sizes = [2, 24], strides = [1, 1]} : vector<2x48xf32> to vector<2x24xf32>
    %386 = vector.extract_strided_slice %384 {offsets = [0, 24], sizes = [2, 24], strides = [1, 1]} : vector<2x48xf32> to vector<2x24xf32>
    %387 = vector.extract_strided_slice %342 {offsets = [2, 0], sizes = [2, 192], strides = [1, 1]} : vector<16x192xf32> to vector<2x192xf32>
    %388 = vector.extract_strided_slice %342 {offsets = [12, 0], sizes = [2, 192], strides = [1, 1]} : vector<16x192xf32> to vector<2x192xf32>
    %389 = arith.select %361, %387, %388 : vector<2x192xi1>, vector<2x192xf32>
    %cst_83 = arith.constant dense<0.000000e+00> : vector<2x192xf32>
    %390 = tpu.matmul %384, %338, %cst_83 {dimension_numbers = #tpu.dot_dimension_numbers<[1], [0], [0], [1], [0, 0, 1, 1], [], []>} : vector<2x48xf32>, vector<48x192xf32>, vector<2x192xf32> -> vector<2x192xf32>
    %391 = arith.addf %389, %390 : vector<2x192xf32>
    %392 = vector.extract_strided_slice %391 {offsets = [0, 0], sizes = [2, 144], strides = [1, 1]} : vector<2x192xf32> to vector<2x144xf32>
    %393 = arith.negf %392 : vector<2x144xf32>
    %394 = math.exp %393 : vector<2x144xf32>
    %cst_84 = arith.constant 1.000000e+00 : f32
    %395 = vector.broadcast %cst_84 : f32 to vector<2x144xf32>
    %396 = arith.addf %395, %394 : vector<2x144xf32>
    %397 = arith.divf %395, %396 : vector<2x144xf32>
    %398 = vector.extract_strided_slice %391 {offsets = [0, 144], sizes = [2, 48], strides = [1, 1]} : vector<2x192xf32> to vector<2x48xf32>
    %399 = math.tanh %398 : vector<2x48xf32>
    %400 = vector.extract_strided_slice %397 {offsets = [0, 48], sizes = [2, 48], strides = [1, 1]} : vector<2x144xf32> to vector<2x48xf32>
    %401 = arith.mulf %400, %381 : vector<2x48xf32>
    %402 = vector.extract_strided_slice %397 {offsets = [0, 0], sizes = [2, 48], strides = [1, 1]} : vector<2x144xf32> to vector<2x48xf32>
    %403 = arith.mulf %402, %399 : vector<2x48xf32>
    %404 = arith.addf %401, %403 : vector<2x48xf32>
    %405 = vector.extract_strided_slice %397 {offsets = [0, 96], sizes = [2, 48], strides = [1, 1]} : vector<2x144xf32> to vector<2x48xf32>
    %406 = math.tanh %404 : vector<2x48xf32>
    %407 = arith.mulf %405, %406 : vector<2x48xf32>
    %408 = vector.extract_strided_slice %407 {offsets = [0, 0], sizes = [2, 24], strides = [1, 1]} : vector<2x48xf32> to vector<2x24xf32>
    %409 = vector.extract_strided_slice %407 {offsets = [0, 24], sizes = [2, 24], strides = [1, 1]} : vector<2x48xf32> to vector<2x24xf32>
    %410 = vector.extract_strided_slice %342 {offsets = [4, 0], sizes = [2, 192], strides = [1, 1]} : vector<16x192xf32> to vector<2x192xf32>
    %411 = vector.extract_strided_slice %342 {offsets = [10, 0], sizes = [2, 192], strides = [1, 1]} : vector<16x192xf32> to vector<2x192xf32>
    %412 = arith.select %361, %410, %411 : vector<2x192xi1>, vector<2x192xf32>
    %cst_85 = arith.constant dense<0.000000e+00> : vector<2x192xf32>
    %413 = tpu.matmul %407, %338, %cst_85 {dimension_numbers = #tpu.dot_dimension_numbers<[1], [0], [0], [1], [0, 0, 1, 1], [], []>} : vector<2x48xf32>, vector<48x192xf32>, vector<2x192xf32> -> vector<2x192xf32>
    %414 = arith.addf %412, %413 : vector<2x192xf32>
    %415 = vector.extract_strided_slice %414 {offsets = [0, 0], sizes = [2, 144], strides = [1, 1]} : vector<2x192xf32> to vector<2x144xf32>
    %416 = arith.negf %415 : vector<2x144xf32>
    %417 = math.exp %416 : vector<2x144xf32>
    %cst_86 = arith.constant 1.000000e+00 : f32
    %418 = vector.broadcast %cst_86 : f32 to vector<2x144xf32>
    %419 = arith.addf %418, %417 : vector<2x144xf32>
    %420 = arith.divf %418, %419 : vector<2x144xf32>
    %421 = vector.extract_strided_slice %414 {offsets = [0, 144], sizes = [2, 48], strides = [1, 1]} : vector<2x192xf32> to vector<2x48xf32>
    %422 = math.tanh %421 : vector<2x48xf32>
    %423 = vector.extract_strided_slice %420 {offsets = [0, 48], sizes = [2, 48], strides = [1, 1]} : vector<2x144xf32> to vector<2x48xf32>
    %424 = arith.mulf %423, %404 : vector<2x48xf32>
    %425 = vector.extract_strided_slice %420 {offsets = [0, 0], sizes = [2, 48], strides = [1, 1]} : vector<2x144xf32> to vector<2x48xf32>
    %426 = arith.mulf %425, %422 : vector<2x48xf32>
    %427 = arith.addf %424, %426 : vector<2x48xf32>
    %428 = vector.extract_strided_slice %420 {offsets = [0, 96], sizes = [2, 48], strides = [1, 1]} : vector<2x144xf32> to vector<2x48xf32>
    %429 = math.tanh %427 : vector<2x48xf32>
    %430 = arith.mulf %428, %429 : vector<2x48xf32>
    %431 = vector.extract_strided_slice %430 {offsets = [0, 0], sizes = [2, 24], strides = [1, 1]} : vector<2x48xf32> to vector<2x24xf32>
    %432 = vector.extract_strided_slice %430 {offsets = [0, 24], sizes = [2, 24], strides = [1, 1]} : vector<2x48xf32> to vector<2x24xf32>
    %433 = vector.extract_strided_slice %342 {offsets = [6, 0], sizes = [2, 192], strides = [1, 1]} : vector<16x192xf32> to vector<2x192xf32>
    %434 = vector.extract_strided_slice %342 {offsets = [8, 0], sizes = [2, 192], strides = [1, 1]} : vector<16x192xf32> to vector<2x192xf32>
    %435 = arith.select %361, %433, %434 : vector<2x192xi1>, vector<2x192xf32>
    %cst_87 = arith.constant dense<0.000000e+00> : vector<2x192xf32>
    %436 = tpu.matmul %430, %338, %cst_87 {dimension_numbers = #tpu.dot_dimension_numbers<[1], [0], [0], [1], [0, 0, 1, 1], [], []>} : vector<2x48xf32>, vector<48x192xf32>, vector<2x192xf32> -> vector<2x192xf32>
    %437 = arith.addf %435, %436 : vector<2x192xf32>
    %438 = vector.extract_strided_slice %437 {offsets = [0, 0], sizes = [2, 144], strides = [1, 1]} : vector<2x192xf32> to vector<2x144xf32>
    %439 = arith.negf %438 : vector<2x144xf32>
    %440 = math.exp %439 : vector<2x144xf32>
    %cst_88 = arith.constant 1.000000e+00 : f32
    %441 = vector.broadcast %cst_88 : f32 to vector<2x144xf32>
    %442 = arith.addf %441, %440 : vector<2x144xf32>
    %443 = arith.divf %441, %442 : vector<2x144xf32>
    %444 = vector.extract_strided_slice %437 {offsets = [0, 144], sizes = [2, 48], strides = [1, 1]} : vector<2x192xf32> to vector<2x48xf32>
    %445 = math.tanh %444 : vector<2x48xf32>
    %446 = vector.extract_strided_slice %443 {offsets = [0, 48], sizes = [2, 48], strides = [1, 1]} : vector<2x144xf32> to vector<2x48xf32>
    %447 = arith.mulf %446, %427 : vector<2x48xf32>
    %448 = vector.extract_strided_slice %443 {offsets = [0, 0], sizes = [2, 48], strides = [1, 1]} : vector<2x144xf32> to vector<2x48xf32>
    %449 = arith.mulf %448, %445 : vector<2x48xf32>
    %450 = arith.addf %447, %449 : vector<2x48xf32>
    %451 = vector.extract_strided_slice %443 {offsets = [0, 96], sizes = [2, 48], strides = [1, 1]} : vector<2x144xf32> to vector<2x48xf32>
    %452 = math.tanh %450 : vector<2x48xf32>
    %453 = arith.mulf %451, %452 : vector<2x48xf32>
    %454 = vector.extract_strided_slice %453 {offsets = [0, 0], sizes = [2, 24], strides = [1, 1]} : vector<2x48xf32> to vector<2x24xf32>
    %455 = vector.extract_strided_slice %453 {offsets = [0, 24], sizes = [2, 24], strides = [1, 1]} : vector<2x48xf32> to vector<2x24xf32>
    %456 = vector.extract_strided_slice %342 {offsets = [8, 0], sizes = [2, 192], strides = [1, 1]} : vector<16x192xf32> to vector<2x192xf32>
    %457 = vector.extract_strided_slice %342 {offsets = [6, 0], sizes = [2, 192], strides = [1, 1]} : vector<16x192xf32> to vector<2x192xf32>
    %458 = arith.select %361, %456, %457 : vector<2x192xi1>, vector<2x192xf32>
    %cst_89 = arith.constant dense<0.000000e+00> : vector<2x192xf32>
    %459 = tpu.matmul %453, %338, %cst_89 {dimension_numbers = #tpu.dot_dimension_numbers<[1], [0], [0], [1], [0, 0, 1, 1], [], []>} : vector<2x48xf32>, vector<48x192xf32>, vector<2x192xf32> -> vector<2x192xf32>
    %460 = arith.addf %458, %459 : vector<2x192xf32>
    %461 = vector.extract_strided_slice %460 {offsets = [0, 0], sizes = [2, 144], strides = [1, 1]} : vector<2x192xf32> to vector<2x144xf32>
    %462 = arith.negf %461 : vector<2x144xf32>
    %463 = math.exp %462 : vector<2x144xf32>
    %cst_90 = arith.constant 1.000000e+00 : f32
    %464 = vector.broadcast %cst_90 : f32 to vector<2x144xf32>
    %465 = arith.addf %464, %463 : vector<2x144xf32>
    %466 = arith.divf %464, %465 : vector<2x144xf32>
    %467 = vector.extract_strided_slice %460 {offsets = [0, 144], sizes = [2, 48], strides = [1, 1]} : vector<2x192xf32> to vector<2x48xf32>
    %468 = math.tanh %467 : vector<2x48xf32>
    %469 = vector.extract_strided_slice %466 {offsets = [0, 48], sizes = [2, 48], strides = [1, 1]} : vector<2x144xf32> to vector<2x48xf32>
    %470 = arith.mulf %469, %450 : vector<2x48xf32>
    %471 = vector.extract_strided_slice %466 {offsets = [0, 0], sizes = [2, 48], strides = [1, 1]} : vector<2x144xf32> to vector<2x48xf32>
    %472 = arith.mulf %471, %468 : vector<2x48xf32>
    %473 = arith.addf %470, %472 : vector<2x48xf32>
    %474 = vector.extract_strided_slice %466 {offsets = [0, 96], sizes = [2, 48], strides = [1, 1]} : vector<2x144xf32> to vector<2x48xf32>
    %475 = math.tanh %473 : vector<2x48xf32>
    %476 = arith.mulf %474, %475 : vector<2x48xf32>
    %477 = vector.extract_strided_slice %476 {offsets = [0, 0], sizes = [2, 24], strides = [1, 1]} : vector<2x48xf32> to vector<2x24xf32>
    %478 = vector.extract_strided_slice %476 {offsets = [0, 24], sizes = [2, 24], strides = [1, 1]} : vector<2x48xf32> to vector<2x24xf32>
    %479 = vector.extract_strided_slice %342 {offsets = [10, 0], sizes = [2, 192], strides = [1, 1]} : vector<16x192xf32> to vector<2x192xf32>
    %480 = vector.extract_strided_slice %342 {offsets = [4, 0], sizes = [2, 192], strides = [1, 1]} : vector<16x192xf32> to vector<2x192xf32>
    %481 = arith.select %361, %479, %480 : vector<2x192xi1>, vector<2x192xf32>
    %cst_91 = arith.constant dense<0.000000e+00> : vector<2x192xf32>
    %482 = tpu.matmul %476, %338, %cst_91 {dimension_numbers = #tpu.dot_dimension_numbers<[1], [0], [0], [1], [0, 0, 1, 1], [], []>} : vector<2x48xf32>, vector<48x192xf32>, vector<2x192xf32> -> vector<2x192xf32>
    %483 = arith.addf %481, %482 : vector<2x192xf32>
    %484 = vector.extract_strided_slice %483 {offsets = [0, 0], sizes = [2, 144], strides = [1, 1]} : vector<2x192xf32> to vector<2x144xf32>
    %485 = arith.negf %484 : vector<2x144xf32>
    %486 = math.exp %485 : vector<2x144xf32>
    %cst_92 = arith.constant 1.000000e+00 : f32
    %487 = vector.broadcast %cst_92 : f32 to vector<2x144xf32>
    %488 = arith.addf %487, %486 : vector<2x144xf32>
    %489 = arith.divf %487, %488 : vector<2x144xf32>
    %490 = vector.extract_strided_slice %483 {offsets = [0, 144], sizes = [2, 48], strides = [1, 1]} : vector<2x192xf32> to vector<2x48xf32>
    %491 = math.tanh %490 : vector<2x48xf32>
    %492 = vector.extract_strided_slice %489 {offsets = [0, 48], sizes = [2, 48], strides = [1, 1]} : vector<2x144xf32> to vector<2x48xf32>
    %493 = arith.mulf %492, %473 : vector<2x48xf32>
    %494 = vector.extract_strided_slice %489 {offsets = [0, 0], sizes = [2, 48], strides = [1, 1]} : vector<2x144xf32> to vector<2x48xf32>
    %495 = arith.mulf %494, %491 : vector<2x48xf32>
    %496 = arith.addf %493, %495 : vector<2x48xf32>
    %497 = vector.extract_strided_slice %489 {offsets = [0, 96], sizes = [2, 48], strides = [1, 1]} : vector<2x144xf32> to vector<2x48xf32>
    %498 = math.tanh %496 : vector<2x48xf32>
    %499 = arith.mulf %497, %498 : vector<2x48xf32>
    %500 = vector.extract_strided_slice %499 {offsets = [0, 0], sizes = [2, 24], strides = [1, 1]} : vector<2x48xf32> to vector<2x24xf32>
    %501 = vector.extract_strided_slice %499 {offsets = [0, 24], sizes = [2, 24], strides = [1, 1]} : vector<2x48xf32> to vector<2x24xf32>
    %502 = vector.extract_strided_slice %342 {offsets = [12, 0], sizes = [2, 192], strides = [1, 1]} : vector<16x192xf32> to vector<2x192xf32>
    %503 = vector.extract_strided_slice %342 {offsets = [2, 0], sizes = [2, 192], strides = [1, 1]} : vector<16x192xf32> to vector<2x192xf32>
    %504 = arith.select %361, %502, %503 : vector<2x192xi1>, vector<2x192xf32>
    %cst_93 = arith.constant dense<0.000000e+00> : vector<2x192xf32>
    %505 = tpu.matmul %499, %338, %cst_93 {dimension_numbers = #tpu.dot_dimension_numbers<[1], [0], [0], [1], [0, 0, 1, 1], [], []>} : vector<2x48xf32>, vector<48x192xf32>, vector<2x192xf32> -> vector<2x192xf32>
    %506 = arith.addf %504, %505 : vector<2x192xf32>
    %507 = vector.extract_strided_slice %506 {offsets = [0, 0], sizes = [2, 144], strides = [1, 1]} : vector<2x192xf32> to vector<2x144xf32>
    %508 = arith.negf %507 : vector<2x144xf32>
    %509 = math.exp %508 : vector<2x144xf32>
    %cst_94 = arith.constant 1.000000e+00 : f32
    %510 = vector.broadcast %cst_94 : f32 to vector<2x144xf32>
    %511 = arith.addf %510, %509 : vector<2x144xf32>
    %512 = arith.divf %510, %511 : vector<2x144xf32>
    %513 = vector.extract_strided_slice %506 {offsets = [0, 144], sizes = [2, 48], strides = [1, 1]} : vector<2x192xf32> to vector<2x48xf32>
    %514 = math.tanh %513 : vector<2x48xf32>
    %515 = vector.extract_strided_slice %512 {offsets = [0, 48], sizes = [2, 48], strides = [1, 1]} : vector<2x144xf32> to vector<2x48xf32>
    %516 = arith.mulf %515, %496 : vector<2x48xf32>
    %517 = vector.extract_strided_slice %512 {offsets = [0, 0], sizes = [2, 48], strides = [1, 1]} : vector<2x144xf32> to vector<2x48xf32>
    %518 = arith.mulf %517, %514 : vector<2x48xf32>
    %519 = arith.addf %516, %518 : vector<2x48xf32>
    %520 = vector.extract_strided_slice %512 {offsets = [0, 96], sizes = [2, 48], strides = [1, 1]} : vector<2x144xf32> to vector<2x48xf32>
    %521 = math.tanh %519 : vector<2x48xf32>
    %522 = arith.mulf %520, %521 : vector<2x48xf32>
    %523 = vector.extract_strided_slice %522 {offsets = [0, 0], sizes = [2, 24], strides = [1, 1]} : vector<2x48xf32> to vector<2x24xf32>
    %524 = vector.extract_strided_slice %522 {offsets = [0, 24], sizes = [2, 24], strides = [1, 1]} : vector<2x48xf32> to vector<2x24xf32>
    %525 = vector.extract_strided_slice %342 {offsets = [14, 0], sizes = [2, 192], strides = [1, 1]} : vector<16x192xf32> to vector<2x192xf32>
    %526 = vector.extract_strided_slice %342 {offsets = [0, 0], sizes = [2, 192], strides = [1, 1]} : vector<16x192xf32> to vector<2x192xf32>
    %527 = arith.select %361, %525, %526 : vector<2x192xi1>, vector<2x192xf32>
    %cst_95 = arith.constant dense<0.000000e+00> : vector<2x192xf32>
    %528 = tpu.matmul %522, %338, %cst_95 {dimension_numbers = #tpu.dot_dimension_numbers<[1], [0], [0], [1], [0, 0, 1, 1], [], []>} : vector<2x48xf32>, vector<48x192xf32>, vector<2x192xf32> -> vector<2x192xf32>
    %529 = arith.addf %527, %528 : vector<2x192xf32>
    %530 = vector.extract_strided_slice %529 {offsets = [0, 0], sizes = [2, 144], strides = [1, 1]} : vector<2x192xf32> to vector<2x144xf32>
    %531 = arith.negf %530 : vector<2x144xf32>
    %532 = math.exp %531 : vector<2x144xf32>
    %cst_96 = arith.constant 1.000000e+00 : f32
    %533 = vector.broadcast %cst_96 : f32 to vector<2x144xf32>
    %534 = arith.addf %533, %532 : vector<2x144xf32>
    %535 = arith.divf %533, %534 : vector<2x144xf32>
    %536 = vector.extract_strided_slice %529 {offsets = [0, 144], sizes = [2, 48], strides = [1, 1]} : vector<2x192xf32> to vector<2x48xf32>
    %537 = math.tanh %536 : vector<2x48xf32>
    %538 = vector.extract_strided_slice %535 {offsets = [0, 48], sizes = [2, 48], strides = [1, 1]} : vector<2x144xf32> to vector<2x48xf32>
    %539 = arith.mulf %538, %519 : vector<2x48xf32>
    %540 = vector.extract_strided_slice %535 {offsets = [0, 0], sizes = [2, 48], strides = [1, 1]} : vector<2x144xf32> to vector<2x48xf32>
    %541 = arith.mulf %540, %537 : vector<2x48xf32>
    %542 = arith.addf %539, %541 : vector<2x48xf32>
    %543 = vector.extract_strided_slice %535 {offsets = [0, 96], sizes = [2, 48], strides = [1, 1]} : vector<2x144xf32> to vector<2x48xf32>
    %544 = math.tanh %542 : vector<2x48xf32>
    %545 = arith.mulf %543, %544 : vector<2x48xf32>
    %546 = vector.extract_strided_slice %545 {offsets = [0, 0], sizes = [2, 24], strides = [1, 1]} : vector<2x48xf32> to vector<2x24xf32>
    %547 = vector.extract_strided_slice %545 {offsets = [0, 24], sizes = [2, 24], strides = [1, 1]} : vector<2x48xf32> to vector<2x24xf32>
    %548 = tpu.concatenate %385, %547 in 1 : vector<2x24xf32>, vector<2x24xf32> -> vector<2x48xf32>
    %549 = tpu.concatenate %408, %524 in 1 : vector<2x24xf32>, vector<2x24xf32> -> vector<2x48xf32>
    %550 = tpu.concatenate %431, %501 in 1 : vector<2x24xf32>, vector<2x24xf32> -> vector<2x48xf32>
    %551 = tpu.concatenate %454, %478 in 1 : vector<2x24xf32>, vector<2x24xf32> -> vector<2x48xf32>
    %552 = tpu.concatenate %477, %455 in 1 : vector<2x24xf32>, vector<2x24xf32> -> vector<2x48xf32>
    %553 = tpu.concatenate %500, %432 in 1 : vector<2x24xf32>, vector<2x24xf32> -> vector<2x48xf32>
    %554 = tpu.concatenate %523, %409 in 1 : vector<2x24xf32>, vector<2x24xf32> -> vector<2x48xf32>
    %555 = tpu.concatenate %546, %386 in 1 : vector<2x24xf32>, vector<2x24xf32> -> vector<2x48xf32>
    %556 = tpu.concatenate %548, %549, %550, %551, %552, %553, %554, %555 in 0 : vector<2x48xf32>, vector<2x48xf32>, vector<2x48xf32>, vector<2x48xf32>, vector<2x48xf32>, vector<2x48xf32>, vector<2x48xf32>, vector<2x48xf32> -> vector<16x48xf32>
    %cst_97 = arith.constant dense<0.000000e+00> : vector<16x48xf32>
    %557 = tpu.matmul %2, %556, %cst_97 {dimension_numbers = #tpu.dot_dimension_numbers<[1], [0], [0], [1], [0, 0, 1, 1], [], []>} : vector<16x16xf32>, vector<16x48xf32>, vector<16x48xf32> -> vector<16x48xf32>
    %c176 = arith.constant 176 : index
    %c0_98 = arith.constant 0 : index
    %558 = vector.load %arg3[%c176, %c0_98] : memref<352x512xf32, #tpu.memory_space<vmem>>, vector<48x32xf32>
    %cst_99 = arith.constant dense<0.000000e+00> : vector<16x32xf32>
    %559 = tpu.matmul %557, %558, %cst_99 {dimension_numbers = #tpu.dot_dimension_numbers<[1], [0], [0], [1], [0, 0, 1, 1], [], []>} : vector<16x48xf32>, vector<48x32xf32>, vector<16x32xf32> -> vector<16x32xf32>
    %c224 = arith.constant 224 : index
    %c0_100 = arith.constant 0 : index
    %560 = vector.load %arg3[%c224, %c0_100] : memref<352x512xf32, #tpu.memory_space<vmem>>, vector<1x32xf32>
    %561 = vector.broadcast %560 : vector<1x32xf32> to vector<16x32xf32>
    %562 = arith.addf %559, %561 : vector<16x32xf32>
    %cst_101 = arith.constant 0.000000e+00 : f32
    %563 = vector.broadcast %cst_101 : f32 to vector<16x32xf32>
    %564 = arith.cmpf ogt, %562, %563 : vector<16x32xf32>
    %cst_102 = arith.constant 0.000000e+00 : f32
    %565 = vector.broadcast %cst_102 : f32 to vector<16x32xf32>
    %566 = arith.minimumf %562, %565 : vector<16x32xf32>
    %567 = math.exp %566 : vector<16x32xf32>
    %cst_103 = arith.constant 1.000000e+00 : f32
    %568 = vector.broadcast %cst_103 : f32 to vector<16x32xf32>
    %569 = arith.subf %567, %568 : vector<16x32xf32>
    %570 = arith.select %564, %562, %569 : vector<16x32xi1>, vector<16x32xf32>
    %cst_104 = arith.constant dense<0.000000e+00> : vector<16x32xf32>
    %571 = tpu.matmul %2, %570, %cst_104 {dimension_numbers = #tpu.dot_dimension_numbers<[1], [0], [0], [1], [0, 0, 1, 1], [], []>} : vector<16x16xf32>, vector<16x32xf32>, vector<16x32xf32> -> vector<16x32xf32>
    %c232 = arith.constant 232 : index
    %c0_105 = arith.constant 0 : index
    %572 = vector.load %arg3[%c232, %c0_105] : memref<352x512xf32, #tpu.memory_space<vmem>>, vector<32x16xf32>
    %cst_106 = arith.constant dense<0.000000e+00> : vector<16x16xf32>
    %573 = tpu.matmul %571, %572, %cst_106 {dimension_numbers = #tpu.dot_dimension_numbers<[1], [0], [0], [1], [0, 0, 1, 1], [], []>} : vector<16x32xf32>, vector<32x16xf32>, vector<16x16xf32> -> vector<16x16xf32>
    %c264 = arith.constant 264 : index
    %c0_107 = arith.constant 0 : index
    %574 = vector.load %arg3[%c264, %c0_107] : memref<352x512xf32, #tpu.memory_space<vmem>>, vector<1x16xf32>
    %575 = vector.broadcast %574 : vector<1x16xf32> to vector<16x16xf32>
    %576 = arith.addf %573, %575 : vector<16x16xf32>
    %577 = tpu.concatenate %556, %576 in 1 : vector<16x48xf32>, vector<16x16xf32> -> vector<16x64xf32>
    %cst_108 = arith.constant 0.000000e+00 : f32
    %578 = vector.broadcast %cst_108 : f32 to vector<8x64xf32>
    %579 = tpu.concatenate %578, %577, %578 in 0 : vector<8x64xf32>, vector<16x64xf32>, vector<8x64xf32> -> vector<32x64xf32>
    %580 = vector.extract_strided_slice %579 {offsets = [0, 0], sizes = [16, 64], strides = [1, 1]} : vector<32x64xf32> to vector<16x64xf32>
    %581 = vector.extract_strided_slice %579 {offsets = [2, 0], sizes = [16, 64], strides = [1, 1]} : vector<32x64xf32> to vector<16x64xf32>
    %582 = vector.extract_strided_slice %579 {offsets = [4, 0], sizes = [16, 64], strides = [1, 1]} : vector<32x64xf32> to vector<16x64xf32>
    %583 = vector.extract_strided_slice %579 {offsets = [6, 0], sizes = [16, 64], strides = [1, 1]} : vector<32x64xf32> to vector<16x64xf32>
    %584 = vector.extract_strided_slice %579 {offsets = [8, 0], sizes = [16, 64], strides = [1, 1]} : vector<32x64xf32> to vector<16x64xf32>
    %585 = vector.extract_strided_slice %579 {offsets = [10, 0], sizes = [16, 64], strides = [1, 1]} : vector<32x64xf32> to vector<16x64xf32>
    %586 = vector.extract_strided_slice %579 {offsets = [12, 0], sizes = [16, 64], strides = [1, 1]} : vector<32x64xf32> to vector<16x64xf32>
    %587 = vector.extract_strided_slice %579 {offsets = [14, 0], sizes = [16, 64], strides = [1, 1]} : vector<32x64xf32> to vector<16x64xf32>
    %588 = vector.extract_strided_slice %579 {offsets = [16, 0], sizes = [16, 64], strides = [1, 1]} : vector<32x64xf32> to vector<16x64xf32>
    %589 = tpu.concatenate %580, %581, %582, %583, %584, %585, %586, %587, %588 in 1 : vector<16x64xf32>, vector<16x64xf32>, vector<16x64xf32>, vector<16x64xf32>, vector<16x64xf32>, vector<16x64xf32>, vector<16x64xf32>, vector<16x64xf32>, vector<16x64xf32> -> vector<16x576xf32>
    %c2048 = arith.constant 2048 : index
    %c0_109 = arith.constant 0 : index
    %590 = vector.load %arg5[%c2048, %c0_109] : memref<2768x48xbf16, #tpu.memory_space<vmem>>, vector<576x48xbf16>
    %591 = arith.truncf %589 : vector<16x576xf32> to vector<16x576xbf16>
    %cst_110 = arith.constant dense<0.000000e+00> : vector<16x48xf32>
    %592 = tpu.matmul %591, %590, %cst_110 {dimension_numbers = #tpu.dot_dimension_numbers<[1], [0], [0], [1], [0, 0, 1, 1], [], []>} : vector<16x576xbf16>, vector<576x48xbf16>, vector<16x48xf32> -> vector<16x48xf32>
    %c272 = arith.constant 272 : index
    %c0_111 = arith.constant 0 : index
    %593 = vector.load %arg3[%c272, %c0_111] : memref<352x512xf32, #tpu.memory_space<vmem>>, vector<1x48xf32>
    %594 = vector.broadcast %593 : vector<1x48xf32> to vector<16x48xf32>
    %595 = arith.addf %592, %594 : vector<16x48xf32>
    %cst_112 = arith.constant 0.000000e+00 : f32
    %596 = vector.broadcast %cst_112 : f32 to vector<16x48xf32>
    %597 = arith.cmpf ogt, %595, %596 : vector<16x48xf32>
    %cst_113 = arith.constant 0.000000e+00 : f32
    %598 = vector.broadcast %cst_113 : f32 to vector<16x48xf32>
    %599 = arith.minimumf %595, %598 : vector<16x48xf32>
    %600 = math.exp %599 : vector<16x48xf32>
    %cst_114 = arith.constant 1.000000e+00 : f32
    %601 = vector.broadcast %cst_114 : f32 to vector<16x48xf32>
    %602 = arith.subf %600, %601 : vector<16x48xf32>
    %603 = arith.select %597, %595, %602 : vector<16x48xi1>, vector<16x48xf32>
    %cst_115 = arith.constant 0.000000e+00 : f32
    %604 = vector.broadcast %cst_115 : f32 to vector<2x48xf32>
    %605 = tpu.concatenate %604, %603, %604 in 0 : vector<2x48xf32>, vector<16x48xf32>, vector<2x48xf32> -> vector<20x48xf32>
    %606 = vector.extract_strided_slice %605 {offsets = [0, 0], sizes = [16, 48], strides = [1, 1]} : vector<20x48xf32> to vector<16x48xf32>
    %607 = vector.extract_strided_slice %605 {offsets = [2, 0], sizes = [16, 48], strides = [1, 1]} : vector<20x48xf32> to vector<16x48xf32>
    %608 = vector.extract_strided_slice %605 {offsets = [4, 0], sizes = [16, 48], strides = [1, 1]} : vector<20x48xf32> to vector<16x48xf32>
    %609 = tpu.concatenate %606, %607, %608 in 1 : vector<16x48xf32>, vector<16x48xf32>, vector<16x48xf32> -> vector<16x144xf32>
    %c2624 = arith.constant 2624 : index
    %c0_116 = arith.constant 0 : index
    %610 = vector.load %arg5[%c2624, %c0_116] : memref<2768x48xbf16, #tpu.memory_space<vmem>>, vector<144x48xbf16>
    %611 = arith.truncf %609 : vector<16x144xf32> to vector<16x144xbf16>
    %cst_117 = arith.constant dense<0.000000e+00> : vector<16x48xf32>
    %612 = tpu.matmul %611, %610, %cst_117 {dimension_numbers = #tpu.dot_dimension_numbers<[1], [0], [0], [1], [0, 0, 1, 1], [], []>} : vector<16x144xbf16>, vector<144x48xbf16>, vector<16x48xf32> -> vector<16x48xf32>
    %c280 = arith.constant 280 : index
    %c0_118 = arith.constant 0 : index
    %613 = vector.load %arg3[%c280, %c0_118] : memref<352x512xf32, #tpu.memory_space<vmem>>, vector<1x48xf32>
    %614 = vector.broadcast %613 : vector<1x48xf32> to vector<16x48xf32>
    %615 = arith.addf %612, %614 : vector<16x48xf32>
    %cst_119 = arith.constant 0.000000e+00 : f32
    %616 = vector.broadcast %cst_119 : f32 to vector<16x48xf32>
    %617 = arith.cmpf ogt, %615, %616 : vector<16x48xf32>
    %cst_120 = arith.constant 0.000000e+00 : f32
    %618 = vector.broadcast %cst_120 : f32 to vector<16x48xf32>
    %619 = arith.minimumf %615, %618 : vector<16x48xf32>
    %620 = math.exp %619 : vector<16x48xf32>
    %cst_121 = arith.constant 1.000000e+00 : f32
    %621 = vector.broadcast %cst_121 : f32 to vector<16x48xf32>
    %622 = arith.subf %620, %621 : vector<16x48xf32>
    %623 = arith.select %617, %615, %622 : vector<16x48xi1>, vector<16x48xf32>
    %624 = vector.extract_strided_slice %623 {offsets = [0, 0], sizes = [2, 48], strides = [1, 1]} : vector<16x48xf32> to vector<2x48xf32>
    %625 = vector.extract_strided_slice %623 {offsets = [2, 0], sizes = [2, 48], strides = [1, 1]} : vector<16x48xf32> to vector<2x48xf32>
    %626 = vector.extract_strided_slice %623 {offsets = [4, 0], sizes = [2, 48], strides = [1, 1]} : vector<16x48xf32> to vector<2x48xf32>
    %627 = vector.extract_strided_slice %623 {offsets = [6, 0], sizes = [2, 48], strides = [1, 1]} : vector<16x48xf32> to vector<2x48xf32>
    %628 = vector.extract_strided_slice %623 {offsets = [8, 0], sizes = [2, 48], strides = [1, 1]} : vector<16x48xf32> to vector<2x48xf32>
    %629 = vector.extract_strided_slice %623 {offsets = [10, 0], sizes = [2, 48], strides = [1, 1]} : vector<16x48xf32> to vector<2x48xf32>
    %630 = vector.extract_strided_slice %623 {offsets = [12, 0], sizes = [2, 48], strides = [1, 1]} : vector<16x48xf32> to vector<2x48xf32>
    %631 = vector.extract_strided_slice %623 {offsets = [14, 0], sizes = [2, 48], strides = [1, 1]} : vector<16x48xf32> to vector<2x48xf32>
    %632 = tpu.concatenate %624, %625, %626, %627, %628, %629, %630, %631 in 1 : vector<2x48xf32>, vector<2x48xf32>, vector<2x48xf32>, vector<2x48xf32>, vector<2x48xf32>, vector<2x48xf32>, vector<2x48xf32>, vector<2x48xf32> -> vector<2x384xf32>
    %c0_122 = arith.constant 0 : index
    %c0_123 = arith.constant 0 : index
    %633 = vector.load %arg6[%c0_122, %c0_123] : memref<2368x512xbf16, #tpu.memory_space<vmem>>, vector<384x256xbf16>
    %634 = arith.truncf %632 : vector<2x384xf32> to vector<2x384xbf16>
    %cst_124 = arith.constant dense<0.000000e+00> : vector<2x256xf32>
    %635 = tpu.matmul %634, %633, %cst_124 {dimension_numbers = #tpu.dot_dimension_numbers<[1], [0], [0], [1], [0, 0, 1, 1], [], []>} : vector<2x384xbf16>, vector<384x256xbf16>, vector<2x256xf32> -> vector<2x256xf32>
    %c288 = arith.constant 288 : index
    %c0_125 = arith.constant 0 : index
    %636 = vector.load %arg3[%c288, %c0_125] : memref<352x512xf32, #tpu.memory_space<vmem>>, vector<1x256xf32>
    %637 = vector.broadcast %636 : vector<1x256xf32> to vector<2x256xf32>
    %638 = arith.addf %635, %637 : vector<2x256xf32>
    %cst_126 = arith.constant 0.000000e+00 : f32
    %639 = vector.broadcast %cst_126 : f32 to vector<2x256xf32>
    %640 = arith.maximumf %638, %639 : vector<2x256xf32>
    %c384 = arith.constant 384 : index
    %c0_127 = arith.constant 0 : index
    %641 = vector.load %arg6[%c384, %c0_127] : memref<2368x512xbf16, #tpu.memory_space<vmem>>, vector<256x256xbf16>
    %642 = arith.truncf %640 : vector<2x256xf32> to vector<2x256xbf16>
    %cst_128 = arith.constant dense<0.000000e+00> : vector<2x256xf32>
    %643 = tpu.matmul %642, %641, %cst_128 {dimension_numbers = #tpu.dot_dimension_numbers<[1], [0], [0], [1], [0, 0, 1, 1], [], []>} : vector<2x256xbf16>, vector<256x256xbf16>, vector<2x256xf32> -> vector<2x256xf32>
    %c296 = arith.constant 296 : index
    %c0_129 = arith.constant 0 : index
    %644 = vector.load %arg3[%c296, %c0_129] : memref<352x512xf32, #tpu.memory_space<vmem>>, vector<1x256xf32>
    %645 = vector.broadcast %644 : vector<1x256xf32> to vector<2x256xf32>
    %646 = arith.addf %643, %645 : vector<2x256xf32>
    %cst_130 = arith.constant 0.000000e+00 : f32
    %647 = vector.broadcast %cst_130 : f32 to vector<2x256xf32>
    %648 = arith.maximumf %646, %647 : vector<2x256xf32>
    %c640 = arith.constant 640 : index
    %c0_131 = arith.constant 0 : index
    %649 = vector.load %arg6[%c640, %c0_131] : memref<2368x512xbf16, #tpu.memory_space<vmem>>, vector<256x512xbf16>
    %650 = arith.truncf %648 : vector<2x256xf32> to vector<2x256xbf16>
    %cst_132 = arith.constant dense<0.000000e+00> : vector<2x512xf32>
    %651 = tpu.matmul %650, %649, %cst_132 {dimension_numbers = #tpu.dot_dimension_numbers<[1], [0], [0], [1], [0, 0, 1, 1], [], []>} : vector<2x256xbf16>, vector<256x512xbf16>, vector<2x512xf32> -> vector<2x512xf32>
    %c304 = arith.constant 304 : index
    %c0_133 = arith.constant 0 : index
    %652 = vector.load %arg3[%c304, %c0_133] : memref<352x512xf32, #tpu.memory_space<vmem>>, vector<1x512xf32>
    %653 = vector.broadcast %652 : vector<1x512xf32> to vector<2x512xf32>
    %654 = arith.addf %651, %653 : vector<2x512xf32>
    %cst_134 = arith.constant 0.000000e+00 : f32
    %655 = vector.broadcast %cst_134 : f32 to vector<2x512xf32>
    %656 = arith.maximumf %654, %655 : vector<2x512xf32>
    %c896 = arith.constant 896 : index
    %c0_135 = arith.constant 0 : index
    %657 = vector.load %arg6[%c896, %c0_135] : memref<2368x512xbf16, #tpu.memory_space<vmem>>, vector<512x512xbf16>
    %658 = arith.truncf %656 : vector<2x512xf32> to vector<2x512xbf16>
    %cst_136 = arith.constant dense<0.000000e+00> : vector<2x512xf32>
    %659 = tpu.matmul %658, %657, %cst_136 {dimension_numbers = #tpu.dot_dimension_numbers<[1], [0], [0], [1], [0, 0, 1, 1], [], []>} : vector<2x512xbf16>, vector<512x512xbf16>, vector<2x512xf32> -> vector<2x512xf32>
    %c312 = arith.constant 312 : index
    %c0_137 = arith.constant 0 : index
    %660 = vector.load %arg3[%c312, %c0_137] : memref<352x512xf32, #tpu.memory_space<vmem>>, vector<1x512xf32>
    %661 = vector.broadcast %660 : vector<1x512xf32> to vector<2x512xf32>
    %662 = arith.addf %659, %661 : vector<2x512xf32>
    %cst_138 = arith.constant 0.000000e+00 : f32
    %663 = vector.broadcast %cst_138 : f32 to vector<2x512xf32>
    %664 = arith.maximumf %662, %663 : vector<2x512xf32>
    %c1408 = arith.constant 1408 : index
    %c0_139 = arith.constant 0 : index
    %665 = vector.load %arg6[%c1408, %c0_139] : memref<2368x512xbf16, #tpu.memory_space<vmem>>, vector<512x256xbf16>
    %666 = arith.truncf %664 : vector<2x512xf32> to vector<2x512xbf16>
    %cst_140 = arith.constant dense<0.000000e+00> : vector<2x256xf32>
    %667 = tpu.matmul %666, %665, %cst_140 {dimension_numbers = #tpu.dot_dimension_numbers<[1], [0], [0], [1], [0, 0, 1, 1], [], []>} : vector<2x512xbf16>, vector<512x256xbf16>, vector<2x256xf32> -> vector<2x256xf32>
    %c320 = arith.constant 320 : index
    %c0_141 = arith.constant 0 : index
    %668 = vector.load %arg3[%c320, %c0_141] : memref<352x512xf32, #tpu.memory_space<vmem>>, vector<1x256xf32>
    %669 = vector.broadcast %668 : vector<1x256xf32> to vector<2x256xf32>
    %670 = arith.addf %667, %669 : vector<2x256xf32>
    %cst_142 = arith.constant 0.000000e+00 : f32
    %671 = vector.broadcast %cst_142 : f32 to vector<2x256xf32>
    %672 = arith.maximumf %670, %671 : vector<2x256xf32>
    %c1920 = arith.constant 1920 : index
    %c0_143 = arith.constant 0 : index
    %673 = vector.load %arg6[%c1920, %c0_143] : memref<2368x512xbf16, #tpu.memory_space<vmem>>, vector<256x128xbf16>
    %674 = arith.truncf %672 : vector<2x256xf32> to vector<2x256xbf16>
    %cst_144 = arith.constant dense<0.000000e+00> : vector<2x128xf32>
    %675 = tpu.matmul %674, %673, %cst_144 {dimension_numbers = #tpu.dot_dimension_numbers<[1], [0], [0], [1], [0, 0, 1, 1], [], []>} : vector<2x256xbf16>, vector<256x128xbf16>, vector<2x128xf32> -> vector<2x128xf32>
    %c328 = arith.constant 328 : index
    %c0_145 = arith.constant 0 : index
    %676 = vector.load %arg3[%c328, %c0_145] : memref<352x512xf32, #tpu.memory_space<vmem>>, vector<1x128xf32>
    %677 = vector.broadcast %676 : vector<1x128xf32> to vector<2x128xf32>
    %678 = arith.addf %675, %677 : vector<2x128xf32>
    %cst_146 = arith.constant 0.000000e+00 : f32
    %679 = vector.broadcast %cst_146 : f32 to vector<2x128xf32>
    %680 = arith.maximumf %678, %679 : vector<2x128xf32>
    %c2176 = arith.constant 2176 : index
    %c0_147 = arith.constant 0 : index
    %681 = vector.load %arg6[%c2176, %c0_147] : memref<2368x512xbf16, #tpu.memory_space<vmem>>, vector<128x64xbf16>
    %682 = arith.truncf %680 : vector<2x128xf32> to vector<2x128xbf16>
    %cst_148 = arith.constant dense<0.000000e+00> : vector<2x64xf32>
    %683 = tpu.matmul %682, %681, %cst_148 {dimension_numbers = #tpu.dot_dimension_numbers<[1], [0], [0], [1], [0, 0, 1, 1], [], []>} : vector<2x128xbf16>, vector<128x64xbf16>, vector<2x64xf32> -> vector<2x64xf32>
    %c336 = arith.constant 336 : index
    %c0_149 = arith.constant 0 : index
    %684 = vector.load %arg3[%c336, %c0_149] : memref<352x512xf32, #tpu.memory_space<vmem>>, vector<1x64xf32>
    %685 = vector.broadcast %684 : vector<1x64xf32> to vector<2x64xf32>
    %686 = arith.addf %683, %685 : vector<2x64xf32>
    %cst_150 = arith.constant 0.000000e+00 : f32
    %687 = vector.broadcast %cst_150 : f32 to vector<2x64xf32>
    %688 = arith.maximumf %686, %687 : vector<2x64xf32>
    %c2304 = arith.constant 2304 : index
    %c0_151 = arith.constant 0 : index
    %689 = vector.load %arg6[%c2304, %c0_151] : memref<2368x512xbf16, #tpu.memory_space<vmem>>, vector<64x16xbf16>
    %690 = arith.truncf %688 : vector<2x64xf32> to vector<2x64xbf16>
    %cst_152 = arith.constant dense<0.000000e+00> : vector<2x16xf32>
    %691 = tpu.matmul %690, %689, %cst_152 {dimension_numbers = #tpu.dot_dimension_numbers<[1], [0], [0], [1], [0, 0, 1, 1], [], []>} : vector<2x64xbf16>, vector<64x16xbf16>, vector<2x16xf32> -> vector<2x16xf32>
    %c344 = arith.constant 344 : index
    %c0_153 = arith.constant 0 : index
    %692 = vector.load %arg3[%c344, %c0_153] : memref<352x512xf32, #tpu.memory_space<vmem>>, vector<1x16xf32>
    %693 = vector.broadcast %692 : vector<1x16xf32> to vector<2x16xf32>
    %694 = arith.addf %691, %693 : vector<2x16xf32>
    %cst_154 = arith.constant 0.000000e+00 : f32
    %695 = vector.broadcast %cst_154 : f32 to vector<2x16xf32>
    %696 = arith.maximumf %694, %695 : vector<2x16xf32>
    %697 = vector.extract_strided_slice %696 {offsets = [0, 0], sizes = [2, 8], strides = [1, 1]} : vector<2x16xf32> to vector<2x8xf32>
    %698 = vector.extract_strided_slice %696 {offsets = [0, 8], sizes = [2, 8], strides = [1, 1]} : vector<2x16xf32> to vector<2x8xf32>
    %699 = arith.maximumf %697, %698 : vector<2x8xf32>
    %700 = arith.subf %697, %699 : vector<2x8xf32>
    %701 = math.exp %700 : vector<2x8xf32>
    %702 = arith.subf %698, %699 : vector<2x8xf32>
    %703 = math.exp %702 : vector<2x8xf32>
    %704 = arith.addf %701, %703 : vector<2x8xf32>
    %cst_155 = arith.constant 1.000000e+00 : f32
    %705 = vector.broadcast %cst_155 : f32 to vector<2x8xf32>
    %706 = arith.divf %705, %704 : vector<2x8xf32>
    %707 = arith.mulf %701, %706 : vector<2x8xf32>
    %708 = arith.mulf %703, %706 : vector<2x8xf32>
    %709 = tpu.concatenate %707, %708 in 1 : vector<2x8xf32>, vector<2x8xf32> -> vector<2x16xf32>
    %c0_156 = arith.constant 0 : index
    %c0_157 = arith.constant 0 : index
    %710 = vector.load %arg7[%c0_156, %c0_157] : memref<2x16xf32, #tpu.memory_space<vmem>>, vector<2x16xf32>
    tpu.vector_store %arg7[%c0_156, %c0_157], %709 {strides = array<i32>} : memref<2x16xf32, #tpu.memory_space<vmem>>, vector<2x16xf32>,
    return
  }
}

</mosaic_0001>

<bundles_post_ra>
// kernel: modelf_forward.1
= control target key start
LH: loop header
LB: loop body
LE: loop exit
PB: predicated region body
PF: predicated region fallthrough
CT: control target
= control target key end

     0   :  { %12 = vsyncpa [#allocation3], 0  ;;  %s12830_s0 = inlined_call_operand.vmem [shape: f32[16,4], index: 0, kind: input, shape index: {}]   ;;  %s12831_s1 = inlined_call_operand.vmem [shape: f32[16,16], index: 1, kind: input, shape index: {}]   ;;  %s12832_s2 = inlined_call_operand.vmem [shape: f32[16,16], index: 2, kind: input, shape index: {}]   ;;  %s12833_s3 = inlined_call_operand.hbm [shape: f32[352,512], index: 3, kind: input, shape index: {}]   ;;  %s12834_s4 = inlined_call_operand.hbm [shape: bf16[16,2048], index: 4, kind: input, shape index: {}]   ;;  %s12835_s5 = inlined_call_operand.vmem [shape: bf16[2768,48], index: 5, kind: input, shape index: {}]   ;;  %s12836_s6 = inlined_call_operand.hbm [shape: bf16[2368,512], index: 6, kind: input, shape index: {}]   ;;  %s12837_s7 = inlined_call_operand.vmem [shape: f32[2,16], index: 7, kind: output, shape index: {}]  }
   0x1   :  { %13 = vsyncpa [#allocation5], 0  ;;  %s11430_s24 = smov [#allocation4]   ;;  %s11360_s28 = scalar_lea.hbm %s12834_s4, 2048 }
   0x2   :  { %s37_s25 = sshll.u32 %s11430_s24, 4  ;;  %p11361_p0 = scmp.ne.s32.totalorder %s12834_s4, %s11360_s28  ;;  %s38_s25 = int_to_ptr.vmem [resolvable:$true] %s37_s25 }
   0x3   :  { %p11364_p1 = scmp.lt.u32.totalorder %s11360_s28, %s12834_s4 }
   0x5   :  { %p11366_p2 = pnand %p11364_p1, %p11361_p0 }
   0x7   :  { %11369 = shalt.err (!%p11366_p2)
}
   0x8   :  { %s11370_s10 = scalar_lea.vmem %s38_s25, 2048  ;;  %p11375_p4 = scmp.lt.s32.totalorder %s38_s25, %s38_s25 }
   0x9   :  { %p11371_p3 = scmp.ne.s32.totalorder %s38_s25, %s11370_s10  ;;  %p11376_p5 = scmp.lt.s32.totalorder %s11370_s10, %s11370_s10 }
   0xb   :  { %p11377_p6 = por %p11376_p5, %p11375_p4 }
   0xd   :  { %p11378_p7 = pnand %p11377_p6, %p11371_p3 }
   0xf   :  { %11381 = shalt.err (!%p11378_p7)
}
  0x10   :  { %s11431_s11 = smov 1024   ;;  %s11432_s12 = smov 64  }
  0x11   :  { %43 = dma.hbm_to_vmem [thread:$0]  %s12834_s4, 2048, %s38_s25, [#allocation5], %s11431_s11, %s11431_s11, %s11432_s12  }
  0x12   :  { %s11433_s15 = smov [#allocation2]   ;;  %s11382_s19 = scalar_lea.hbm %s12833_s3, 22528 }
  0x13   :  { %s25_s16 = sshll.u32 %s11433_s15, 4  ;;  %p11383_p8 = scmp.ne.s32.totalorder %s12833_s3, %s11382_s19  ;;  %s26_s16 = int_to_ptr.vmem [resolvable:$true] %s25_s16 }
  0x14   :  { %p11386_p9 = scmp.lt.u32.totalorder %s11382_s19, %s12833_s3 }
  0x16   :  { %p11388_p10 = pnand %p11386_p9, %p11383_p8 }
  0x18   :  { %11391 = shalt.err (!%p11388_p10)
}
  0x19   :  { %s11392_s24 = scalar_lea.vmem %s26_s16, 22528  ;;  %p11397_p12 = scmp.lt.s32.totalorder %s26_s16, %s26_s16 }
  0x1a   :  { %p11393_p11 = scmp.ne.s32.totalorder %s26_s16, %s11392_s24  ;;  %p11398_p13 = scmp.lt.s32.totalorder %s11392_s24, %s11392_s24 }
  0x1c   :  { %p11399_p0 = por %p11398_p13, %p11397_p12 }
  0x1e   :  { %p11400_p1 = pnand %p11399_p0, %p11393_p11 }
  0x20   :  { %11403 = shalt.err (!%p11400_p1)
}
  0x21   :  { %s11434_s4 = smov 512   ;;  %s11435_s25 = smov 32  }
  0x22   :  { %31 = dma.hbm_to_vmem [thread:$0]  %s12833_s3, 22528, %s26_s16, [#allocation3], %s11434_s4, %s11434_s4, %s11435_s25  }
  0x23   :  { %s11436_s28 = smov [#allocation6]   ;;  %s11404_s9 = scalar_lea.hbm %s12836_s6, 75776 }
  0x24   :  { %s51_s29 = sshll.u32 %s11436_s28, 4  ;;  %p11405_p2 = scmp.ne.s32.totalorder %s12836_s6, %s11404_s9  ;;  %s52_s29 = int_to_ptr.vmem [resolvable:$true] %s51_s29 }
  0x25   :  { %p11408_p3 = scmp.lt.u32.totalorder %s11404_s9, %s12836_s6 }
  0x27   :  { %p11410_p4 = pnand %p11408_p3, %p11405_p2 }
  0x29   :  { %11413 = shalt.err (!%p11410_p4)
}
  0x2a   :  { %s11414_s15 = scalar_lea.vmem %s52_s29, 75776  ;;  %p11419_p6 = scmp.lt.s32.totalorder %s52_s29, %s52_s29 }
  0x2b   :  { %p11415_p5 = scmp.ne.s32.totalorder %s52_s29, %s11414_s15  ;;  %p11420_p7 = scmp.lt.s32.totalorder %s11414_s15, %s11414_s15 }
  0x2d   :  { %p11421_p8 = por %p11420_p7, %p11419_p6 }
  0x2f   :  { %p11422_p9 = pnand %p11421_p8, %p11415_p5 }
  0x31   :  { %11425 = shalt.err (!%p11422_p9)
}
  0x32   :  { %s11437_s3 = smov 256   ;;  %s11438_s16 = smov 16  }
  0x33   :  { %57 = dma.hbm_to_vmem [thread:$0]  %s12836_s6, 75776, %s52_s29, [#allocation5], %s11437_s3, %s11437_s3, %s11438_s16  }
  0x34   :  { %11426 = dma.done.wait [#allocation3], 22528  }
  0x35   :  { %11427 = vsyncadd [#allocation3], 4294944768 }
  0x36   :  { %11428 = dma.done.wait [#allocation5], 77824  }
  0x37   :  { %11429 = vsyncadd [#allocation5], 4294889472  ;;  %vm83_vm0 = vcmask 1043456   ;;  %vm76_vm1 = vcmask 31744   ;;  %v74_v0 = vld [vmem:[#allocation2] sm:$0xf] }
  0x38   :  { %v68_v1 = vld [vmem:[%s12830_s0] sm:$0xff]  ;;  %v69_v2 = vld [vmem:[%s12830_s0 + $0x8] sm:$0xff]  ;;  %9927 = vmatprep.subr.msk.mxu0 %vm83_vm0, %v74_v0  ;;  %vm168_vm2 = vcmask 15360   ;;  %s11439_s6 = smov 126   ;;  %s11440_s23 = smov 124   ;;  %vm256_vm4 = vcmask 130048  }
  0x39   :  { %9929 = vmatprep.mubr.msk.f32.mxu0 %vm76_vm1, %v68_v1  ;;  %9928 = vmatpush3.msk.msra.mxu0 %vm83_vm0, %v74_v0  ;;  %v75_v3 = vld [vmem:[#allocation2 + $0x20] ss:$0 sm:$0xff]  ;;  %s11441_s24 = smov 122   ;;  %vm10111_vm3 = vmpackc.low %vm168_vm2, %vm168_vm2  ;;  %v71_v26 = vld [vmem:[%s12831_s1 + $0x8] sm:$0xff]  ;;  %s11443_s29 = smov 120   ;;  %vm841_vm5 = vcmask 1041408  }
  0x3a   :  { %9930 = vmatmul.mubr.msk.f32.vlgmr.msra.gmra.mrb[0].mxu0 %vm76_vm1, %v69_v2  ;;  %v70_v28 = vld [vmem:[%s12831_s1] sm:$0xff]  ;;  %s11442_s1 = smov 118   ;;  %s11444_s30 = smov 2   ;;  %vm11447_vm6 = vmmov 0   ;;  %vm3634_vm8 = vcmask 64512   ;;  %vm3689_vm9 = vcmask 1045504  }
  0x3b   :  { %s11449_s27 = smov 80   ;;  %s11450_s28 = smov 96  }
 0x10d   :  { %v9931_v4 = vpop.f32.mrb[0].mxu0 }
 0x10e   :  { %v159_v5 = vadd.f32 %v9931_v4, %v75_v3  ;;  %v153_v6 = vpop.f32.mrb[1].mxu0 }
 0x10f   :  { %v154_v7 = vadd.f32 %v153_v6, %v75_v3 }
 0x111   :  { %366 = vrot.lane.b32.xlu1 %v154_v7, %s11439_s6  ;;  %9936 = vmatprep.mubr.msk.f32.mxu1 %vm168_vm2, %v154_v7  ;;  %v11545_v8 = vpack.i.bf16 %v159_v5, %v154_v7 }
 0x113   :  { %10336 = vrot.lane.b32.xlu0 %v11545_v8, %s11440_s23 }
 0x115   :  { %368 = vrot.lane.b32.xlu1 %v159_v5, %s11439_s6 }
 0x117   :  { %10341 = vrot.lane.b32.xlu0 %v11545_v8, %s11441_s24 }
 0x183   :  { %v367_v17 = vpop.permute.xlu1 %366 }
 0x185   :  { %v10337_v9 = vpop.permute.xlu0 %10336 }
 0x186   :  { %v10339_v10 = vunpack.i.h.bf16 %v10337_v9  ;;  %v10338_v11 = vunpack.i.l.bf16 %v10337_v9 }
 0x187   :  { %v369_v18 = vpop.permute.xlu1 %368 }
 0x188   :  { %v10110_v12 = vpack.c.bf16 %v10339_v10, %v10338_v11 }
 0x189   :  { %v10342_v13 = vpop.permute.xlu0 %10341 }
 0x18a   :  { %v10344_v14 = vunpack.i.h.bf16 %v10342_v13  ;;  %v10343_v15 = vunpack.i.l.bf16 %v10342_v13  ;;  %10112 = vmatprep.subr.msk.bf16.mxu1 %vm10111_vm3, %v10110_v12  ;;  %v580_v13 = vld [vmem:[#allocation2 + $0x40] sm:$0xf] }
 0x18b   :  { %10115 = vmatpush3.bf16.xpose.msk.msra.mxu1 %vm10111_vm3, %v10110_v12 }
 0x18c   :  { %v10120_v16 = vpack.c.bf16 %v10344_v14, %v10343_v15 }
 0x18e   :  { %10122 = vmatprep.subr.msk.bf16.mxu1 %vm10111_vm3, %v10120_v16 }
 0x192   :  { %9937 = vmatmul.mubr.msk.f32.vlgmr.msra.gmra.mrb[0].mxu1 %vm168_vm2, %v159_v5 }
 0x193   :  { %10125 = vmatpush3.bf16.xpose.msk.msra.mxu1 %vm10111_vm3, %v10120_v16  ;;  %9950 = vmatprep.mubr.msk.f32.mxu1 %vm168_vm2, %v367_v17  ;;  %vm3968_vm3 = vcmask 261120  }
 0x19a   :  { %9951 = vmatmul.mubr.msk.f32.vlgmr.msra.gmra.mrb[2].mxu1 %vm168_vm2, %v369_v18 }
 0x265   :  { %v9938_v19 = vpop.f32.mrb[0].mxu1 }
 0x266   :  { %v243_v20 = vpop.f32.mrb[1].mxu1  ;;  %v253_v31 = vmul.f32 0.70710677, %v9938_v19 }
 0x267   :  { %v252_v24 = vmul.f32 0.70710677, %v243_v20 }
 0x268   :  { %v255_v35 = vadd.f32 %v253_v31, %v71_v26 }
 0x269   :  { %v254_v33 = vadd.f32 %v252_v24, %v70_v28 }
 0x26a   :  { %v260_v36 = vsel %vm256_vm4, %v255_v35, -inf }
 0x26b   :  { %v257_v34 = vsel %vm256_vm4, %v254_v33, -inf }
 0x26d   :  { %v9952_v21 = vpop.f32.mrb[2].mxu1 }
 0x26e   :  { %v458_v22 = vmul.f32 0.70710677, %v9952_v21  ;;  %v448_v23 = vpop.f32.mrb[3].mxu1 }
 0x26f   :  { %v457_v25 = vmul.f32 0.70710677, %v448_v23 }
 0x270   :  { %v460_v27 = vadd.f32 %v458_v22, %v71_v26  ;;  %v581_v22 = vld [vmem:[#allocation2 + $0x60] ss:$0 sm:$0xff] }
 0x271   :  { %v459_v29 = vadd.f32 %v457_v25, %v70_v28 }
 0x272   :  { %v464_v30 = vsel %vm256_vm4, %v460_v27, -inf }
 0x273   :  { %465 = vmax.xlane.f32.xlu1 %v464_v30  ;;  %v461_v32 = vsel %vm256_vm4, %v459_v29, -inf }
 0x274   :  { %462 = vmax.xlane.f32.xlu0 %v461_v32 }
 0x278   :  { %258 = vmax.xlane.f32.xlu0 %v257_v34 }
 0x27c   :  { %261 = vmax.xlane.f32.xlu0 %v260_v36 }
 0x300   :  { %v466_v37 = vpop.xlane.xlu1 %465 }
 0x301   :  { %v468_v38 = vsub.f32 %v460_v27, %v466_v37  ;;  %v463_v39 = vpop.xlane.xlu0 %462  ;;  %v11358_v27 = vld [vmem:[%s12830_s0 + $0x8] sm:$0xff] }
 0x302   :  { %v467_v40 = vsub.f32 %v459_v29, %v463_v39  ;;  %v11359_v29 = vld [vmem:[%s12830_s0] sm:$0xff] }
 0x303   :  { %v471_v41 = vmul.f32 1.442695, %v468_v38 }
 0x304   :  { %v469_v42 = vmul.f32 1.442695, %v467_v40 }
 0x305   :  { %11156 = vpow2.f32 %v471_v41  ;;  %v259_v43 = vpop.xlane.xlu0 %258 }
 0x306   :  { %11158 = vpow2.f32 %v469_v42  ;;  %v263_v44 = vsub.f32 %v254_v33, %v259_v43  ;;  %v701_v43 = vld [vmem:[#allocation4] sm:$0x33] }
 0x308   :  { %v265_v45 = vmul.f32 1.442695, %v263_v44  ;;  %v702_v44 = vld [vmem:[#allocation4 + $0x8] sm:$0x33] }
 0x309   :  { %v262_v46 = vpop.xlane.xlu0 %261 }
 0x30a   :  { %11160 = vpow2.f32 %v265_v45  ;;  %v264_v47 = vsub.f32 %v255_v35, %v262_v46  ;;  %v8963_v45 = vcombine.high %v701_v43, %v701_v43  ;;  %v8965_v46 = vcombine.high %v702_v44, %v702_v44 }
 0x30c   :  { %v267_v48 = vmul.f32 1.442695, %v264_v47  ;;  %v8962_v47 = vcombine.low %v701_v43, %v701_v43  ;;  %v10465_v43 = vld [vmem:[%s12835_s5 + $0x18] sm:$0xff]  }
 0x30e   :  { %11162 = vpow2.f32 %v267_v48  ;;  %v8964_v48 = vcombine.low %v702_v44, %v702_v44  ;;  %v10466_v44 = vld [vmem:[%s12835_s5 + $0x98] sm:$0xff]  }
 0x30f   :  { %v11157_v49 = vpop.eup %11156 }
 0x310   :  { %v11159_v50 = vpop.eup %11158  ;;  %v476_v51 = vsel %vm256_vm4, %v11157_v49, 0.0 }
 0x311   :  { %477 = vadd.xlane.f32.xlu0 %v476_v51  ;;  %v473_v52 = vsel %vm256_vm4, %v11159_v50, 0.0  ;;  %v11445_v51 = vmov 0  }
 0x312   :  { %474 = vadd.xlane.f32.xlu1 %v473_v52  ;;  %v703_v52 = vld [vmem:[#allocation4 + $0x10] sm:$0x33] }
 0x314   :  { %v11161_v53 = vpop.eup %11160 }
 0x315   :  { %v269_v54 = vsel %vm256_vm4, %v11161_v53, 0.0 }
 0x316   :  { %270 = vadd.xlane.f32.xlu0 %v269_v54  ;;  %v8967_v54 = vcombine.high %v703_v52, %v703_v52 }
 0x318   :  { %v11163_v55 = vpop.eup %11162 }
 0x319   :  { %v272_v56 = vsel %vm256_vm4, %v11163_v55, 0.0 }
 0x31a   :  { %273 = vadd.xlane.f32.xlu0 %v272_v56 }
 0x323   :  { %10346 = vrot.lane.b32.xlu1 %v11545_v8, %s11442_s1  ;;  %s11451_s1 = smov 112  }
 0x330   :  { %10351 = vrot.lane.b32.xlu0 %v11545_v8, %s11443_s29 }
 0x39e   :  { %v478_v57 = vpop.xlane.xlu0 %477 }
 0x39f   :  { %11164 = vrcp.f32 %v478_v57  ;;  %v475_v58 = vpop.xlane.xlu1 %474 }
 0x3a0   :  { %11166 = vrcp.f32 %v475_v58 }
 0x3a3   :  { %v10347_v59 = vpop.permute.xlu1 %10346  ;;  %v271_v60 = vpop.xlane.xlu0 %270 }
 0x3a4   :  { %v10349_v61 = vunpack.i.h.bf16 %v10347_v59  ;;  %v10348_v62 = vunpack.i.l.bf16 %v10347_v59  ;;  %11168 = vrcp.f32 %v271_v60 }
 0x3a6   :  { %v10126_v63 = vpack.c.bf16 %v10349_v61, %v10348_v62 }
 0x3a7   :  { %v274_v0 = vpop.xlane.xlu0 %273 }
 0x3a8   :  { %11170 = vrcp.f32 %v274_v0  ;;  %10127 = vmatprep.subr.bf16.mxu1 %v10126_v63 }
 0x3a9   :  { %v11165_v1 = vpop.eup %11164  ;;  %10129 = vmatpush3.bf16.msra.mxu1 %v10126_v63  ;;  %v668_v63 = vld [vmem:[#allocation2 + $0x80] ss:$0 sm:$0xff] }
 0x3aa   :  { %v11167_v2 = vpop.eup %11166  ;;  %v482_v7 = vmul.f32 %v11165_v1, %v11157_v49  ;;  %9960 = vmatprep.subr.msk.mxu1 %vm83_vm0, %v580_v13  ;;  %v843_v49 = vsel %vm841_vm5, %v8962_v47, 0  ;;  %v10469_v47 = vld [vmem:[%s12835_s5 + $0x20] sm:$0xff]  }
 0x3ab   :  { %v10352_v3 = vpop.permute.xlu0 %10351  ;;  %v480_v4 = vmul.f32 %v11167_v2, %v11159_v50  ;;  %v849_v50 = vsel %vm841_vm5, %v8964_v48, 0  ;;  %v669_v2 = vld [vmem:[#allocation2 + $0xa0] ss:$0 sm:$0xff] }
 0x3ac   :  { %v10354_v5 = vunpack.i.h.bf16 %v10352_v3  ;;  %v10353_v6 = vunpack.i.l.bf16 %v10352_v3  ;;  %v10470_v48 = vld [vmem:[%s12835_s5 + $0xa0] sm:$0xff]  }
 0x3ad   :  { %9957 = vmatprep.mubr.msk.f32.mxu1 %vm256_vm4, %v480_v4 }
 0x3ae   :  { %v11169_v8 = vpop.eup %11168  ;;  %9958 = vmatmul.mubr.msk.f32.vlgmr.msra.gmra.mrb[4].mxu1 %vm256_vm4, %v482_v7  ;;  %v10116_v9 = vpack.c.bf16 %v10354_v5, %v10353_v6  ;;  %v8966_v6 = vcombine.low %v703_v52, %v703_v52  ;;  %v10473_v52 = vld [vmem:[%s12835_s5 + $0x28] sm:$0xff]  }
 0x3af   :  { %v276_v10 = vmul.f32 %v11169_v8, %v11161_v53  ;;  %9961 = vmatpush3.msk.msra.mxu1 %vm83_vm0, %v580_v13  ;;  %v704_v53 = vld [vmem:[#allocation4 + $0x18] sm:$0x33] }
 0x3b0   :  { %10117 = vmatprep.subr.bf16.mxu0 %v10116_v9  ;;  %8980 = vmatprep.subr.msk.bf16.mxu1 %vm841_vm5, %v8965_v46  ;;  %v8968_v7 = vcombine.low %v704_v53, %v704_v53  ;;  %v855_v13 = vsel %vm841_vm5, %v8966_v6, 0  ;;  %v10468_v46 = vld [vmem:[%s12835_s5 + $0xe0] sm:$0xff]  }
 0x3b1   :  { %10119 = vmatpush3.bf16.msra.mxu0 %v10116_v9  ;;  %9943 = vmatprep.mubr.msk.f32.mxu0 %vm256_vm4, %v276_v10  ;;  %v705_v10 = vld [vmem:[#allocation4 + $0x20] sm:$0x33] }
 0x3b2   :  { %v11171_v11 = vpop.eup %11170  ;;  %8978 = vmatprep.subr.msk.bf16.mxu0 %vm841_vm5, %v8963_v45  ;;  %v10467_v45 = vld [vmem:[%s12835_s5 + $0x60] sm:$0xff]  }
 0x3b3   :  { %v278_v12 = vmul.f32 %v11171_v11, %v11163_v55  ;;  %v8969_v55 = vcombine.high %v704_v53, %v704_v53  ;;  %v706_v11 = vld [vmem:[#allocation4 + $0x28] sm:$0x33] }
 0x3b4   :  { %v10474_v53 = vld [vmem:[%s12835_s5 + $0xa8] sm:$0xff]  }
 0x3b5   :  { %9944 = vmatmul.mubr.msk.f32.vlgmr.msra.gmra.mrb[2].mxu0 %vm256_vm4, %v278_v12 }
 0x3b6   :  { %891 = vmatpush1.bf16.msra.mxu0 %v843_v49  ;;  %922 = vmatprep.mubr.bf16.mxu0 %v11445_v51  ;;  %v10471_v49 = vld [vmem:[%s12835_s5 + $0x68] sm:$0xff]  }
 0x3b7   :  { %8982 = vmatprep.subr.msk.bf16.mxu0 %vm841_vm5, %v8967_v54  ;;  %v10475_v54 = vld [vmem:[%s12835_s5 + $0x70] sm:$0xff]  }
 0x481   :  { %v9959_v14 = vpop.f32.mrb[4].mxu1 }
 0x482   :  { %v561_v15 = vpop.f32.mrb[5].mxu1 }
 0x483   :  { %572 = vrot.lane.b32.xlu1 %v561_v15, %s11444_s30  ;;  %v8971_v15 = vcombine.high %v705_v10, %v705_v10 }
 0x487   :  { %574 = vrot.lane.b32.xlu1 %v9959_v14, %s11444_s30  ;;  %v861_v14 = vsel %vm841_vm5, %v8968_v7, 0  ;;  %s11452_s30 = smov 48  }
 0x488   :  { %v9945_v16 = vpop.f32.mrb[2].mxu0 }
 0x489   :  { %v357_v17 = vpop.f32.mrb[3].mxu0 }
 0x4f5   :  { %v573_v18 = vpop.permute.xlu1 %572 }
 0x4f6   :  { %v578_v19 = vsel %vm168_vm2, %v357_v17, %v573_v18  ;;  %v8970_v17 = vcombine.low %v705_v10, %v705_v10  ;;  %v8972_v18 = vcombine.low %v706_v11, %v706_v11 }
 0x4f7   :  { %9962 = vmatprep.mubr.msk.f32.mxu1 %vm76_vm1, %v578_v19  ;;  %v707_v19 = vld [vmem:[#allocation4 + $0x30] sm:$0x33] }
 0x4f9   :  { %v575_v20 = vpop.permute.xlu1 %574 }
 0x4fa   :  { %v579_v21 = vsel %vm168_vm2, %v9945_v16, %v575_v20  ;;  %v8973_v16 = vcombine.high %v706_v11, %v706_v11  ;;  %v708_v20 = vld [vmem:[#allocation4 + $0x38] sm:$0x33]  ;;  %v712_v11 = vld [vmem:[#allocation4 + $0x50] sm:$0x11] }
 0x4fb   :  { %9963 = vmatmul.mubr.msk.f32.vlgmr.msra.gmra.mrb[6].mxu1 %vm76_vm1, %v579_v21  ;;  %v867_v21 = vsel %vm841_vm5, %v8970_v17, 0  ;;  %v722_v17 = vunpack.c.l.bf16 %v712_v11 }
 0x4fc   :  { %934 = vmatpush1.bf16.msra.mxu1 %v849_v50  ;;  %965 = vmatprep.mubr.bf16.mxu1 %v11445_v51  ;;  %v10472_v50 = vld [vmem:[%s12835_s5 + $0xe8] sm:$0xff]  }
 0x4fd   :  { %8984 = vmatprep.subr.msk.bf16.mxu1 %vm841_vm5, %v8969_v55  ;;  %v10476_v55 = vld [vmem:[%s12835_s5 + $0xf0] sm:$0xff]  }
 0x5ce   :  { %v9964_v23 = vpop.f32.mrb[6].mxu1 }
 0x5cf   :  { %v663_v24 = vadd.f32 %v9964_v23, %v581_v22  ;;  %v657_v25 = vpop.f32.mrb[7].mxu1  ;;  %v8975_v23 = vcombine.high %v707_v19, %v707_v19 }
 0x5d0   :  { %v658_v26 = vadd.f32 %v657_v25, %v581_v22  ;;  %v873_v22 = vsel %vm841_vm5, %v8972_v18, 0  ;;  %v8974_v25 = vcombine.low %v707_v19, %v707_v19  ;;  %v723_v19 = vunpack.c.h.bf16 %v712_v11 }
 0x5d1   :  { %v667_v28 = vadd.f32 %v11358_v27, %v663_v24  ;;  %v8977_v24 = vcombine.high %v708_v20, %v708_v20 }
 0x5d2   :  { %v666_v30 = vadd.f32 %v11359_v29, %v658_v26  ;;  %v8976_v26 = vcombine.low %v708_v20, %v708_v20  ;;  %v879_v27 = vsel %vm841_vm5, %v8974_v25, 0  ;;  %v10451_v29 = vld [vmem:[%s12835_s5 + $0x40] sm:$0xff]  }
 0x5d3   :  { %v673_v31 = vsel %vm76_vm1, %v667_v28, 0.0 }
 0x5d4   :  { %674 = vadd.xlane.f32.xlu0 %v673_v31  ;;  %v670_v32 = vsel %vm76_vm1, %v666_v30, 0.0  ;;  %v10453_v31 = vld [vmem:[%s12835_s5] sm:$0xff]  }
 0x5d5   :  { %671 = vadd.xlane.f32.xlu1 %v670_v32  ;;  %v10454_v32 = vld [vmem:[%s12835_s5 + $0x80] sm:$0xff]  }
 0x661   :  { %v675_v33 = vpop.xlane.xlu0 %674 }
 0x662   :  { %v678_v34 = vmul.f32 0.25, %v675_v33  ;;  %v672_v35 = vpop.xlane.xlu1 %671  ;;  %v10455_v33 = vld [vmem:[%s12835_s5 + $0x48] sm:$0xff]  }
 0x663   :  { %v677_v36 = vmul.f32 0.25, %v672_v35  ;;  %v10457_v35 = vld [vmem:[%s12835_s5 + $0x8] sm:$0xff]  }
 0x664   :  { %v680_v37 = vsub.f32 %v667_v28, %v678_v34  ;;  %v885_v28 = vsel %vm841_vm5, %v8976_v26, 0  ;;  %v10456_v34 = vld [vmem:[%s12835_s5 + $0xc8] sm:$0xff]  }
 0x665   :  { %v679_v38 = vsub.f32 %v666_v30, %v677_v36  ;;  %v10452_v30 = vld [vmem:[%s12835_s5 + $0xc0] sm:$0xff]   ;;  %v10458_v36 = vld [vmem:[%s12835_s5 + $0x88] sm:$0xff]  }
 0x666   :  { %v682_v39 = vmul.f32 %v680_v37, %v680_v37 }
 0x667   :  { %v681_v40 = vmul.f32 %v679_v38, %v679_v38 }
 0x668   :  { %v686_v41 = vsel %vm76_vm1, %v682_v39, 0.0  ;;  %v10461_v39 = vld [vmem:[%s12835_s5 + $0x10] sm:$0xff]  }
 0x669   :  { %687 = vadd.xlane.f32.xlu0 %v686_v41  ;;  %v683_v42 = vsel %vm76_vm1, %v681_v40, 0.0  ;;  %v10462_v40 = vld [vmem:[%s12835_s5 + $0x90] sm:$0xff]   ;;  %v10463_v41 = vld [vmem:[%s12835_s5 + $0x58] sm:$0xff]  }
 0x66a   :  { %684 = vadd.xlane.f32.xlu1 %v683_v42  ;;  %v10464_v42 = vld [vmem:[%s12835_s5 + $0xd8] sm:$0xff]  }
 0x6f6   :  { %v688_v56 = vpop.xlane.xlu0 %687 }
 0x6f7   :  { %v690_v57 = vmul.f32 0.25, %v688_v56  ;;  %v685_v58 = vpop.xlane.xlu1 %684  ;;  %v10477_v56 = vld [vmem:[%s12835_s5 + $0x30] sm:$0xff]  }
 0x6f8   :  { %v689_v59 = vmul.f32 0.25, %v685_v58  ;;  %v10479_v58 = vld [vmem:[%s12835_s5 + $0x78] sm:$0xff]  }
 0x6f9   :  { %v692_v60 = vadd.f32 1e-05, %v690_v57  ;;  %v10478_v57 = vld [vmem:[%s12835_s5 + $0xb0] sm:$0xff]  }
 0x6fa   :  { %v691_v61 = vadd.f32 1e-05, %v689_v59  ;;  %v10480_v59 = vld [vmem:[%s12835_s5 + $0xf8] sm:$0xff]  }
 0x6fb   :  { %11172 = vrsqrt.f32 %v692_v60  ;;  %v10481_v60 = vld [vmem:[%s12835_s5 + $0x38] sm:$0xff]  }
 0x6fc   :  { %11174 = vrsqrt.f32 %v691_v61  ;;  %v10482_v61 = vld [vmem:[%s12835_s5 + $0xb8] sm:$0xff]  }
 0x705   :  { %v11173_v62 = vpop.eup %11172 }
 0x706   :  { %v11175_v0 = vpop.eup %11174  ;;  %v696_v1 = vmul.f32 %v11173_v62, %v680_v37  ;;  %v10459_v37 = vld [vmem:[%s12835_s5 + $0x50] sm:$0xff]   ;;  %v10483_v62 = vld [vmem:[%s12835_s5 + $0x140] sm:$0xff]  }
 0x707   :  { %v695_v3 = vmul.f32 %v11175_v0, %v679_v38  ;;  %v10460_v38 = vld [vmem:[%s12835_s5 + $0xd0] sm:$0xff]   ;;  %v734_v0 = vlaneseq }
 0x708   :  { %v698_v4 = vmul.f32 %v696_v1, %v668_v63 }
 0x709   :  { %v697_v5 = vmul.f32 %v695_v3, %v668_v63  ;;  %v10484_v63 = vld [vmem:[%s12835_s5 + $0x1c0] sm:$0xff]   ;;  %v11732_v1 = vshrl.u32 %v734_v0, 7  ;;  %v711_v3 = vld [vmem:[#allocation4 + $0x48] sm:$0x11] }
 0x70a   :  { %v11599_v8 = vadd.f32 %v698_v4, %v669_v2  ;;  %v720_v6 = vunpack.c.l.bf16 %v711_v3  ;;  %v721_v10 = vunpack.c.h.bf16 %v711_v3 }
 0x70b   :  { %v11601_v9 = vadd.f32 %v697_v5, %v669_v2  ;;  %v710_v2 = vld [vmem:[#allocation4 + $0x40] sm:$0x11]  ;;  %v11735_v5 = vsub.s32 0, %v11732_v1 }
 0x70c   :  { %v718_v4 = vunpack.c.l.bf16 %v710_v2  ;;  %v719_v7 = vunpack.c.h.bf16 %v710_v2 }
 0x70d   :  { %v709_v12 = vpack.c.bf16 %v11599_v8, %v11601_v9 }
 0x70f   :  { %8979 = vmatmul.mubr.msk.bf16.vlgmr.msra.gmra.mrb[4].mxu0 %vm76_vm1, %v709_v12  ;;  %8981 = vmatmul.mubr.msk.bf16.vlgmr.msra.gmra.mrb[8].mxu1 %vm76_vm1, %v709_v12 }
 0x710   :  { %977 = vmatpush1.bf16.msra.mxu0 %v855_v13  ;;  %1020 = vmatpush1.bf16.msra.mxu1 %v861_v14  ;;  %v737_v13 = vrot.slane %v718_v4, %v11735_v5  ;;  %v745_v14 = vrot.slane %v720_v6, %v11735_v5 }
 0x711   :  { %1008 = vmatprep.mubr.bf16.mxu0 %v11445_v51  ;;  %1051 = vmatprep.mubr.bf16.mxu1 %v11445_v51 }
 0x712   :  { %8986 = vmatprep.subr.msk.bf16.mxu0 %vm841_vm5, %v8971_v15  ;;  %8988 = vmatprep.subr.msk.bf16.mxu1 %vm841_vm5, %v8973_v16  ;;  %v741_v15 = vrot.slane %v719_v7, %v11735_v5  ;;  %v749_v16 = vrot.slane %v721_v10, %v11735_v5  ;;  %v10487_v7 = vld [vmem:[%s12835_s5 + $0x148] sm:$0xff]  }
 0x713   :  { %v10488_v10 = vld [vmem:[%s12835_s5 + $0x1c8] sm:$0xff]  }
 0x717   :  { %8983 = vmatmul.mubr.msk.bf16.vlgmr.msra.gmra.mrb[8].mxu0 %vm76_vm1, %v709_v12  ;;  %8985 = vmatmul.mubr.msk.bf16.vlgmr.msra.gmra.mrb[12].mxu1 %vm76_vm1, %v709_v12 }
 0x718   :  { %1063 = vmatpush1.bf16.msra.mxu0 %v867_v21  ;;  %1106 = vmatpush1.bf16.msra.mxu1 %v873_v22 }
 0x719   :  { %1094 = vmatprep.mubr.bf16.mxu0 %v11445_v51  ;;  %1137 = vmatprep.mubr.bf16.mxu1 %v11445_v51 }
 0x71a   :  { %8990 = vmatprep.subr.msk.bf16.mxu0 %vm841_vm5, %v8975_v23  ;;  %8992 = vmatprep.subr.msk.bf16.mxu1 %vm841_vm5, %v8977_v24 }
 0x71f   :  { %8987 = vmatmul.mubr.msk.bf16.vlgmr.msra.gmra.mrb[12].mxu0 %vm76_vm1, %v709_v12  ;;  %8989 = vmatmul.mubr.msk.bf16.vlgmr.msra.gmra.mrb[16].mxu1 %vm76_vm1, %v709_v12 }
 0x720   :  { %1149 = vmatpush1.bf16.msra.mxu0 %v879_v27  ;;  %1192 = vmatpush1.bf16.msra.mxu1 %v885_v28  ;;  %v714_v27 = vld [vmem:[#allocation4 + $0x60] sm:$0x11]  ;;  %v11741_v28 = vld [vmem:[#allocation4 + $0x68] sm:$0x11] }
 0x721   :  { %1180 = vmatprep.mubr.bf16.mxu0 %v11445_v51  ;;  %1223 = vmatprep.mubr.bf16.mxu1 %v11445_v51 }
 0x722   :  { %9617 = vmatprep.subr.bf16.mxu0 %v10451_v29  ;;  %9639 = vmatprep.subr.bf16.mxu1 %v10452_v30 }
 0x727   :  { %8991 = vmatmul.mubr.msk.bf16.vlgmr.msra.gmra.mrb[16].mxu0 %vm76_vm1, %v709_v12  ;;  %8993 = vmatmul.mubr.msk.bf16.vlgmr.msra.gmra.mrb[20].mxu1 %vm76_vm1, %v709_v12  ;;  %v713_v12 = vld [vmem:[#allocation4 + $0x58] sm:$0x11] }
 0x728   :  { %9618 = vmatpush3.bf16.msra.mxu0 %v10453_v31  ;;  %9640 = vmatpush3.bf16.msra.mxu1 %v10454_v32  ;;  %v724_v18 = vunpack.c.l.bf16 %v713_v12  ;;  %v725_v20 = vunpack.c.h.bf16 %v713_v12  ;;  %v11764_v12 = vld [vmem:[#allocation4 + $0x70] sm:$0x11] }
 0x729   :  { %9619 = vmatprep.subr.bf16.mxu0 %v10455_v33  ;;  %9641 = vmatprep.subr.bf16.mxu1 %v10456_v34  ;;  %v753_v33 = vrot.slane %v722_v17, %v11735_v5 }
 0x72a   :  { %v761_v34 = vrot.slane %v724_v18, %v11735_v5 }
 0x72c   :  { %9620 = vmatpush3.bf16.msra.mxu0 %v10457_v35  ;;  %9642 = vmatpush3.bf16.msra.mxu1 %v10458_v36 }
 0x72d   :  { %9621 = vmatprep.subr.bf16.mxu0 %v10459_v37  ;;  %9643 = vmatprep.subr.bf16.mxu1 %v10460_v38 }
 0x730   :  { %9622 = vmatpush3.bf16.msra.mxu0 %v10461_v39  ;;  %9644 = vmatpush3.bf16.msra.mxu1 %v10462_v40  ;;  %v757_v39 = vrot.slane %v723_v19, %v11735_v5  ;;  %v765_v40 = vrot.slane %v725_v20, %v11735_v5 }
 0x731   :  { %9623 = vmatprep.subr.bf16.mxu0 %v10463_v41  ;;  %9645 = vmatprep.subr.bf16.mxu1 %v10464_v42 }
 0x734   :  { %9624 = vmatpush3.bf16.msra.mxu0 %v10465_v43  ;;  %9646 = vmatpush3.bf16.msra.mxu1 %v10466_v44  ;;  %v726_v43 = vunpack.c.l.bf16 %v714_v27  ;;  %v728_v44 = vunpack.c.l.bf16 %v11741_v28 }
 0x735   :  { %9625 = vmatprep.subr.bf16.mxu0 %v10467_v45  ;;  %9647 = vmatprep.subr.bf16.mxu1 %v10468_v46 }
 0x736   :  { %v11762_v11 = vrot.slane %v726_v43, %v11735_v5  ;;  %v777_v17 = vrot.slane %v728_v44, %v11735_v5  ;;  %v731_v43 = vunpack.c.h.bf16 %v11764_v12 }
 0x738   :  { %9626 = vmatpush3.bf16.msra.mxu0 %v10469_v47  ;;  %9648 = vmatpush3.bf16.msra.mxu1 %v10470_v48 }
 0x739   :  { %9627 = vmatprep.subr.bf16.mxu0 %v10471_v49  ;;  %9649 = vmatprep.subr.bf16.mxu1 %v10472_v50 }
 0x73c   :  { %9628 = vmatpush3.bf16.msra.mxu0 %v10473_v52  ;;  %9650 = vmatpush3.bf16.msra.mxu1 %v10474_v53 }
 0x73d   :  { %9629 = vmatprep.subr.bf16.mxu0 %v10475_v54  ;;  %9651 = vmatprep.subr.bf16.mxu1 %v10476_v55 }
 0x740   :  { %9630 = vmatpush3.bf16.msra.mxu0 %v10477_v56  ;;  %9652 = vmatpush3.bf16.msra.mxu1 %v10478_v57  ;;  %v727_v56 = vunpack.c.h.bf16 %v714_v27 }
 0x741   :  { %9631 = vmatprep.subr.bf16.mxu0 %v10479_v58  ;;  %9653 = vmatprep.subr.bf16.mxu1 %v10480_v59 }
 0x744   :  { %9632 = vmatpush3.bf16.msra.mxu0 %v10481_v60  ;;  %9654 = vmatpush3.bf16.msra.mxu1 %v10482_v61  ;;  %v10485_v61 = vld [vmem:[%s12835_s5 + $0x100] sm:$0xff]  }
 0x745   :  { %9661 = vmatprep.subr.bf16.mxu0 %v10483_v62  ;;  %9683 = vmatprep.subr.bf16.mxu1 %v10484_v63  ;;  %v10486_v62 = vld [vmem:[%s12835_s5 + $0x180] sm:$0xff]   ;;  %v729_v63 = vunpack.c.h.bf16 %v11741_v28  ;;  %v730_v28 = vunpack.c.l.bf16 %v11764_v12 }
 0x747   :  { %v781_v27 = vrot.slane %v729_v63, %v11735_v5 }
 0x7e2   :  { %v924_v21 = vpop.f32.mrb[4].mxu0  ;;  %v967_v22 = vpop.f32.mrb[8].mxu1 }
 0x7e3   :  { %v925_v23 = vadd.f32 %v924_v21, %v737_v13  ;;  %v968_v24 = vadd.f32 %v967_v22, %v745_v14  ;;  %v926_v25 = vpop.f32.mrb[5].mxu0  ;;  %v969_v26 = vpop.f32.mrb[9].mxu1  ;;  %v773_v22 = vrot.slane %v727_v56, %v11735_v5  ;;  %v10495_v56 = vld [vmem:[%s12835_s5 + $0x158] sm:$0xff]  }
 0x7e4   :  { %v927_v29 = vadd.f32 %v926_v25, %v741_v15  ;;  %v970_v30 = vadd.f32 %v969_v26, %v749_v16  ;;  %v928_v31 = vpop.f32.mrb[6].mxu0  ;;  %v971_v32 = vpop.f32.mrb[10].mxu1  ;;  %v10489_v25 = vld [vmem:[%s12835_s5 + $0x108] sm:$0xff]  }
 0x7e5   :  { %v929_v35 = vadd.f32 %v928_v31, %v737_v13  ;;  %v972_v36 = vadd.f32 %v971_v32, %v745_v14  ;;  %v930_v37 = vpop.f32.mrb[7].mxu0  ;;  %v973_v38 = vpop.f32.mrb[11].mxu1  ;;  %v1234_v45 = vmax.f32 %v925_v23, 0.0  ;;  %v1236_v46 = vmax.f32 %v968_v24, 0.0  ;;  %v10490_v26 = vld [vmem:[%s12835_s5 + $0x188] sm:$0xff]  }
 0x7e6   :  { %v931_v41 = vadd.f32 %v930_v37, %v741_v15  ;;  %v974_v42 = vadd.f32 %v973_v38, %v749_v16  ;;  %v1235_v49 = vmax.f32 %v927_v29, 0.0  ;;  %v1237_v50 = vmax.f32 %v970_v30, 0.0  ;;  %v717_v29 = vld [vmem:[#allocation4 + $0x78] sm:$0x11] }
 0x7e7   :  { %v1250_v47 = vmax.f32 %v929_v35, 0.0  ;;  %v1252_v48 = vmax.f32 %v972_v36, 0.0  ;;  %v10492_v35 = vld [vmem:[%s12835_s5 + $0x1d0] sm:$0xff]  }
 0x7e8   :  { %v1251_v52 = vmax.f32 %v931_v41, 0.0  ;;  %v1253_v53 = vmax.f32 %v974_v42, 0.0  ;;  %v732_v42 = vunpack.c.l.bf16 %v717_v29 }
 0x7e9   :  { %v1522_v54 = vpack.c.bf16 %v1250_v47, %v1234_v45  ;;  %v1524_v55 = vpack.c.bf16 %v1252_v48, %v1236_v46  ;;  %v10493_v48 = vld [vmem:[%s12835_s5 + $0x110] sm:$0xff]  }
 0x7ea   :  { %v1523_v57 = vpack.c.bf16 %v1251_v52, %v1235_v49  ;;  %v1525_v58 = vpack.c.bf16 %v1253_v53, %v1237_v50  ;;  %v1010_v59 = vpop.f32.mrb[8].mxu0  ;;  %v1053_v60 = vpop.f32.mrb[12].mxu1  ;;  %v10494_v49 = vld [vmem:[%s12835_s5 + $0x190] sm:$0xff]   ;;  %v733_v50 = vunpack.c.h.bf16 %v717_v29 }
 0x7eb   :  { %v1011_v2 = vadd.f32 %v1010_v59, %v753_v33  ;;  %v1054_v3 = vadd.f32 %v1053_v60, %v761_v34  ;;  %v1012_v4 = vpop.f32.mrb[9].mxu0  ;;  %v1055_v6 = vpop.f32.mrb[13].mxu1 }
 0x7ec   :  { %v1013_v13 = vadd.f32 %v1012_v4, %v757_v39  ;;  %v1056_v14 = vadd.f32 %v1055_v6, %v765_v40  ;;  %v1014_v15 = vpop.f32.mrb[10].mxu0  ;;  %v1057_v16 = vpop.f32.mrb[14].mxu1  ;;  %2339 = vmatprep.mubr.bf16.mxu0 %v1523_v57  ;;  %2380 = vmatprep.mubr.bf16.mxu1 %v1525_v58  ;;  %v10496_v57 = vld [vmem:[%s12835_s5 + $0x1d8] sm:$0xff]   ;;  %v793_v6 = vrot.slane %v732_v42, %v11735_v5 }
 0x7ed   :  { %v1015_v18 = vadd.f32 %v1014_v15, %v753_v33  ;;  %v1058_v19 = vadd.f32 %v1057_v16, %v761_v34  ;;  %v1016_v20 = vpop.f32.mrb[11].mxu0  ;;  %v1059_v21 = vpop.f32.mrb[15].mxu1  ;;  %2340 = vmatmul.mubr.bf16.vlgmr.msra.gmra.mrb[20].mxu0 %v1522_v54  ;;  %2381 = vmatmul.mubr.bf16.vlgmr.msra.gmra.mrb[24].mxu1 %v1524_v55  ;;  %v1238_v30 = vmax.f32 %v1011_v2, 0.0  ;;  %v1240_v31 = vmax.f32 %v1054_v3, 0.0  ;;  %v10491_v34 = vld [vmem:[%s12835_s5 + $0x150] sm:$0xff]  }
 0x7ee   :  { %v1017_v23 = vadd.f32 %v1016_v20, %v757_v39  ;;  %v1060_v24 = vadd.f32 %v1059_v21, %v765_v40  ;;  %9662 = vmatpush3.bf16.msra.mxu0 %v10485_v61  ;;  %9684 = vmatpush3.bf16.msra.mxu1 %v10486_v62  ;;  %v1239_v36 = vmax.f32 %v1013_v13, 0.0  ;;  %v1241_v37 = vmax.f32 %v1056_v14, 0.0  ;;  %v10497_v13 = vld [vmem:[%s12835_s5 + $0x118] sm:$0xff]   ;;  %v10500_v20 = vld [vmem:[%s12835_s5 + $0x1e0] sm:$0xff]  }
 0x7ef   :  { %v1254_v32 = vmax.f32 %v1015_v18, 0.0  ;;  %v1256_v33 = vmax.f32 %v1058_v19, 0.0  ;;  %9663 = vmatprep.subr.bf16.mxu0 %v10487_v7  ;;  %9685 = vmatprep.subr.bf16.mxu1 %v10488_v10  ;;  %v785_v62 = vrot.slane %v730_v28, %v11735_v5  ;;  %v789_v7 = vrot.slane %v731_v43, %v11735_v5  ;;  %v10498_v14 = vld [vmem:[%s12835_s5 + $0x198] sm:$0xff]   ;;  %v10499_v19 = vld [vmem:[%s12835_s5 + $0x160] sm:$0xff]  }
 0x7f0   :  { %v1255_v38 = vmax.f32 %v1017_v23, 0.0  ;;  %v1257_v39 = vmax.f32 %v1060_v24, 0.0 }
 0x7f1   :  { %v11782_v40 = vpack.c.bf16 %v1254_v32, %v1238_v30  ;;  %v11784_v41 = vpack.c.bf16 %v1256_v33, %v1240_v31  ;;  %v10501_v31 = vld [vmem:[%s12835_s5 + $0x120] sm:$0xff]  }
 0x7f2   :  { %v1527_v44 = vpack.c.bf16 %v1255_v38, %v1239_v36  ;;  %v1529_v45 = vpack.c.bf16 %v1257_v39, %v1241_v37  ;;  %9664 = vmatpush3.bf16.msra.mxu0 %v10489_v25  ;;  %9686 = vmatpush3.bf16.msra.mxu1 %v10490_v26  ;;  %v1096_v46 = vpop.f32.mrb[12].mxu0  ;;  %v1139_v47 = vpop.f32.mrb[16].mxu1  ;;  %v10502_v32 = vld [vmem:[%s12835_s5 + $0x1a0] sm:$0xff]   ;;  %v10503_v37 = vld [vmem:[%s12835_s5 + $0x168] sm:$0xff]  }
 0x7f3   :  { %v1097_v52 = vadd.f32 %v1096_v46, %v11762_v11  ;;  %v1140_v53 = vadd.f32 %v1139_v47, %v777_v17  ;;  %v1098_v54 = vpop.f32.mrb[13].mxu0  ;;  %v1141_v55 = vpop.f32.mrb[17].mxu1  ;;  %9665 = vmatprep.subr.bf16.mxu0 %v10491_v34  ;;  %9687 = vmatprep.subr.bf16.mxu1 %v10492_v35  ;;  %v10504_v38 = vld [vmem:[%s12835_s5 + $0x1e8] sm:$0xff]  }
 0x7f4   :  { %v1099_v58 = vadd.f32 %v1098_v54, %v773_v22  ;;  %v1142_v59 = vadd.f32 %v1141_v55, %v781_v27  ;;  %v1100_v60 = vpop.f32.mrb[14].mxu0  ;;  %v1143_v61 = vpop.f32.mrb[18].mxu1  ;;  %2421 = vmatprep.mubr.bf16.mxu0 %v1527_v44  ;;  %2462 = vmatprep.mubr.bf16.mxu1 %v1529_v45 }
 0x7f5   :  { %v1101_v63 = vadd.f32 %v1100_v60, %v11762_v11  ;;  %v1144_v2 = vadd.f32 %v1143_v61, %v777_v17  ;;  %v1102_v3 = vpop.f32.mrb[15].mxu0  ;;  %v1145_v4 = vpop.f32.mrb[19].mxu1  ;;  %v797_v11 = vrot.slane %v733_v50, %v11735_v5  ;;  %v1242_v15 = vmax.f32 %v1097_v52, 0.0  ;;  %v10505_v52 = vld [vmem:[%s12835_s5 + $0x128] sm:$0xff]  }
 0x7f6   :  { %v1103_v10 = vadd.f32 %v1102_v3, %v773_v22  ;;  %v1146_v12 = vadd.f32 %v1145_v4, %v781_v27  ;;  %9666 = vmatpush3.bf16.msra.mxu0 %v10493_v48  ;;  %9688 = vmatpush3.bf16.msra.mxu1 %v10494_v49  ;;  %v1244_v16 = vmax.f32 %v1140_v53, 0.0  ;;  %v1243_v21 = vmax.f32 %v1099_v58, 0.0  ;;  %v10506_v53 = vld [vmem:[%s12835_s5 + $0x1a8] sm:$0xff]   ;;  %v10507_v58 = vld [vmem:[%s12835_s5 + $0x170] sm:$0xff]  }
 0x7f7   :  { %v1258_v17 = vmax.f32 %v1101_v63, 0.0  ;;  %v1260_v18 = vmax.f32 %v1144_v2, 0.0  ;;  %9667 = vmatprep.subr.bf16.mxu0 %v10495_v56  ;;  %9689 = vmatprep.subr.bf16.mxu1 %v10496_v57  ;;  %v1245_v22 = vmax.f32 %v1142_v59, 0.0  ;;  %v10508_v59 = vld [vmem:[%s12835_s5 + $0x1f0] sm:$0xff]  }
 0x7f8   :  { %v1259_v23 = vmax.f32 %v1103_v10, 0.0  ;;  %v1261_v24 = vmax.f32 %v1146_v12, 0.0  ;;  %v10510_v10 = vld [vmem:[%s12835_s5 + $0x1b0] sm:$0xff]   ;;  %v10511_v12 = vld [vmem:[%s12835_s5 + $0x178] sm:$0xff]  }
 0x7f9   :  { %v11817_v25 = vpack.c.bf16 %v1258_v17, %v1242_v15  ;;  %v11819_v26 = vpack.c.bf16 %v1260_v18, %v1244_v16  ;;  %v10515_v15 = vld [vmem:[%s12835_s5 + $0x240] sm:$0xff]  }
 0x7fa   :  { %v11821_v27 = vpack.c.bf16 %v1259_v23, %v1243_v21  ;;  %v11823_v28 = vpack.c.bf16 %v1261_v24, %v1245_v22  ;;  %9668 = vmatpush3.bf16.msra.mxu0 %v10497_v13  ;;  %9690 = vmatpush3.bf16.msra.mxu1 %v10498_v14  ;;  %v1182_v29 = vpop.f32.mrb[16].mxu0  ;;  %v1225_v30 = vpop.f32.mrb[20].mxu1  ;;  %v10512_v13 = vld [vmem:[%s12835_s5 + $0x1f8] sm:$0xff]   ;;  %v10516_v16 = vld [vmem:[%s12835_s5 + $0x2c0] sm:$0xff]   ;;  %v10521_v21 = vld [vmem:[%s12835_s5 + $0x208] sm:$0xff]  }
 0x7fb   :  { %v1183_v33 = vadd.f32 %v1182_v29, %v785_v62  ;;  %v1226_v34 = vadd.f32 %v1225_v30, %v793_v6  ;;  %v1184_v35 = vpop.f32.mrb[17].mxu0  ;;  %v1227_v36 = vpop.f32.mrb[21].mxu1  ;;  %9669 = vmatprep.subr.bf16.mxu0 %v10499_v19  ;;  %9691 = vmatprep.subr.bf16.mxu1 %v10500_v20  ;;  %v10513_v14 = vld [vmem:[%s12835_s5 + $0x138] sm:$0xff]   ;;  %v10517_v17 = vld [vmem:[%s12835_s5 + $0x200] sm:$0xff]   ;;  %v10519_v19 = vld [vmem:[%s12835_s5 + $0x248] sm:$0xff]  }
 0x7fc   :  { %v1185_v39 = vadd.f32 %v1184_v35, %v789_v7  ;;  %v1228_v42 = vadd.f32 %v1227_v36, %v797_v11  ;;  %v1186_v43 = vpop.f32.mrb[18].mxu0  ;;  %v1229_v44 = vpop.f32.mrb[22].mxu1  ;;  %v10518_v18 = vld [vmem:[%s12835_s5 + $0x280] sm:$0xff]   ;;  %v10520_v20 = vld [vmem:[%s12835_s5 + $0x2c8] sm:$0xff]   ;;  %v10525_v23 = vld [vmem:[%s12835_s5 + $0x210] sm:$0xff]  }
 0x7fd   :  { %v1187_v45 = vadd.f32 %v1186_v43, %v785_v62  ;;  %v1230_v46 = vadd.f32 %v1229_v44, %v793_v6  ;;  %v1188_v47 = vpop.f32.mrb[19].mxu0  ;;  %v1231_v48 = vpop.f32.mrb[23].mxu1  ;;  %v1246_v54 = vmax.f32 %v1183_v33, 0.0  ;;  %v1248_v55 = vmax.f32 %v1226_v34, 0.0  ;;  %v10522_v22 = vld [vmem:[%s12835_s5 + $0x288] sm:$0xff]   ;;  %v10526_v24 = vld [vmem:[%s12835_s5 + $0x290] sm:$0xff]  }
 0x7fe   :  { %v1189_v49 = vadd.f32 %v1188_v47, %v789_v7  ;;  %v1232_v50 = vadd.f32 %v1231_v48, %v797_v11  ;;  %9670 = vmatpush3.bf16.msra.mxu0 %v10501_v31  ;;  %9692 = vmatpush3.bf16.msra.mxu1 %v10502_v32  ;;  %v1247_v60 = vmax.f32 %v1185_v39, 0.0  ;;  %v1249_v61 = vmax.f32 %v1228_v42, 0.0  ;;  %v10509_v7 = vld [vmem:[%s12835_s5 + $0x130] sm:$0xff]   ;;  %v10514_v11 = vld [vmem:[%s12835_s5 + $0x1b8] sm:$0xff]   ;;  %v10531_v31 = vld [vmem:[%s12835_s5 + $0x260] sm:$0xff]  }
 0x7ff   :  { %v1262_v56 = vmax.f32 %v1187_v45, 0.0  ;;  %v1264_v57 = vmax.f32 %v1230_v46, 0.0  ;;  %9671 = vmatprep.subr.bf16.mxu0 %v10503_v37  ;;  %9693 = vmatprep.subr.bf16.mxu1 %v10504_v38  ;;  %v10529_v29 = vld [vmem:[%s12835_s5 + $0x218] sm:$0xff]   ;;  %v10532_v32 = vld [vmem:[%s12835_s5 + $0x2e0] sm:$0xff]   ;;  %v10535_v35 = vld [vmem:[%s12835_s5 + $0x268] sm:$0xff]  }
 0x800   :  { %v1263_v62 = vmax.f32 %v1189_v49, 0.0  ;;  %v1265_v63 = vmax.f32 %v1232_v50, 0.0  ;;  %v10530_v30 = vld [vmem:[%s12835_s5 + $0x298] sm:$0xff]   ;;  %v10533_v33 = vld [vmem:[%s12835_s5 + $0x220] sm:$0xff]   ;;  %v10536_v36 = vld [vmem:[%s12835_s5 + $0x2e8] sm:$0xff]  }
 0x801   :  { %v11849_v2 = vpack.c.bf16 %v1262_v56, %v1246_v54  ;;  %v11851_v3 = vpack.c.bf16 %v1264_v57, %v1248_v55  ;;  %v10534_v34 = vld [vmem:[%s12835_s5 + $0x2a0] sm:$0xff]   ;;  %v10537_v37 = vld [vmem:[%s12835_s5 + $0x228] sm:$0xff]   ;;  %v10539_v39 = vld [vmem:[%s12835_s5 + $0x270] sm:$0xff]  }
 0x802   :  { %v11853_v4 = vpack.c.bf16 %v1263_v62, %v1247_v60  ;;  %v11855_v6 = vpack.c.bf16 %v1265_v63, %v1249_v61  ;;  %9672 = vmatpush3.bf16.msra.mxu0 %v10505_v52  ;;  %9694 = vmatpush3.bf16.msra.mxu1 %v10506_v53  ;;  %v10538_v38 = vld [vmem:[%s12835_s5 + $0x2a8] sm:$0xff]   ;;  %v10540_v42 = vld [vmem:[%s12835_s5 + $0x2f0] sm:$0xff]   ;;  %v10543_v45 = vld [vmem:[%s12835_s5 + $0x278] sm:$0xff]  }
 0x803   :  { %9673 = vmatprep.subr.bf16.mxu0 %v10507_v58  ;;  %9695 = vmatprep.subr.bf16.mxu1 %v10508_v59  ;;  %v10541_v43 = vld [vmem:[%s12835_s5 + $0x230] sm:$0xff]   ;;  %v10544_v46 = vld [vmem:[%s12835_s5 + $0x2f8] sm:$0xff]   ;;  %v10547_v49 = vld [vmem:[%s12835_s5 + $0x340] sm:$0xff]  }
 0x804   :  { %v10542_v44 = vld [vmem:[%s12835_s5 + $0x2b0] sm:$0xff]   ;;  %v10545_v47 = vld [vmem:[%s12835_s5 + $0x238] sm:$0xff]   ;;  %v10548_v50 = vld [vmem:[%s12835_s5 + $0x3c0] sm:$0xff]  }
 0x805   :  { %v10546_v48 = vld [vmem:[%s12835_s5 + $0x2b8] sm:$0xff]   ;;  %v10549_v52 = vld [vmem:[%s12835_s5 + $0x300] sm:$0xff]   ;;  %v10551_v54 = vld [vmem:[%s12835_s5 + $0x348] sm:$0xff]  }
 0x806   :  { %9674 = vmatpush3.bf16.msra.mxu0 %v10509_v7  ;;  %9696 = vmatpush3.bf16.msra.mxu1 %v10510_v10  ;;  %v10550_v53 = vld [vmem:[%s12835_s5 + $0x380] sm:$0xff]   ;;  %v10552_v55 = vld [vmem:[%s12835_s5 + $0x3c8] sm:$0xff]   ;;  %v10557_v58 = vld [vmem:[%s12835_s5 + $0x310] sm:$0xff]  }
 0x807   :  { %9675 = vmatprep.subr.bf16.mxu0 %v10511_v12  ;;  %9697 = vmatprep.subr.bf16.mxu1 %v10512_v13  ;;  %v10553_v56 = vld [vmem:[%s12835_s5 + $0x308] sm:$0xff]   ;;  %v10558_v59 = vld [vmem:[%s12835_s5 + $0x390] sm:$0xff]   ;;  %v10559_v60 = vld [vmem:[%s12835_s5 + $0x358] sm:$0xff]  }
 0x808   :  { %v10554_v57 = vld [vmem:[%s12835_s5 + $0x388] sm:$0xff]   ;;  %v10560_v61 = vld [vmem:[%s12835_s5 + $0x3d8] sm:$0xff]   ;;  %v10565_v7 = vld [vmem:[%s12835_s5 + $0x320] sm:$0xff]  }
 0x809   :  { %v10561_v62 = vld [vmem:[%s12835_s5 + $0x318] sm:$0xff]   ;;  %v10566_v10 = vld [vmem:[%s12835_s5 + $0x3a0] sm:$0xff]   ;;  %v10567_v12 = vld [vmem:[%s12835_s5 + $0x368] sm:$0xff]  }
 0x80a   :  { %9676 = vmatpush3.bf16.msra.mxu0 %v10513_v14  ;;  %9698 = vmatpush3.bf16.msra.mxu1 %v10514_v11  ;;  %v10562_v63 = vld [vmem:[%s12835_s5 + $0x398] sm:$0xff]   ;;  %v10568_v13 = vld [vmem:[%s12835_s5 + $0x3e8] sm:$0xff]  }
 0x80b   :  { %9705 = vmatprep.subr.bf16.mxu0 %v10515_v15  ;;  %9727 = vmatprep.subr.bf16.mxu1 %v10516_v16  ;;  %v10569_v14 = vld [vmem:[%s12835_s5 + $0x328] sm:$0xff]   ;;  %v10571_v15 = vld [vmem:[%s12835_s5 + $0x370] sm:$0xff]  }
 0x80c   :  { %v10570_v11 = vld [vmem:[%s12835_s5 + $0x3a8] sm:$0xff]   ;;  %v10572_v16 = vld [vmem:[%s12835_s5 + $0x3f0] sm:$0xff]  }
 0x80d   :  { %2422 = vmatmul.mubr.bf16.vlgmr.msra.gmra.mrb[24].mxu0 %v11782_v40  ;;  %2463 = vmatmul.mubr.bf16.vlgmr.msra.gmra.mrb[28].mxu1 %v11784_v41  ;;  %v10523_v40 = vld [vmem:[%s12835_s5 + $0x250] sm:$0xff]  }
 0x80e   :  { %9706 = vmatpush3.bf16.msra.mxu0 %v10517_v17  ;;  %2503 = vmatprep.mubr.bf16.mxu0 %v11821_v27  ;;  %v10524_v41 = vld [vmem:[%s12835_s5 + $0x2d0] sm:$0xff]   ;;  %v10527_v27 = vld [vmem:[%s12835_s5 + $0x258] sm:$0xff]  }
 0x80f   :  { %9728 = vmatpush3.bf16.msra.mxu1 %v10518_v18  ;;  %2544 = vmatprep.mubr.bf16.mxu1 %v11823_v28  ;;  %v10528_v28 = vld [vmem:[%s12835_s5 + $0x2d8] sm:$0xff]   ;;  %v10573_v17 = vld [vmem:[%s12835_s5 + $0x330] sm:$0xff]  }
 0x810   :  { %9707 = vmatprep.subr.bf16.mxu0 %v10519_v19  ;;  %9729 = vmatprep.subr.bf16.mxu1 %v10520_v20  ;;  %v10574_v18 = vld [vmem:[%s12835_s5 + $0x3b0] sm:$0xff]   ;;  %v10575_v19 = vld [vmem:[%s12835_s5 + $0x378] sm:$0xff]  }
 0x811   :  { %v10576_v20 = vld [vmem:[%s12835_s5 + $0x3f8] sm:$0xff]  }
 0x812   :  { %9708 = vmatpush3.bf16.msra.mxu0 %v10521_v21  ;;  %v10577_v21 = vld [vmem:[%s12835_s5 + $0x338] sm:$0xff]  }
 0x813   :  { %9730 = vmatpush3.bf16.msra.mxu1 %v10522_v22  ;;  %9709 = vmatprep.subr.bf16.mxu0 %v10523_v40  ;;  %v10578_v22 = vld [vmem:[%s12835_s5 + $0x3b8] sm:$0xff]  }
 0x814   :  { %9731 = vmatprep.subr.bf16.mxu1 %v10524_v41 }
 0x816   :  { %9710 = vmatpush3.bf16.msra.mxu0 %v10525_v23  ;;  %v1538_v23 = vld [vmem:[#allocation2 + $0xc0] ss:$0 sm:$0xff] }
 0x817   :  { %9732 = vmatpush3.bf16.msra.mxu1 %v10526_v24  ;;  %9711 = vmatprep.subr.bf16.mxu0 %v10527_v27 }
 0x818   :  { %9733 = vmatprep.subr.bf16.mxu1 %v10528_v28 }
 0x81a   :  { %9712 = vmatpush3.bf16.msra.mxu0 %v10529_v29 }
 0x81b   :  { %9734 = vmatpush3.bf16.msra.mxu1 %v10530_v30  ;;  %9713 = vmatprep.subr.bf16.mxu0 %v10531_v31 }
 0x81c   :  { %9735 = vmatprep.subr.bf16.mxu1 %v10532_v32 }
 0x81e   :  { %9714 = vmatpush3.bf16.msra.mxu0 %v10533_v33 }
 0x81f   :  { %9736 = vmatpush3.bf16.msra.mxu1 %v10534_v34  ;;  %9715 = vmatprep.subr.bf16.mxu0 %v10535_v35 }
 0x820   :  { %9737 = vmatprep.subr.bf16.mxu1 %v10536_v36 }
 0x822   :  { %9716 = vmatpush3.bf16.msra.mxu0 %v10537_v37 }
 0x823   :  { %9738 = vmatpush3.bf16.msra.mxu1 %v10538_v38  ;;  %9717 = vmatprep.subr.bf16.mxu0 %v10539_v39 }
 0x824   :  { %9739 = vmatprep.subr.bf16.mxu1 %v10540_v42 }
 0x826   :  { %9718 = vmatpush3.bf16.msra.mxu0 %v10541_v43 }
 0x827   :  { %9740 = vmatpush3.bf16.msra.mxu1 %v10542_v44  ;;  %9719 = vmatprep.subr.bf16.mxu0 %v10543_v45 }
 0x828   :  { %9741 = vmatprep.subr.bf16.mxu1 %v10544_v46 }
 0x82a   :  { %9720 = vmatpush3.bf16.msra.mxu0 %v10545_v47 }
 0x82b   :  { %9742 = vmatpush3.bf16.msra.mxu1 %v10546_v48  ;;  %9749 = vmatprep.subr.bf16.mxu0 %v10547_v49 }
 0x82c   :  { %9771 = vmatprep.subr.bf16.mxu1 %v10548_v50 }
 0x82d   :  { %2504 = vmatmul.mubr.bf16.vlgmr.msra.gmra.mrb[28].mxu0 %v11817_v25  ;;  %v10555_v25 = vld [vmem:[%s12835_s5 + $0x350] sm:$0xff]  }
 0x82e   :  { %2545 = vmatmul.mubr.bf16.vlgmr.msra.gmra.mrb[32].mxu1 %v11819_v26  ;;  %9750 = vmatpush3.bf16.msra.mxu0 %v10549_v52  ;;  %v10556_v26 = vld [vmem:[%s12835_s5 + $0x3d0] sm:$0xff]  }
 0x82f   :  { %2585 = vmatprep.mubr.bf16.mxu0 %v11853_v4  ;;  %9772 = vmatpush3.bf16.msra.mxu1 %v10550_v53  ;;  %v10563_v4 = vld [vmem:[%s12835_s5 + $0x360] sm:$0xff]  }
 0x830   :  { %2626 = vmatprep.mubr.bf16.mxu1 %v11855_v6  ;;  %9751 = vmatprep.subr.bf16.mxu0 %v10551_v54  ;;  %v10564_v6 = vld [vmem:[%s12835_s5 + $0x3e0] sm:$0xff]  }
 0x831   :  { %9773 = vmatprep.subr.bf16.mxu1 %v10552_v55 }
 0x832   :  { %9752 = vmatpush3.bf16.msra.mxu0 %v10553_v56 }
 0x833   :  { %9774 = vmatpush3.bf16.msra.mxu1 %v10554_v57  ;;  %9753 = vmatprep.subr.bf16.mxu0 %v10555_v25 }
 0x834   :  { %9775 = vmatprep.subr.bf16.mxu1 %v10556_v26 }
 0x836   :  { %9754 = vmatpush3.bf16.msra.mxu0 %v10557_v58 }
 0x837   :  { %9776 = vmatpush3.bf16.msra.mxu1 %v10558_v59  ;;  %9755 = vmatprep.subr.bf16.mxu0 %v10559_v60 }
 0x838   :  { %9777 = vmatprep.subr.bf16.mxu1 %v10560_v61 }
 0x83a   :  { %9756 = vmatpush3.bf16.msra.mxu0 %v10561_v62 }
 0x83b   :  { %9778 = vmatpush3.bf16.msra.mxu1 %v10562_v63  ;;  %9757 = vmatprep.subr.bf16.mxu0 %v10563_v4 }
 0x83c   :  { %9779 = vmatprep.subr.bf16.mxu1 %v10564_v6 }
 0x83e   :  { %9758 = vmatpush3.bf16.msra.mxu0 %v10565_v7 }
 0x83f   :  { %9780 = vmatpush3.bf16.msra.mxu1 %v10566_v10  ;;  %9759 = vmatprep.subr.bf16.mxu0 %v10567_v12 }
 0x840   :  { %9781 = vmatprep.subr.bf16.mxu1 %v10568_v13 }
 0x842   :  { %9760 = vmatpush3.bf16.msra.mxu0 %v10569_v14 }
 0x843   :  { %9782 = vmatpush3.bf16.msra.mxu1 %v10570_v11  ;;  %9761 = vmatprep.subr.bf16.mxu0 %v10571_v15 }
 0x844   :  { %9783 = vmatprep.subr.bf16.mxu1 %v10572_v16 }
 0x846   :  { %9762 = vmatpush3.bf16.msra.mxu0 %v10573_v17 }
 0x847   :  { %9784 = vmatpush3.bf16.msra.mxu1 %v10574_v18  ;;  %9763 = vmatprep.subr.bf16.mxu0 %v10575_v19 }
 0x848   :  { %9785 = vmatprep.subr.bf16.mxu1 %v10576_v20 }
 0x84a   :  { %9764 = vmatpush3.bf16.msra.mxu0 %v10577_v21 }
 0x84b   :  { %9786 = vmatpush3.bf16.msra.mxu1 %v10578_v22 }
 0x84d   :  { %2586 = vmatmul.mubr.bf16.vlgmr.msra.gmra.mrb[32].mxu0 %v11849_v2 }
 0x84e   :  { %2627 = vmatmul.mubr.bf16.vlgmr.msra.gmra.mrb[36].mxu1 %v11851_v3 }
 0x8c0   :  { %v9633_v40 = vpop.f32.mrb[20].mxu0  ;;  %v9655_v41 = vpop.f32.mrb[24].mxu1 }
 0x8c1   :  { %v9634_v24 = vpop.f32.mrb[21].mxu0  ;;  %v9656_v27 = vpop.f32.mrb[25].mxu1 }
 0x8c2   :  { %v9635_v28 = vadd.f32 %v9634_v24, %v9633_v40  ;;  %v9657_v29 = vadd.f32 %v9656_v27, %v9655_v41  ;;  %v9636_v30 = vpop.f32.mrb[22].mxu0  ;;  %v9658_v31 = vpop.f32.mrb[26].mxu1 }
 0x8c3   :  { %v9637_v32 = vpop.f32.mrb[23].mxu0  ;;  %v9659_v33 = vpop.f32.mrb[27].mxu1 }
 0x8c4   :  { %v2342_v34 = vadd.f32 %v9635_v28, %v1538_v23  ;;  %v9638_v35 = vadd.f32 %v9637_v32, %v9636_v30  ;;  %v9660_v36 = vadd.f32 %v9659_v33, %v9658_v31 }
 0x8c6   :  { %v2383_v37 = vadd.f32 %v9657_v29, %v2342_v34  ;;  %v2345_v38 = vadd.f32 %v9638_v35, %v1538_v23 }
 0x8c8   :  { %v2386_v39 = vadd.f32 %v9660_v36, %v2345_v38 }
 0x8e0   :  { %v9677_v2 = vpop.f32.mrb[24].mxu0  ;;  %v9699_v42 = vpop.f32.mrb[28].mxu1 }
 0x8e1   :  { %v9678_v3 = vpop.f32.mrb[25].mxu0  ;;  %v9700_v43 = vpop.f32.mrb[29].mxu1 }
 0x8e2   :  { %v9679_v44 = vadd.f32 %v9678_v3, %v9677_v2  ;;  %v9701_v45 = vadd.f32 %v9700_v43, %v9699_v42  ;;  %v9680_v46 = vpop.f32.mrb[26].mxu0  ;;  %v9702_v47 = vpop.f32.mrb[30].mxu1  ;;  %v2669_v43 = vld [vmem:[#allocation2 + $0x120] sm:$0xf] }
 0x8e3   :  { %v9681_v48 = vpop.f32.mrb[27].mxu0  ;;  %v9703_v49 = vpop.f32.mrb[31].mxu1  ;;  %9965 = vmatprep.subr.msk.mxu0 %vm83_vm0, %v2669_v43 }
 0x8e4   :  { %v2424_v50 = vadd.f32 %v9679_v44, %v2383_v37  ;;  %v9682_v52 = vadd.f32 %v9681_v48, %v9680_v46  ;;  %v9704_v53 = vadd.f32 %v9703_v49, %v9702_v47  ;;  %9966 = vmatpush3.msk.msra.mxu0 %vm83_vm0, %v2669_v43  ;;  %v2670_v44 = vld [vmem:[#allocation2 + $0x140] sm:$0xff]  ;;  %v11448_v47 = vmov 0.0  }
 0x8e5   :  { %9974 = vmatprep.mubr.msk.f32.mxu1 %vm11447_vm6, %v11448_v47 }
 0x8e6   :  { %v2465_v54 = vadd.f32 %v9701_v45, %v2424_v50  ;;  %v2427_v55 = vadd.f32 %v9682_v52, %v2386_v39  ;;  %v2671_v45 = vld [vmem:[#allocation2 + $0x160] sm:$0xff] }
 0x8e7   :  { %v12087_v46 = vpack.c.bf16 %v2671_v45, %v2670_v44 }
 0x8e8   :  { %v2468_v56 = vadd.f32 %v9704_v53, %v2427_v55 }
 0x900   :  { %v9721_v57 = vpop.f32.mrb[28].mxu0 }
 0x901   :  { %v9743_v25 = vpop.f32.mrb[32].mxu1  ;;  %v9722_v26 = vpop.f32.mrb[29].mxu0 }
 0x902   :  { %v9723_v58 = vadd.f32 %v9722_v26, %v9721_v57  ;;  %v9744_v59 = vpop.f32.mrb[33].mxu1  ;;  %v9724_v60 = vpop.f32.mrb[30].mxu0  ;;  %v2638_v26 = vld [vmem:[#allocation2 + $0x100] ss:$0 sm:$0xff] }
 0x903   :  { %v9745_v61 = vadd.f32 %v9744_v59, %v9743_v25  ;;  %v9746_v62 = vpop.f32.mrb[34].mxu1  ;;  %v9725_v63 = vpop.f32.mrb[31].mxu0 }
 0x904   :  { %v2506_v4 = vadd.f32 %v9723_v58, %v2465_v54  ;;  %v9726_v6 = vadd.f32 %v9725_v63, %v9724_v60  ;;  %v9747_v7 = vpop.f32.mrb[35].mxu1 }
 0x905   :  { %v9748_v10 = vadd.f32 %v9747_v7, %v9746_v62  ;;  %v2672_v7 = vld [vmem:[#allocation2 + $0x180] ss:$0 sm:$0xff] }
 0x906   :  { %v2547_v12 = vadd.f32 %v9745_v61, %v2506_v4  ;;  %v2509_v13 = vadd.f32 %v9726_v6, %v2468_v56  ;;  %v2637_v56 = vld [vmem:[#allocation2 + $0xe0] ss:$0 sm:$0xff]  ;;  %v12105_v6 = vand.u32 127, %v734_v0 }
 0x908   :  { %v2550_v14 = vadd.f32 %v9748_v10, %v2509_v13  ;;  %v2763_v10 = vand.u32 15, %v12105_v6 }
 0x90a   :  { %vm2771_vm7 = vcmp.lt.s32.totalorder %v2763_v10, 8 }
 0x920   :  { %v9765_v11 = vpop.f32.mrb[32].mxu0 }
 0x921   :  { %v9787_v15 = vpop.f32.mrb[36].mxu1  ;;  %v9766_v16 = vpop.f32.mrb[33].mxu0 }
 0x922   :  { %v9767_v17 = vadd.f32 %v9766_v16, %v9765_v11  ;;  %v9788_v18 = vpop.f32.mrb[37].mxu1  ;;  %v9768_v19 = vpop.f32.mrb[34].mxu0 }
 0x923   :  { %v9789_v20 = vadd.f32 %v9788_v18, %v9787_v15  ;;  %v9790_v21 = vpop.f32.mrb[38].mxu1  ;;  %v9769_v22 = vpop.f32.mrb[35].mxu0 }
 0x924   :  { %v2588_v40 = vadd.f32 %v9767_v17, %v2547_v12  ;;  %v9770_v41 = vadd.f32 %v9769_v22, %v9768_v19  ;;  %v9791_v23 = vpop.f32.mrb[39].mxu1 }
 0x925   :  { %v9792_v24 = vadd.f32 %v9791_v23, %v9790_v21 }
 0x926   :  { %v2629_v27 = vadd.f32 %v9789_v20, %v2588_v40  ;;  %v2591_v28 = vadd.f32 %v9770_v41, %v2550_v14 }
 0x928   :  { %v2632_v29 = vadd.f32 %v9792_v24, %v2591_v28  ;;  %v2635_v30 = vadd.f32 %v2629_v27, %v11601_v9 }
 0x92a   :  { %v2639_v31 = vsel %vm76_vm1, %v2635_v30, 0.0  ;;  %v2636_v32 = vadd.f32 %v2632_v29, %v11599_v8  ;;  %v11446_v8 = vmov 0.0|0.0  }
 0x92b   :  { %2640 = vadd.xlane.f32.xlu1 %v2639_v31  ;;  %10130 = vmatprep.subr.bf16.mxu1 %v11446_v8 }
 0x92c   :  { %v2642_v33 = vsel %vm76_vm1, %v2636_v32, 0.0  ;;  %10133 = vmatprep.subr.bf16.mxu0 %v11446_v8  ;;  %10132 = vmatpush3.bf16.msra.mxu1 %v12087_v46 }
 0x92d   :  { %2643 = vadd.xlane.f32.xlu0 %v2642_v33  ;;  %10136 = vmatprep.subr.bf16.mxu1 %v11446_v8 }
 0x92f   :  { %9975 = vmatmul.mubr.f32.vlgmr.msra.gmra.mrb[40].mxu1 %v11448_v47 }
 0x930   :  { %10138 = vmatpush3.bf16.msra.mxu1 %v12087_v46  ;;  %9988 = vmatprep.mubr.msk.f32.mxu1 %vm11447_vm6, %v11448_v47 }
 0x931   :  { %10142 = vmatprep.subr.bf16.mxu1 %v11446_v8 }
 0x9b8   :  { %v2641_v34 = vpop.xlane.xlu1 %2640 }
 0x9b9   :  { %v2645_v35 = vmul.f32 0.25, %v2641_v34 }
 0x9ba   :  { %v2644_v36 = vpop.xlane.xlu0 %2643 }
 0x9bb   :  { %v2647_v37 = vsub.f32 %v2635_v30, %v2645_v35  ;;  %v2646_v38 = vmul.f32 0.25, %v2644_v36 }
 0x9bd   :  { %v2648_v39 = vsub.f32 %v2636_v32, %v2646_v38  ;;  %v2649_v2 = vmul.f32 %v2647_v37, %v2647_v37 }
 0x9bf   :  { %v2651_v42 = vsel %vm76_vm1, %v2649_v2, 0.0  ;;  %v2650_v3 = vmul.f32 %v2648_v39, %v2648_v39 }
 0x9c0   :  { %2652 = vadd.xlane.f32.xlu1 %v2651_v42 }
 0x9c1   :  { %v2654_v9 = vsel %vm76_vm1, %v2650_v3, 0.0 }
 0x9c2   :  { %2655 = vadd.xlane.f32.xlu0 %v2654_v9 }
 0xa02   :  { %v2845_v63 = vpop.f32.mrb[40].mxu1 }
 0xa03   :  { %v9976_v4 = vpop.f32.mrb[41].mxu1 }
 0xa4d   :  { %v2653_v48 = vpop.xlane.xlu1 %2652 }
 0xa4e   :  { %v2657_v49 = vmul.f32 0.25, %v2653_v48 }
 0xa4f   :  { %v2656_v50 = vpop.xlane.xlu0 %2655 }
 0xa50   :  { %v2659_v52 = vadd.f32 1e-05, %v2657_v49  ;;  %v2658_v53 = vmul.f32 0.25, %v2656_v50 }
 0xa52   :  { %11176 = vrsqrt.f32 %v2659_v52  ;;  %v2660_v54 = vadd.f32 1e-05, %v2658_v53 }
 0xa54   :  { %11178 = vrsqrt.f32 %v2660_v54 }
 0xa5c   :  { %v11177_v55 = vpop.eup %11176 }
 0xa5d   :  { %v2663_v57 = vmul.f32 %v11177_v55, %v2647_v37 }
 0xa5e   :  { %v11179_v25 = vpop.eup %11178 }
 0xa5f   :  { %v2664_v58 = vmul.f32 %v11179_v25, %v2648_v39  ;;  %v2665_v59 = vmul.f32 %v2663_v57, %v2637_v56 }
 0xa61   :  { %v2666_v60 = vmul.f32 %v2664_v58, %v2637_v56  ;;  %v2667_v61 = vadd.f32 %v2665_v59, %v2638_v26 }
 0xa63   :  { %v2668_v62 = vadd.f32 %v2666_v60, %v2638_v26  ;;  %9967 = vmatprep.mubr.msk.f32.mxu0 %vm76_vm1, %v2667_v61 }
 0xa65   :  { %9968 = vmatmul.mubr.msk.f32.vlgmr.msra.gmra.mrb[36].mxu0 %vm76_vm1, %v2668_v62 }
 0xa66   :  { %10135 = vmatpush3.bf16.msra.mxu0 %v12087_v46  ;;  %9981 = vmatprep.mubr.msk.f32.mxu0 %vm11447_vm6, %v11448_v47 }
 0xa67   :  { %10139 = vmatprep.subr.bf16.mxu0 %v11446_v8 }
 0xb38   :  { %v9969_v12 = vpop.f32.mrb[36].mxu0 }
 0xb39   :  { %v2754_v13 = vadd.f32 %v9969_v12, %v2672_v7  ;;  %v2748_v14 = vpop.f32.mrb[37].mxu0 }
 0xb3a   :  { %v2749_v11 = vadd.f32 %v2748_v14, %v2672_v7 }
 0xb3b   :  { %v2773_v15 = vrot.slane %v2754_v13, 6  ;;  %v2874_v16 = vrot.slane %v2754_v13, 2 }
 0xb3c   :  { %v3198_v17 = vrot.slane %v2749_v11, 6  ;;  %v3305_v18 = vrot.slane %v2749_v11, 2 }
 0xb3d   :  { %v12108_v19 = vsel %vm2771_vm7, %v2749_v11, %v2773_v15  ;;  %v12110_v20 = vsel %vm2771_vm7, %v2749_v11, %v2874_v16 }
 0xb3e   :  { %v2849_v21 = vadd.f32 %v2845_v63, %v12108_v19  ;;  %v12113_v0 = vsel %vm2771_vm7, %v2754_v13, %v3198_v17  ;;  %v12115_v22 = vsel %vm2771_vm7, %v2754_v13, %v3305_v18  ;;  %vm3849_vm7 = vcmask 392192  }
 0xb40   :  { %11180 = vtanh.f32 %v2849_v21  ;;  %v9125_v41 = vmul.f32 -1.442695, %v2849_v21 }
 0xb42   :  { %11182 = vpow2.f32 %v9125_v41 }
 0xb4a   :  { %v11181_v40 = vpop.eup %11180 }
 0xb4b   :  { %2859 = vrot.lane.b32.xlu1 %v11181_v40, %s11449_s27 }
 0xb4c   :  { %v11183_v23 = vpop.eup %11182 }
 0xb4d   :  { %v2853_v24 = vadd.f32 1.0, %v11183_v23 }
 0xb4f   :  { %11184 = vrcp.f32 %v2853_v24 }
 0xb59   :  { %v11185_v27 = vpop.eup %11184 }
 0xb5a   :  { %v2857_v30 = vmul.f32 0.0, %v11185_v27 }
 0xbbd   :  { %v2860_v28 = vpop.permute.xlu1 %2859 }
 0xbbe   :  { %v2862_v29 = vmul.f32 %v11185_v27, %v2860_v28 }
 0xbc0   :  { %2864 = vrot.lane.b32.xlu0 %v2862_v29, %s11438_s16 }
 0xc32   :  { %v2865_v31 = vpop.permute.xlu0 %2864 }
 0xc33   :  { %v2867_v32 = vadd.f32 %v2865_v31, %v2857_v30 }
 0xc35   :  { %11186 = vtanh.f32 %v2867_v32  ;;  %v2964_v49 = vrot.slane %v2867_v32, 6 }
 0xc3f   :  { %v11187_v33 = vpop.eup %11186 }
 0xc40   :  { %2870 = vrot.lane.b32.xlu1 %v11187_v33, %s11438_s16 }
 0xcb2   :  { %v2871_v34 = vpop.permute.xlu1 %2870 }
 0xcb3   :  { %v12120_v35 = vmul.f32 %v11185_v27, %v2871_v34 }
 0xcb5   :  { %2878 = vrot.lane.b32.xlu1 %v12120_v35, %s11450_s28 }
 0xd27   :  { %v12124_v36 = vpop.permute.xlu1 %2878 }
 0xd28   :  { %9982 = vmatmul.mubr.msk.f32.vlgmr.msra.gmra.mrb[38].mxu0 %vm256_vm4, %v12124_v36 }
 0xd29   :  { %10141 = vmatpush3.bf16.msra.mxu0 %v12087_v46  ;;  %9995 = vmatprep.mubr.msk.f32.mxu0 %vm11447_vm6, %v11448_v47 }
 0xd2a   :  { %10145 = vmatprep.subr.bf16.mxu0 %v11446_v8 }
 0xdfb   :  { %v2948_v37 = vpop.f32.mrb[38].mxu0 }
 0xdfc   :  { %v2953_v38 = vrot.slane %v2948_v37, 6  ;;  %v9983_v39 = vpop.f32.mrb[39].mxu0 }
 0xdfe   :  { %v2955_v2 = vadd.f32 %v2953_v38, %v12110_v20 }
 0xe00   :  { %11188 = vtanh.f32 %v2955_v2  ;;  %v9127_v3 = vmul.f32 -1.442695, %v2955_v2 }
 0xe02   :  { %11190 = vpow2.f32 %v9127_v3 }
 0xe0a   :  { %v11189_v42 = vpop.eup %11188 }
 0xe0b   :  { %2968 = vrot.lane.b32.xlu0 %v11189_v42, %s11449_s27 }
 0xe0c   :  { %v11191_v9 = vpop.eup %11190 }
 0xe0d   :  { %v2959_v43 = vadd.f32 1.0, %v11191_v9 }
 0xe0f   :  { %11192 = vrcp.f32 %v2959_v43 }
 0xe19   :  { %v11193_v44 = vpop.eup %11192 }
 0xe1a   :  { %v2966_v50 = vmul.f32 %v11193_v44, %v2964_v49 }
 0xe7d   :  { %v2969_v45 = vpop.permute.xlu0 %2968 }
 0xe7e   :  { %v2971_v48 = vmul.f32 %v11193_v44, %v2969_v45 }
 0xe80   :  { %2973 = vrot.lane.b32.xlu1 %v2971_v48, %s11438_s16 }
 0xef2   :  { %v2974_v52 = vpop.permute.xlu1 %2973 }
 0xef3   :  { %v2976_v53 = vadd.f32 %v2974_v52, %v2966_v50 }
 0xef5   :  { %11194 = vtanh.f32 %v2976_v53  ;;  %v3071_v13 = vrot.slane %v2976_v53, 6 }
 0xeff   :  { %v11195_v54 = vpop.eup %11194 }
 0xf00   :  { %2979 = vrot.lane.b32.xlu0 %v11195_v54, %s11438_s16 }
 0xf72   :  { %v2980_v55 = vpop.permute.xlu0 %2979 }
 0xf73   :  { %v12136_v56 = vmul.f32 %v11193_v44, %v2980_v55 }
 0xf75   :  { %v2984_v57 = vrot.slane %v12136_v56, 2 }
 0xf77   :  { %2985 = vrot.lane.b32.xlu1 %v2984_v57, %s11450_s28 }
 0xfe9   :  { %v2986_v25 = vpop.permute.xlu1 %2985 }
 0xfea   :  { %9989 = vmatmul.mubr.msk.f32.vlgmr.msra.gmra.mrb[42].mxu1 %vm256_vm4, %v2986_v25 }
 0xfeb   :  { %10144 = vmatpush3.bf16.msra.mxu1 %v12087_v46  ;;  %10002 = vmatprep.mubr.msk.f32.mxu1 %vm11447_vm6, %v11448_v47 }
 0xfec   :  { %10148 = vmatprep.subr.bf16.mxu1 %v11446_v8 }
0x10bd   :  { %v3055_v26 = vpop.f32.mrb[42].mxu1 }
0x10be   :  { %v3060_v58 = vrot.slane %v3055_v26, 4  ;;  %v9990_v59 = vpop.f32.mrb[43].mxu1 }
0x10c0   :  { %v3062_v60 = vadd.f32 %v3060_v58, %v12108_v19 }
0x10c2   :  { %11196 = vtanh.f32 %v3062_v60  ;;  %v9129_v62 = vmul.f32 -1.442695, %v3062_v60 }
0x10c4   :  { %11198 = vpow2.f32 %v9129_v62 }
0x10cc   :  { %v11197_v61 = vpop.eup %11196 }
0x10cd   :  { %3075 = vrot.lane.b32.xlu0 %v11197_v61, %s11449_s27 }
0x10ce   :  { %v11199_v63 = vpop.eup %11198 }
0x10cf   :  { %v3066_v4 = vadd.f32 1.0, %v11199_v63 }
0x10d1   :  { %11200 = vrcp.f32 %v3066_v4 }
0x10db   :  { %v11201_v7 = vpop.eup %11200 }
0x10dc   :  { %v3073_v14 = vmul.f32 %v11201_v7, %v3071_v13 }
0x113f   :  { %v3076_v10 = vpop.permute.xlu0 %3075 }
0x1140   :  { %v3078_v12 = vmul.f32 %v11201_v7, %v3076_v10 }
0x1142   :  { %3080 = vrot.lane.b32.xlu1 %v3078_v12, %s11438_s16 }
0x11b4   :  { %v3081_v11 = vpop.permute.xlu1 %3080 }
0x11b5   :  { %v3083_v15 = vadd.f32 %v3081_v11, %v3073_v14 }
0x11b7   :  { %11202 = vtanh.f32 %v3083_v15 }
0x11c1   :  { %v11203_v16 = vpop.eup %11202 }
0x11c2   :  { %3086 = vrot.lane.b32.xlu0 %v11203_v16, %s11438_s16 }
0x1234   :  { %v3087_v17 = vpop.permute.xlu0 %3086 }
0x1235   :  { %v12149_v18 = vmul.f32 %v11201_v7, %v3087_v17 }
0x1237   :  { %v3091_v19 = vrot.slane %v12149_v18, 4 }
0x1239   :  { %3092 = vrot.lane.b32.xlu1 %v3091_v19, %s11450_s28 }
0x12ab   :  { %v3093_v21 = vpop.permute.xlu1 %3092 }
0x12ac   :  { %9996 = vmatmul.mubr.msk.f32.vlgmr.msra.gmra.mrb[40].mxu0 %vm256_vm4, %v3093_v21 }
0x12ad   :  { %10147 = vmatpush3.bf16.msra.mxu0 %v12087_v46  ;;  %10009 = vmatprep.mubr.msk.f32.mxu0 %vm11447_vm6, %v11448_v47 }
0x12ae   :  { %10151 = vmatprep.subr.bf16.mxu0 %v11446_v8  ;;  %v3178_v8 = vrot.slane %v3083_v15, 6 }
0x137f   :  { %v3162_v40 = vpop.f32.mrb[40].mxu0 }
0x1380   :  { %v3167_v41 = vrot.slane %v3162_v40, 2  ;;  %v9997_v23 = vpop.f32.mrb[41].mxu0 }
0x1382   :  { %v3169_v24 = vadd.f32 %v3167_v41, %v12110_v20 }
0x1384   :  { %11204 = vtanh.f32 %v3169_v24  ;;  %v9131_v28 = vmul.f32 -1.442695, %v3169_v24 }
0x1386   :  { %11206 = vpow2.f32 %v9131_v28 }
0x138e   :  { %v11205_v27 = vpop.eup %11204 }
0x138f   :  { %3182 = vrot.lane.b32.xlu0 %v11205_v27, %s11449_s27 }
0x1390   :  { %v11207_v29 = vpop.eup %11206 }
0x1391   :  { %v3173_v30 = vadd.f32 1.0, %v11207_v29 }
0x1393   :  { %11208 = vrcp.f32 %v3173_v30 }
0x139d   :  { %v11209_v31 = vpop.eup %11208 }
0x139e   :  { %v3180_v34 = vmul.f32 %v11209_v31, %v3178_v8 }
0x1401   :  { %v3183_v32 = vpop.permute.xlu0 %3182 }
0x1402   :  { %v3185_v33 = vmul.f32 %v11209_v31, %v3183_v32 }
0x1404   :  { %3187 = vrot.lane.b32.xlu1 %v3185_v33, %s11438_s16 }
0x1476   :  { %v3188_v37 = vpop.permute.xlu1 %3187 }
0x1477   :  { %v3190_v38 = vadd.f32 %v3188_v37, %v3180_v34 }
0x1479   :  { %11210 = vtanh.f32 %v3190_v38  ;;  %v3286_v55 = vrot.slane %v3190_v38, 6 }
0x1483   :  { %v11211_v20 = vpop.eup %11210 }
0x1484   :  { %3193 = vrot.lane.b32.xlu0 %v11211_v20, %s11438_s16 }
0x14f6   :  { %v3194_v39 = vpop.permute.xlu0 %3193 }
0x14f7   :  { %v12162_v2 = vmul.f32 %v11209_v31, %v3194_v39 }
0x14f9   :  { %v3202_v42 = vrot.slane %v12162_v2, 6 }
0x14fb   :  { %3203 = vrot.lane.b32.xlu1 %v3202_v42, %s11450_s28 }
0x156d   :  { %v12166_v3 = vpop.permute.xlu1 %3203 }
0x156e   :  { %10003 = vmatmul.mubr.msk.f32.vlgmr.msra.gmra.mrb[44].mxu1 %vm256_vm4, %v12166_v3 }
0x156f   :  { %10150 = vmatpush3.bf16.msra.mxu1 %v12087_v46  ;;  %10016 = vmatprep.mubr.msk.f32.mxu1 %vm11447_vm6, %v11448_v47 }
0x1641   :  { %v3273_v9 = vpop.f32.mrb[44].mxu1 }
0x1642   :  { %v3277_v43 = vadd.f32 %v3273_v9, %v12113_v0  ;;  %v10004_v44 = vpop.f32.mrb[45].mxu1 }
0x1644   :  { %11212 = vtanh.f32 %v3277_v43  ;;  %v9133_v48 = vmul.f32 -1.442695, %v3277_v43 }
0x1646   :  { %11214 = vpow2.f32 %v9133_v48 }
0x164e   :  { %v11213_v45 = vpop.eup %11212 }
0x164f   :  { %3290 = vrot.lane.b32.xlu0 %v11213_v45, %s11449_s27 }
0x1650   :  { %v11215_v49 = vpop.eup %11214 }
0x1651   :  { %v3281_v50 = vadd.f32 1.0, %v11215_v49 }
0x1653   :  { %11216 = vrcp.f32 %v3281_v50 }
0x165d   :  { %v11217_v52 = vpop.eup %11216 }
0x165e   :  { %v3288_v57 = vmul.f32 %v11217_v52, %v3286_v55 }
0x16c1   :  { %v3291_v53 = vpop.permute.xlu0 %3290 }
0x16c2   :  { %v3293_v54 = vmul.f32 %v11217_v52, %v3291_v53 }
0x16c4   :  { %3295 = vrot.lane.b32.xlu1 %v3293_v54, %s11438_s16 }
0x1736   :  { %v3296_v25 = vpop.permute.xlu1 %3295 }
0x1737   :  { %v3298_v26 = vadd.f32 %v3296_v25, %v3288_v57 }
0x1739   :  { %11218 = vtanh.f32 %v3298_v26  ;;  %v3395_v16 = vrot.slane %v3298_v26, 6 }
0x1743   :  { %v11219_v58 = vpop.eup %11218 }
0x1744   :  { %3301 = vrot.lane.b32.xlu0 %v11219_v58, %s11438_s16 }
0x17b6   :  { %v3302_v59 = vpop.permute.xlu0 %3301 }
0x17b7   :  { %v12177_v60 = vmul.f32 %v11217_v52, %v3302_v59 }
0x17b9   :  { %3309 = vrot.lane.b32.xlu1 %v12177_v60, %s11450_s28 }
0x182b   :  { %v12181_v61 = vpop.permute.xlu1 %3309 }
0x182c   :  { %10010 = vmatmul.mubr.msk.f32.vlgmr.msra.gmra.mrb[42].mxu0 %vm256_vm4, %v12181_v61 }
0x182d   :  { %10153 = vmatpush3.bf16.msra.mxu0 %v12087_v46  ;;  %10023 = vmatprep.mubr.msk.f32.mxu0 %vm11447_vm6, %v11448_v47 }
0x18ff   :  { %v3379_v62 = vpop.f32.mrb[42].mxu0 }
0x1900   :  { %v3384_v63 = vrot.slane %v3379_v62, 6  ;;  %v10011_v4 = vpop.f32.mrb[43].mxu0 }
0x1902   :  { %v3386_v7 = vadd.f32 %v3384_v63, %v12115_v22 }
0x1904   :  { %11220 = vtanh.f32 %v3386_v7  ;;  %v9135_v12 = vmul.f32 -1.442695, %v3386_v7  ;;  %v3666_v7 = vrot.slane %v12149_v18, 2 }
0x1906   :  { %11222 = vpow2.f32 %v9135_v12 }
0x190e   :  { %v11221_v10 = vpop.eup %11220 }
0x190f   :  { %3399 = vrot.lane.b32.xlu0 %v11221_v10, %s11449_s27 }
0x1910   :  { %v11223_v13 = vpop.eup %11222 }
0x1911   :  { %v3390_v14 = vadd.f32 1.0, %v11223_v13 }
0x1913   :  { %11224 = vrcp.f32 %v3390_v14 }
0x191d   :  { %v11225_v11 = vpop.eup %11224 }
0x191e   :  { %v3397_v17 = vmul.f32 %v11225_v11, %v3395_v16  ;;  %v3694_v16 = vld [vmem:[#allocation2 + $0x1a0] sm:$0xff] }
0x1981   :  { %v3400_v15 = vpop.permute.xlu0 %3399 }
0x1982   :  { %v3402_v46 = vmul.f32 %v11225_v11, %v3400_v15  ;;  %v3697_v15 = vld [vmem:[#allocation2 + $0x1c8] sm:$0xff] }
0x1984   :  { %3404 = vrot.lane.b32.xlu1 %v3402_v46, %s11438_s16 }
0x19f6   :  { %v3405_v19 = vpop.permute.xlu1 %3404 }
0x19f7   :  { %v3407_v21 = vadd.f32 %v3405_v19, %v3397_v17  ;;  %v3696_v17 = vld [vmem:[#allocation2 + $0x1c0] sm:$0xff] }
0x19f8   :  { %v10156_v19 = vpack.c.bf16 %v3696_v17, %v3694_v16 }
0x19f9   :  { %11226 = vtanh.f32 %v3407_v21  ;;  %v3502_v39 = vrot.slane %v3407_v21, 6  ;;  %v3699_v21 = vld [vmem:[#allocation2 + $0x1e8] sm:$0xff] }
0x1a03   :  { %v11227_v40 = vpop.eup %11226 }
0x1a04   :  { %3410 = vrot.lane.b32.xlu0 %v11227_v40, %s11438_s16  ;;  %v3701_v40 = vld [vmem:[#allocation2 + $0x208] sm:$0xff] }
0x1a76   :  { %v3411_v41 = vpop.permute.xlu0 %3410 }
0x1a77   :  { %v12192_v23 = vmul.f32 %v11225_v11, %v3411_v41  ;;  %v12225_v41 = vpack.c.bf16 %v3701_v40, %v3699_v21 }
0x1a79   :  { %v3415_v24 = vrot.slane %v12192_v23, 2  ;;  %v3647_v4 = vrot.slane %v12192_v23, 6  ;;  %10183 = vmatprep.subr.bf16.mxu0 %v12225_v41 }
0x1a7b   :  { %3416 = vrot.lane.b32.xlu1 %v3415_v24, %s11450_s28  ;;  %v3700_v24 = vld [vmem:[#allocation2 + $0x200] sm:$0xff] }
0x1aed   :  { %v3417_v27 = vpop.permute.xlu1 %3416 }
0x1aee   :  { %10017 = vmatmul.mubr.msk.f32.vlgmr.msra.gmra.mrb[46].mxu1 %vm256_vm4, %v3417_v27  ;;  %v3705_v27 = vld [vmem:[#allocation2 + $0x248] sm:$0xff] }
0x1aef   :  { %3793 = vmatprep.mubr.f32.mxu1 %v11448_v47 }
0x1bc1   :  { %v3486_v28 = vpop.f32.mrb[46].mxu1 }
0x1bc2   :  { %v3491_v29 = vrot.slane %v3486_v28, 4  ;;  %v10018_v30 = vpop.f32.mrb[47].mxu1 }
0x1bc3   :  { %v3704_v30 = vld [vmem:[#allocation2 + $0x240] sm:$0xff] }
0x1bc4   :  { %v3493_v31 = vadd.f32 %v3491_v29, %v12113_v0  ;;  %v3702_v29 = vld [vmem:[#allocation2 + $0x220] sm:$0xff] }
0x1bc6   :  { %11228 = vtanh.f32 %v3493_v31  ;;  %v9137_v33 = vmul.f32 -1.442695, %v3493_v31 }
0x1bc8   :  { %11230 = vpow2.f32 %v9137_v33 }
0x1bd0   :  { %v11229_v32 = vpop.eup %11228 }
0x1bd1   :  { %3506 = vrot.lane.b32.xlu0 %v11229_v32, %s11449_s27  ;;  %v12234_v32 = vpack.c.bf16 %v3704_v30, %v3702_v29 }
0x1bd2   :  { %v11231_v8 = vpop.eup %11230 }
0x1bd3   :  { %v3497_v34 = vadd.f32 1.0, %v11231_v8  ;;  %v3707_v8 = vld [vmem:[#allocation2 + $0x268] sm:$0xff] }
0x1bd5   :  { %11232 = vrcp.f32 %v3497_v34  ;;  %v3709_v34 = vld [vmem:[#allocation2 + $0x288] sm:$0xff] }
0x1bdf   :  { %v11233_v37 = vpop.eup %11232 }
0x1be0   :  { %v3504_v42 = vmul.f32 %v11233_v37, %v3502_v39  ;;  %v3708_v39 = vld [vmem:[#allocation2 + $0x280] sm:$0xff] }
0x1c43   :  { %v3507_v38 = vpop.permute.xlu0 %3506 }
0x1c44   :  { %v3509_v20 = vmul.f32 %v11233_v37, %v3507_v38 }
0x1c46   :  { %3511 = vrot.lane.b32.xlu1 %v3509_v20, %s11438_s16  ;;  %v12239_v20 = vpack.c.bf16 %v3709_v34, %v3707_v8 }
0x1cb8   :  { %v3512_v9 = vpop.permute.xlu1 %3511 }
0x1cb9   :  { %v3514_v43 = vadd.f32 %v3512_v9, %v3504_v42  ;;  %v3674_v9 = vrot.slane %v12136_v56, 6 }
0x1cbb   :  { %11234 = vtanh.f32 %v3514_v43  ;;  %v3609_v10 = vrot.slane %v3514_v43, 6  ;;  %v3682_v43 = vrot.slane %v12120_v35, 2 }
0x1cc5   :  { %v11235_v0 = vpop.eup %11234 }
0x1cc6   :  { %3517 = vrot.lane.b32.xlu0 %v11235_v0, %s11438_s16 }
0x1d38   :  { %v3518_v44 = vpop.permute.xlu0 %3517 }
0x1d39   :  { %v3520_v45 = vmul.f32 %v11233_v37, %v3518_v44  ;;  %v3706_v37 = vld [vmem:[#allocation2 + $0x260] sm:$0xff] }
0x1d3a   :  { %v12241_v42 = vpack.c.bf16 %v3708_v39, %v3706_v37 }
0x1d3b   :  { %v3522_v48 = vrot.slane %v3520_v45, 4  ;;  %v3639_v63 = vrot.slane %v3520_v45, 2 }
0x1d3d   :  { %3523 = vrot.lane.b32.xlu1 %v3522_v48, %s11450_s28 }
0x1daf   :  { %v3524_v49 = vpop.permute.xlu1 %3523 }
0x1db0   :  { %10024 = vmatmul.mubr.msk.f32.vlgmr.msra.gmra.mrb[44].mxu0 %vm256_vm4, %v3524_v49 }
0x1db1   :  { %4160 = vmatprep.mubr.f32.mxu0 %v11448_v47 }
0x1e83   :  { %v3593_v50 = vpop.f32.mrb[44].mxu0 }
0x1e84   :  { %v3598_v52 = vrot.slane %v3593_v50, 2  ;;  %v10025_v53 = vpop.f32.mrb[45].mxu0 }
0x1e86   :  { %v3600_v54 = vadd.f32 %v3598_v52, %v12115_v22  ;;  %v3655_v22 = vrot.slane %v12177_v60, 2  ;;  %v3695_v60 = vld [vmem:[#allocation2 + $0x1a8] sm:$0xff] }
0x1e87   :  { %v10154_v46 = vpack.c.bf16 %v3697_v15, %v3695_v60 }
0x1e88   :  { %11236 = vtanh.f32 %v3600_v54  ;;  %v9139_v57 = vmul.f32 -1.442695, %v3600_v54 }
0x1e89   :  { %10155 = vmatprep.subr.bf16.mxu1 %v10154_v46 }
0x1e8a   :  { %11238 = vpow2.f32 %v9139_v57  ;;  %10157 = vmatpush1.bf16.msra.mxu1 %v10156_v19 }
0x1e8b   :  { %10159 = vmatprep.subr.bf16.mxu1 %v12225_v41 }
0x1e92   :  { %v11237_v55 = vpop.eup %11236 }
0x1e93   :  { %3613 = vrot.lane.b32.xlu0 %v11237_v55, %s11449_s27 }
0x1e94   :  { %v11239_v25 = vpop.eup %11238 }
0x1e95   :  { %v3604_v26 = vadd.f32 1.0, %v11239_v25 }
0x1e97   :  { %11240 = vrcp.f32 %v3604_v26 }
0x1ea1   :  { %v11241_v58 = vpop.eup %11240 }
0x1ea2   :  { %v3611_v12 = vmul.f32 %v11241_v58, %v3609_v10 }
0x1f05   :  { %v3614_v59 = vpop.permute.xlu0 %3613 }
0x1f06   :  { %v3616_v62 = vmul.f32 %v11241_v58, %v3614_v59 }
0x1f08   :  { %3618 = vrot.lane.b32.xlu1 %v3616_v62, %s11438_s16 }
0x1f0c   :  { %3640 = vrot.lane.b32.xlu1 %v3639_v63, %s11450_s28 }
0x1f10   :  { %3648 = vrot.lane.b32.xlu1 %v3647_v4, %s11450_s28 }
0x1f14   :  { %3656 = vrot.lane.b32.xlu1 %v3655_v22, %s11450_s28 }
0x1f18   :  { %3667 = vrot.lane.b32.xlu1 %v3666_v7, %s11450_s28 }
0x1f7a   :  { %v3619_v13 = vpop.permute.xlu1 %3618 }
0x1f7b   :  { %v3621_v14 = vadd.f32 %v3619_v13, %v3611_v12 }
0x1f7d   :  { %11242 = vtanh.f32 %v3621_v14 }
0x1f7e   :  { %v3641_v0 = vpop.permute.xlu1 %3640 }
0x1f87   :  { %v11243_v11 = vpop.eup %11242 }
0x1f88   :  { %3624 = vrot.lane.b32.xlu0 %v11243_v11, %s11438_s16 }
0x1f8c   :  { %3636 = vrot.lane.b32.xlu0 %v12136_v56, %s11450_s28 }
0x1f90   :  { %3644 = vrot.lane.b32.xlu0 %v12149_v18, %s11450_s28  ;;  %v3698_v18 = vld [vmem:[#allocation2 + $0x1e0] sm:$0xff] }
0x1f94   :  { %3652 = vrot.lane.b32.xlu0 %v12162_v2, %s11450_s28  ;;  %v12227_v2 = vpack.c.bf16 %v3700_v24, %v3698_v18  ;;  %v3711_v18 = vld [vmem:[#allocation2 + $0x2a0] ss:$8 sm:$0x3]  ;;  %v12298_v24 = vsub.s32 1, %v11732_v1 }
0x1f96   :  { %10185 = vmatpush1.bf16.msra.mxu0 %v12227_v2  ;;  %v3720_v30 = vrot.slane %v3711_v18, %v12298_v24 }
0x1f98   :  { %3663 = vrot.lane.b32.xlu0 %v12192_v23, %s11450_s28  ;;  %v3703_v23 = vld [vmem:[#allocation2 + $0x228] sm:$0xff] }
0x1f99   :  { %v12231_v28 = vpack.c.bf16 %v3705_v27, %v3703_v23  ;;  %v3716_v23 = vrot.slane %v3711_v18, %v11735_v5 }
0x1f9b   :  { %10187 = vmatprep.subr.bf16.mxu0 %v12231_v28 }
0x1f9c   :  { %3671 = vrot.lane.b32.xlu0 %v3520_v45, %s11450_s28  ;;  %10189 = vmatpush1.bf16.msra.mxu0 %v12234_v32  ;;  %v3649_v45 = vpop.permute.xlu1 %3648 }
0x1f9d   :  { %10191 = vmatprep.subr.bf16.mxu0 %v12239_v20 }
0x1fa0   :  { %10193 = vmatpush1.bf16.msra.mxu0 %v12241_v42  ;;  %v3657_v49 = vpop.permute.xlu1 %3656 }
0x1fa1   :  { %10207 = vmatprep.subr.bf16.mxu0 %v12225_v41 }
0x1fa4   :  { %v3668_v52 = vpop.permute.xlu1 %3667 }
0x1ffa   :  { %v3625_v31 = vpop.permute.xlu0 %3624 }
0x1ffb   :  { %v3627_v33 = vmul.f32 %v11241_v58, %v3625_v31 }
0x1ffd   :  { %v3630_v38 = vrot.slane %v3627_v33, 6  ;;  %3679 = vrot.lane.b32.xlu0 %v3627_v33, %s11450_s28 }
0x1ffe   :  { %v3637_v44 = vpop.permute.xlu0 %3636 }
0x1fff   :  { %3631 = vrot.lane.b32.xlu1 %v3630_v38, %s11450_s28  ;;  %v3643_v56 = vsel %vm3634_vm8, %v3637_v44, %v3641_v0 }
0x2002   :  { %v3645_v48 = vpop.permute.xlu0 %3644 }
0x2003   :  { %3675 = vrot.lane.b32.xlu1 %v3674_v9, %s11450_s28  ;;  %v3651_v35 = vsel %vm3634_vm8, %v3645_v48, %v3649_v45 }
0x2006   :  { %v3653_v50 = vpop.permute.xlu0 %3652 }
0x2007   :  { %3683 = vrot.lane.b32.xlu1 %v3682_v43, %s11450_s28  ;;  %v3659_v25 = vsel %vm3634_vm8, %v3653_v50, %v3657_v49 }
0x200a   :  { %v3664_v53 = vpop.permute.xlu0 %3663 }
0x200b   :  { %v3670_v63 = vsel %vm3634_vm8, %v3664_v53, %v3668_v52 }
0x200e   :  { %v3672_v58 = vpop.permute.xlu0 %3671 }
0x206f   :  { %v3680_v7 = vpop.permute.xlu0 %3679 }
0x2071   :  { %v3632_v54 = vpop.permute.xlu1 %3631 }
0x2072   :  { %v3635_v55 = vsel %vm3634_vm8, %v12124_v36, %v3632_v54  ;;  %v3662_v36 = vsel %vm3634_vm8, %v12181_v61, %v12166_v3  ;;  %v3806_v3 = vadd.s32 128, %v12105_v6 }
0x2073   :  { %v3687_v57 = vsel %vm841_vm5, %v3635_v55, %v3643_v56  ;;  %v3691_v22 = vsel %vm841_vm5, %v3662_v36, %v3670_v63  ;;  %v12288_v61 = vmul.u32.u64.low 2863311531, %v12105_v6  ;;  %v12289_v11 = vmul.u32.u64.high 2863311531, %v12105_v6, %v12288_v61 }
0x2074   :  { %v3688_v26 = vsel %vm83_vm0, %v3687_v57, %v3651_v35  ;;  %v12291_v60 = vmul.u32.u64.low 2863311531, %v3806_v3  ;;  %v12292_v15 = vmul.u32.u64.high 2863311531, %v3806_v3, %v12291_v60 }
0x2075   :  { %v3676_v59 = vpop.permute.xlu1 %3675  ;;  %v3690_v62 = vsel %vm3689_vm9, %v3688_v26, %v3659_v25  ;;  %v3813_v46 = vshrl.u32 %v12289_v11, 5 }
0x2076   :  { %9140 = vmatmul.mubr.msk.f32.vlgmr.msra.gmra.mrb[48].mxu1 %vm256_vm4, %v3690_v62  ;;  %v3678_v4 = vsel %vm3634_vm8, %v3672_v58, %v3676_v59  ;;  %v3824_v16 = vshrl.u32 %v12292_v15, 5 }
0x2077   :  { %10161 = vmatpush1.bf16.msra.mxu1 %v12227_v2  ;;  %3799 = vmatprep.mubr.f32.mxu1 %v11448_v47  ;;  %v3692_v12 = vsel %vm83_vm0, %v3691_v22, %v3678_v4  ;;  %v3814_v17 = vmul.u32 48, %v3813_v46 }
0x2078   :  { %10163 = vmatprep.subr.bf16.mxu1 %v12231_v28  ;;  %v3825_v19 = vmul.u32 48, %v3824_v16 }
0x2079   :  { %v3684_v10 = vpop.permute.xlu1 %3683  ;;  %v3815_v21 = vsub.s32 %v12105_v6, %v3814_v17 }
0x207a   :  { %v3686_v13 = vsel %vm3634_vm8, %v3680_v7, %v3684_v10  ;;  %v3826_v40 = vsub.s32 %v3806_v3, %v3825_v19 }
0x207b   :  { %10165 = vmatpush1.bf16.msra.mxu1 %v12234_v32  ;;  %v3693_v14 = vsel %vm3689_vm9, %v3692_v12, %v3686_v13  ;;  %vm3829_vm10 = vcmp.ne.s32.totalorder %v3815_v21, 0  ;;  %vm3831_vm11 = vcmp.lt.s32.totalorder %v3815_v21, 0  ;;  %v3835_v27 = vadd.s32 48, %v3815_v21 }
0x207c   :  { %9141 = vmatmul.mubr.msk.f32.gmra.mrb[50].mxu1 %vm256_vm4, %v3693_v14  ;;  %10167 = vmatprep.subr.bf16.mxu1 %v12239_v20  ;;  %vm3830_vm12 = vcmp.ne.s32.totalorder %v3826_v40, 0  ;;  %vm3832_vm13 = vcmp.lt.s32.totalorder %v3826_v40, 0  ;;  %vm3833_vm14 = vmand %vm3831_vm11, %vm3829_vm10  ;;  %v3836_v31 = vadd.s32 48, %v3826_v40  ;;  %vm4846_vm10 = vcmask 195584  }
0x207d   :  { %3916 = vmatprep.mubr.f32.mxu1 %v11448_v47  ;;  %vm3834_vm15 = vmand %vm3832_vm13, %vm3830_vm12  ;;  %v3837_v8 = vsel %vm3833_vm14, %v3835_v27, %v3815_v21  ;;  %vm5322_vm13 = vcmask 523264  }
0x207e   :  { %v3838_v37 = vsel %vm3834_vm15, %v3836_v31, %v3826_v40  ;;  %vm12302_vm1 = vcmp.lt.s32.totalorder %v3837_v8, 24  ;;  %vm9211_vm14 = vmneg %vm5322_vm13  ;;  %vm11453_vm15 = vmmov 1  }
0x207f   :  { %10169 = vmatpush1.bf16.msra.mxu1 %v12241_v42  ;;  %vm12306_vm2 = vcmp.lt.s32.totalorder %v3838_v37, 24 }
0x2080   :  { %10171 = vmatprep.subr.bf16.mxu1 %v12225_v41 }
0x2082   :  { %3917 = vmatmul.mubr.f32.vlgmr.msra.gmra.mrb[52].mxu1 %v11448_v47 }
0x2083   :  { %10173 = vmatpush1.bf16.msra.mxu1 %v12227_v2  ;;  %4036 = vmatprep.mubr.f32.mxu1 %v11448_v47 }
0x2084   :  { %10175 = vmatprep.subr.bf16.mxu1 %v12231_v28 }
0x2087   :  { %10177 = vmatpush1.bf16.msra.mxu1 %v12234_v32 }
0x2088   :  { %10179 = vmatprep.subr.bf16.mxu1 %v12239_v20 }
0x208b   :  { %10181 = vmatpush1.bf16.msra.mxu1 %v12241_v42 }
0x208c   :  { %10195 = vmatprep.subr.bf16.mxu1 %v12225_v41 }
0x2149   :  { %v3795_v29 = vpop.f32.mrb[48].mxu1 }
0x214a   :  { %v3797_v33 = vpop.f32.mrb[49].mxu1  ;;  %v3796_v6 = vadd.f32 %v3795_v29, %v3716_v23 }
0x214b   :  { %v3798_v34 = vadd.f32 %v3797_v33, %v3720_v30 }
0x214c   :  { %v4335_v44 = vrot.slane %v3796_v6, 6  ;;  %v4459_v45 = vrot.slane %v3796_v6, 2 }
0x214d   :  { %v4336_v49 = vrot.slane %v3798_v34, 6  ;;  %v4460_v50 = vrot.slane %v3798_v34, 2 }
0x214f   :  { %v3801_v38 = vpop.f32.mrb[50].mxu1 }
0x2150   :  { %v3802_v9 = vadd.f32 %v3801_v38, %v3716_v23  ;;  %v3803_v43 = vpop.f32.mrb[51].mxu1 }
0x2151   :  { %v3804_v48 = vadd.f32 %v3803_v43, %v3720_v30 }
0x2152   :  { %v3843_v52 = vrot.slane %v3802_v9, 6  ;;  %v3956_v53 = vrot.slane %v3802_v9, 2  ;;  %v12312_v54 = vsel %vm12302_vm1, %v3802_v9, %v4335_v44  ;;  %v12316_v56 = vsel %vm12302_vm1, %v3802_v9, %v4459_v45 }
0x2153   :  { %v3844_v55 = vrot.slane %v3804_v48, 6  ;;  %v3957_v35 = vrot.slane %v3804_v48, 2  ;;  %v12320_v57 = vsel %vm12306_vm2, %v3804_v48, %v4336_v49  ;;  %v12324_v25 = vsel %vm12306_vm2, %v3804_v48, %v4460_v50 }
0x2154   :  { %v12328_v26 = vsel %vm12302_vm1, %v3796_v6, %v3843_v52  ;;  %v12332_v58 = vsel %vm12302_vm1, %v3796_v6, %v3956_v53  ;;  %vm9212_vm1 = vmpackc.low %vm11453_vm15, %vm9211_vm14 }
0x2155   :  { %v3918_v59 = vpop.f32.mrb[52].mxu1  ;;  %v12336_v62 = vsel %vm12306_vm2, %v3798_v34, %v3844_v55  ;;  %v12340_v63 = vsel %vm12306_vm2, %v3798_v34, %v3957_v35 }
0x2156   :  { %v3920_v4 = vpop.f32.mrb[53].mxu1  ;;  %v3923_v7 = vadd.f32 %v3918_v59, %v12328_v26 }
0x2157   :  { %v3924_v36 = vadd.f32 %v3920_v4, %v12336_v62 }
0x2158   :  { %v9142_v10 = vmul.f32 -1.442695, %v3923_v7 }
0x2159   :  { %11244 = vtanh.f32 %v3924_v36  ;;  %v9143_v16 = vmul.f32 -1.442695, %v3924_v36 }
0x215a   :  { %11246 = vpow2.f32 %v9142_v10 }
0x2163   :  { %v11245_v22 = vpop.eup %11244 }
0x2164   :  { %3940 = vrot.lane.b32.xlu0 %v11245_v22, %s11451_s1  ;;  %v11247_v12 = vpop.eup %11246 }
0x2165   :  { %v3931_v13 = vadd.f32 1.0, %v11247_v12 }
0x2167   :  { %11248 = vrcp.f32 %v3931_v13 }
0x2171   :  { %v11249_v14 = vpop.eup %11248 }
0x2172   :  { %v3938_v11 = vmul.f32 0.0, %v11249_v14 }
0x21d6   :  { %v3941_v3 = vpop.permute.xlu0 %3940 }
0x21d7   :  { %v3943_v61 = vmul.f32 %v11249_v14, %v3941_v3 }
0x21d9   :  { %3945 = vrot.lane.b32.xlu1 %v3943_v61, %s11452_s30 }
0x224b   :  { %v3946_v60 = vpop.permute.xlu1 %3945 }
0x224c   :  { %v3948_v15 = vadd.f32 %v3946_v60, %v3938_v11 }
0x224e   :  { %11250 = vtanh.f32 %v3948_v15  ;;  %v4065_v52 = vrot.slane %v3948_v15, 6 }
0x224f   :  { %11252 = vpow2.f32 %v9143_v16 }
0x2258   :  { %v11251_v46 = vpop.eup %11250 }
0x2259   :  { %3951 = vrot.lane.b32.xlu0 %v11251_v46, %s11452_s30  ;;  %v11253_v17 = vpop.eup %11252 }
0x225a   :  { %v3932_v19 = vadd.f32 1.0, %v11253_v17 }
0x225c   :  { %11254 = vrcp.f32 %v3932_v19 }
0x2266   :  { %v11255_v21 = vpop.eup %11254 }
0x22cb   :  { %v3952_v40 = vpop.permute.xlu0 %3951 }
0x22cc   :  { %v3955_v18 = vmul.f32 %v11255_v21, %v3952_v40  ;;  %v3954_v23 = vmul.f32 %v11249_v14, %v3952_v40 }
0x22ce   :  { %3966 = vrot.lane.b32.xlu0 %v3955_v18, %s11435_s25  ;;  %v4915_v27 = vrot.slane %v3955_v18, 2  ;;  %3964 = vrot.lane.b32.xlu1 %v3954_v23, %s11435_s25  ;;  %v4914_v29 = vrot.slane %v3954_v23, 2 }
0x22d0   :  { %v12349_v30 = vpack.i.bf16 %v4915_v27, %v4914_v29 }
0x2340   :  { %v3967_v31 = vpop.permute.xlu0 %3966  ;;  %v12351_v33 = vpop.permute.xlu1 %3964 }
0x2341   :  { %v3969_v6 = vsel %vm3968_vm3, %v12351_v33, %v3967_v31 }
0x2342   :  { %9144 = vmatmul.mubr.msk.f32.vlgmr.msra.gmra.mrb[54].mxu1 %vm3849_vm7, %v3969_v6 }
0x2343   :  { %10197 = vmatpush1.bf16.msra.mxu1 %v12227_v2  ;;  %4284 = vmatprep.mubr.f32.mxu1 %v11448_v47 }
0x2344   :  { %10199 = vmatprep.subr.bf16.mxu1 %v12231_v28 }
0x2347   :  { %10201 = vmatpush1.bf16.msra.mxu1 %v12234_v32 }
0x2348   :  { %10203 = vmatprep.subr.bf16.mxu1 %v12239_v20 }
0x234b   :  { %10205 = vmatpush1.bf16.msra.mxu1 %v12241_v42 }
0x234c   :  { %10219 = vmatprep.subr.bf16.mxu1 %v12225_v41 }
0x2415   :  { %v4038_v8 = vpop.f32.mrb[54].mxu1 }
0x2416   :  { %v4040_v34 = vpop.f32.mrb[55].mxu1  ;;  %v4045_v9 = vrot.slane %v4038_v8, 6 }
0x2417   :  { %v4046_v37 = vrot.slane %v4040_v34, 6 }
0x2418   :  { %v4049_v43 = vadd.f32 %v4045_v9, %v12332_v58 }
0x2419   :  { %v4050_v38 = vadd.f32 %v4046_v37, %v12340_v63 }
0x241a   :  { %v9145_v0 = vmul.f32 -1.442695, %v4049_v43 }
0x241b   :  { %11256 = vtanh.f32 %v4050_v38  ;;  %v9146_v4 = vmul.f32 -1.442695, %v4050_v38 }
0x241c   :  { %11258 = vpow2.f32 %v9145_v0 }
0x2425   :  { %v11257_v39 = vpop.eup %11256 }
0x2426   :  { %4069 = vrot.lane.b32.xlu1 %v11257_v39, %s11451_s1  ;;  %v11259_v44 = vpop.eup %11258 }
0x2427   :  { %v4057_v45 = vadd.f32 1.0, %v11259_v44 }
0x2429   :  { %11260 = vrcp.f32 %v4057_v45 }
0x2433   :  { %v11261_v48 = vpop.eup %11260 }
0x2434   :  { %v4067_v53 = vmul.f32 %v11261_v48, %v4065_v52 }
0x2498   :  { %v4070_v49 = vpop.permute.xlu1 %4069 }
0x2499   :  { %v4072_v50 = vmul.f32 %v11261_v48, %v4070_v49 }
0x249b   :  { %4074 = vrot.lane.b32.xlu0 %v4072_v50, %s11452_s30 }
0x250d   :  { %v4075_v55 = vpop.permute.xlu0 %4074 }
0x250e   :  { %v4077_v35 = vadd.f32 %v4075_v55, %v4067_v53 }
0x2510   :  { %11262 = vtanh.f32 %v4077_v35  ;;  %v4189_v8 = vrot.slane %v4077_v35, 6 }
0x2511   :  { %11264 = vpow2.f32 %v9146_v4 }
0x251a   :  { %v11263_v59 = vpop.eup %11262 }
0x251b   :  { %4080 = vrot.lane.b32.xlu1 %v11263_v59, %s11452_s30  ;;  %v11265_v36 = vpop.eup %11264 }
0x251c   :  { %v4058_v22 = vadd.f32 1.0, %v11265_v36 }
0x251e   :  { %11266 = vrcp.f32 %v4058_v22 }
0x2528   :  { %v11267_v7 = vpop.eup %11266 }
0x258d   :  { %v4081_v10 = vpop.permute.xlu1 %4080 }
0x258e   :  { %v12368_v12 = vmul.f32 %v11261_v48, %v4081_v10  ;;  %v12370_v13 = vmul.f32 %v11267_v7, %v4081_v10 }
0x2590   :  { %v4087_v14 = vrot.slane %v12368_v12, 2  ;;  %v4088_v3 = vrot.slane %v12370_v13, 2 }
0x2592   :  { %4089 = vrot.lane.b32.xlu0 %v4087_v14, %s11435_s25  ;;  %4091 = vrot.lane.b32.xlu1 %v4088_v3, %s11435_s25 }
0x2604   :  { %v4090_v61 = vpop.permute.xlu0 %4089  ;;  %v4092_v11 = vpop.permute.xlu1 %4091 }
0x2605   :  { %v4093_v60 = vsel %vm3968_vm3, %v4090_v61, %v4092_v11 }
0x2606   :  { %9147 = vmatmul.mubr.msk.f32.vlgmr.msra.gmra.mrb[46].mxu0 %vm3849_vm7, %v4093_v60 }
0x2607   :  { %10209 = vmatpush1.bf16.msra.mxu0 %v12227_v2  ;;  %4416 = vmatprep.mubr.f32.mxu0 %v11448_v47 }
0x2608   :  { %10211 = vmatprep.subr.bf16.mxu0 %v12231_v28 }
0x260b   :  { %10213 = vmatpush1.bf16.msra.mxu0 %v12234_v32 }
0x260c   :  { %10215 = vmatprep.subr.bf16.mxu0 %v12239_v20 }
0x260f   :  { %10217 = vmatpush1.bf16.msra.mxu0 %v12241_v42 }
0x2610   :  { %10231 = vmatprep.subr.bf16.mxu0 %v12225_v41 }
0x26d9   :  { %v4162_v15 = vpop.f32.mrb[46].mxu0 }
0x26da   :  { %v4164_v46 = vpop.f32.mrb[47].mxu0  ;;  %v4169_v21 = vrot.slane %v4162_v15, 4 }
0x26db   :  { %v4170_v16 = vrot.slane %v4164_v46, 4 }
0x26dc   :  { %v4173_v40 = vadd.f32 %v4169_v21, %v12328_v26 }
0x26dd   :  { %v4174_v17 = vadd.f32 %v4170_v16, %v12336_v62 }
0x26de   :  { %v9148_v18 = vmul.f32 -1.442695, %v4173_v40 }
0x26df   :  { %11268 = vtanh.f32 %v4174_v17  ;;  %v9149_v39 = vmul.f32 -1.442695, %v4174_v17 }
0x26e0   :  { %11270 = vpow2.f32 %v9148_v18 }
0x26e9   :  { %v11269_v19 = vpop.eup %11268 }
0x26ea   :  { %4193 = vrot.lane.b32.xlu0 %v11269_v19, %s11451_s1  ;;  %v11271_v23 = vpop.eup %11270 }
0x26eb   :  { %v4181_v27 = vadd.f32 1.0, %v11271_v23 }
0x26ed   :  { %11272 = vrcp.f32 %v4181_v27 }
0x26f7   :  { %v11273_v29 = vpop.eup %11272 }
0x26f8   :  { %v4191_v34 = vmul.f32 %v11273_v29, %v4189_v8 }
0x275c   :  { %v4194_v31 = vpop.permute.xlu0 %4193 }
0x275d   :  { %v4196_v6 = vmul.f32 %v11273_v29, %v4194_v31 }
0x275f   :  { %4198 = vrot.lane.b32.xlu1 %v4196_v6, %s11452_s30 }
0x27d1   :  { %v4199_v62 = vpop.permute.xlu1 %4198 }
0x27d2   :  { %v4201_v37 = vadd.f32 %v4199_v62, %v4191_v34 }
0x27d4   :  { %11274 = vtanh.f32 %v4201_v37  ;;  %v4313_v60 = vrot.slane %v4201_v37, 6 }
0x27d5   :  { %11276 = vpow2.f32 %v9149_v39 }
0x27de   :  { %v11275_v38 = vpop.eup %11274 }
0x27df   :  { %4204 = vrot.lane.b32.xlu0 %v11275_v38, %s11452_s30  ;;  %v11277_v26 = vpop.eup %11276 }
0x27e0   :  { %v4182_v9 = vadd.f32 1.0, %v11277_v26 }
0x27e2   :  { %11278 = vrcp.f32 %v4182_v9 }
0x27ec   :  { %v11279_v43 = vpop.eup %11278 }
0x2851   :  { %v4205_v0 = vpop.permute.xlu0 %4204 }
0x2852   :  { %v12390_v44 = vmul.f32 %v11273_v29, %v4205_v0  ;;  %v12392_v45 = vmul.f32 %v11279_v43, %v4205_v0 }
0x2854   :  { %v4211_v48 = vrot.slane %v12390_v44, 4  ;;  %v4212_v49 = vrot.slane %v12392_v45, 4 }
0x2856   :  { %4213 = vrot.lane.b32.xlu1 %v4211_v48, %s11435_s25  ;;  %4215 = vrot.lane.b32.xlu0 %v4212_v49, %s11435_s25 }
0x28c8   :  { %v4214_v50 = vpop.permute.xlu1 %4213  ;;  %v4216_v52 = vpop.permute.xlu0 %4215 }
0x28c9   :  { %v4217_v53 = vsel %vm3968_vm3, %v4214_v50, %v4216_v52 }
0x28ca   :  { %9150 = vmatmul.mubr.msk.f32.vlgmr.msra.gmra.mrb[56].mxu1 %vm3849_vm7, %v4217_v53 }
0x28cb   :  { %10221 = vmatpush1.bf16.msra.mxu1 %v12227_v2  ;;  %4538 = vmatprep.mubr.f32.mxu1 %v11448_v47 }
0x28cc   :  { %10223 = vmatprep.subr.bf16.mxu1 %v12231_v28 }
0x28cf   :  { %10225 = vmatpush1.bf16.msra.mxu1 %v12234_v32 }
0x28d0   :  { %10227 = vmatprep.subr.bf16.mxu1 %v12239_v20 }
0x28d3   :  { %10229 = vmatpush1.bf16.msra.mxu1 %v12241_v42 }
0x28d4   :  { %10243 = vmatprep.subr.bf16.mxu1 %v12225_v41 }
0x299d   :  { %v4286_v55 = vpop.f32.mrb[56].mxu1 }
0x299e   :  { %v4288_v35 = vpop.f32.mrb[57].mxu1  ;;  %v4293_v22 = vrot.slane %v4286_v55, 2 }
0x299f   :  { %v4294_v59 = vrot.slane %v4288_v35, 2 }
0x29a0   :  { %v4297_v7 = vadd.f32 %v4293_v22, %v12332_v58 }
0x29a1   :  { %v4298_v4 = vadd.f32 %v4294_v59, %v12340_v63 }
0x29a2   :  { %v9151_v10 = vmul.f32 -1.442695, %v4297_v7 }
0x29a3   :  { %11280 = vtanh.f32 %v4298_v4  ;;  %v9152_v17 = vmul.f32 -1.442695, %v4298_v4 }
0x29a4   :  { %11282 = vpow2.f32 %v9151_v10 }
0x29ad   :  { %v11281_v36 = vpop.eup %11280 }
0x29ae   :  { %4317 = vrot.lane.b32.xlu1 %v11281_v36, %s11451_s1  ;;  %v11283_v14 = vpop.eup %11282 }
0x29af   :  { %v4305_v3 = vadd.f32 1.0, %v11283_v14 }
0x29b1   :  { %11284 = vrcp.f32 %v4305_v3 }
0x29bb   :  { %v11285_v61 = vpop.eup %11284 }
0x29bc   :  { %v4315_v15 = vmul.f32 %v11285_v61, %v4313_v60 }
0x2a20   :  { %v4318_v11 = vpop.permute.xlu1 %4317 }
0x2a21   :  { %v4320_v41 = vmul.f32 %v11285_v61, %v4318_v11 }
0x2a23   :  { %4322 = vrot.lane.b32.xlu0 %v4320_v41, %s11452_s30 }
0x2a95   :  { %v4323_v63 = vpop.permute.xlu0 %4322 }
0x2a96   :  { %v4325_v46 = vadd.f32 %v4323_v63, %v4315_v15 }
0x2a98   :  { %11286 = vtanh.f32 %v4325_v46  ;;  %v4439_v50 = vrot.slane %v4325_v46, 6 }
0x2a99   :  { %11288 = vpow2.f32 %v9152_v17 }
0x2aa2   :  { %v11287_v16 = vpop.eup %11286 }
0x2aa3   :  { %4328 = vrot.lane.b32.xlu1 %v11287_v16, %s11452_s30  ;;  %v11289_v58 = vpop.eup %11288 }
0x2aa4   :  { %v4306_v19 = vadd.f32 1.0, %v11289_v58 }
0x2aa6   :  { %11290 = vrcp.f32 %v4306_v19 }
0x2ab0   :  { %v11291_v21 = vpop.eup %11290 }
0x2b15   :  { %v4329_v40 = vpop.permute.xlu1 %4328 }
0x2b16   :  { %v12412_v18 = vmul.f32 %v11285_v61, %v4329_v40  ;;  %v4332_v23 = vmul.f32 %v11291_v21, %v4329_v40 }
0x2b18   :  { %v4343_v27 = vrot.slane %v12412_v18, 6  ;;  %v4344_v29 = vrot.slane %v4332_v23, 6 }
0x2b1a   :  { %4345 = vrot.lane.b32.xlu0 %v4343_v27, %s11435_s25  ;;  %4347 = vrot.lane.b32.xlu1 %v4344_v29, %s11435_s25 }
0x2b8c   :  { %v4346_v31 = vpop.permute.xlu0 %4345  ;;  %v4348_v6 = vpop.permute.xlu1 %4347 }
0x2b8d   :  { %v12418_v8 = vsel %vm3968_vm3, %v4346_v31, %v4348_v6 }
0x2b8e   :  { %9153 = vmatmul.mubr.msk.f32.vlgmr.msra.gmra.mrb[48].mxu0 %vm3849_vm7, %v12418_v8 }
0x2b8f   :  { %10233 = vmatpush1.bf16.msra.mxu0 %v12227_v2  ;;  %4662 = vmatprep.mubr.f32.mxu0 %v11448_v47 }
0x2b90   :  { %10235 = vmatprep.subr.bf16.mxu0 %v12231_v28 }
0x2b93   :  { %10237 = vmatpush1.bf16.msra.mxu0 %v12234_v32 }
0x2b94   :  { %10239 = vmatprep.subr.bf16.mxu0 %v12239_v20 }
0x2b97   :  { %10241 = vmatpush1.bf16.msra.mxu0 %v12241_v42 }
0x2c61   :  { %v4418_v34 = vpop.f32.mrb[48].mxu0 }
0x2c62   :  { %v4420_v62 = vpop.f32.mrb[49].mxu0  ;;  %v4423_v39 = vadd.f32 %v4418_v34, %v12312_v54 }
0x2c63   :  { %v4424_v37 = vadd.f32 %v4420_v62, %v12320_v57 }
0x2c64   :  { %v9154_v26 = vmul.f32 -1.442695, %v4423_v39 }
0x2c65   :  { %11292 = vtanh.f32 %v4424_v37  ;;  %v9155_v59 = vmul.f32 -1.442695, %v4424_v37 }
0x2c66   :  { %11294 = vpow2.f32 %v9154_v26 }
0x2c6f   :  { %v11293_v38 = vpop.eup %11292 }
0x2c70   :  { %4443 = vrot.lane.b32.xlu0 %v11293_v38, %s11451_s1  ;;  %v11295_v9 = vpop.eup %11294 }
0x2c71   :  { %v4431_v43 = vadd.f32 1.0, %v11295_v9 }
0x2c73   :  { %11296 = vrcp.f32 %v4431_v43 }
0x2c7d   :  { %v11297_v0 = vpop.eup %11296 }
0x2c7e   :  { %v4441_v52 = vmul.f32 %v11297_v0, %v4439_v50 }
0x2ce2   :  { %v4444_v48 = vpop.permute.xlu0 %4443 }
0x2ce3   :  { %v4446_v49 = vmul.f32 %v11297_v0, %v4444_v48 }
0x2ce5   :  { %4448 = vrot.lane.b32.xlu1 %v4446_v49, %s11452_s30 }
0x2d57   :  { %v4449_v53 = vpop.permute.xlu1 %4448 }
0x2d58   :  { %v4451_v55 = vadd.f32 %v4449_v53, %v4441_v52 }
0x2d5a   :  { %11298 = vtanh.f32 %v4451_v55  ;;  %v4567_v19 = vrot.slane %v4451_v55, 6 }
0x2d5b   :  { %11300 = vpow2.f32 %v9155_v59 }
0x2d64   :  { %v11299_v35 = vpop.eup %11298 }
0x2d65   :  { %4454 = vrot.lane.b32.xlu0 %v11299_v35, %s11452_s30  ;;  %v11301_v4 = vpop.eup %11300 }
0x2d66   :  { %v4432_v36 = vadd.f32 1.0, %v11301_v4 }
0x2d68   :  { %11302 = vrcp.f32 %v4432_v36 }
0x2d72   :  { %v11303_v22 = vpop.eup %11302 }
0x2dd7   :  { %v4455_v7 = vpop.permute.xlu0 %4454 }
0x2dd8   :  { %v12433_v10 = vmul.f32 %v11297_v0, %v4455_v7  ;;  %v12435_v14 = vmul.f32 %v11303_v22, %v4455_v7 }
0x2dda   :  { %4467 = vrot.lane.b32.xlu1 %v12433_v10, %s11435_s25  ;;  %4469 = vrot.lane.b32.xlu0 %v12435_v14, %s11435_s25 }
0x2e4c   :  { %v12441_v3 = vpop.permute.xlu1 %4467  ;;  %v4470_v61 = vpop.permute.xlu0 %4469 }
0x2e4d   :  { %v4471_v11 = vsel %vm3968_vm3, %v12441_v3, %v4470_v61 }
0x2e4e   :  { %9156 = vmatmul.mubr.msk.f32.vlgmr.msra.gmra.mrb[58].mxu1 %vm3849_vm7, %v4471_v11 }
0x2e4f   :  { %10245 = vmatpush1.bf16.msra.mxu1 %v12227_v2  ;;  %4786 = vmatprep.mubr.f32.mxu1 %v11448_v47 }
0x2e50   :  { %10247 = vmatprep.subr.bf16.mxu1 %v12231_v28 }
0x2e53   :  { %10249 = vmatpush1.bf16.msra.mxu1 %v12234_v32 }
0x2e54   :  { %10251 = vmatprep.subr.bf16.mxu1 %v12239_v20 }
0x2e57   :  { %10253 = vmatpush1.bf16.msra.mxu1 %v12241_v42 }
0x2f21   :  { %v4540_v41 = vpop.f32.mrb[58].mxu1 }
0x2f22   :  { %v4542_v60 = vpop.f32.mrb[59].mxu1  ;;  %v4547_v2 = vrot.slane %v4540_v41, 6 }
0x2f23   :  { %v4548_v15 = vrot.slane %v4542_v60, 6 }
0x2f24   :  { %v4551_v16 = vadd.f32 %v4547_v2, %v12316_v56 }
0x2f25   :  { %v4552_v63 = vadd.f32 %v4548_v15, %v12324_v25 }
0x2f26   :  { %v9157_v17 = vmul.f32 -1.442695, %v4551_v16 }
0x2f27   :  { %11304 = vtanh.f32 %v4552_v63  ;;  %v9158_v29 = vmul.f32 -1.442695, %v4552_v63 }
0x2f28   :  { %11306 = vpow2.f32 %v9157_v17 }
0x2f31   :  { %v11305_v46 = vpop.eup %11304 }
0x2f32   :  { %4571 = vrot.lane.b32.xlu1 %v11305_v46, %s11451_s1  ;;  %v11307_v28 = vpop.eup %11306 }
0x2f33   :  { %v4559_v32 = vadd.f32 1.0, %v11307_v28 }
0x2f35   :  { %11308 = vrcp.f32 %v4559_v32 }
0x2f3f   :  { %v11309_v20 = vpop.eup %11308 }
0x2f40   :  { %v4569_v21 = vmul.f32 %v11309_v20, %v4567_v19 }
0x2fa4   :  { %v4572_v58 = vpop.permute.xlu1 %4571 }
0x2fa5   :  { %v4574_v42 = vmul.f32 %v11309_v20, %v4572_v58  ;;  %v4876_v58 = vrot.slane %v12435_v14, 2 }
0x2fa7   :  { %4576 = vrot.lane.b32.xlu0 %v4574_v42, %s11452_s30 }
0x3019   :  { %v4577_v40 = vpop.permute.xlu0 %4576 }
0x301a   :  { %v4579_v23 = vadd.f32 %v4577_v40, %v4569_v21 }
0x301c   :  { %11310 = vtanh.f32 %v4579_v23  ;;  %v4691_v60 = vrot.slane %v4579_v23, 6 }
0x301d   :  { %11312 = vpow2.f32 %v9158_v29 }
0x3026   :  { %v11311_v27 = vpop.eup %11310 }
0x3027   :  { %4582 = vrot.lane.b32.xlu1 %v11311_v27, %s11452_s30  ;;  %v11313_v31 = vpop.eup %11312 }
0x3028   :  { %v4560_v6 = vadd.f32 1.0, %v11313_v31 }
0x302a   :  { %11314 = vrcp.f32 %v4560_v6 }
0x3034   :  { %v11315_v34 = vpop.eup %11314 }
0x3099   :  { %v4583_v62 = vpop.permute.xlu1 %4582 }
0x309a   :  { %v12457_v37 = vmul.f32 %v11309_v20, %v4583_v62  ;;  %v4586_v38 = vmul.f32 %v11315_v34, %v4583_v62 }
0x309c   :  { %v4864_v39 = vrot.slane %v4586_v38, 6  ;;  %v4589_v26 = vrot.slane %v12457_v37, 2  ;;  %v4590_v9 = vrot.slane %v4586_v38, 2 }
0x309e   :  { %4591 = vrot.lane.b32.xlu0 %v4589_v26, %s11435_s25  ;;  %4593 = vrot.lane.b32.xlu1 %v4590_v9, %s11435_s25  ;;  %v12463_v43 = vpack.i.bf16 %v12457_v37, %v4864_v39 }
0x3110   :  { %v4592_v0 = vpop.permute.xlu0 %4591  ;;  %v4594_v48 = vpop.permute.xlu1 %4593 }
0x3111   :  { %v4595_v49 = vsel %vm3968_vm3, %v4592_v0, %v4594_v48 }
0x3112   :  { %9159 = vmatmul.mubr.msk.f32.vlgmr.msra.gmra.mrb[50].mxu0 %vm3849_vm7, %v4595_v49 }
0x31e5   :  { %v4664_v50 = vpop.f32.mrb[50].mxu0 }
0x31e6   :  { %v4666_v52 = vpop.f32.mrb[51].mxu0  ;;  %v4671_v59 = vrot.slane %v4664_v50, 4 }
0x31e7   :  { %v4672_v53 = vrot.slane %v4666_v52, 4 }
0x31e8   :  { %v4675_v4 = vadd.f32 %v4671_v59, %v12312_v54  ;;  %v4875_v59 = vrot.slane %v12433_v10, 2  ;;  %v4903_v10 = vrot.slane %v12370_v13, 6 }
0x31e9   :  { %v4676_v55 = vadd.f32 %v4672_v53, %v12320_v57  ;;  %v4891_v53 = vrot.slane %v12392_v45, 2 }
0x31ea   :  { %v9160_v36 = vmul.f32 -1.442695, %v4675_v4 }
0x31eb   :  { %11316 = vtanh.f32 %v4676_v55  ;;  %v9161_v2 = vmul.f32 -1.442695, %v4676_v55 }
0x31ec   :  { %11318 = vpow2.f32 %v9160_v36 }
0x31f5   :  { %v11317_v35 = vpop.eup %11316 }
0x31f6   :  { %4695 = vrot.lane.b32.xlu0 %v11317_v35, %s11451_s1  ;;  %v11319_v22 = vpop.eup %11318  ;;  %v4890_v35 = vrot.slane %v12390_v44, 2 }
0x31f7   :  { %v4683_v7 = vadd.f32 1.0, %v11319_v22 }
0x31f9   :  { %11320 = vrcp.f32 %v4683_v7 }
0x3203   :  { %v11321_v61 = vpop.eup %11320 }
0x3204   :  { %v4693_v15 = vmul.f32 %v11321_v61, %v4691_v60 }
0x3268   :  { %v4696_v11 = vpop.permute.xlu0 %4695 }
0x3269   :  { %v4698_v41 = vmul.f32 %v11321_v61, %v4696_v11 }
0x326b   :  { %4700 = vrot.lane.b32.xlu1 %v4698_v41, %s11452_s30 }
0x32dd   :  { %v4701_v57 = vpop.permute.xlu1 %4700 }
0x32de   :  { %v4703_v63 = vadd.f32 %v4701_v57, %v4693_v15 }
0x32e0   :  { %11322 = vtanh.f32 %v4703_v63  ;;  %v4815_v4 = vrot.slane %v4703_v63, 6 }
0x32e1   :  { %11324 = vpow2.f32 %v9161_v2 }
0x32ea   :  { %v11323_v46 = vpop.eup %11322 }
0x32eb   :  { %4706 = vrot.lane.b32.xlu0 %v11323_v46, %s11452_s30  ;;  %v11325_v54 = vpop.eup %11324 }
0x32ec   :  { %v4684_v16 = vadd.f32 1.0, %v11325_v54 }
0x32ee   :  { %11326 = vrcp.f32 %v4684_v16  ;;  %v12503_v16 = vld [vmem:[%s12832_s2] sm:$0xff] }
0x32ef   :  { %10030 = vmatprep.mubr.msk.f32.mxu0 %vm256_vm4, %v12503_v16 }
0x32f8   :  { %v11327_v17 = vpop.eup %11326 }
0x335d   :  { %v4707_v28 = vpop.permute.xlu0 %4706 }
0x335e   :  { %v4709_v32 = vmul.f32 %v11321_v61, %v4707_v28  ;;  %v4710_v20 = vmul.f32 %v11327_v17, %v4707_v28  ;;  %v4863_v61 = vrot.slane %v12457_v37, 6  ;;  %v5010_v17 = vld [vmem:[#allocation2 + $0x2c0] sm:$0xff] }
0x335f   :  { %v5011_v28 = vld [vmem:[#allocation2 + $0x2e0] sm:$0xff] }
0x3360   :  { %v4714_v42 = vrot.slane %v4710_v20, 4  ;;  %v4852_v19 = vrot.slane %v4710_v20, 2  ;;  %v4713_v21 = vrot.slane %v4709_v32, 4  ;;  %v4851_v40 = vrot.slane %v4709_v32, 2 }
0x3361   :  { %v10385_v23 = vpack.i.bf16 %v4709_v32, %v4876_v58  ;;  %v5012_v32 = vld [vmem:[#allocation2 + $0x300] sm:$0xff]  ;;  %v10258_v20 = vpack.c.bf16 %v5011_v28, %v5010_v17 }
0x3362   :  { %4715 = vrot.lane.b32.xlu1 %v4713_v21, %s11435_s25  ;;  %4717 = vrot.lane.b32.xlu0 %v4714_v42, %s11435_s25  ;;  %v10355_v27 = vpack.i.bf16 %v4852_v19, %v4851_v40  ;;  %v5014_v42 = vld [vmem:[#allocation2 + $0x340] sm:$0xff] }
0x3363   :  { %v5015_v19 = vld [vmem:[#allocation2 + $0x360] sm:$0xff]  ;;  %10259 = vmatprep.subr.bf16.mxu1 %v10258_v20 }
0x3364   :  { %v10266_v21 = vpack.c.bf16 %v5015_v19, %v5014_v42  ;;  %v5016_v42 = vld [vmem:[#allocation2 + $0x380] ss:$0 sm:$0xff] }
0x33d4   :  { %v4716_v29 = vpop.permute.xlu1 %4715  ;;  %v4718_v31 = vpop.permute.xlu0 %4717 }
0x33d5   :  { %v4719_v6 = vsel %vm3968_vm3, %v4716_v29, %v4718_v31 }
0x33d6   :  { %9162 = vmatmul.mubr.msk.f32.vlgmr.msra.gmra.mrb[60].mxu1 %vm3849_vm7, %v4719_v6 }
0x33d7   :  { %10261 = vmatpush3.bf16.msra.mxu1 %v10258_v20  ;;  %v73_v20 = vld [vmem:[%s12832_s2 + $0x8] sm:$0xff] }
0x34a9   :  { %v4788_v34 = vpop.f32.mrb[60].mxu1 }
0x34aa   :  { %v4790_v62 = vpop.f32.mrb[61].mxu1  ;;  %v4795_v26 = vrot.slane %v4788_v34, 2 }
0x34ab   :  { %v4796_v38 = vrot.slane %v4790_v62, 2 }
0x34ac   :  { %v4799_v9 = vadd.f32 %v4795_v26, %v12316_v56  ;;  %v10380_v56 = vpack.i.bf16 %v4875_v59, %v12390_v44  ;;  %v4902_v44 = vrot.slane %v12368_v12, 6 }
0x34ad   :  { %v4800_v14 = vadd.f32 %v4796_v38, %v12324_v25  ;;  %v10360_v25 = vpack.i.bf16 %v4891_v53, %v4890_v35 }
0x34ae   :  { %v9163_v0 = vmul.f32 -1.442695, %v4799_v9  ;;  %v10375_v11 = vpack.i.bf16 %v4903_v10, %v4902_v44 }
0x34af   :  { %11328 = vtanh.f32 %v4800_v14  ;;  %v9164_v41 = vmul.f32 -1.442695, %v4800_v14 }
0x34b0   :  { %11330 = vpow2.f32 %v9163_v0 }
0x34b9   :  { %v11329_v39 = vpop.eup %11328 }
0x34ba   :  { %4819 = vrot.lane.b32.xlu1 %v11329_v39, %s11451_s1  ;;  %v11331_v48 = vpop.eup %11330 }
0x34bb   :  { %v4807_v49 = vadd.f32 1.0, %v11331_v48 }
0x34bd   :  { %11332 = vrcp.f32 %v4807_v49 }
0x34c7   :  { %v11333_v50 = vpop.eup %11332 }
0x34c8   :  { %v4817_v36 = vmul.f32 %v11333_v50, %v4815_v4 }
0x352c   :  { %v4820_v52 = vpop.permute.xlu1 %4819 }
0x352d   :  { %v4822_v55 = vmul.f32 %v11333_v50, %v4820_v52 }
0x352f   :  { %4824 = vrot.lane.b32.xlu0 %v4822_v55, %s11452_s30 }
0x3533   :  { %10361 = vrot.lane.b32.xlu0 %v10360_v25, %s11435_s25 }
0x3537   :  { %10371 = vrot.lane.b32.xlu0 %v12463_v43, %s11435_s25  ;;  %v10365_v43 = vpack.i.bf16 %v4863_v61, %v12368_v12 }
0x353b   :  { %10381 = vrot.lane.b32.xlu0 %v10380_v56, %s11435_s25 }
0x35a1   :  { %v4825_v45 = vpop.permute.xlu0 %4824 }
0x35a2   :  { %v4827_v22 = vadd.f32 %v4825_v45, %v4817_v36 }
0x35a4   :  { %11334 = vtanh.f32 %v4827_v22 }
0x35a5   :  { %11336 = vpow2.f32 %v9164_v41 }
0x35ae   :  { %v11335_v7 = vpop.eup %11334 }
0x35af   :  { %4830 = vrot.lane.b32.xlu1 %v11335_v7, %s11452_s30  ;;  %v11337_v60 = vpop.eup %11336 }
0x35b0   :  { %v4808_v15 = vadd.f32 1.0, %v11337_v60 }
0x35b2   :  { %11338 = vrcp.f32 %v4808_v15 }
0x35b3   :  { %10356 = vrot.lane.b32.xlu1 %v10355_v27, %s11435_s25 }
0x35b7   :  { %10366 = vrot.lane.b32.xlu1 %v10365_v43, %s11435_s25 }
0x35bb   :  { %10376 = vrot.lane.b32.xlu1 %v10375_v11, %s11435_s25 }
0x35bc   :  { %v11339_v37 = vpop.eup %11338 }
0x35bf   :  { %10386 = vrot.lane.b32.xlu1 %v10385_v23, %s11435_s25  ;;  %v10362_v23 = vpop.permute.xlu0 %10361 }
0x35c0   :  { %v10364_v6 = vunpack.i.h.bf16 %v10362_v23  ;;  %v10363_v34 = vunpack.i.l.bf16 %v10362_v23 }
0x35c2   :  { %v4896_v48 = vsel %vm3968_vm3, %v10363_v34, %v10364_v6 }
0x35c3   :  { %v10372_v29 = vpop.permute.xlu0 %10371 }
0x35c4   :  { %v10374_v14 = vunpack.i.h.bf16 %v10372_v29  ;;  %v10373_v9 = vunpack.i.l.bf16 %v10372_v29 }
0x35c6   :  { %v4898_v56 = vsel %vm4846_vm10, %v10374_v14, %v4896_v48  ;;  %v5186_v14 = vld [vmem:[#allocation2 + $0x3c0] sm:$0xff] }
0x35c7   :  { %v10382_v62 = vpop.permute.xlu0 %10381  ;;  %v5187_v48 = vld [vmem:[#allocation2 + $0x3e0] sm:$0xff] }
0x35c8   :  { %v10383_v4 = vunpack.i.l.bf16 %v10382_v62  ;;  %v10384_v45 = vunpack.i.h.bf16 %v10382_v62 }
0x3621   :  { %v4831_v57 = vpop.permute.xlu1 %4830 }
0x3622   :  { %v4833_v63 = vmul.f32 %v11333_v50, %v4831_v57  ;;  %v4834_v13 = vmul.f32 %v11339_v37, %v4831_v57 }
0x3624   :  { %v10400_v46 = vpack.i.bf16 %v4833_v63, %v12412_v18  ;;  %v4838_v2 = vrot.slane %v4833_v63, 6  ;;  %v4839_v12 = vrot.slane %v4834_v13, 6  ;;  %v5013_v18 = vld [vmem:[#allocation2 + $0x320] sm:$0xff]  ;;  %v4886_v63 = vsel %vm4846_vm10, %v12441_v3, %v12418_v8 }
0x3625   :  { %v10262_v58 = vpack.c.bf16 %v5013_v18, %v5012_v32  ;;  %v10357_v40 = vpop.permute.xlu1 %10356 }
0x3626   :  { %10401 = vrot.lane.b32.xlu1 %v10400_v46, %s11435_s25  ;;  %v10390_v54 = vpack.i.bf16 %v4839_v12, %v4838_v2  ;;  %v10359_v39 = vunpack.i.h.bf16 %v10357_v40  ;;  %v10358_v26 = vunpack.i.l.bf16 %v10357_v40  ;;  %v4926_v2 = vsel %vm841_vm5, %v4886_v63, %v4898_v56  ;;  %v10590_v63 = vld [vmem:[%s12835_s5 + $0x418] sm:$0xff]  }
0x3627   :  { %10263 = vmatprep.subr.bf16.mxu1 %v10262_v58 }
0x3628   :  { %10391 = vrot.lane.b32.xlu0 %v10390_v54, %s11435_s25  ;;  %10265 = vmatpush3.bf16.msra.mxu1 %v10262_v58  ;;  %v4857_v36 = vsel %vm3968_vm3, %v10358_v26, %v10359_v39 }
0x3629   :  { %10267 = vmatprep.subr.bf16.mxu1 %v10266_v21  ;;  %v10367_v27 = vpop.permute.xlu1 %10366 }
0x362a   :  { %v10369_v38 = vunpack.i.h.bf16 %v10367_v27  ;;  %v10368_v0 = vunpack.i.l.bf16 %v10367_v27 }
0x362c   :  { %10396 = vrot.lane.b32.xlu0 %v12349_v30, %s11435_s25  ;;  %10269 = vmatpush3.bf16.msra.mxu1 %v10266_v21  ;;  %v4869_v53 = vsel %vm3968_vm3, %v10369_v38, %v10373_v9  ;;  %v4859_v22 = vsel %vm4846_vm10, %v10368_v0, %v4857_v36  ;;  %v10579_v36 = vld [vmem:[%s12835_s5 + $0x440] sm:$0xff]  }
0x362d   :  { %v10377_v31 = vpop.permute.xlu1 %10376  ;;  %v4871_v10 = vsel %vm4846_vm10, %v10383_v4, %v4869_v53  ;;  %9842 = vmatprep.subr.bf16.mxu1 %v10579_v36 }
0x362e   :  { %v10379_v49 = vunpack.i.h.bf16 %v10377_v31  ;;  %v10378_v50 = vunpack.i.l.bf16 %v10377_v31 }
0x3630   :  { %v4908_v43 = vsel %vm3968_vm3, %v10378_v50, %v10379_v49  ;;  %v5188_v49 = vld [vmem:[#allocation2 + $0x400] sm:$0xff] }
0x3631   :  { %v10387_v30 = vpop.permute.xlu1 %10386  ;;  %v10278_v50 = vpack.c.bf16 %v5188_v49, %v5187_v48 }
0x3632   :  { %v10389_v55 = vunpack.i.h.bf16 %v10387_v30  ;;  %v10388_v7 = vunpack.i.l.bf16 %v10387_v30  ;;  %v5185_v30 = vld [vmem:[#allocation2 + $0x3a0] sm:$0xff] }
0x3633   :  { %v10274_v0 = vpack.c.bf16 %v5186_v14, %v5185_v30 }
0x3634   :  { %v4910_v60 = vsel %vm4846_vm10, %v10389_v55, %v4908_v43  ;;  %v4881_v12 = vsel %vm3968_vm3, %v10384_v45, %v10388_v7  ;;  %v5189_v55 = vld [vmem:[#allocation2 + $0x420] ss:$0 sm:$0xff]  ;;  %v10582_v43 = vld [vmem:[%s12835_s5 + $0x408] sm:$0xff]  }
0x3635   :  { %v4927_v28 = vsel %vm83_vm0, %v4926_v2, %v4910_v60  ;;  %v10580_v45 = vld [vmem:[%s12835_s5 + $0x400] sm:$0xff]   ;;  %v10586_v60 = vld [vmem:[%s12835_s5 + $0x410] sm:$0xff]  }
0x3636   :  { %v10583_v7 = vld [vmem:[%s12835_s5 + $0x4c0] sm:$0xff]  }
0x3637   :  { %v10599_v2 = vld [vmem:[%s12835_s5 + $0x4e0] sm:$0xff]  }
0x3698   :  { %v10402_v35 = vpop.permute.xlu1 %10401 }
0x3699   :  { %v10403_v44 = vunpack.i.l.bf16 %v10402_v35  ;;  %v10404_v13 = vunpack.i.h.bf16 %v10402_v35 }
0x369a   :  { %v10392_v52 = vpop.permute.xlu0 %10391 }
0x369b   :  { %v10394_v25 = vunpack.i.h.bf16 %v10392_v52  ;;  %v10393_v59 = vunpack.i.l.bf16 %v10392_v52  ;;  %v4883_v54 = vsel %vm4846_vm10, %v10403_v44, %v4881_v12  ;;  %v10585_v44 = vld [vmem:[%s12835_s5 + $0x450] sm:$0xff]   ;;  %v10594_v12 = vld [vmem:[%s12835_s5 + $0x420] sm:$0xff]  }
0x369d   :  { %v4844_v61 = vsel %vm3968_vm3, %v10393_v59, %v10394_v25 }
0x369e   :  { %v4847_v11 = vsel %vm4846_vm10, %v12351_v33, %v4844_v61  ;;  %v10397_v41 = vpop.permute.xlu0 %10396  ;;  %v10584_v61 = vld [vmem:[%s12835_s5 + $0x480] sm:$0xff]  }
0x369f   :  { %v10399_v15 = vunpack.i.h.bf16 %v10397_v41  ;;  %v10398_v37 = vunpack.i.l.bf16 %v10397_v41  ;;  %v4923_v57 = vsel %vm841_vm5, %v4847_v11, %v4859_v22  ;;  %v10581_v22 = vld [vmem:[%s12835_s5 + $0x448] sm:$0xff]   ;;  %v10591_v41 = vld [vmem:[%s12835_s5 + $0x4d0] sm:$0xff]  }
0x36a0   :  { %v4924_v46 = vsel %vm83_vm0, %v4923_v57, %v4871_v10  ;;  %v10587_v10 = vld [vmem:[%s12835_s5 + $0x4c8] sm:$0xff]   ;;  %v10595_v57 = vld [vmem:[%s12835_s5 + $0x4d8] sm:$0xff]  }
0x36a1   :  { %v4920_v33 = vsel %vm3968_vm3, %v10398_v37, %v10399_v15  ;;  %v12533_v32 = vsel %vm3689_vm9, %v4924_v46, %v4883_v54  ;;  %v10588_v11 = vld [vmem:[%s12835_s5 + $0x488] sm:$0xff]   ;;  %v10589_v15 = vld [vmem:[%s12835_s5 + $0x458] sm:$0xff]   ;;  %v10592_v37 = vld [vmem:[%s12835_s5 + $0x490] sm:$0xff]  }
0x36a2   :  { %v4922_v17 = vsel %vm4846_vm10, %v10404_v13, %v4920_v33  ;;  %v10593_v13 = vld [vmem:[%s12835_s5 + $0x460] sm:$0xff]   ;;  %v10596_v46 = vld [vmem:[%s12835_s5 + $0x498] sm:$0xff]   ;;  %v10597_v33 = vld [vmem:[%s12835_s5 + $0x468] sm:$0xff]  }
0x36a3   :  { %v12536_v8 = vsel %vm3689_vm9, %v4927_v28, %v4922_v17  ;;  %v10600_v54 = vld [vmem:[%s12835_s5 + $0x4a0] sm:$0xff]   ;;  %v10603_v17 = vld [vmem:[%s12835_s5 + $0x4e8] sm:$0xff]  }
0x36a4   :  { %v10254_v3 = vpack.c.bf16 %v12536_v8, %v12533_v32  ;;  %v10598_v28 = vld [vmem:[%s12835_s5 + $0x428] sm:$0xff]  }
0x36a6   :  { %10255 = vmatprep.subr.bf16.mxu0 %v10254_v3 }
0x36a7   :  { %10257 = vmatpush3.bf16.msra.mxu0 %v10254_v3  ;;  %v10601_v3 = vld [vmem:[%s12835_s5 + $0x470] sm:$0xff]  }
0x36aa   :  { %10031 = vmatmul.mubr.msk.f32.vlgmr.msra.gmra.mrb[52].mxu0 %vm256_vm4, %v73_v20 }
0x36ab   :  { %10052 = vmatprep.mubr.msk.f32.mxu0 %vm256_vm4, %v12503_v16 }
0x377d   :  { %v10032_v18 = vpop.f32.mrb[52].mxu0 }
0x377e   :  { %v5001_v58 = vpop.f32.mrb[53].mxu0 }
0x377f   :  { %10045 = vmatprep.mubr.msk.f32.mxu1 %vm3849_vm7, %v5001_v58  ;;  %v10605_v58 = vld [vmem:[%s12835_s5 + $0x478] sm:$0xff]  }
0x3780   :  { %10046 = vmatmul.mubr.msk.f32.vlgmr.msra.gmra.mrb[62].mxu1 %vm3849_vm7, %v10032_v18  ;;  %v10602_v18 = vld [vmem:[%s12835_s5 + $0x430] sm:$0xff]  }
0x3781   :  { %9843 = vmatpush3.bf16.msra.mxu1 %v10580_v45 }
0x3782   :  { %9844 = vmatprep.subr.bf16.mxu1 %v10581_v22 }
0x3785   :  { %9845 = vmatpush3.bf16.msra.mxu1 %v10582_v43 }
0x3786   :  { %9846 = vmatprep.subr.bf16.mxu1 %v10585_v44 }
0x3789   :  { %9847 = vmatpush3.bf16.msra.mxu1 %v10586_v60 }
0x378a   :  { %9848 = vmatprep.subr.bf16.mxu1 %v10589_v15 }
0x378d   :  { %9849 = vmatpush3.bf16.msra.mxu1 %v10590_v63 }
0x378e   :  { %9850 = vmatprep.subr.bf16.mxu1 %v10593_v13 }
0x3791   :  { %9851 = vmatpush3.bf16.msra.mxu1 %v10594_v12  ;;  %v10612_v12 = vld [vmem:[%s12835_s5 + $0x508] sm:$0xff]  }
0x3792   :  { %9852 = vmatprep.subr.bf16.mxu1 %v10597_v33  ;;  %v10613_v33 = vld [vmem:[%s12835_s5 + $0x510] sm:$0xff]  }
0x3795   :  { %9853 = vmatpush3.bf16.msra.mxu1 %v10598_v28  ;;  %v10615_v28 = vld [vmem:[%s12835_s5 + $0x520] sm:$0xff]  }
0x3796   :  { %9854 = vmatprep.subr.bf16.mxu1 %v10601_v3  ;;  %v10616_v3 = vld [vmem:[%s12835_s5 + $0x528] sm:$0xff]  }
0x3799   :  { %9855 = vmatpush3.bf16.msra.mxu1 %v10602_v18  ;;  %v10618_v18 = vld [vmem:[%s12835_s5 + $0x538] sm:$0xff]  }
0x379a   :  { %9856 = vmatprep.subr.bf16.mxu1 %v10605_v58  ;;  %v10619_v58 = vld [vmem:[%s12835_s5 + $0x540] sm:$0xff]  }
0x3853   :  { %v10047_v19 = vpop.f32.mrb[62].mxu1 }
0x3854   :  { %v5095_v21 = vadd.f32 %v10047_v19, %v5016_v42  ;;  %v5089_v40 = vpop.f32.mrb[63].mxu1  ;;  %v10607_v19 = vld [vmem:[%s12835_s5 + $0x4f0] sm:$0xff]  }
0x3855   :  { %v5090_v23 = vadd.f32 %v5089_v40, %v5016_v42  ;;  %v10606_v42 = vld [vmem:[%s12835_s5 + $0x438] sm:$0xff]  }
0x3856   :  { %v5101_v27 = vmin.f32 %v5095_v21, 0.0  ;;  %vm5099_vm11 = vcmp.gt.f32.partialorder %v5095_v21, 0.0  ;;  %9857 = vmatpush3.bf16.msra.mxu1 %v10606_v42  ;;  %v10620_v42 = vld [vmem:[%s12835_s5 + $0x548] sm:$0xff]  }
0x3857   :  { %v5100_v29 = vmin.f32 %v5090_v23, 0.0  ;;  %vm5098_vm12 = vcmp.gt.f32.partialorder %v5090_v23, 0.0  ;;  %10066 = vmatprep.subr.bf16.mxu1 %v11448_v47 }
0x3858   :  { %v5104_v31 = vmul.f32 1.442695, %v5101_v27 }
0x3859   :  { %v5102_v6 = vmul.f32 1.442695, %v5100_v29  ;;  %v5301_v29 = vrot.slane %v11448_v47, 6 }
0x385a   :  { %11340 = vpow2.f32 %v5104_v31  ;;  %v5283_v31 = vrot.slane %v11448_v47, 2 }
0x385b   :  { %11342 = vpow2.f32 %v5102_v6  ;;  %v10609_v6 = vld [vmem:[%s12835_s5 + $0x4f8] sm:$0xff]  }
0x3864   :  { %v11341_v34 = vpop.eup %11340 }
0x3865   :  { %v11343_v62 = vpop.eup %11342  ;;  %v9170_v16 = vadd.f32 -1.0, %v11341_v34 }
0x3866   :  { %v9169_v38 = vadd.f32 -1.0, %v11343_v62 }
0x3867   :  { %v5109_v39 = vsel %vm5099_vm11, %v5095_v21, %v9170_v16  ;;  %v10608_v21 = vld [vmem:[%s12835_s5 + $0x4b0] sm:$0xff]   ;;  %v10611_v16 = vld [vmem:[%s12835_s5 + $0x4b8] sm:$0xff]   ;;  %vm5964_vm11 = vcmask 916480  }
0x3868   :  { %v5108_v26 = vsel %vm5098_vm12, %v5090_v23, %v9169_v38 }
0x3869   :  { %v10270_v9 = vpack.c.bf16 %v5109_v39, %v5108_v26 }
0x386b   :  { %10271 = vmatprep.subr.bf16.mxu0 %v10270_v9 }
0x386c   :  { %10273 = vmatpush3.bf16.msra.mxu0 %v10270_v9 }
0x386d   :  { %10275 = vmatprep.subr.bf16.mxu0 %v10274_v0 }
0x386f   :  { %10053 = vmatmul.mubr.msk.f32.vlgmr.msra.gmra.mrb[54].mxu0 %vm256_vm4, %v73_v20  ;;  %v10604_v20 = vld [vmem:[%s12835_s5 + $0x4a8] sm:$0xff]  }
0x3870   :  { %10277 = vmatpush3.bf16.msra.mxu0 %v10274_v0 }
0x3871   :  { %10279 = vmatprep.subr.bf16.mxu0 %v10278_v50 }
0x3874   :  { %10281 = vmatpush3.bf16.msra.mxu0 %v10278_v50 }
0x3875   :  { %9864 = vmatprep.subr.bf16.mxu0 %v10583_v7 }
0x3942   :  { %v10054_v52 = vpop.f32.mrb[54].mxu0 }
0x3943   :  { %v5176_v53 = vpop.f32.mrb[55].mxu0 }
0x3944   :  { %10063 = vmatprep.mubr.msk.f32.mxu0 %vm3968_vm3, %v5176_v53 }
0x3945   :  { %10064 = vmatmul.mubr.msk.f32.vlgmr.msra.gmra.mrb[56].mxu0 %vm3968_vm3, %v10054_v52 }
0x3946   :  { %9865 = vmatpush3.bf16.msra.mxu0 %v10584_v61 }
0x3947   :  { %9866 = vmatprep.subr.bf16.mxu0 %v10587_v10 }
0x394a   :  { %9867 = vmatpush3.bf16.msra.mxu0 %v10588_v11 }
0x394b   :  { %9868 = vmatprep.subr.bf16.mxu0 %v10591_v41  ;;  %v10610_v41 = vld [vmem:[%s12835_s5 + $0x500] sm:$0xff]  }
0x394e   :  { %9869 = vmatpush3.bf16.msra.mxu0 %v10592_v37 }
0x394f   :  { %9870 = vmatprep.subr.bf16.mxu0 %v10595_v57 }
0x3952   :  { %9871 = vmatpush3.bf16.msra.mxu0 %v10596_v46 }
0x3953   :  { %9872 = vmatprep.subr.bf16.mxu0 %v10599_v2 }
0x3956   :  { %9873 = vmatpush3.bf16.msra.mxu0 %v10600_v54  ;;  %v10614_v54 = vld [vmem:[%s12835_s5 + $0x518] sm:$0xff]  }
0x3957   :  { %9874 = vmatprep.subr.bf16.mxu0 %v10603_v17 }
0x395a   :  { %9875 = vmatpush3.bf16.msra.mxu0 %v10604_v20  ;;  %v10617_v20 = vld [vmem:[%s12835_s5 + $0x530] sm:$0xff]  }
0x395b   :  { %9876 = vmatprep.subr.bf16.mxu0 %v10607_v19  ;;  %v10621_v19 = vld [vmem:[%s12835_s5 + $0x550] sm:$0xff]  }
0x395e   :  { %9877 = vmatpush3.bf16.msra.mxu0 %v10608_v21  ;;  %v10622_v21 = vld [vmem:[%s12835_s5 + $0x558] sm:$0xff]  }
0x395f   :  { %9878 = vmatprep.subr.bf16.mxu0 %v10609_v6 }
0x3962   :  { %9879 = vmatpush3.bf16.msra.mxu0 %v10611_v16 }
0x3963   :  { %5878 = vmatprep.subr.bf16.mxu0 %v11445_v51 }
0x3a18   :  { %v10065_v35 = vpop.f32.mrb[56].mxu0 }
0x3a19   :  { %v5268_v25 = vadd.f32 %v10065_v35, %v5189_v55  ;;  %v5262_v59 = vpop.f32.mrb[57].mxu0 }
0x3a1a   :  { %v5263_v56 = vadd.f32 %v5262_v59, %v5189_v55  ;;  %v5294_v55 = vrot.slane %v11448_v47, 4 }
0x3a1c   :  { %v10405_v4 = vpack.i.bf16 %v5268_v25, %v5263_v56 }
0x3a1e   :  { %10406 = vrot.lane.b32.xlu0 %v10405_v4, %s11452_s30 }
0x3a90   :  { %v10407_v40 = vpop.permute.xlu0 %10406 }
0x3a91   :  { %v10409_v23 = vunpack.i.h.bf16 %v10407_v40  ;;  %v10408_v27 = vunpack.i.l.bf16 %v10407_v40 }
0x3a93   :  { %v12650_v34 = vsel %vm3849_vm7, %v12536_v8, %v10409_v23  ;;  %v5279_v62 = vsel %vm3849_vm7, %v12533_v32, %v10408_v27 }
0x3a94   :  { %v5302_v38 = vrot.slane %v5279_v62, 6  ;;  %v5304_v30 = vrot.slane %v12650_v34, 6  ;;  %v5284_v14 = vrot.slane %v5279_v62, 2  ;;  %v5286_v39 = vrot.slane %v12650_v34, 2 }
0x3a95   :  { %v5295_v53 = vrot.slane %v5279_v62, 4  ;;  %v5297_v35 = vrot.slane %v12650_v34, 4  ;;  %v5405_v17 = vpack.c.bf16 %v11448_v47, %v12650_v34 }
0x3a96   :  { %v5303_v26 = vsel %vm841_vm5, %v5301_v29, %v5302_v38  ;;  %v5305_v8 = vsel %vm841_vm5, %v5302_v38, %v5304_v30  ;;  %v5285_v9 = vsel %vm3689_vm9, %v5283_v31, %v5284_v14  ;;  %v5287_v0 = vsel %vm3689_vm9, %v5284_v14, %v5286_v39 }
0x3a97   :  { %v10410_v32 = vpack.i.bf16 %v5305_v8, %v5303_v26  ;;  %v10415_v48 = vpack.i.bf16 %v5285_v9, %v5287_v0  ;;  %v5312_v49 = vsel %vm3689_vm9, %v5286_v39, %v5283_v31  ;;  %v5318_v50 = vsel %vm841_vm5, %v5304_v30, %v5301_v29  ;;  %v5406_v31 = vld [vmem:[#allocation2 + $0x440] ss:$0 sm:$0xff] }
0x3a98   :  { %v10420_v52 = vpack.i.bf16 %v5312_v49, %v5318_v50  ;;  %v5296_v22 = vsel %vm83_vm0, %v5294_v55, %v5295_v53  ;;  %v5298_v7 = vsel %vm83_vm0, %v5295_v53, %v5297_v35  ;;  %v5316_v57 = vsel %vm83_vm0, %v5297_v35, %v5294_v55 }
0x3a99   :  { %10411 = vrot.lane.b32.xlu1 %v10410_v32, %s11432_s12  ;;  %10416 = vrot.lane.b32.xlu0 %v10415_v48, %s11432_s12 }
0x3a9d   :  { %10421 = vrot.lane.b32.xlu1 %v10420_v52, %s11432_s12 }
0x3b0b   :  { %v10412_v25 = vpop.permute.xlu1 %10411  ;;  %v10417_v4 = vpop.permute.xlu0 %10416 }
0x3b0c   :  { %v10414_v59 = vunpack.i.h.bf16 %v10412_v25  ;;  %v10413_v56 = vunpack.i.l.bf16 %v10412_v25  ;;  %v10419_v36 = vunpack.i.h.bf16 %v10417_v4  ;;  %v10418_v45 = vunpack.i.l.bf16 %v10417_v4 }
0x3b0e   :  { %v5325_v61 = vsel %vm5322_vm13, %v5296_v22, %v10413_v56  ;;  %v5326_v10 = vsel %vm5322_vm13, %v5298_v7, %v10414_v59  ;;  %v5324_v43 = vsel %vm5322_vm13, %v5279_v62, %v10418_v45  ;;  %v10623_v7 = vld [vmem:[%s12835_s5 + $0x560] sm:$0xff]   ;;  %s11454_s5 = smov 8  }
0x3b0f   :  { %v10422_v44 = vpop.permute.xlu1 %10421  ;;  %v5402_v11 = vpack.c.bf16 %v5326_v10, %v5325_v61  ;;  %v9213_v60 = vpack.c.bf16 %v5324_v43, %v10419_v36 }
0x3b10   :  { %v10424_v15 = vunpack.i.h.bf16 %v10422_v44  ;;  %v10423_v37 = vunpack.i.l.bf16 %v10422_v44 }
0x3b11   :  { %5658 = vmatprep.mubr.bf16.mxu1 %v5402_v11 }
0x3b12   :  { %v5327_v63 = vsel %vm5322_vm13, %v12650_v34, %v10424_v15  ;;  %9214 = vmatmul.mubr.msk.bf16.vlgmr.msra.gmra.mrb[64].mxu1 %vm9212_vm1, %v9213_v60  ;;  %v5328_v13 = vsel %vm5322_vm13, %v5316_v57, %v10423_v37 }
0x3b13   :  { %v5403_v46 = vpack.c.bf16 %v5327_v63, %v5324_v43  ;;  %10067 = vmatpush3.bf16.msra.mxu1 %v10610_v41  ;;  %v5404_v2 = vpack.c.bf16 %v5328_v13, %v5326_v10  ;;  %10074 = vmatprep.mubr.msk.bf16.mxu1 %vm11447_vm6, %v11448_v47 }
0x3b14   :  { %10068 = vmatprep.subr.bf16.mxu1 %v11448_v47 }
0x3b15   :  { %5699 = vmatprep.mubr.bf16.mxu0 %v5404_v2 }
0x3b16   :  { %5700 = vmatmul.mubr.bf16.vlgmr.msra.gmra.mrb[60].mxu0 %v5403_v46 }
0x3b17   :  { %10069 = vmatpush3.bf16.msra.mxu1 %v10612_v12  ;;  %5879 = vmatpush1.bf16.msra.mxu0 %v10615_v28 }
0x3b18   :  { %10070 = vmatprep.subr.bf16.mxu1 %v11448_v47  ;;  %5880 = vmatprep.subr.bf16.mxu0 %v11445_v51 }
0x3b1b   :  { %10071 = vmatpush3.bf16.msra.mxu1 %v10613_v33  ;;  %5881 = vmatpush1.bf16.msra.mxu0 %v10616_v3 }
0x3b1c   :  { %10072 = vmatprep.subr.bf16.mxu1 %v11448_v47  ;;  %5882 = vmatprep.subr.bf16.mxu0 %v11445_v51 }
0x3b1f   :  { %10073 = vmatpush3.bf16.msra.mxu1 %v10614_v54  ;;  %5883 = vmatpush1.bf16.msra.mxu0 %v10617_v20 }
0x3b20   :  { %5884 = vmatprep.subr.bf16.mxu0 %v11445_v51 }
0x3b22   :  { %10075 = vmatmul.mubr.msk.bf16.vlgmr.msra.gmra.mrb[68].mxu1 %vm5322_vm13, %v5405_v17 }
0x3b23   :  { %5885 = vmatpush1.bf16.msra.mxu0 %v10618_v18 }
0x3b24   :  { %5886 = vmatprep.subr.bf16.mxu0 %v11445_v51 }
0x3b27   :  { %5887 = vmatpush1.bf16.msra.mxu0 %v10619_v58 }
0x3b28   :  { %5888 = vmatprep.subr.bf16.mxu0 %v11445_v51 }
0x3b2b   :  { %5889 = vmatpush1.bf16.msra.mxu0 %v10620_v42 }
0x3b2c   :  { %5890 = vmatprep.subr.bf16.mxu0 %v11445_v51 }
0x3b2f   :  { %5891 = vmatpush1.bf16.msra.mxu0 %v10621_v19 }
0x3b30   :  { %5892 = vmatprep.subr.bf16.mxu0 %v11445_v51 }
0x3b33   :  { %5893 = vmatpush1.bf16.msra.mxu0 %v10622_v21 }
0x3b34   :  { %5894 = vmatprep.subr.bf16.mxu0 %v11445_v51 }
0x3b37   :  { %5895 = vmatpush1.bf16.msra.mxu0 %v10623_v7  ;;  %v5820_v7 = vld [vmem:[#allocation2 + $0x460] ss:$0 sm:$0xff] }
0x3be5   :  { %v9858_v40 = vpop.f32.mrb[64].mxu1 }
0x3be6   :  { %v9859_v23 = vpop.f32.mrb[65].mxu1 }
0x3be7   :  { %v9860_v27 = vadd.f32 %v9859_v23, %v9858_v40  ;;  %v9861_v29 = vpop.f32.mrb[66].mxu1 }
0x3be8   :  { %v9862_v6 = vpop.f32.mrb[67].mxu1 }
0x3be9   :  { %v9863_v34 = vadd.f32 %v9862_v6, %v9861_v29  ;;  %v9880_v62 = vpop.f32.mrb[60].mxu0  ;;  %v5661_v38 = vadd.f32 %v9860_v27, %v5406_v31  ;;  %v10626_v6 = vld [vmem:[#allocation6 + $0x4] ss:$16 sps:$4 sm:$0xff]  }
0x3bea   :  { %v9881_v16 = vpop.f32.mrb[61].mxu0  ;;  %6273 = vmatprep.subr.bf16.mxu1 %v10626_v6  ;;  %v10704_v6 = vld [vmem:[#allocation6 + $0x344] ss:$16 sps:$4 sm:$0xff]  }
0x3beb   :  { %v9882_v30 = vadd.f32 %v9881_v16, %v9880_v62  ;;  %v9883_v14 = vpop.f32.mrb[62].mxu0  ;;  %v5664_v26 = vadd.f32 %v9863_v34, %v5406_v31  ;;  %v10624_v31 = vld [vmem:[#allocation6] ss:$16 sps:$4 sm:$0xff]   ;;  %v10629_v34 = vld [vmem:[#allocation6 + $0x24] ss:$16 sps:$4 sm:$0xff]  }
0x3bec   :  { %v9884_v39 = vpop.f32.mrb[63].mxu0  ;;  %6274 = vmatpush1.bf16.msra.mxu1 %v10624_v31  ;;  %v10627_v62 = vld [vmem:[#allocation6 + $0x20] ss:$16 sps:$4 sm:$0xff]   ;;  %v10632_v16 = vld [vmem:[#allocation6 + $0x44] ss:$16 sps:$4 sm:$0xff]  }
0x3bed   :  { %v9885_v8 = vadd.f32 %v9884_v39, %v9883_v14  ;;  %v5702_v9 = vadd.f32 %v9882_v30, %v5661_v38  ;;  %6275 = vmatprep.subr.bf16.mxu1 %v10629_v34  ;;  %v10630_v38 = vld [vmem:[#allocation6 + $0x40] ss:$16 sps:$4 sm:$0xff]   ;;  %v10635_v30 = vld [vmem:[#allocation6 + $0x64] ss:$16 sps:$4 sm:$0xff]  }
0x3bee   :  { %v10633_v14 = vld [vmem:[#allocation6 + $0x60] ss:$16 sps:$4 sm:$0xff]   ;;  %v10638_v39 = vld [vmem:[#allocation6 + $0x84] ss:$16 sps:$4 sm:$0xff]  }
0x3bef   :  { %v5705_v32 = vadd.f32 %v9885_v8, %v5664_v26  ;;  %v10636_v26 = vld [vmem:[#allocation6 + $0x80] ss:$16 sps:$4 sm:$0xff]   ;;  %v10641_v8 = vld [vmem:[#allocation6 + $0xa4] ss:$16 sps:$4 sm:$0xff]  }
0x3bf0   :  { %6276 = vmatpush1.bf16.msra.mxu1 %v10627_v62  ;;  %v10699_v31 = vld [vmem:[#allocation6 + $0x320] ss:$16 sps:$4 sm:$0xff]   ;;  %v10707_v62 = vld [vmem:[#allocation6 + $0x364] ss:$16 sps:$4 sm:$0xff]  }
0x3bf1   :  { %6277 = vmatprep.subr.bf16.mxu1 %v10632_v16  ;;  %v10702_v34 = vld [vmem:[#allocation6 + $0x340] ss:$16 sps:$4 sm:$0xff]  }
0x3bf2   :  { %v10705_v16 = vld [vmem:[#allocation6 + $0x360] ss:$16 sps:$4 sm:$0xff]  }
0x3bf4   :  { %6278 = vmatpush1.bf16.msra.mxu1 %v10630_v38  ;;  %v10710_v38 = vld [vmem:[#allocation6 + $0x384] ss:$16 sps:$4 sm:$0xff]  }
0x3bf5   :  { %v5742_v0 = vpop.f32.mrb[68].mxu1  ;;  %6279 = vmatprep.subr.bf16.mxu1 %v10635_v30  ;;  %v10708_v30 = vld [vmem:[#allocation6 + $0x380] ss:$16 sps:$4 sm:$0xff]  }
0x3bf6   :  { %v5743_v48 = vadd.f32 %v5742_v0, %v5702_v9  ;;  %v10076_v49 = vpop.f32.mrb[69].mxu1  ;;  %v10639_v9 = vld [vmem:[#allocation6 + $0xa0] ss:$16 sps:$4 sm:$0xff]  }
0x3bf7   :  { %v5745_v50 = vpop.f32.mrb[70].mxu1  ;;  %v10642_v0 = vld [vmem:[#allocation6 + $0xc0] ss:$16 sps:$4 sm:$0xff]  }
0x3bf8   :  { %v5751_v52 = vmin.f32 %v5743_v48, 0.0  ;;  %v5746_v53 = vadd.f32 %v5745_v50, %v5705_v32  ;;  %v10077_v55 = vpop.f32.mrb[71].mxu1  ;;  %vm5749_vm2 = vcmp.gt.f32.partialorder %v5743_v48, 0.0  ;;  %6280 = vmatpush1.bf16.msra.mxu1 %v10633_v14  ;;  %v10644_v32 = vld [vmem:[#allocation6 + $0xc4] ss:$16 sps:$4 sm:$0xff]  }
0x3bf9   :  { %6281 = vmatprep.subr.bf16.mxu1 %v10638_v39  ;;  %v10645_v49 = vld [vmem:[#allocation6 + $0xe0] ss:$16 sps:$4 sm:$0xff]   ;;  %v10650_v50 = vld [vmem:[#allocation6 + $0x104] ss:$16 sps:$4 sm:$0xff]  }
0x3bfa   :  { %v5753_v35 = vmul.f32 1.442695, %v5751_v52  ;;  %v5752_v25 = vmin.f32 %v5746_v53, 0.0  ;;  %vm5750_vm10 = vcmp.gt.f32.partialorder %v5746_v53, 0.0  ;;  %v10648_v52 = vld [vmem:[#allocation6 + $0x100] ss:$16 sps:$4 sm:$0xff]  }
0x3bfb   :  { %v10651_v55 = vld [vmem:[#allocation6 + $0x120] ss:$16 sps:$4 sm:$0xff]   ;;  %v10713_v14 = vld [vmem:[#allocation6 + $0x3a4] ss:$16 sps:$4 sm:$0xff]  }
0x3bfc   :  { %11344 = vpow2.f32 %v5753_v35  ;;  %v5755_v59 = vmul.f32 1.442695, %v5752_v25  ;;  %6282 = vmatpush1.bf16.msra.mxu1 %v10636_v26  ;;  %v10656_v35 = vld [vmem:[#allocation6 + $0x144] ss:$16 sps:$4 sm:$0xff]   ;;  %v10654_v25 = vld [vmem:[#allocation6 + $0x140] ss:$16 sps:$4 sm:$0xff]  }
0x3bfd   :  { %6283 = vmatprep.subr.bf16.mxu1 %v10641_v8  ;;  %v10711_v39 = vld [vmem:[#allocation6 + $0x3a0] ss:$16 sps:$4 sm:$0xff]   ;;  %v10716_v26 = vld [vmem:[#allocation6 + $0x3c4] ss:$16 sps:$4 sm:$0xff]  }
0x3bfe   :  { %11346 = vpow2.f32 %v5755_v59  ;;  %v10659_v59 = vld [vmem:[#allocation6 + $0x164] ss:$16 sps:$4 sm:$0xff]   ;;  %v10714_v8 = vld [vmem:[#allocation6 + $0x3c0] ss:$16 sps:$4 sm:$0xff]  }
0x3c00   :  { %6284 = vmatpush1.bf16.msra.mxu1 %v10639_v9  ;;  %v10719_v9 = vld [vmem:[#allocation6 + $0x3e4] ss:$16 sps:$4 sm:$0xff]  }
0x3c01   :  { %6285 = vmatprep.subr.bf16.mxu1 %v10644_v32  ;;  %v10717_v32 = vld [vmem:[#allocation6 + $0x3e0] ss:$16 sps:$4 sm:$0xff]  }
0x3c04   :  { %6286 = vmatpush1.bf16.msra.mxu1 %v10642_v0  ;;  %v10722_v0 = vld [vmem:[#allocation6 + $0x404] ss:$16 sps:$4 sm:$0xff]  }
0x3c06   :  { %v11345_v56 = vpop.eup %11344 }
0x3c07   :  { %v9216_v4 = vadd.f32 -1.0, %v11345_v56  ;;  %v10657_v56 = vld [vmem:[#allocation6 + $0x160] ss:$16 sps:$4 sm:$0xff]  }
0x3c08   :  { %v11347_v36 = vpop.eup %11346 }
0x3c09   :  { %v5759_v45 = vsel %vm5749_vm2, %v5743_v48, %v9216_v4  ;;  %v9217_v22 = vadd.f32 -1.0, %v11347_v36  ;;  %v10647_v48 = vld [vmem:[#allocation6 + $0xe4] ss:$16 sps:$4 sm:$0xff]   ;;  %v10660_v36 = vld [vmem:[#allocation6 + $0x180] ss:$16 sps:$4 sm:$0xff]  }
0x3c0a   :  { %v5763_v61 = vrot.slane %v5759_v45, 6  ;;  %6287 = vmatprep.subr.bf16.mxu1 %v10647_v48  ;;  %v10662_v4 = vld [vmem:[#allocation6 + $0x184] ss:$16 sps:$4 sm:$0xff]   ;;  %v10720_v48 = vld [vmem:[#allocation6 + $0x400] ss:$16 sps:$4 sm:$0xff]  }
0x3c0b   :  { %v5760_v10 = vsel %vm5750_vm10, %v5746_v53, %v9217_v22  ;;  %6288 = vmatpush1.bf16.msra.mxu1 %v10645_v49  ;;  %v10653_v53 = vld [vmem:[#allocation6 + $0x124] ss:$16 sps:$4 sm:$0xff]   ;;  %v10663_v22 = vld [vmem:[#allocation6 + $0x1a0] ss:$16 sps:$4 sm:$0xff]  }
0x3c0c   :  { %v5769_v43 = vsel %vm841_vm5, 0.0, %v5763_v61  ;;  %v5764_v44 = vrot.slane %v5760_v10, 6  ;;  %6289 = vmatprep.subr.bf16.mxu1 %v10650_v50  ;;  %v10665_v45 = vld [vmem:[#allocation6 + $0x1a4] ss:$16 sps:$4 sm:$0xff]   ;;  %v10723_v50 = vld [vmem:[#allocation6 + $0x420] ss:$16 sps:$4 sm:$0xff]  }
0x3c0d   :  { %v5773_v11 = vrot.slane %v5769_v43, 2  ;;  %v5784_v41 = vrot.slane %v5769_v43, 4  ;;  %v10725_v49 = vld [vmem:[#allocation6 + $0x424] ss:$16 sps:$4 sm:$0xff]  }
0x3c0e   :  { %v5765_v60 = vsel %vm841_vm5, %v5763_v61, %v5764_v44  ;;  %v5770_v15 = vsel %vm841_vm5, %v5764_v44, 0.0  ;;  %vm5797_vm5 = vcmask 785408  }
0x3c0f   :  { %v5774_v37 = vrot.slane %v5765_v60, 2  ;;  %v5776_v57 = vrot.slane %v5770_v15, 2  ;;  %v5785_v63 = vrot.slane %v5765_v60, 4  ;;  %v5787_v13 = vrot.slane %v5770_v15, 4  ;;  %6290 = vmatpush1.bf16.msra.mxu1 %v10648_v52  ;;  %v10728_v52 = vld [vmem:[#allocation6 + $0x444] ss:$16 sps:$4 sm:$0xff]  }
0x3c10   :  { %6291 = vmatprep.subr.bf16.mxu1 %v10653_v53  ;;  %v10726_v53 = vld [vmem:[#allocation6 + $0x440] ss:$16 sps:$4 sm:$0xff]  }
0x3c11   :  { %v5786_v46 = vsel %vm83_vm0, %v5784_v41, %v5785_v63  ;;  %v5788_v2 = vsel %vm83_vm0, %v5785_v63, %v5787_v13  ;;  %v5775_v12 = vsel %vm3689_vm9, %v5773_v11, %v5774_v37  ;;  %v5777_v33 = vsel %vm3689_vm9, %v5774_v37, %v5776_v57  ;;  %v10666_v63 = vld [vmem:[#allocation6 + $0x1c0] ss:$16 sps:$4 sm:$0xff]   ;;  %v10668_v13 = vld [vmem:[#allocation6 + $0x1c4] ss:$16 sps:$4 sm:$0xff]  }
0x3c12   :  { %v10430_v54 = vpack.i.bf16 %v5788_v2, %v5786_v46  ;;  %v10425_v17 = vpack.i.bf16 %v5777_v33, %v5775_v12  ;;  %v10669_v46 = vld [vmem:[#allocation6 + $0x1e0] ss:$16 sps:$4 sm:$0xff]   ;;  %v10671_v2 = vld [vmem:[#allocation6 + $0x1e4] ss:$16 sps:$4 sm:$0xff]  }
0x3c13   :  { %6292 = vmatpush1.bf16.msra.mxu1 %v10651_v55  ;;  %v10731_v55 = vld [vmem:[#allocation6 + $0x464] ss:$16 sps:$4 sm:$0xff]  }
0x3c14   :  { %10431 = vrot.lane.b32.xlu1 %v10430_v54, %s11450_s28  ;;  %10426 = vrot.lane.b32.xlu0 %v10425_v17, %s11452_s30 }
0x3c15   :  { %6293 = vmatprep.subr.bf16.mxu1 %v10656_v35  ;;  %v10729_v35 = vld [vmem:[#allocation6 + $0x460] ss:$16 sps:$4 sm:$0xff]  }
0x3c17   :  { %6294 = vmatpush1.bf16.msra.mxu1 %v10654_v25  ;;  %v10734_v25 = vld [vmem:[#allocation6 + $0x484] ss:$16 sps:$4 sm:$0xff]  }
0x3c18   :  { %6295 = vmatprep.subr.bf16.mxu1 %v10659_v59  ;;  %v10732_v59 = vld [vmem:[#allocation6 + $0x480] ss:$16 sps:$4 sm:$0xff]  }
0x3c1b   :  { %6296 = vmatpush1.bf16.msra.mxu1 %v10657_v56  ;;  %v10737_v56 = vld [vmem:[#allocation6 + $0x4a4] ss:$16 sps:$4 sm:$0xff]  }
0x3c1c   :  { %6297 = vmatprep.subr.bf16.mxu1 %v10662_v4  ;;  %v10735_v4 = vld [vmem:[#allocation6 + $0x4a0] ss:$16 sps:$4 sm:$0xff]  }
0x3c1f   :  { %6298 = vmatpush1.bf16.msra.mxu1 %v10660_v36 }
0x3c20   :  { %6299 = vmatprep.subr.bf16.mxu1 %v10665_v45 }
0x3c23   :  { %6300 = vmatpush1.bf16.msra.mxu1 %v10663_v22 }
0x3c24   :  { %6301 = vmatprep.subr.bf16.mxu1 %v10668_v13  ;;  %v10680_v13 = vld [vmem:[#allocation6 + $0x244] ss:$16 sps:$4 sm:$0xff]  }
0x3c27   :  { %6302 = vmatpush1.bf16.msra.mxu1 %v10666_v63  ;;  %v10675_v63 = vld [vmem:[#allocation6 + $0x220] ss:$16 sps:$4 sm:$0xff]  }
0x3c28   :  { %6303 = vmatprep.subr.bf16.mxu1 %v10671_v2  ;;  %v10683_v2 = vld [vmem:[#allocation6 + $0x264] ss:$16 sps:$4 sm:$0xff]  }
0x3c2b   :  { %6304 = vmatpush1.bf16.msra.mxu1 %v10669_v46  ;;  %v10678_v46 = vld [vmem:[#allocation6 + $0x240] ss:$16 sps:$4 sm:$0xff]  }
0x3c86   :  { %v10432_v28 = vpop.permute.xlu1 %10431  ;;  %v10427_v3 = vpop.permute.xlu0 %10426 }
0x3c87   :  { %v10434_v20 = vunpack.i.h.bf16 %v10432_v28  ;;  %v10433_v18 = vunpack.i.l.bf16 %v10432_v28  ;;  %v10429_v58 = vunpack.i.h.bf16 %v10427_v3  ;;  %v10428_v42 = vunpack.i.l.bf16 %v10427_v3  ;;  %v10674_v28 = vld [vmem:[#allocation6 + $0x204] ss:$16 sps:$4 sm:$0xff]  }
0x3c88   :  { %6314 = vmatprep.subr.bf16.mxu1 %v10674_v28  ;;  %v10687_v28 = vld [vmem:[#allocation6 + $0x2a0] ss:$16 sps:$4 sm:$0xff]  }
0x3c89   :  { %v5819_v19 = vpack.c.bf16 %v10434_v20, %v10433_v18  ;;  %v5796_v21 = vsel %vm3849_vm7, %v5765_v60, %v10429_v58  ;;  %v5795_v40 = vsel %vm3849_vm7, %v5769_v43, %v10428_v42 }
0x3c8a   :  { %v5798_v23 = vsel %vm5797_vm5, %v5795_v40, %v10433_v18  ;;  %v5799_v27 = vsel %vm5797_vm5, %v5796_v21, %v10434_v20 }
0x3c8b   :  { %9227 = vmatprep.mubr.msk.bf16.mxu0 %vm256_vm4, %v5819_v19  ;;  %v5818_v29 = vpack.c.bf16 %v5799_v27, %v5798_v23  ;;  %v10696_v23 = vld [vmem:[#allocation6 + $0x300] ss:$16 sps:$4 sm:$0xff]   ;;  %v10698_v27 = vld [vmem:[#allocation6 + $0x304] ss:$16 sps:$4 sm:$0xff]  }
0x3c8c   :  { %6564 = vmatprep.subr.bf16.mxu0 %v10698_v27  ;;  %v10738_v27 = vld [vmem:[#allocation6 + $0x4c0] ss:$16 sps:$4 sm:$0xff]  }
0x3c8d   :  { %5911 = vmatmul.mubr.bf16.vlgmr.msra.gmra.mrb[64].mxu0 %v5818_v29  ;;  %v10701_v29 = vld [vmem:[#allocation6 + $0x324] ss:$16 sps:$4 sm:$0xff]  }
0x3c8e   :  { %6565 = vmatpush1.bf16.msra.mxu0 %v10696_v23  ;;  %v10740_v23 = vld [vmem:[#allocation6 + $0x4c4] ss:$16 sps:$4 sm:$0xff]  }
0x3c8f   :  { %6566 = vmatprep.subr.bf16.mxu0 %v10701_v29  ;;  %v10743_v29 = vld [vmem:[#allocation6 + $0x4e4] ss:$16 sps:$4 sm:$0xff]  }
0x3c92   :  { %6567 = vmatpush1.bf16.msra.mxu0 %v10699_v31  ;;  %v10741_v31 = vld [vmem:[#allocation6 + $0x4e0] ss:$16 sps:$4 sm:$0xff]  }
0x3c93   :  { %6568 = vmatprep.subr.bf16.mxu0 %v10704_v6  ;;  %v10746_v6 = vld [vmem:[#allocation6 + $0x504] ss:$16 sps:$4 sm:$0xff]  }
0x3c96   :  { %6569 = vmatpush1.bf16.msra.mxu0 %v10702_v34  ;;  %v10747_v34 = vld [vmem:[#allocation6 + $0x508] ss:$16 sps:$4 sm:$0xff]  }
0x3c97   :  { %6570 = vmatprep.subr.bf16.mxu0 %v10707_v62  ;;  %v10749_v62 = vld [vmem:[#allocation6 + $0x50c] ss:$16 sps:$4 sm:$0xff]  }
0x3c9a   :  { %6571 = vmatpush1.bf16.msra.mxu0 %v10705_v16  ;;  %v10755_v16 = vld [vmem:[#allocation6 + $0x52c] ss:$16 sps:$4 sm:$0xff]  }
0x3c9b   :  { %6572 = vmatprep.subr.bf16.mxu0 %v10710_v38  ;;  %v10753_v38 = vld [vmem:[#allocation6 + $0x528] ss:$16 sps:$4 sm:$0xff]  }
0x3c9e   :  { %6573 = vmatpush1.bf16.msra.mxu0 %v10708_v30  ;;  %v10761_v30 = vld [vmem:[#allocation6 + $0x54c] ss:$16 sps:$4 sm:$0xff]  }
0x3c9f   :  { %6574 = vmatprep.subr.bf16.mxu0 %v10713_v14  ;;  %v10759_v14 = vld [vmem:[#allocation6 + $0x548] ss:$16 sps:$4 sm:$0xff]  }
0x3ca2   :  { %6575 = vmatpush1.bf16.msra.mxu0 %v10711_v39  ;;  %v10767_v39 = vld [vmem:[#allocation6 + $0x56c] ss:$16 sps:$4 sm:$0xff]  }
0x3ca3   :  { %6576 = vmatprep.subr.bf16.mxu0 %v10716_v26  ;;  %v10765_v26 = vld [vmem:[#allocation6 + $0x568] ss:$16 sps:$4 sm:$0xff]  }
0x3ca6   :  { %6577 = vmatpush1.bf16.msra.mxu0 %v10714_v8  ;;  %v10773_v8 = vld [vmem:[#allocation6 + $0x58c] ss:$16 sps:$4 sm:$0xff]  }
0x3ca7   :  { %6578 = vmatprep.subr.bf16.mxu0 %v10719_v9  ;;  %v10771_v9 = vld [vmem:[#allocation6 + $0x588] ss:$16 sps:$4 sm:$0xff]  }
0x3caa   :  { %6579 = vmatpush1.bf16.msra.mxu0 %v10717_v32  ;;  %v10779_v32 = vld [vmem:[#allocation6 + $0x5ac] ss:$16 sps:$4 sm:$0xff]  }
0x3cab   :  { %6580 = vmatprep.subr.bf16.mxu0 %v10722_v0  ;;  %v10777_v0 = vld [vmem:[#allocation6 + $0x5a8] ss:$16 sps:$4 sm:$0xff]  }
0x3cae   :  { %6581 = vmatpush1.bf16.msra.mxu0 %v10720_v48  ;;  %v10785_v48 = vld [vmem:[#allocation6 + $0x5cc] ss:$16 sps:$4 sm:$0xff]  }
0x3caf   :  { %6582 = vmatprep.subr.bf16.mxu0 %v10725_v49  ;;  %v10783_v49 = vld [vmem:[#allocation6 + $0x5c8] ss:$16 sps:$4 sm:$0xff]  }
0x3cb2   :  { %6583 = vmatpush1.bf16.msra.mxu0 %v10723_v50  ;;  %v10791_v50 = vld [vmem:[#allocation6 + $0x5ec] ss:$16 sps:$4 sm:$0xff]  }
0x3cb3   :  { %6584 = vmatprep.subr.bf16.mxu0 %v10728_v52  ;;  %v10789_v52 = vld [vmem:[#allocation6 + $0x5e8] ss:$16 sps:$4 sm:$0xff]  }
0x3cb6   :  { %6585 = vmatpush1.bf16.msra.mxu0 %v10726_v53  ;;  %v10797_v53 = vld [vmem:[#allocation6 + $0x60c] ss:$16 sps:$4 sm:$0xff]  }
0x3cb7   :  { %6586 = vmatprep.subr.bf16.mxu0 %v10731_v55  ;;  %v10795_v55 = vld [vmem:[#allocation6 + $0x608] ss:$16 sps:$4 sm:$0xff]  }
0x3cba   :  { %6587 = vmatpush1.bf16.msra.mxu0 %v10729_v35  ;;  %v10803_v35 = vld [vmem:[#allocation6 + $0x62c] ss:$16 sps:$4 sm:$0xff]  }
0x3cbb   :  { %6588 = vmatprep.subr.bf16.mxu0 %v10734_v25  ;;  %v10801_v25 = vld [vmem:[#allocation6 + $0x628] ss:$16 sps:$4 sm:$0xff]  }
0x3cbe   :  { %6589 = vmatpush1.bf16.msra.mxu0 %v10732_v59  ;;  %v10809_v59 = vld [vmem:[#allocation6 + $0x64c] ss:$16 sps:$4 sm:$0xff]  }
0x3cbf   :  { %6590 = vmatprep.subr.bf16.mxu0 %v10737_v56  ;;  %v10807_v56 = vld [vmem:[#allocation6 + $0x648] ss:$16 sps:$4 sm:$0xff]  }
0x3cc2   :  { %6591 = vmatpush1.bf16.msra.mxu0 %v10735_v4  ;;  %v10815_v4 = vld [vmem:[#allocation6 + $0x66c] ss:$16 sps:$4 sm:$0xff]  }
0x3cc3   :  { %6592 = vmatprep.subr.bf16.mxu0 %v10740_v23  ;;  %v10786_v23 = vld [vmem:[#allocation6 + $0x5e0] ss:$16 sps:$4 sm:$0xff]  }
0x3cc6   :  { %6593 = vmatpush1.bf16.msra.mxu0 %v10738_v27  ;;  %v10794_v27 = vld [vmem:[#allocation6 + $0x604] ss:$16 sps:$4 sm:$0xff]  }
0x3cc7   :  { %6594 = vmatprep.subr.bf16.mxu0 %v10743_v29  ;;  %v10792_v29 = vld [vmem:[#allocation6 + $0x600] ss:$16 sps:$4 sm:$0xff]  }
0x3cca   :  { %6595 = vmatpush1.bf16.msra.mxu0 %v10741_v31  ;;  %v10800_v31 = vld [vmem:[#allocation6 + $0x624] ss:$16 sps:$4 sm:$0xff]  }
0x3ccb   :  { %7016 = vmatprep.subr.bf16.mxu0 %v10746_v6  ;;  %v10798_v6 = vld [vmem:[#allocation6 + $0x620] ss:$16 sps:$4 sm:$0xff]  }
0x3d60   :  { %v5912_v61 = vpop.f32.mrb[64].mxu0 }
0x3d61   :  { %v5913_v10 = vadd.f32 %v5912_v61, %v5820_v7  ;;  %v5914_v43 = vpop.f32.mrb[65].mxu0 }
0x3d62   :  { %v5915_v44 = vpop.f32.mrb[66].mxu0 }
0x3d63   :  { %v5921_v11 = vmin.f32 %v5913_v10, 0.0  ;;  %v5916_v41 = vadd.f32 %v5915_v44, %v5820_v7  ;;  %v5917_v60 = vpop.f32.mrb[67].mxu0  ;;  %vm5919_vm0 = vcmp.gt.f32.partialorder %v5913_v10, 0.0 }
0x3d65   :  { %v5923_v15 = vmul.f32 1.442695, %v5921_v11  ;;  %v5922_v37 = vmin.f32 %v5916_v41, 0.0  ;;  %vm5920_vm9 = vcmp.gt.f32.partialorder %v5916_v41, 0.0 }
0x3d67   :  { %11348 = vpow2.f32 %v5923_v15  ;;  %v5925_v57 = vmul.f32 1.442695, %v5922_v37  ;;  %v10672_v15 = vld [vmem:[#allocation6 + $0x200] ss:$16 sps:$4 sm:$0xff]  }
0x3d69   :  { %11350 = vpow2.f32 %v5925_v57  ;;  %v10677_v57 = vld [vmem:[#allocation6 + $0x224] ss:$16 sps:$4 sm:$0xff]  }
0x3d71   :  { %v11349_v12 = vpop.eup %11348 }
0x3d72   :  { %v9228_v33 = vadd.f32 -1.0, %v11349_v12  ;;  %v10681_v12 = vld [vmem:[#allocation6 + $0x260] ss:$16 sps:$4 sm:$0xff]  }
0x3d73   :  { %v11351_v54 = vpop.eup %11350 }
0x3d74   :  { %v12750_v17 = vsel %vm5919_vm0, %v5913_v10, %v9228_v33  ;;  %v9229_v18 = vadd.f32 -1.0, %v11351_v54  ;;  %v10686_v33 = vld [vmem:[#allocation6 + $0x284] ss:$16 sps:$4 sm:$0xff]   ;;  %v10684_v54 = vld [vmem:[#allocation6 + $0x280] ss:$16 sps:$4 sm:$0xff]  }
0x3d75   :  { %v5940_v3 = vrot.slane %v12750_v17, 6  ;;  %v5936_v20 = vrot.slane %v12750_v17, 4  ;;  %v5932_v58 = vrot.slane %v12750_v17, 2 }
0x3d76   :  { %v5930_v42 = vsel %vm5920_vm9, %v5916_v41, %v9229_v18 }
0x3d77   :  { %5941 = vrot.lane.b32.xlu1 %v5940_v3, %s11438_s16  ;;  %5937 = vrot.lane.b32.xlu0 %v5936_v20, %s11450_s28  ;;  %v5948_v19 = vrot.slane %v5930_v42, 2  ;;  %v5952_v21 = vrot.slane %v5930_v42, 4  ;;  %v5956_v40 = vrot.slane %v5930_v42, 6  ;;  %v10692_v3 = vld [vmem:[#allocation6 + $0x2c4] ss:$16 sps:$4 sm:$0xff]  }
0x3d78   :  { %v10695_v20 = vld [vmem:[#allocation6 + $0x2e4] ss:$16 sps:$4 sm:$0xff]  }
0x3d7b   :  { %5945 = vrot.lane.b32.xlu0 %v5930_v42, %s11432_s12  ;;  %5933 = vrot.lane.b32.xlu1 %v5932_v58, %s11452_s30  ;;  %v10693_v42 = vld [vmem:[#allocation6 + $0x2e0] ss:$16 sps:$4 sm:$0xff]  }
0x3d7f   :  { %5949 = vrot.lane.b32.xlu0 %v5948_v19, %s11451_s1  ;;  %5953 = vrot.lane.b32.xlu1 %v5952_v21, %s11435_s25 }
0x3d83   :  { %5957 = vrot.lane.b32.xlu0 %v5956_v40, %s11449_s27 }
0x3de9   :  { %v5942_v36 = vpop.permute.xlu1 %5941  ;;  %v5938_v45 = vpop.permute.xlu0 %5937 }
0x3dea   :  { %v5962_v10 = vsel %vm256_vm4, %v5938_v45, %v5942_v36  ;;  %vm5967_vm4 = vcmask 654336   ;;  %v10813_v36 = vld [vmem:[#allocation6 + $0x668] ss:$16 sps:$4 sm:$0xff]  }
0x3ded   :  { %v5946_v22 = vpop.permute.xlu0 %5945  ;;  %v5934_v7 = vpop.permute.xlu1 %5933 }
0x3dee   :  { %v5960_v61 = vsel %vm3849_vm7, %v12750_v17, %v5934_v7  ;;  %v5963_v43 = vsel %vm5322_vm13, %v5962_v10, %v5946_v22  ;;  %v10689_v17 = vld [vmem:[#allocation6 + $0x2a4] ss:$16 sps:$4 sm:$0xff]   ;;  %v10819_v22 = vld [vmem:[#allocation6 + $0x688] ss:$16 sps:$4 sm:$0xff]   ;;  %v10827_v7 = vld [vmem:[#allocation6 + $0x6ac] ss:$16 sps:$4 sm:$0xff]  }
0x3def   :  { %v5961_v44 = vsel %vm5797_vm5, %v5960_v61, %v5938_v45  ;;  %v10821_v45 = vld [vmem:[#allocation6 + $0x68c] ss:$16 sps:$4 sm:$0xff]   ;;  %v10825_v61 = vld [vmem:[#allocation6 + $0x6a8] ss:$16 sps:$4 sm:$0xff]  }
0x3df0   :  { %v6017_v37 = vpack.c.bf16 %v5961_v44, %v5961_v44  ;;  %v6021_v10 = vld [vmem:[#allocation2 + $0x480] ss:$8 sm:$0x3] }
0x3df1   :  { %v5950_v11 = vpop.permute.xlu0 %5949  ;;  %v5954_v18 = vpop.permute.xlu1 %5953  ;;  %v6030_v44 = vrot.slane %v6021_v10, %v12298_v24 }
0x3df2   :  { %v5965_v41 = vsel %vm5964_vm11, %v5963_v43, %v5950_v11  ;;  %v5966_v19 = vsel %vm3968_vm3, %v5950_v11, %v5954_v18  ;;  %v6026_v43 = vrot.slane %v6021_v10, %v11735_v5  ;;  %v10768_v18 = vld [vmem:[#allocation6 + $0x580] ss:$16 sps:$4 sm:$0xff]  }
0x3df3   :  { %v6018_v60 = vpack.c.bf16 %v5965_v41, %v5965_v41 }
0x3df5   :  { %6305 = vmatprep.mubr.bf16.mxu1 %v6018_v60  ;;  %v5958_v58 = vpop.permute.xlu0 %5957 }
0x3df6   :  { %6306 = vmatmul.mubr.bf16.vlgmr.msra.gmra.mrb[72].mxu1 %v6017_v37  ;;  %v5968_v21 = vsel %vm5967_vm4, %v5966_v19, %v5958_v58  ;;  %v10776_v58 = vld [vmem:[#allocation6 + $0x5a4] ss:$16 sps:$4 sm:$0xff]  }
0x3df7   :  { %6315 = vmatpush1.bf16.msra.mxu1 %v10672_v15  ;;  %6346 = vmatprep.mubr.bf16.mxu1 %v11445_v51  ;;  %v10690_v51 = vld [vmem:[#allocation6 + $0x2c0] ss:$16 sps:$4 sm:$0xff]   ;;  %v6019_v40 = vpack.c.bf16 %v5968_v21, %v5968_v21  ;;  %v10782_v19 = vld [vmem:[#allocation6 + $0x5c4] ss:$16 sps:$4 sm:$0xff]  }
0x3df8   :  { %6316 = vmatprep.subr.bf16.mxu1 %v10677_v57  ;;  %v10780_v21 = vld [vmem:[#allocation6 + $0x5c0] ss:$16 sps:$4 sm:$0xff]  }
0x3dfb   :  { %6317 = vmatpush1.bf16.msra.mxu1 %v10675_v63 }
0x3dfc   :  { %6318 = vmatprep.subr.bf16.mxu1 %v10680_v13 }
0x3dff   :  { %6319 = vmatpush1.bf16.msra.mxu1 %v10678_v46 }
0x3e00   :  { %6320 = vmatprep.subr.bf16.mxu1 %v10683_v2  ;;  %v10744_v2 = vld [vmem:[#allocation6 + $0x500] ss:$16 sps:$4 sm:$0xff]  }
0x3e03   :  { %6321 = vmatpush1.bf16.msra.mxu1 %v10681_v12 }
0x3e04   :  { %6322 = vmatprep.subr.bf16.mxu1 %v10686_v33  ;;  %v10752_v33 = vld [vmem:[#allocation6 + $0x524] ss:$16 sps:$4 sm:$0xff]  }
0x3e07   :  { %6323 = vmatpush1.bf16.msra.mxu1 %v10684_v54  ;;  %v10750_v54 = vld [vmem:[#allocation6 + $0x520] ss:$16 sps:$4 sm:$0xff]  }
0x3e08   :  { %6324 = vmatprep.subr.bf16.mxu1 %v10689_v17  ;;  %v10758_v17 = vld [vmem:[#allocation6 + $0x544] ss:$16 sps:$4 sm:$0xff]  }
0x3e0b   :  { %6325 = vmatpush1.bf16.msra.mxu1 %v10687_v28  ;;  %v10756_v28 = vld [vmem:[#allocation6 + $0x540] ss:$16 sps:$4 sm:$0xff]  }
0x3e0c   :  { %6326 = vmatprep.subr.bf16.mxu1 %v10692_v3  ;;  %v10764_v3 = vld [vmem:[#allocation6 + $0x564] ss:$16 sps:$4 sm:$0xff]  }
0x3e0f   :  { %6327 = vmatpush1.bf16.msra.mxu1 %v10690_v51  ;;  %v10762_v51 = vld [vmem:[#allocation6 + $0x560] ss:$16 sps:$4 sm:$0xff]  }
0x3e10   :  { %6328 = vmatprep.subr.bf16.mxu1 %v10695_v20  ;;  %v10770_v20 = vld [vmem:[#allocation6 + $0x584] ss:$16 sps:$4 sm:$0xff]  }
0x3e13   :  { %6329 = vmatpush1.bf16.msra.mxu1 %v10693_v42  ;;  %v10774_v42 = vld [vmem:[#allocation6 + $0x5a0] ss:$16 sps:$4 sm:$0xff]  }
0x3e14   :  { %7057 = vmatprep.subr.bf16.mxu1 %v10749_v62  ;;  %v10804_v62 = vld [vmem:[#allocation6 + $0x640] ss:$16 sps:$4 sm:$0xff]  }
0x3e16   :  { %6347 = vmatmul.mubr.bf16.vlgmr.msra.gmra.mrb[72].mxu1 %v6019_v40  ;;  %v10788_v40 = vld [vmem:[#allocation6 + $0x5e4] ss:$16 sps:$4 sm:$0xff]  }
0x3e17   :  { %7058 = vmatpush1.bf16.msra.mxu1 %v10747_v34  ;;  %v10806_v34 = vld [vmem:[#allocation6 + $0x644] ss:$16 sps:$4 sm:$0xff]  }
0x3e18   :  { %7059 = vmatprep.subr.bf16.mxu1 %v10755_v16  ;;  %v10812_v16 = vld [vmem:[#allocation6 + $0x664] ss:$16 sps:$4 sm:$0xff]  }
0x3e1b   :  { %7060 = vmatpush1.bf16.msra.mxu1 %v10753_v38  ;;  %v10810_v38 = vld [vmem:[#allocation6 + $0x660] ss:$16 sps:$4 sm:$0xff]  }
0x3e1c   :  { %7061 = vmatprep.subr.bf16.mxu1 %v10761_v30  ;;  %v10818_v30 = vld [vmem:[#allocation6 + $0x684] ss:$16 sps:$4 sm:$0xff]  }
0x3e1f   :  { %7062 = vmatpush1.bf16.msra.mxu1 %v10759_v14  ;;  %v10816_v14 = vld [vmem:[#allocation6 + $0x680] ss:$16 sps:$4 sm:$0xff]  }
0x3e20   :  { %7063 = vmatprep.subr.bf16.mxu1 %v10767_v39  ;;  %v10824_v39 = vld [vmem:[#allocation6 + $0x6a4] ss:$16 sps:$4 sm:$0xff]  }
0x3e23   :  { %7064 = vmatpush1.bf16.msra.mxu1 %v10765_v26  ;;  %v10822_v26 = vld [vmem:[#allocation6 + $0x6a0] ss:$16 sps:$4 sm:$0xff]  }
0x3e24   :  { %7065 = vmatprep.subr.bf16.mxu1 %v10773_v8  ;;  %v10830_v8 = vld [vmem:[#allocation6 + $0x6c4] ss:$16 sps:$4 sm:$0xff]  }
0x3e27   :  { %7066 = vmatpush1.bf16.msra.mxu1 %v10771_v9  ;;  %v10833_v9 = vld [vmem:[#allocation6 + $0x6cc] ss:$16 sps:$4 sm:$0xff]  }
0x3e28   :  { %7067 = vmatprep.subr.bf16.mxu1 %v10779_v32  ;;  %v10828_v32 = vld [vmem:[#allocation6 + $0x6c0] ss:$16 sps:$4 sm:$0xff]  }
0x3e2b   :  { %7068 = vmatpush1.bf16.msra.mxu1 %v10777_v0  ;;  %v10831_v0 = vld [vmem:[#allocation6 + $0x6c8] ss:$16 sps:$4 sm:$0xff]  }
0x3e2c   :  { %7069 = vmatprep.subr.bf16.mxu1 %v10785_v48  ;;  %v10836_v48 = vld [vmem:[#allocation6 + $0x6e4] ss:$16 sps:$4 sm:$0xff]  }
0x3e2f   :  { %7070 = vmatpush1.bf16.msra.mxu1 %v10783_v49  ;;  %v10839_v49 = vld [vmem:[#allocation6 + $0x6ec] ss:$16 sps:$4 sm:$0xff]  }
0x3e30   :  { %7071 = vmatprep.subr.bf16.mxu1 %v10791_v50  ;;  %v10834_v50 = vld [vmem:[#allocation6 + $0x6e0] ss:$16 sps:$4 sm:$0xff]  }
0x3e33   :  { %7072 = vmatpush1.bf16.msra.mxu1 %v10789_v52  ;;  %v10837_v52 = vld [vmem:[#allocation6 + $0x6e8] ss:$16 sps:$4 sm:$0xff]  }
0x3e34   :  { %7073 = vmatprep.subr.bf16.mxu1 %v10797_v53  ;;  %v10842_v53 = vld [vmem:[#allocation6 + $0x704] ss:$16 sps:$4 sm:$0xff]  }
0x3e37   :  { %7074 = vmatpush1.bf16.msra.mxu1 %v10795_v55  ;;  %v10845_v55 = vld [vmem:[#allocation6 + $0x70c] ss:$16 sps:$4 sm:$0xff]  }
0x3e38   :  { %7075 = vmatprep.subr.bf16.mxu1 %v10803_v35  ;;  %v6392_v35 = vld [vmem:[#allocation2 + $0x4a0] ss:$8 sm:$0x3] }
0x3e3b   :  { %7076 = vmatpush1.bf16.msra.mxu1 %v10801_v25  ;;  %v6397_v25 = vrot.slane %v6392_v35, %v11735_v5 }
0x3e3c   :  { %7077 = vmatprep.subr.bf16.mxu1 %v10809_v59  ;;  %v6401_v59 = vrot.slane %v6392_v35, %v12298_v24  ;;  %v10917_v35 = vld [vmem:[#allocation6 + $0x88c] ss:$16 sps:$4 sm:$0xff]  }
0x3e3f   :  { %7078 = vmatpush1.bf16.msra.mxu1 %v10807_v56 }
0x3e40   :  { %7079 = vmatprep.subr.bf16.mxu1 %v10815_v4 }
0x3e43   :  { %7080 = vmatpush1.bf16.msra.mxu1 %v10813_v36 }
0x3e44   :  { %7081 = vmatprep.subr.bf16.mxu1 %v10821_v45 }
0x3e47   :  { %7082 = vmatpush1.bf16.msra.mxu1 %v10819_v22 }
0x3e48   :  { %7083 = vmatprep.subr.bf16.mxu1 %v10827_v7 }
0x3e4b   :  { %7084 = vmatpush1.bf16.msra.mxu1 %v10825_v61 }
0x3e4c   :  { %7085 = vmatprep.subr.bf16.mxu1 %v10833_v9  ;;  %v10902_v9 = vld [vmem:[#allocation6 + $0x844] ss:$16 sps:$4 sm:$0xff]  }
0x3e4f   :  { %7086 = vmatpush1.bf16.msra.mxu1 %v10831_v0  ;;  %v10900_v0 = vld [vmem:[#allocation6 + $0x840] ss:$16 sps:$4 sm:$0xff]  }
0x3e50   :  { %7087 = vmatprep.subr.bf16.mxu1 %v10839_v49  ;;  %v10908_v49 = vld [vmem:[#allocation6 + $0x864] ss:$16 sps:$4 sm:$0xff]  }
0x3e53   :  { %7088 = vmatpush1.bf16.msra.mxu1 %v10837_v52  ;;  %v10906_v52 = vld [vmem:[#allocation6 + $0x860] ss:$16 sps:$4 sm:$0xff]  }
0x3e54   :  { %7979 = vmatprep.subr.bf16.mxu1 %v10845_v55  ;;  %v10914_v55 = vld [vmem:[#allocation6 + $0x884] ss:$16 sps:$4 sm:$0xff]  }
0x3ee9   :  { %v6348_v11 = vpop.f32.mrb[72].mxu1 }
0x3eea   :  { %v10282_v41 = vadd.f32 %v6348_v11, %v6026_v43  ;;  %v6350_v60 = vpop.f32.mrb[73].mxu1  ;;  %v10843_v11 = vld [vmem:[#allocation6 + $0x708] ss:$16 sps:$4 sm:$0xff]  }
0x3eeb   :  { %v10283_v15 = vadd.f32 %v6350_v60, %v6030_v44  ;;  %v6352_v37 = vpop.f32.mrb[74].mxu1  ;;  %v10840_v44 = vld [vmem:[#allocation6 + $0x700] ss:$16 sps:$4 sm:$0xff]   ;;  %v10848_v60 = vld [vmem:[#allocation6 + $0x724] ss:$16 sps:$4 sm:$0xff]  }
0x3eec   :  { %v6355_v57 = vmax.f32 %v10282_v41, 0.0  ;;  %v6353_v63 = vpop.f32.mrb[75].mxu1  ;;  %v10846_v37 = vld [vmem:[#allocation6 + $0x720] ss:$16 sps:$4 sm:$0xff]  }
0x3eed   :  { %v6356_v13 = vmax.f32 %v10283_v15, 0.0  ;;  %v10851_v15 = vld [vmem:[#allocation6 + $0x72c] ss:$16 sps:$4 sm:$0xff]   ;;  %v10854_v63 = vld [vmem:[#allocation6 + $0x744] ss:$16 sps:$4 sm:$0xff]  }
0x3eee   :  { %v6389_v12 = vpack.c.bf16 %v6355_v57, %v6355_v57  ;;  %v10849_v57 = vld [vmem:[#allocation6 + $0x728] ss:$16 sps:$4 sm:$0xff]  }
0x3eef   :  { %v6390_v46 = vpack.c.bf16 %v6356_v13, %v6356_v13  ;;  %v10857_v13 = vld [vmem:[#allocation6 + $0x74c] ss:$16 sps:$4 sm:$0xff]  }
0x3ef1   :  { %6596 = vmatprep.mubr.bf16.mxu0 %v6390_v46  ;;  %v10852_v46 = vld [vmem:[#allocation6 + $0x740] ss:$16 sps:$4 sm:$0xff]  }
0x3ef2   :  { %6597 = vmatmul.mubr.bf16.vlgmr.msra.gmra.mrb[68].mxu0 %v6389_v12  ;;  %v10860_v12 = vld [vmem:[#allocation6 + $0x764] ss:$16 sps:$4 sm:$0xff]  }
0x3ef3   :  { %7017 = vmatpush1.bf16.msra.mxu0 %v10744_v2  ;;  %v10855_v2 = vld [vmem:[#allocation6 + $0x748] ss:$16 sps:$4 sm:$0xff]  }
0x3ef4   :  { %7018 = vmatprep.subr.bf16.mxu0 %v10752_v33  ;;  %v10863_v33 = vld [vmem:[#allocation6 + $0x76c] ss:$16 sps:$4 sm:$0xff]  }
0x3ef7   :  { %7019 = vmatpush1.bf16.msra.mxu0 %v10750_v54  ;;  %v10858_v54 = vld [vmem:[#allocation6 + $0x760] ss:$16 sps:$4 sm:$0xff]  }
0x3ef8   :  { %7020 = vmatprep.subr.bf16.mxu0 %v10758_v17  ;;  %v10861_v17 = vld [vmem:[#allocation6 + $0x768] ss:$16 sps:$4 sm:$0xff]  }
0x3efb   :  { %7021 = vmatpush1.bf16.msra.mxu0 %v10756_v28  ;;  %v10866_v28 = vld [vmem:[#allocation6 + $0x784] ss:$16 sps:$4 sm:$0xff]  }
0x3efc   :  { %7022 = vmatprep.subr.bf16.mxu0 %v10764_v3  ;;  %v10869_v3 = vld [vmem:[#allocation6 + $0x78c] ss:$16 sps:$4 sm:$0xff]  }
0x3eff   :  { %7023 = vmatpush1.bf16.msra.mxu0 %v10762_v51  ;;  %v10864_v51 = vld [vmem:[#allocation6 + $0x780] ss:$16 sps:$4 sm:$0xff]  }
0x3f00   :  { %7024 = vmatprep.subr.bf16.mxu0 %v10770_v20  ;;  %v10867_v20 = vld [vmem:[#allocation6 + $0x788] ss:$16 sps:$4 sm:$0xff]  }
0x3f03   :  { %7025 = vmatpush1.bf16.msra.mxu0 %v10768_v18  ;;  %v10872_v18 = vld [vmem:[#allocation6 + $0x7a4] ss:$16 sps:$4 sm:$0xff]  }
0x3f04   :  { %7026 = vmatprep.subr.bf16.mxu0 %v10776_v58  ;;  %v10875_v58 = vld [vmem:[#allocation6 + $0x7ac] ss:$16 sps:$4 sm:$0xff]  }
0x3f07   :  { %7027 = vmatpush1.bf16.msra.mxu0 %v10774_v42  ;;  %v10870_v42 = vld [vmem:[#allocation6 + $0x7a0] ss:$16 sps:$4 sm:$0xff]  }
0x3f08   :  { %7028 = vmatprep.subr.bf16.mxu0 %v10782_v19  ;;  %v10873_v19 = vld [vmem:[#allocation6 + $0x7a8] ss:$16 sps:$4 sm:$0xff]  }
0x3f0b   :  { %7029 = vmatpush1.bf16.msra.mxu0 %v10780_v21  ;;  %v10878_v21 = vld [vmem:[#allocation6 + $0x7c4] ss:$16 sps:$4 sm:$0xff]  }
0x3f0c   :  { %7030 = vmatprep.subr.bf16.mxu0 %v10788_v40  ;;  %v10881_v40 = vld [vmem:[#allocation6 + $0x7cc] ss:$16 sps:$4 sm:$0xff]  }
0x3f0f   :  { %7031 = vmatpush1.bf16.msra.mxu0 %v10786_v23  ;;  %v10876_v23 = vld [vmem:[#allocation6 + $0x7c0] ss:$16 sps:$4 sm:$0xff]  }
0x3f10   :  { %7032 = vmatprep.subr.bf16.mxu0 %v10794_v27  ;;  %v10879_v27 = vld [vmem:[#allocation6 + $0x7c8] ss:$16 sps:$4 sm:$0xff]  }
0x3f13   :  { %7033 = vmatpush1.bf16.msra.mxu0 %v10792_v29  ;;  %v10884_v29 = vld [vmem:[#allocation6 + $0x7e4] ss:$16 sps:$4 sm:$0xff]  }
0x3f14   :  { %7034 = vmatprep.subr.bf16.mxu0 %v10800_v31  ;;  %v10887_v31 = vld [vmem:[#allocation6 + $0x7ec] ss:$16 sps:$4 sm:$0xff]  }
0x3f17   :  { %7035 = vmatpush1.bf16.msra.mxu0 %v10798_v6  ;;  %v10882_v6 = vld [vmem:[#allocation6 + $0x7e0] ss:$16 sps:$4 sm:$0xff]  }
0x3f18   :  { %7036 = vmatprep.subr.bf16.mxu0 %v10806_v34  ;;  %v10885_v34 = vld [vmem:[#allocation6 + $0x7e8] ss:$16 sps:$4 sm:$0xff]  }
0x3f1b   :  { %7037 = vmatpush1.bf16.msra.mxu0 %v10804_v62  ;;  %v10890_v62 = vld [vmem:[#allocation6 + $0x804] ss:$16 sps:$4 sm:$0xff]  }
0x3f1c   :  { %7038 = vmatprep.subr.bf16.mxu0 %v10812_v16  ;;  %v10893_v16 = vld [vmem:[#allocation6 + $0x80c] ss:$16 sps:$4 sm:$0xff]  }
0x3f1f   :  { %7039 = vmatpush1.bf16.msra.mxu0 %v10810_v38  ;;  %v10888_v38 = vld [vmem:[#allocation6 + $0x800] ss:$16 sps:$4 sm:$0xff]  }
0x3f20   :  { %7040 = vmatprep.subr.bf16.mxu0 %v10818_v30  ;;  %v10891_v30 = vld [vmem:[#allocation6 + $0x808] ss:$16 sps:$4 sm:$0xff]  }
0x3f23   :  { %7041 = vmatpush1.bf16.msra.mxu0 %v10816_v14  ;;  %v10896_v14 = vld [vmem:[#allocation6 + $0x824] ss:$16 sps:$4 sm:$0xff]  }
0x3f24   :  { %7042 = vmatprep.subr.bf16.mxu0 %v10824_v39  ;;  %v10899_v39 = vld [vmem:[#allocation6 + $0x82c] ss:$16 sps:$4 sm:$0xff]  }
0x3f27   :  { %7043 = vmatpush1.bf16.msra.mxu0 %v10822_v26  ;;  %v10894_v26 = vld [vmem:[#allocation6 + $0x820] ss:$16 sps:$4 sm:$0xff]  }
0x3f28   :  { %7044 = vmatprep.subr.bf16.mxu0 %v10830_v8  ;;  %v10897_v8 = vld [vmem:[#allocation6 + $0x828] ss:$16 sps:$4 sm:$0xff]  }
0x3f2b   :  { %7045 = vmatpush1.bf16.msra.mxu0 %v10828_v32  ;;  %v10905_v32 = vld [vmem:[#allocation6 + $0x84c] ss:$16 sps:$4 sm:$0xff]  }
0x3f2c   :  { %7046 = vmatprep.subr.bf16.mxu0 %v10836_v48  ;;  %v10903_v48 = vld [vmem:[#allocation6 + $0x848] ss:$16 sps:$4 sm:$0xff]  }
0x3f2f   :  { %7047 = vmatpush1.bf16.msra.mxu0 %v10834_v50  ;;  %v10911_v50 = vld [vmem:[#allocation6 + $0x86c] ss:$16 sps:$4 sm:$0xff]  }
0x3f30   :  { %7897 = vmatprep.subr.bf16.mxu0 %v10842_v53  ;;  %v10909_v53 = vld [vmem:[#allocation6 + $0x868] ss:$16 sps:$4 sm:$0xff]  }
0x3fc5   :  { %v6598_v56 = vpop.f32.mrb[68].mxu0 }
0x3fc6   :  { %v6599_v4 = vadd.f32 %v6598_v56, %v6397_v25  ;;  %v6600_v36 = vpop.f32.mrb[69].mxu0  ;;  %v10912_v25 = vld [vmem:[#allocation6 + $0x880] ss:$16 sps:$4 sm:$0xff]   ;;  %v10920_v56 = vld [vmem:[#allocation6 + $0x8a4] ss:$16 sps:$4 sm:$0xff]  }
0x3fc7   :  { %v6601_v45 = vadd.f32 %v6600_v36, %v6401_v59  ;;  %v6602_v22 = vpop.f32.mrb[70].mxu0  ;;  %v10915_v59 = vld [vmem:[#allocation6 + $0x888] ss:$16 sps:$4 sm:$0xff]   ;;  %v10918_v36 = vld [vmem:[#allocation6 + $0x8a0] ss:$16 sps:$4 sm:$0xff]  }
0x3fc8   :  { %v6605_v7 = vmax.f32 %v6599_v4, 0.0  ;;  %v6603_v61 = vpop.f32.mrb[71].mxu0  ;;  %v10923_v4 = vld [vmem:[#allocation6 + $0x8ac] ss:$16 sps:$4 sm:$0xff]   ;;  %v10926_v22 = vld [vmem:[#allocation6 + $0x8c4] ss:$16 sps:$4 sm:$0xff]  }
0x3fc9   :  { %v6606_v10 = vmax.f32 %v6601_v45, 0.0  ;;  %v10921_v45 = vld [vmem:[#allocation6 + $0x8a8] ss:$16 sps:$4 sm:$0xff]   ;;  %v10924_v61 = vld [vmem:[#allocation6 + $0x8c0] ss:$16 sps:$4 sm:$0xff]  }
0x3fca   :  { %v6671_v41 = vpack.c.bf16 %v6605_v7, %v6605_v7  ;;  %v10929_v7 = vld [vmem:[#allocation6 + $0x8cc] ss:$16 sps:$4 sm:$0xff]  }
0x3fcb   :  { %v6672_v43 = vpack.c.bf16 %v6606_v10, %v6606_v10  ;;  %v10927_v10 = vld [vmem:[#allocation6 + $0x8c8] ss:$16 sps:$4 sm:$0xff]  }
0x3fcd   :  { %7048 = vmatprep.mubr.bf16.mxu0 %v6672_v43  ;;  %7089 = vmatprep.mubr.bf16.mxu1 %v6672_v43  ;;  %v10932_v43 = vld [vmem:[#allocation6 + $0x8e4] ss:$16 sps:$4 sm:$0xff]  }
0x3fce   :  { %7049 = vmatmul.mubr.bf16.vlgmr.msra.gmra.mrb[72].mxu0 %v6671_v41  ;;  %7090 = vmatmul.mubr.bf16.vlgmr.msra.gmra.mrb[76].mxu1 %v6671_v41  ;;  %v10933_v41 = vld [vmem:[#allocation6 + $0x8e8] ss:$16 sps:$4 sm:$0xff]  }
0x3fcf   :  { %7898 = vmatpush1.bf16.msra.mxu0 %v10840_v44  ;;  %7980 = vmatpush1.bf16.msra.mxu1 %v10843_v11  ;;  %v10935_v44 = vld [vmem:[#allocation6 + $0x8ec] ss:$16 sps:$4 sm:$0xff]   ;;  %v10930_v11 = vld [vmem:[#allocation6 + $0x8e0] ss:$16 sps:$4 sm:$0xff]  }
0x3fd0   :  { %7899 = vmatprep.subr.bf16.mxu0 %v10848_v60  ;;  %7981 = vmatprep.subr.bf16.mxu1 %v10851_v15  ;;  %v10938_v60 = vld [vmem:[#allocation6 + $0x904] ss:$16 sps:$4 sm:$0xff]   ;;  %v10941_v15 = vld [vmem:[#allocation6 + $0x90c] ss:$16 sps:$4 sm:$0xff]  }
0x3fd3   :  { %7900 = vmatpush1.bf16.msra.mxu0 %v10846_v37  ;;  %7982 = vmatpush1.bf16.msra.mxu1 %v10849_v57  ;;  %v12773_v37 = vld [vmem:[#allocation2 + $0x4c0] ss:$8 sm:$0xf]  ;;  %v6690_v57 = vsub.s32 3, %v11732_v1 }
0x3fd4   :  { %7901 = vmatprep.subr.bf16.mxu0 %v10854_v63  ;;  %7983 = vmatprep.subr.bf16.mxu1 %v10857_v13  ;;  %v6679_v63 = vrot.slane %v12773_v37, %v11735_v5  ;;  %v6683_v13 = vrot.slane %v12773_v37, %v12298_v24 }
0x3fd7   :  { %7902 = vmatpush1.bf16.msra.mxu0 %v10852_v46  ;;  %7984 = vmatpush1.bf16.msra.mxu1 %v10855_v2  ;;  %v6691_v46 = vrot.slane %v12773_v37, %v6690_v57 }
0x3fd8   :  { %7903 = vmatprep.subr.bf16.mxu0 %v10860_v12  ;;  %7985 = vmatprep.subr.bf16.mxu1 %v10863_v33 }
0x3fdb   :  { %7904 = vmatpush1.bf16.msra.mxu0 %v10858_v54  ;;  %7986 = vmatpush1.bf16.msra.mxu1 %v10861_v17 }
0x3fdc   :  { %7905 = vmatprep.subr.bf16.mxu0 %v10866_v28  ;;  %7987 = vmatprep.subr.bf16.mxu1 %v10869_v3 }
0x3fdf   :  { %7906 = vmatpush1.bf16.msra.mxu0 %v10864_v51  ;;  %7988 = vmatpush1.bf16.msra.mxu1 %v10867_v20 }
0x3fe0   :  { %7907 = vmatprep.subr.bf16.mxu0 %v10872_v18  ;;  %7989 = vmatprep.subr.bf16.mxu1 %v10875_v58 }
0x3fe3   :  { %7908 = vmatpush1.bf16.msra.mxu0 %v10870_v42  ;;  %7990 = vmatpush1.bf16.msra.mxu1 %v10873_v19 }
0x3fe4   :  { %7909 = vmatprep.subr.bf16.mxu0 %v10878_v21  ;;  %7991 = vmatprep.subr.bf16.mxu1 %v10881_v40 }
0x3fe7   :  { %7910 = vmatpush1.bf16.msra.mxu0 %v10876_v23  ;;  %7992 = vmatpush1.bf16.msra.mxu1 %v10879_v27  ;;  %v10936_v23 = vld [vmem:[#allocation6 + $0x900] ss:$16 sps:$4 sm:$0xff]   ;;  %v10939_v27 = vld [vmem:[#allocation6 + $0x908] ss:$16 sps:$4 sm:$0xff]  }
0x3fe8   :  { %7911 = vmatprep.subr.bf16.mxu0 %v10884_v29  ;;  %7993 = vmatprep.subr.bf16.mxu1 %v10887_v31  ;;  %v10944_v31 = vld [vmem:[#allocation6 + $0x924] ss:$16 sps:$4 sm:$0xff]  }
0x3feb   :  { %7912 = vmatpush1.bf16.msra.mxu0 %v10882_v6  ;;  %7994 = vmatpush1.bf16.msra.mxu1 %v10885_v34  ;;  %v10947_v6 = vld [vmem:[#allocation6 + $0x92c] ss:$16 sps:$4 sm:$0xff]  }
0x3fec   :  { %7913 = vmatprep.subr.bf16.mxu0 %v10890_v62  ;;  %7995 = vmatprep.subr.bf16.mxu1 %v10893_v16  ;;  %v10942_v62 = vld [vmem:[#allocation6 + $0x920] ss:$16 sps:$4 sm:$0xff]   ;;  %v10945_v16 = vld [vmem:[#allocation6 + $0x928] ss:$16 sps:$4 sm:$0xff]  }
0x3fef   :  { %7914 = vmatpush1.bf16.msra.mxu0 %v10888_v38  ;;  %7996 = vmatpush1.bf16.msra.mxu1 %v10891_v30  ;;  %v10950_v38 = vld [vmem:[#allocation6 + $0x944] ss:$16 sps:$4 sm:$0xff]   ;;  %v10953_v30 = vld [vmem:[#allocation6 + $0x94c] ss:$16 sps:$4 sm:$0xff]  }
0x3ff0   :  { %7915 = vmatprep.subr.bf16.mxu0 %v10896_v14  ;;  %7997 = vmatprep.subr.bf16.mxu1 %v10899_v39  ;;  %v10948_v14 = vld [vmem:[#allocation6 + $0x940] ss:$16 sps:$4 sm:$0xff]   ;;  %v10951_v39 = vld [vmem:[#allocation6 + $0x948] ss:$16 sps:$4 sm:$0xff]  }
0x3ff3   :  { %7916 = vmatpush1.bf16.msra.mxu0 %v10894_v26  ;;  %7998 = vmatpush1.bf16.msra.mxu1 %v10897_v8  ;;  %v10956_v26 = vld [vmem:[#allocation6 + $0x964] ss:$16 sps:$4 sm:$0xff]   ;;  %v10959_v8 = vld [vmem:[#allocation6 + $0x96c] ss:$16 sps:$4 sm:$0xff]  }
0x3ff4   :  { %7917 = vmatprep.subr.bf16.mxu0 %v10902_v9  ;;  %7999 = vmatprep.subr.bf16.mxu1 %v10905_v32  ;;  %v10954_v9 = vld [vmem:[#allocation6 + $0x960] ss:$16 sps:$4 sm:$0xff]   ;;  %v10957_v32 = vld [vmem:[#allocation6 + $0x968] ss:$16 sps:$4 sm:$0xff]  }
0x3ff7   :  { %7918 = vmatpush1.bf16.msra.mxu0 %v10900_v0  ;;  %8000 = vmatpush1.bf16.msra.mxu1 %v10903_v48  ;;  %v10962_v0 = vld [vmem:[#allocation6 + $0x984] ss:$16 sps:$4 sm:$0xff]   ;;  %v10965_v48 = vld [vmem:[#allocation6 + $0x98c] ss:$16 sps:$4 sm:$0xff]  }
0x3ff8   :  { %7919 = vmatprep.subr.bf16.mxu0 %v10908_v49  ;;  %8001 = vmatprep.subr.bf16.mxu1 %v10911_v50  ;;  %v10960_v49 = vld [vmem:[#allocation6 + $0x980] ss:$16 sps:$4 sm:$0xff]   ;;  %v10963_v50 = vld [vmem:[#allocation6 + $0x988] ss:$16 sps:$4 sm:$0xff]  }
0x3ffb   :  { %7920 = vmatpush1.bf16.msra.mxu0 %v10906_v52  ;;  %8002 = vmatpush1.bf16.msra.mxu1 %v10909_v53  ;;  %v10968_v52 = vld [vmem:[#allocation6 + $0x9a4] ss:$16 sps:$4 sm:$0xff]   ;;  %v10971_v53 = vld [vmem:[#allocation6 + $0x9ac] ss:$16 sps:$4 sm:$0xff]  }
0x3ffc   :  { %7921 = vmatprep.subr.bf16.mxu0 %v10914_v55  ;;  %8003 = vmatprep.subr.bf16.mxu1 %v10917_v35  ;;  %v10966_v55 = vld [vmem:[#allocation6 + $0x9a0] ss:$16 sps:$4 sm:$0xff]   ;;  %v10969_v35 = vld [vmem:[#allocation6 + $0x9a8] ss:$16 sps:$4 sm:$0xff]  }
0x3fff   :  { %7922 = vmatpush1.bf16.msra.mxu0 %v10912_v25  ;;  %8004 = vmatpush1.bf16.msra.mxu1 %v10915_v59  ;;  %v10974_v25 = vld [vmem:[#allocation6 + $0x9c4] ss:$16 sps:$4 sm:$0xff]   ;;  %v10977_v59 = vld [vmem:[#allocation6 + $0x9cc] ss:$16 sps:$4 sm:$0xff]  }
0x4000   :  { %7923 = vmatprep.subr.bf16.mxu0 %v10920_v56  ;;  %8005 = vmatprep.subr.bf16.mxu1 %v10923_v4  ;;  %v10972_v56 = vld [vmem:[#allocation6 + $0x9c0] ss:$16 sps:$4 sm:$0xff]   ;;  %v10975_v4 = vld [vmem:[#allocation6 + $0x9c8] ss:$16 sps:$4 sm:$0xff]  }
0x4003   :  { %7924 = vmatpush1.bf16.msra.mxu0 %v10918_v36  ;;  %8006 = vmatpush1.bf16.msra.mxu1 %v10921_v45  ;;  %v10980_v36 = vld [vmem:[#allocation6 + $0x9e4] ss:$16 sps:$4 sm:$0xff]   ;;  %v10983_v45 = vld [vmem:[#allocation6 + $0x9ec] ss:$16 sps:$4 sm:$0xff]  }
0x4004   :  { %7925 = vmatprep.subr.bf16.mxu0 %v10926_v22  ;;  %8007 = vmatprep.subr.bf16.mxu1 %v10929_v7  ;;  %v10978_v22 = vld [vmem:[#allocation6 + $0x9e0] ss:$16 sps:$4 sm:$0xff]   ;;  %v10981_v7 = vld [vmem:[#allocation6 + $0x9e8] ss:$16 sps:$4 sm:$0xff]  }
0x4007   :  { %7926 = vmatpush1.bf16.msra.mxu0 %v10924_v61  ;;  %8008 = vmatpush1.bf16.msra.mxu1 %v10927_v10  ;;  %v10986_v61 = vld [vmem:[#allocation6 + $0xa04] ss:$16 sps:$4 sm:$0xff]   ;;  %v10989_v10 = vld [vmem:[#allocation6 + $0xa0c] ss:$16 sps:$4 sm:$0xff]  }
0x4008   :  { %7927 = vmatprep.subr.bf16.mxu0 %v10932_v43  ;;  %8009 = vmatprep.subr.bf16.mxu1 %v10935_v44  ;;  %v10984_v43 = vld [vmem:[#allocation6 + $0xa00] ss:$16 sps:$4 sm:$0xff]   ;;  %v10987_v44 = vld [vmem:[#allocation6 + $0xa08] ss:$16 sps:$4 sm:$0xff]  }
0x400b   :  { %7928 = vmatpush1.bf16.msra.mxu0 %v10930_v11  ;;  %8010 = vmatpush1.bf16.msra.mxu1 %v10933_v41  ;;  %v10992_v11 = vld [vmem:[#allocation6 + $0xa24] ss:$16 sps:$4 sm:$0xff]   ;;  %v10995_v41 = vld [vmem:[#allocation6 + $0xa2c] ss:$16 sps:$4 sm:$0xff]  }
0x400c   :  { %7938 = vmatprep.subr.bf16.mxu0 %v10938_v60  ;;  %8020 = vmatprep.subr.bf16.mxu1 %v10941_v15  ;;  %v10990_v60 = vld [vmem:[#allocation6 + $0xa20] ss:$16 sps:$4 sm:$0xff]   ;;  %v10993_v15 = vld [vmem:[#allocation6 + $0xa28] ss:$16 sps:$4 sm:$0xff]  }
0x40a1   :  { %v7050_v2 = vpop.f32.mrb[72].mxu0  ;;  %v12783_v12 = vpop.f32.mrb[76].mxu1 }
0x40a2   :  { %v7051_v33 = vadd.f32 %v7050_v2, %v6679_v63  ;;  %v7052_v54 = vpop.f32.mrb[73].mxu0  ;;  %v7093_v17 = vpop.f32.mrb[77].mxu1  ;;  %v10998_v63 = vld [vmem:[#allocation6 + $0xa44] ss:$16 sps:$4 sm:$0xff]   ;;  %v10999_v2 = vld [vmem:[#allocation6 + $0xa48] ss:$16 sps:$4 sm:$0xff]  }
0x40a3   :  { %v7053_v28 = vadd.f32 %v7052_v54, %v6683_v13  ;;  %v7094_v3 = vadd.f32 %v7093_v17, %v6691_v46  ;;  %v7054_v51 = vpop.f32.mrb[74].mxu0  ;;  %v7095_v20 = vpop.f32.mrb[78].mxu1  ;;  %v11001_v13 = vld [vmem:[#allocation6 + $0xa4c] ss:$16 sps:$4 sm:$0xff]   ;;  %v10996_v46 = vld [vmem:[#allocation6 + $0xa40] ss:$16 sps:$4 sm:$0xff]  }
0x40a4   :  { %v7098_v18 = vmax.f32 %v7051_v33, 0.0  ;;  %v7055_v58 = vpop.f32.mrb[75].mxu0  ;;  %v7096_v42 = vpop.f32.mrb[79].mxu1  ;;  %v11004_v33 = vld [vmem:[#allocation6 + $0xa64] ss:$16 sps:$4 sm:$0xff]  }
0x40a5   :  { %v7099_v19 = vmax.f32 %v7053_v28, 0.0  ;;  %v7101_v21 = vmax.f32 %v7094_v3, 0.0  ;;  %v11007_v54 = vld [vmem:[#allocation6 + $0xa6c] ss:$16 sps:$4 sm:$0xff]   ;;  %v11002_v17 = vld [vmem:[#allocation6 + $0xa60] ss:$16 sps:$4 sm:$0xff]  }
0x40a6   :  { %v7230_v29 = vpack.c.bf16 %v7098_v18, %v7098_v18  ;;  %v11005_v28 = vld [vmem:[#allocation6 + $0xa68] ss:$16 sps:$4 sm:$0xff]   ;;  %v11010_v3 = vld [vmem:[#allocation6 + $0xa84] ss:$16 sps:$4 sm:$0xff]   ;;  %v11013_v51 = vld [vmem:[#allocation6 + $0xa8c] ss:$16 sps:$4 sm:$0xff]  }
0x40a7   :  { %v7231_v40 = vpack.c.bf16 %v7099_v19, %v7099_v19  ;;  %v7233_v34 = vpack.c.bf16 %v7101_v21, %v7101_v21  ;;  %v11008_v20 = vld [vmem:[#allocation6 + $0xa80] ss:$16 sps:$4 sm:$0xff]   ;;  %v11011_v18 = vld [vmem:[#allocation6 + $0xa88] ss:$16 sps:$4 sm:$0xff]   ;;  %v6686_v58 = vsub.s32 2, %v11732_v1 }
0x40a8   :  { %v11016_v42 = vld [vmem:[#allocation6 + $0xaa4] ss:$16 sps:$4 sm:$0xff]   ;;  %v11019_v19 = vld [vmem:[#allocation6 + $0xaac] ss:$16 sps:$4 sm:$0xff]   ;;  %v11014_v21 = vld [vmem:[#allocation6 + $0xaa0] ss:$16 sps:$4 sm:$0xff]  }
0x40a9   :  { %7929 = vmatprep.mubr.bf16.mxu0 %v7231_v40  ;;  %8011 = vmatprep.mubr.bf16.mxu1 %v7231_v40  ;;  %v11017_v40 = vld [vmem:[#allocation6 + $0xaa8] ss:$16 sps:$4 sm:$0xff]   ;;  %v11142_v1 = vld [vmem:[#allocation6 + $0x10e0] ss:$16 sps:$4 sm:$0xff]  }
0x40aa   :  { %7930 = vmatmul.mubr.bf16.vlgmr.msra.gmra.mrb[76].mxu0 %v7230_v29  ;;  %8012 = vmatmul.mubr.bf16.vlgmr.msra.gmra.mrb[80].mxu1 %v7230_v29  ;;  %v11025_v29 = vld [vmem:[#allocation6 + $0xacc] ss:$16 sps:$4 sm:$0xff]  }
0x40ab   :  { %7939 = vmatpush1.bf16.msra.mxu0 %v10936_v23  ;;  %8021 = vmatpush1.bf16.msra.mxu1 %v10939_v27  ;;  %v6687_v23 = vrot.slane %v12773_v37, %v6686_v58  ;;  %v11022_v27 = vld [vmem:[#allocation6 + $0xac4] ss:$16 sps:$4 sm:$0xff]  }
0x40ac   :  { %7970 = vmatprep.mubr.bf16.mxu0 %v7233_v34  ;;  %8052 = vmatprep.mubr.bf16.mxu1 %v7233_v34  ;;  %v11034_v37 = vld [vmem:[#allocation6 + $0xb04] ss:$16 sps:$4 sm:$0xff]  }
0x40ad   :  { %7940 = vmatprep.subr.bf16.mxu0 %v10944_v31  ;;  %8022 = vmatprep.subr.bf16.mxu1 %v10947_v6  ;;  %v11020_v31 = vld [vmem:[#allocation6 + $0xac0] ss:$16 sps:$4 sm:$0xff]   ;;  %v11023_v6 = vld [vmem:[#allocation6 + $0xac8] ss:$16 sps:$4 sm:$0xff]   ;;  %v7092_v34 = vadd.f32 %v12783_v12, %v6687_v23 }
0x40ae   :  { %v11035_v12 = vld [vmem:[#allocation6 + $0xb20] ss:$16 sps:$4 sm:$0xff]  }
0x40af   :  { %7941 = vmatpush1.bf16.msra.mxu0 %v10942_v62  ;;  %8023 = vmatpush1.bf16.msra.mxu1 %v10945_v16  ;;  %v11028_v62 = vld [vmem:[#allocation6 + $0xae4] ss:$16 sps:$4 sm:$0xff]   ;;  %v11031_v16 = vld [vmem:[#allocation6 + $0xaec] ss:$16 sps:$4 sm:$0xff]  }
0x40b0   :  { %7942 = vmatprep.subr.bf16.mxu0 %v10950_v38  ;;  %8024 = vmatprep.subr.bf16.mxu1 %v10953_v30  ;;  %v11026_v38 = vld [vmem:[#allocation6 + $0xae0] ss:$16 sps:$4 sm:$0xff]   ;;  %v11029_v30 = vld [vmem:[#allocation6 + $0xae8] ss:$16 sps:$4 sm:$0xff]  }
0x40b3   :  { %7943 = vmatpush1.bf16.msra.mxu0 %v10948_v14  ;;  %8025 = vmatpush1.bf16.msra.mxu1 %v10951_v39  ;;  %v7100_v14 = vmax.f32 %v7092_v34, 0.0  ;;  %v11032_v39 = vld [vmem:[#allocation6 + $0xb00] ss:$16 sps:$4 sm:$0xff]  }
0x40b4   :  { %7944 = vmatprep.subr.bf16.mxu0 %v10956_v26  ;;  %8026 = vmatprep.subr.bf16.mxu1 %v10959_v8  ;;  %v11037_v8 = vld [vmem:[#allocation6 + $0xb24] ss:$16 sps:$4 sm:$0xff]  }
0x40b5   :  { %v7232_v26 = vpack.c.bf16 %v7100_v14, %v7100_v14 }
0x40b7   :  { %7945 = vmatpush1.bf16.msra.mxu0 %v10954_v9  ;;  %8027 = vmatpush1.bf16.msra.mxu1 %v10957_v32  ;;  %v11040_v9 = vld [vmem:[#allocation6 + $0xb44] ss:$16 sps:$4 sm:$0xff]   ;;  %v11038_v32 = vld [vmem:[#allocation6 + $0xb40] ss:$16 sps:$4 sm:$0xff]  }
0x40b8   :  { %7946 = vmatprep.subr.bf16.mxu0 %v10962_v0  ;;  %8028 = vmatprep.subr.bf16.mxu1 %v10965_v48  ;;  %v11043_v0 = vld [vmem:[#allocation6 + $0xb64] ss:$16 sps:$4 sm:$0xff]   ;;  %v11041_v48 = vld [vmem:[#allocation6 + $0xb60] ss:$16 sps:$4 sm:$0xff]  }
0x40bb   :  { %7947 = vmatpush1.bf16.msra.mxu0 %v10960_v49  ;;  %8029 = vmatpush1.bf16.msra.mxu1 %v10963_v50  ;;  %v11046_v49 = vld [vmem:[#allocation6 + $0xb84] ss:$16 sps:$4 sm:$0xff]   ;;  %v11044_v50 = vld [vmem:[#allocation6 + $0xb80] ss:$16 sps:$4 sm:$0xff]  }
0x40bc   :  { %7948 = vmatprep.subr.bf16.mxu0 %v10968_v52  ;;  %8030 = vmatprep.subr.bf16.mxu1 %v10971_v53  ;;  %v11049_v52 = vld [vmem:[#allocation6 + $0xba4] ss:$16 sps:$4 sm:$0xff]   ;;  %v11047_v53 = vld [vmem:[#allocation6 + $0xba0] ss:$16 sps:$4 sm:$0xff]  }
0x40bf   :  { %7949 = vmatpush1.bf16.msra.mxu0 %v10966_v55  ;;  %8031 = vmatpush1.bf16.msra.mxu1 %v10969_v35  ;;  %v11052_v55 = vld [vmem:[#allocation6 + $0xbc4] ss:$16 sps:$4 sm:$0xff]   ;;  %v11050_v35 = vld [vmem:[#allocation6 + $0xbc0] ss:$16 sps:$4 sm:$0xff]  }
0x40c0   :  { %7950 = vmatprep.subr.bf16.mxu0 %v10974_v25  ;;  %8032 = vmatprep.subr.bf16.mxu1 %v10977_v59  ;;  %v11055_v25 = vld [vmem:[#allocation6 + $0xbe4] ss:$16 sps:$4 sm:$0xff]   ;;  %v11053_v59 = vld [vmem:[#allocation6 + $0xbe0] ss:$16 sps:$4 sm:$0xff]  }
0x40c3   :  { %7951 = vmatpush1.bf16.msra.mxu0 %v10972_v56  ;;  %8033 = vmatpush1.bf16.msra.mxu1 %v10975_v4  ;;  %v11058_v56 = vld [vmem:[#allocation6 + $0xc04] ss:$16 sps:$4 sm:$0xff]   ;;  %v11056_v4 = vld [vmem:[#allocation6 + $0xc00] ss:$16 sps:$4 sm:$0xff]  }
0x40c4   :  { %7952 = vmatprep.subr.bf16.mxu0 %v10980_v36  ;;  %8034 = vmatprep.subr.bf16.mxu1 %v10983_v45  ;;  %v11061_v36 = vld [vmem:[#allocation6 + $0xc24] ss:$16 sps:$4 sm:$0xff]   ;;  %v11059_v45 = vld [vmem:[#allocation6 + $0xc20] ss:$16 sps:$4 sm:$0xff]  }
0x40c7   :  { %7953 = vmatpush1.bf16.msra.mxu0 %v10978_v22  ;;  %8035 = vmatpush1.bf16.msra.mxu1 %v10981_v7  ;;  %v11064_v22 = vld [vmem:[#allocation6 + $0xc44] ss:$16 sps:$4 sm:$0xff]   ;;  %v11062_v7 = vld [vmem:[#allocation6 + $0xc40] ss:$16 sps:$4 sm:$0xff]  }
0x40c8   :  { %7954 = vmatprep.subr.bf16.mxu0 %v10986_v61  ;;  %8036 = vmatprep.subr.bf16.mxu1 %v10989_v10  ;;  %v11067_v61 = vld [vmem:[#allocation6 + $0xc64] ss:$16 sps:$4 sm:$0xff]   ;;  %v11065_v10 = vld [vmem:[#allocation6 + $0xc60] ss:$16 sps:$4 sm:$0xff]  }
0x40cb   :  { %7955 = vmatpush1.bf16.msra.mxu0 %v10984_v43  ;;  %8037 = vmatpush1.bf16.msra.mxu1 %v10987_v44  ;;  %v11070_v43 = vld [vmem:[#allocation6 + $0xc84] ss:$16 sps:$4 sm:$0xff]   ;;  %v11068_v44 = vld [vmem:[#allocation6 + $0xc80] ss:$16 sps:$4 sm:$0xff]  }
0x40cc   :  { %7956 = vmatprep.subr.bf16.mxu0 %v10992_v11  ;;  %8038 = vmatprep.subr.bf16.mxu1 %v10995_v41  ;;  %v11073_v11 = vld [vmem:[#allocation6 + $0xca4] ss:$16 sps:$4 sm:$0xff]   ;;  %v11071_v41 = vld [vmem:[#allocation6 + $0xca0] ss:$16 sps:$4 sm:$0xff]  }
0x40cf   :  { %7957 = vmatpush1.bf16.msra.mxu0 %v10990_v60  ;;  %8039 = vmatpush1.bf16.msra.mxu1 %v10993_v15  ;;  %v11076_v60 = vld [vmem:[#allocation6 + $0xcc4] ss:$16 sps:$4 sm:$0xff]   ;;  %v11074_v15 = vld [vmem:[#allocation6 + $0xcc0] ss:$16 sps:$4 sm:$0xff]  }
0x40d0   :  { %7958 = vmatprep.subr.bf16.mxu0 %v10998_v63  ;;  %8040 = vmatprep.subr.bf16.mxu1 %v11001_v13  ;;  %v11079_v63 = vld [vmem:[#allocation6 + $0xce4] ss:$16 sps:$4 sm:$0xff]   ;;  %v11077_v13 = vld [vmem:[#allocation6 + $0xce0] ss:$16 sps:$4 sm:$0xff]  }
0x40d3   :  { %7959 = vmatpush1.bf16.msra.mxu0 %v10996_v46  ;;  %8041 = vmatpush1.bf16.msra.mxu1 %v10999_v2  ;;  %v11082_v46 = vld [vmem:[#allocation6 + $0xd04] ss:$16 sps:$4 sm:$0xff]   ;;  %v11128_v2 = vld [vmem:[#allocation6 + $0x1000] ss:$16 sps:$4 sm:$0xff]  }
0x40d4   :  { %7960 = vmatprep.subr.bf16.mxu0 %v11004_v33  ;;  %8042 = vmatprep.subr.bf16.mxu1 %v11007_v54  ;;  %v11129_v33 = vld [vmem:[#allocation6 + $0xf00] ss:$16 sps:$4 sm:$0xff]  }
0x40d5   :  { %v11130_v54 = vld [vmem:[#allocation6 + $0x1020] ss:$16 sps:$4 sm:$0xff]  }
0x40d7   :  { %7961 = vmatpush1.bf16.msra.mxu0 %v11002_v17  ;;  %8043 = vmatpush1.bf16.msra.mxu1 %v11005_v28  ;;  %v11131_v17 = vld [vmem:[#allocation6 + $0xf20] ss:$16 sps:$4 sm:$0xff]  }
0x40d8   :  { %7962 = vmatprep.subr.bf16.mxu0 %v11010_v3  ;;  %8044 = vmatprep.subr.bf16.mxu1 %v11013_v51  ;;  %v11132_v28 = vld [vmem:[#allocation6 + $0x1040] ss:$16 sps:$4 sm:$0xff]  }
0x40d9   :  { %v11133_v3 = vld [vmem:[#allocation6 + $0xf40] ss:$16 sps:$4 sm:$0xff]  }
0x40da   :  { %v11134_v51 = vld [vmem:[#allocation6 + $0x1060] ss:$16 sps:$4 sm:$0xff]  }
0x40db   :  { %7963 = vmatpush1.bf16.msra.mxu0 %v11008_v20  ;;  %8045 = vmatpush1.bf16.msra.mxu1 %v11011_v18  ;;  %v11135_v20 = vld [vmem:[#allocation6 + $0xf60] ss:$16 sps:$4 sm:$0xff]  }
0x40dc   :  { %7964 = vmatprep.subr.bf16.mxu0 %v11016_v42  ;;  %8046 = vmatprep.subr.bf16.mxu1 %v11019_v19  ;;  %v11136_v18 = vld [vmem:[#allocation6 + $0x1080] ss:$16 sps:$4 sm:$0xff]  }
0x40dd   :  { %v11137_v42 = vld [vmem:[#allocation6 + $0xf80] ss:$16 sps:$4 sm:$0xff]  }
0x40de   :  { %v11138_v19 = vld [vmem:[#allocation6 + $0x10a0] ss:$16 sps:$4 sm:$0xff]  }
0x40df   :  { %7965 = vmatpush1.bf16.msra.mxu0 %v11014_v21  ;;  %8047 = vmatpush1.bf16.msra.mxu1 %v11017_v40  ;;  %v11139_v21 = vld [vmem:[#allocation6 + $0xfa0] ss:$16 sps:$4 sm:$0xff]  }
0x40e0   :  { %7966 = vmatprep.subr.bf16.mxu0 %v11022_v27  ;;  %8048 = vmatprep.subr.bf16.mxu1 %v11025_v29  ;;  %v12790_v40 = vld [vmem:[#allocation2 + $0x4e0] ss:$8 sm:$0xf] }
0x40e1   :  { %v7240_v23 = vrot.slane %v12790_v40, %v11735_v5  ;;  %v7244_v27 = vrot.slane %v12790_v40, %v12298_v24  ;;  %v7252_v29 = vrot.slane %v12790_v40, %v6690_v57 }
0x40e3   :  { %7967 = vmatpush1.bf16.msra.mxu0 %v11020_v31  ;;  %8049 = vmatpush1.bf16.msra.mxu1 %v11023_v6 }
0x40e4   :  { %7968 = vmatprep.subr.bf16.mxu0 %v11028_v62  ;;  %8050 = vmatprep.subr.bf16.mxu1 %v11031_v16 }
0x40e7   :  { %7969 = vmatpush1.bf16.msra.mxu0 %v11026_v38  ;;  %8051 = vmatpush1.bf16.msra.mxu1 %v11029_v30 }
0x40e8   :  { %8466 = vmatprep.subr.bf16.mxu0 %v11034_v37  ;;  %9891 = vmatprep.subr.bf16.mxu1 %v11128_v2  ;;  %v11119_v2 = vld [vmem:[#allocation6 + $0xea0] ss:$16 sps:$4 sm:$0xff]  }
0x40ea   :  { %7971 = vmatmul.mubr.bf16.vlgmr.msra.gmra.mrb[76].mxu0 %v7232_v26  ;;  %8053 = vmatmul.mubr.bf16.vlgmr.msra.gmra.mrb[80].mxu1 %v7232_v26 }
0x40eb   :  { %8467 = vmatpush1.bf16.msra.mxu0 %v11032_v39  ;;  %9892 = vmatpush3.bf16.msra.mxu1 %v11129_v33  ;;  %v7248_v33 = vrot.slane %v12790_v40, %v6686_v58  ;;  %v11143_v58 = vld [vmem:[#allocation6 + $0xfe0] ss:$16 sps:$4 sm:$0xff]  }
0x40ec   :  { %8468 = vmatprep.subr.bf16.mxu0 %v11037_v8  ;;  %9893 = vmatprep.subr.bf16.mxu1 %v11130_v54  ;;  %v11124_v54 = vld [vmem:[#allocation6 + $0xec4] ss:$16 sps:$4 sm:$0xff]  }
0x40ef   :  { %8469 = vmatpush1.bf16.msra.mxu0 %v11035_v12  ;;  %9894 = vmatpush3.bf16.msra.mxu1 %v11131_v17  ;;  %v11122_v17 = vld [vmem:[#allocation6 + $0xec0] ss:$16 sps:$4 sm:$0xff]  }
0x40f0   :  { %8470 = vmatprep.subr.bf16.mxu0 %v11040_v9  ;;  %9895 = vmatprep.subr.bf16.mxu1 %v11132_v28 }
0x40f3   :  { %8471 = vmatpush1.bf16.msra.mxu0 %v11038_v32  ;;  %9896 = vmatpush3.bf16.msra.mxu1 %v11133_v3  ;;  %v11127_v3 = vld [vmem:[#allocation6 + $0xee4] ss:$16 sps:$4 sm:$0xff]  }
0x40f4   :  { %8472 = vmatprep.subr.bf16.mxu0 %v11043_v0  ;;  %9897 = vmatprep.subr.bf16.mxu1 %v11134_v51  ;;  %v11080_v0 = vld [vmem:[#allocation6 + $0xd00] ss:$16 sps:$4 sm:$0xff]  }
0x40f5   :  { %v11125_v51 = vld [vmem:[#allocation6 + $0xee0] ss:$16 sps:$4 sm:$0xff]  }
0x40f7   :  { %8473 = vmatpush1.bf16.msra.mxu0 %v11041_v48  ;;  %9898 = vmatpush3.bf16.msra.mxu1 %v11135_v20 }
0x40f8   :  { %8474 = vmatprep.subr.bf16.mxu0 %v11046_v49  ;;  %9899 = vmatprep.subr.bf16.mxu1 %v11136_v18  ;;  %v11085_v49 = vld [vmem:[#allocation6 + $0xd24] ss:$16 sps:$4 sm:$0xff]  }
0x40fb   :  { %8475 = vmatpush1.bf16.msra.mxu0 %v11044_v50  ;;  %9900 = vmatpush3.bf16.msra.mxu1 %v11137_v42  ;;  %v11083_v50 = vld [vmem:[#allocation6 + $0xd20] ss:$16 sps:$4 sm:$0xff]  }
0x40fc   :  { %8476 = vmatprep.subr.bf16.mxu0 %v11049_v52  ;;  %9901 = vmatprep.subr.bf16.mxu1 %v11138_v19  ;;  %v11088_v52 = vld [vmem:[#allocation6 + $0xd44] ss:$16 sps:$4 sm:$0xff]   ;;  %v11140_v42 = vld [vmem:[#allocation6 + $0x10c0] ss:$16 sps:$4 sm:$0xff]  }
0x40fd   :  { %v11141_v19 = vld [vmem:[#allocation6 + $0xfc0] ss:$16 sps:$4 sm:$0xff]  }
0x40ff   :  { %8477 = vmatpush1.bf16.msra.mxu0 %v11047_v53  ;;  %9902 = vmatpush3.bf16.msra.mxu1 %v11139_v21  ;;  %v11086_v53 = vld [vmem:[#allocation6 + $0xd40] ss:$16 sps:$4 sm:$0xff]  }
0x4100   :  { %8478 = vmatprep.subr.bf16.mxu0 %v11052_v55  ;;  %v11091_v55 = vld [vmem:[#allocation6 + $0xd64] ss:$16 sps:$4 sm:$0xff]   ;;  %9903 = vmatprep.subr.bf16.mxu1 %v11140_v42  ;;  %v8134_v21 = vld [vmem:[#allocation2 + $0x500] ss:$8 sm:$0x3] }
0x4101   :  { %v8139_v40 = vrot.slane %v8134_v21, %v11735_v5  ;;  %v11146_v5 = vld [vmem:[#allocation6 + $0x1140] ss:$16 sps:$4 sm:$0xff]  }
0x4103   :  { %8479 = vmatpush1.bf16.msra.mxu0 %v11050_v35  ;;  %v11089_v35 = vld [vmem:[#allocation6 + $0xd60] ss:$16 sps:$4 sm:$0xff]   ;;  %9904 = vmatpush3.bf16.msra.mxu1 %v11141_v19 }
0x4104   :  { %8480 = vmatprep.subr.bf16.mxu0 %v11055_v25  ;;  %v11094_v25 = vld [vmem:[#allocation6 + $0xd84] ss:$16 sps:$4 sm:$0xff]   ;;  %9905 = vmatprep.subr.bf16.mxu1 %v11142_v1 }
0x4107   :  { %8481 = vmatpush1.bf16.msra.mxu0 %v11053_v59  ;;  %v11092_v59 = vld [vmem:[#allocation6 + $0xd80] ss:$16 sps:$4 sm:$0xff]   ;;  %9906 = vmatpush3.bf16.msra.mxu1 %v11143_v58 }
0x4108   :  { %8482 = vmatprep.subr.bf16.mxu0 %v11058_v56  ;;  %v11097_v56 = vld [vmem:[#allocation6 + $0xda4] ss:$16 sps:$4 sm:$0xff]   ;;  %10078 = vmatprep.subr.bf16.mxu1 %v11448_v47 }
0x410b   :  { %8483 = vmatpush1.bf16.msra.mxu0 %v11056_v4  ;;  %v11095_v4 = vld [vmem:[#allocation6 + $0xda0] ss:$16 sps:$4 sm:$0xff]  }
0x410c   :  { %8484 = vmatprep.subr.bf16.mxu0 %v11061_v36  ;;  %v11100_v36 = vld [vmem:[#allocation6 + $0xdc4] ss:$16 sps:$4 sm:$0xff]  }
0x410f   :  { %8485 = vmatpush1.bf16.msra.mxu0 %v11059_v45  ;;  %v11098_v45 = vld [vmem:[#allocation6 + $0xdc0] ss:$16 sps:$4 sm:$0xff]  }
0x4110   :  { %8486 = vmatprep.subr.bf16.mxu0 %v11064_v22  ;;  %v11103_v22 = vld [vmem:[#allocation6 + $0xde4] ss:$16 sps:$4 sm:$0xff]  }
0x4113   :  { %8487 = vmatpush1.bf16.msra.mxu0 %v11062_v7  ;;  %v11101_v7 = vld [vmem:[#allocation6 + $0xde0] ss:$16 sps:$4 sm:$0xff]  }
0x4114   :  { %8488 = vmatprep.subr.bf16.mxu0 %v11067_v61  ;;  %v11106_v61 = vld [vmem:[#allocation6 + $0xe04] ss:$16 sps:$4 sm:$0xff]  }
0x4117   :  { %8489 = vmatpush1.bf16.msra.mxu0 %v11065_v10  ;;  %v11104_v10 = vld [vmem:[#allocation6 + $0xe00] ss:$16 sps:$4 sm:$0xff]  }
0x4118   :  { %8490 = vmatprep.subr.bf16.mxu0 %v11070_v43  ;;  %v11109_v43 = vld [vmem:[#allocation6 + $0xe24] ss:$16 sps:$4 sm:$0xff]  }
0x411b   :  { %8491 = vmatpush1.bf16.msra.mxu0 %v11068_v44  ;;  %v11107_v44 = vld [vmem:[#allocation6 + $0xe20] ss:$16 sps:$4 sm:$0xff]  }
0x411c   :  { %8492 = vmatprep.subr.bf16.mxu0 %v11073_v11  ;;  %v11112_v11 = vld [vmem:[#allocation6 + $0xe44] ss:$16 sps:$4 sm:$0xff]  }
0x411f   :  { %8493 = vmatpush1.bf16.msra.mxu0 %v11071_v41  ;;  %v11110_v41 = vld [vmem:[#allocation6 + $0xe40] ss:$16 sps:$4 sm:$0xff]  }
0x4120   :  { %8494 = vmatprep.subr.bf16.mxu0 %v11076_v60  ;;  %v11115_v60 = vld [vmem:[#allocation6 + $0xe64] ss:$16 sps:$4 sm:$0xff]  }
0x4123   :  { %8495 = vmatpush1.bf16.msra.mxu0 %v11074_v15  ;;  %v11113_v15 = vld [vmem:[#allocation6 + $0xe60] ss:$16 sps:$4 sm:$0xff]  }
0x4124   :  { %8496 = vmatprep.subr.bf16.mxu0 %v11079_v63  ;;  %v11118_v63 = vld [vmem:[#allocation6 + $0xe84] ss:$16 sps:$4 sm:$0xff]  }
0x4127   :  { %8497 = vmatpush1.bf16.msra.mxu0 %v11077_v13  ;;  %v11116_v13 = vld [vmem:[#allocation6 + $0xe80] ss:$16 sps:$4 sm:$0xff]  }
0x4128   :  { %8507 = vmatprep.subr.bf16.mxu0 %v11082_v46  ;;  %v11121_v46 = vld [vmem:[#allocation6 + $0xea4] ss:$16 sps:$4 sm:$0xff]  }
0x41bd   :  { %v7972_v31 = vpop.f32.mrb[76].mxu0  ;;  %v12799_v6 = vpop.f32.mrb[80].mxu1 }
0x41be   :  { %v10284_v34 = vadd.f32 %v7972_v31, %v7240_v23  ;;  %v7974_v62 = vpop.f32.mrb[77].mxu0  ;;  %v8056_v16 = vpop.f32.mrb[81].mxu1  ;;  %v10286_v28 = vadd.f32 %v12799_v6, %v7248_v33  ;;  %v8143_v23 = vrot.slane %v8134_v21, %v12298_v24  ;;  %v11147_v24 = vld [vmem:[#allocation6 + $0x1160] ss:$16 sps:$4 sm:$0xff]  }
0x41bf   :  { %v10285_v38 = vadd.f32 %v7974_v62, %v7244_v27  ;;  %v10287_v30 = vadd.f32 %v8056_v16, %v7252_v29  ;;  %v7976_v14 = vpop.f32.mrb[78].mxu0  ;;  %v8058_v37 = vpop.f32.mrb[82].mxu1 }
0x41c0   :  { %v8061_v39 = vmax.f32 %v10284_v34, 0.0  ;;  %v7977_v26 = vpop.f32.mrb[79].mxu0  ;;  %v8059_v8 = vpop.f32.mrb[83].mxu1  ;;  %v8063_v20 = vmax.f32 %v10286_v28, 0.0  ;;  %v11144_v14 = vld [vmem:[#allocation6 + $0x1100] ss:$16 sps:$4 sm:$0xff]  }
0x41c1   :  { %v8062_v12 = vmax.f32 %v10285_v38, 0.0  ;;  %v8064_v9 = vmax.f32 %v10287_v30, 0.0  ;;  %v11148_v26 = vld [vmem:[#allocation6 + $0x1180] ss:$16 sps:$4 sm:$0xff]  }
0x41c2   :  { %v8129_v48 = vpack.c.bf16 %v8061_v39, %v8061_v39  ;;  %v8131_v18 = vpack.c.bf16 %v8063_v20, %v8063_v20  ;;  %v11145_v39 = vld [vmem:[#allocation6 + $0x1120] ss:$16 sps:$4 sm:$0xff]  }
0x41c3   :  { %v8130_v32 = vpack.c.bf16 %v8062_v12, %v8062_v12  ;;  %v8132_v57 = vpack.c.bf16 %v8064_v9, %v8064_v9  ;;  %v11149_v8 = vld [vmem:[#allocation6 + $0x11a0] ss:$16 sps:$4 sm:$0xff]  }
0x41c4   :  { %v11150_v12 = vld [vmem:[#allocation6 + $0x11c0] ss:$16 sps:$4 sm:$0xff]  }
0x41c5   :  { %8498 = vmatprep.mubr.bf16.mxu0 %v8130_v32  ;;  %v11151_v9 = vld [vmem:[#allocation6 + $0x11e0] ss:$16 sps:$4 sm:$0xff]  }
0x41c6   :  { %8499 = vmatmul.mubr.bf16.vlgmr.msra.gmra.mrb[80].mxu0 %v8129_v48 }
0x41c7   :  { %8508 = vmatpush1.bf16.msra.mxu0 %v11080_v0  ;;  %8539 = vmatprep.mubr.bf16.mxu0 %v8132_v57  ;;  %v8584_v0 = vld [vmem:[#allocation2 + $0x520] ss:$0 sm:$0xff] }
0x41c8   :  { %8509 = vmatprep.subr.bf16.mxu0 %v11085_v49 }
0x41cb   :  { %8510 = vmatpush1.bf16.msra.mxu0 %v11083_v50 }
0x41cc   :  { %8511 = vmatprep.subr.bf16.mxu0 %v11088_v52 }
0x41cf   :  { %8512 = vmatpush1.bf16.msra.mxu0 %v11086_v53 }
0x41d0   :  { %8513 = vmatprep.subr.bf16.mxu0 %v11091_v55  ;;  %v11152_v55 = vld [vmem:[#allocation6 + $0x1200] ss:$16 sps:$4 sm:$0xff]  }
0x41d3   :  { %8514 = vmatpush1.bf16.msra.mxu0 %v11089_v35 }
0x41d4   :  { %8515 = vmatprep.subr.bf16.mxu0 %v11094_v25  ;;  %v11153_v25 = vld [vmem:[#allocation6 + $0x1220] ss:$16 sps:$4 sm:$0xff]  }
0x41d7   :  { %8516 = vmatpush1.bf16.msra.mxu0 %v11092_v59  ;;  %v11154_v59 = vld [vmem:[#allocation6 + $0x1240] ss:$16 sps:$4 sm:$0xff]  }
0x41d8   :  { %8517 = vmatprep.subr.bf16.mxu0 %v11097_v56  ;;  %v11155_v56 = vld [vmem:[#allocation6 + $0x1260] ss:$16 sps:$4 sm:$0xff]  }
0x41db   :  { %8518 = vmatpush1.bf16.msra.mxu0 %v11095_v4  ;;  %v8739_v4 = vld [vmem:[#allocation2 + $0x540] ss:$0 sm:$0xff] }
0x41dc   :  { %8519 = vmatprep.subr.bf16.mxu0 %v11100_v36 }
0x41df   :  { %8520 = vmatpush1.bf16.msra.mxu0 %v11098_v45 }
0x41e0   :  { %8521 = vmatprep.subr.bf16.mxu0 %v11103_v22 }
0x41e3   :  { %8522 = vmatpush1.bf16.msra.mxu0 %v11101_v7 }
0x41e4   :  { %8523 = vmatprep.subr.bf16.mxu0 %v11106_v61 }
0x41e7   :  { %8524 = vmatpush1.bf16.msra.mxu0 %v11104_v10 }
0x41e8   :  { %8525 = vmatprep.subr.bf16.mxu0 %v11109_v43 }
0x41eb   :  { %8526 = vmatpush1.bf16.msra.mxu0 %v11107_v44  ;;  %v8838_v44 = vld [vmem:[#allocation2 + $0x560] ss:$0 sm:$0xff] }
0x41ec   :  { %8527 = vmatprep.subr.bf16.mxu0 %v11112_v11 }
0x41ef   :  { %8528 = vmatpush1.bf16.msra.mxu0 %v11110_v41 }
0x41f0   :  { %8529 = vmatprep.subr.bf16.mxu0 %v11115_v60 }
0x41f3   :  { %8530 = vmatpush1.bf16.msra.mxu0 %v11113_v15 }
0x41f4   :  { %8531 = vmatprep.subr.bf16.mxu0 %v11118_v63 }
0x41f7   :  { %8532 = vmatpush1.bf16.msra.mxu0 %v11116_v13 }
0x41f8   :  { %8533 = vmatprep.subr.bf16.mxu0 %v11121_v46 }
0x41fb   :  { %8534 = vmatpush1.bf16.msra.mxu0 %v11119_v2 }
0x41fc   :  { %8535 = vmatprep.subr.bf16.mxu0 %v11124_v54 }
0x41ff   :  { %8536 = vmatpush1.bf16.msra.mxu0 %v11122_v17 }
0x4200   :  { %8537 = vmatprep.subr.bf16.mxu0 %v11127_v3 }
0x4203   :  { %8538 = vmatpush1.bf16.msra.mxu0 %v11125_v51 }
0x4206   :  { %8540 = vmatmul.mubr.bf16.vlgmr.msra.gmra.mrb[80].mxu0 %v8131_v18 }
0x42d9   :  { %v8541_v27 = vpop.f32.mrb[80].mxu0 }
0x42da   :  { %v10288_v29 = vadd.f32 %v8541_v27, %v8139_v40  ;;  %v8543_v31 = vpop.f32.mrb[81].mxu0 }
0x42db   :  { %v10289_v6 = vadd.f32 %v8543_v31, %v8143_v23  ;;  %v8545_v34 = vpop.f32.mrb[82].mxu0 }
0x42dc   :  { %v8548_v62 = vmax.f32 %v10288_v29, 0.0  ;;  %v8546_v16 = vpop.f32.mrb[83].mxu0 }
0x42dd   :  { %v8549_v38 = vmax.f32 %v10289_v6, 0.0 }
0x42de   :  { %v8582_v37 = vpack.c.bf16 %v8548_v62, %v8548_v62 }
0x42df   :  { %v8583_v30 = vpack.c.bf16 %v8549_v38, %v8549_v38 }
0x42e1   :  { %8713 = vmatprep.mubr.bf16.mxu1 %v8583_v30 }
0x42e2   :  { %8714 = vmatmul.mubr.bf16.vlgmr.msra.gmra.mrb[84].mxu1 %v8582_v37 }
0x42e3   :  { %10079 = vmatpush3.bf16.msra.mxu1 %v11144_v14  ;;  %10094 = vmatprep.mubr.msk.bf16.mxu1 %vm11447_vm6, %v11448_v47 }
0x42e4   :  { %10080 = vmatprep.subr.bf16.mxu1 %v11448_v47 }
0x42e7   :  { %10081 = vmatpush3.bf16.msra.mxu1 %v11145_v39 }
0x42e8   :  { %10082 = vmatprep.subr.bf16.mxu1 %v11448_v47 }
0x42eb   :  { %10083 = vmatpush3.bf16.msra.mxu1 %v11146_v5 }
0x42ec   :  { %10084 = vmatprep.subr.bf16.mxu1 %v11448_v47 }
0x42ef   :  { %10085 = vmatpush3.bf16.msra.mxu1 %v11147_v24 }
0x42f0   :  { %10086 = vmatprep.subr.bf16.mxu1 %v11448_v47 }
0x42f3   :  { %10087 = vmatpush3.bf16.msra.mxu1 %v11148_v26 }
0x42f4   :  { %10088 = vmatprep.subr.bf16.mxu1 %v11448_v47 }
0x42f7   :  { %10089 = vmatpush3.bf16.msra.mxu1 %v11149_v8 }
0x42f8   :  { %10090 = vmatprep.subr.bf16.mxu1 %v11448_v47 }
0x42fb   :  { %10091 = vmatpush3.bf16.msra.mxu1 %v11150_v12 }
0x42fc   :  { %10092 = vmatprep.subr.bf16.mxu1 %v11448_v47 }
0x42ff   :  { %10093 = vmatpush3.bf16.msra.mxu1 %v11151_v9 }
0x4300   :  { %10098 = vmatprep.subr.bf16.mxu1 %v11448_v47 }
0x43b5   :  { %v9907_v32 = vpop.f32.mrb[84].mxu1 }
0x43b6   :  { %v9908_v48 = vpop.f32.mrb[85].mxu1 }
0x43b7   :  { %v9909_v49 = vadd.f32 %v9908_v48, %v9907_v32  ;;  %v9910_v57 = vpop.f32.mrb[86].mxu1 }
0x43b8   :  { %v9911_v50 = vpop.f32.mrb[87].mxu1 }
0x43b9   :  { %v8716_v52 = vadd.f32 %v9909_v49, %v8584_v0 }
0x43bb   :  { %v8721_v53 = vmax.f32 %v8716_v52, 0.0 }
0x43bd   :  { %v8738_v35 = vpack.c.bf16 %v8721_v53, %v8721_v53 }
0x43bf   :  { %10095 = vmatmul.mubr.bf16.vlgmr.msra.gmra.mrb[88].mxu1 %v8738_v35 }
0x43c0   :  { %10099 = vmatpush3.bf16.msra.mxu1 %v11152_v55  ;;  %10106 = vmatprep.mubr.msk.bf16.mxu1 %vm11447_vm6, %v11448_v47  ;;  %vm8936_vm6 = vcmask 123904  }
0x43c1   :  { %10100 = vmatprep.subr.bf16.mxu1 %v11448_v47 }
0x43c4   :  { %10101 = vmatpush3.bf16.msra.mxu1 %v11153_v25 }
0x43c5   :  { %10102 = vmatprep.subr.bf16.mxu1 %v11448_v47 }
0x43c8   :  { %10103 = vmatpush3.bf16.msra.mxu1 %v11154_v59 }
0x43c9   :  { %10104 = vmatprep.subr.bf16.mxu1 %v11448_v47 }
0x43cc   :  { %10105 = vmatpush3.bf16.msra.mxu1 %v11155_v56 }
0x4492   :  { %v8822_v36 = vpop.f32.mrb[88].mxu1 }
0x4493   :  { %v8823_v45 = vadd.f32 %v8822_v36, %v8739_v4  ;;  %v10096_v22 = vpop.f32.mrb[89].mxu1 }
0x4494   :  { %v8825_v7 = vpop.f32.mrb[90].mxu1 }
0x4495   :  { %v8828_v61 = vmax.f32 %v8823_v45, 0.0  ;;  %v10097_v10 = vpop.f32.mrb[91].mxu1 }
0x4497   :  { %v8837_v43 = vpack.c.bf16 %v8828_v61, %v8828_v61 }
0x4499   :  { %10107 = vmatmul.mubr.msk.bf16.vlgmr.msra.gmra.mrb[92].mxu1 %vm5322_vm13, %v8837_v43 }
0x456c   :  { %v8900_v11 = vpop.f32.mrb[92].mxu1 }
0x456d   :  { %v8901_v41 = vadd.f32 %v8900_v11, %v8838_v44  ;;  %v10108_v60 = vpop.f32.mrb[93].mxu1 }
0x456e   :  { %v8903_v15 = vpop.f32.mrb[94].mxu1 }
0x456f   :  { %v8906_v63 = vmax.f32 %v8901_v41, 0.0  ;;  %v10109_v13 = vpop.f32.mrb[95].mxu1 }
0x4571   :  { %8908 = vrot.lane.b32.xlu1 %v8906_v63, %s11443_s29 }
0x45e3   :  { %v8909_v47 = vpop.permute.xlu1 %8908 }
0x45e4   :  { %v8911_v46 = vmax.f32 %v8906_v63, %v8909_v47 }
0x45e6   :  { %8916 = vrot.lane.b32.xlu0 %v8911_v46, %s11454_s5  ;;  %v8912_v28 = vsub.f32 %v8906_v63, %v8911_v46 }
0x45e8   :  { %v8913_v3 = vmul.f32 1.442695, %v8912_v28 }
0x4658   :  { %v8917_v2 = vpop.permute.xlu0 %8916 }
0x4659   :  { %v8919_v33 = vsub.f32 %v8906_v63, %v8917_v2 }
0x465b   :  { %v8920_v54 = vmul.f32 1.442695, %v8919_v33 }
0x465d   :  { %11352 = vpow2.f32 %v8920_v54 }
0x465e   :  { %11354 = vpow2.f32 %v8913_v3 }
0x4667   :  { %v11353_v17 = vpop.eup %11352 }
0x4668   :  { %8923 = vrot.lane.b32.xlu1 %v11353_v17, %s11443_s29  ;;  %v11355_v51 = vpop.eup %11354 }
0x46da   :  { %v8924_v20 = vpop.permute.xlu1 %8923 }
0x46db   :  { %v8926_v18 = vadd.f32 %v11355_v51, %v8924_v20 }
0x46dd   :  { %11356 = vrcp.f32 %v8926_v18 }
0x46e7   :  { %v11357_v42 = vpop.eup %11356 }
0x46e8   :  { %8931 = vrot.lane.b32.xlu0 %v11357_v42, %s11454_s5  ;;  %v8929_v19 = vmul.f32 %v11357_v42, %v11355_v51 }
0x475a   :  { %v8932_v1 = vpop.permute.xlu0 %8931 }
0x475b   :  { %v8934_v58 = vmul.f32 %v11353_v17, %v8932_v1 }
0x475d   :  { %v8935_v21 = vsel %vm3634_vm8, %v8929_v19, %v8934_v58 }
0x475e   :  { %8937 = vst.msk [vmem:[%s12837_s7] sm:$0x3] %vm8936_vm6, %v8935_v21 }
0x475f   :  { %8942 = vsyncpa [#allocation3], 1 }
0x4760   :  { %8943 = vsyncpa [#allocation5], 1 }

</bundles_post_ra>
